<compile_context>
chip_gen: v5e
topology: v5e:2x2
jax: 0.10.0
libtpu: 0.0.40
codegen_flags: <defaults>
</compile_context>

<pallas_src>
import functools

import jax
import jax.numpy as jnp
from jax import lax
from jax.experimental import pallas as pl
from jax.experimental.pallas import tpu as pltpu

_HALO_PAD = 16  # interior column offset in the intermediate scratch (bf16 sublane aligned)


def _double_conv_kernel(x_ref, w1_ref, b1_ref, w2_ref, b2_ref, y_ref,
                        p1_ref, hpad_ref, p2_ref, *, H, W, c_in, c_mid, c_out_p):
    """One batch element of DoubleConv (inference).

    x_ref:    (1, H+2, W+2, c_in)   bf16 zero-halo NHWC input tile
    w1_ref:   (9*c_in, c_mid)       bf16 conv1 weights (BN1 folded), tap-major
    b1_ref:   (1, c_mid)            f32  conv1 bias (BN1 folded)
    w2_ref:   (9*c_mid, c_out_p)    bf16 conv2 weights (BN2 folded), N padded to 128k
    b2_ref:   (1, c_out_p)          f32  conv2 bias (BN2 folded, zero in padding)
    y_ref:    (1, H, W, c_out_p)    f32  output tile (lane-dense last dim)
    p1_ref:   VMEM (H, W, 9*c_in)   bf16 im2col patches for conv1
    hpad_ref: VMEM (H+2, W+2*PAD, c_mid) bf16 intermediate with zero halo;
              interior at rows [1:H+1], cols [PAD:PAD+W]
    p2_ref:   VMEM (H, W, 9*c_mid)  bf16 im2col patches for conv2
    """
    PAD = _HALO_PAD

    # ---- conv1 (+ folded BN1) + ReLU: one fused K=9*c_in bf16 MXU matmul ----
    # Ref-sliced shifted windows -> patch scratch (no full padded value kept live).
    for ky in range(3):
        for kx in range(3):
            t = ky * 3 + kx
            p1_ref[:, :, t * c_in:(t + 1) * c_in] = x_ref[0, ky:ky + H, kx:kx + W, :]
    p1 = p1_ref[...].reshape(H * W, 9 * c_in)                       # bf16
    h = jnp.dot(p1, w1_ref[...], preferred_element_type=jnp.float32)
    h = jnp.maximum(h + b1_ref[...], 0.0)                           # (H*W, c_mid) f32

    # ---- stash intermediate in the zero-halo VMEM buffer (no HBM round trip) ----
    # Re-zero only the halo ring; the interior is fully overwritten every step.
    zrow = jnp.zeros((W + 2 * PAD, c_mid), hpad_ref.dtype)
    zcol = jnp.zeros((H, PAD, c_mid), hpad_ref.dtype)
    hpad_ref[0] = zrow
    hpad_ref[H + 1] = zrow
    hpad_ref[1:H + 1, 0:PAD, :] = zcol
    hpad_ref[1:H + 1, PAD + W:PAD + W + PAD, :] = zcol
    hpad_ref[1:H + 1, PAD:PAD + W, :] = h.astype(hpad_ref.dtype).reshape(H, W, c_mid)

    # ---- conv2 (+ folded BN2) + ReLU: one fused K=9*c_mid bf16 MXU matmul ----
    for ky in range(3):
        for kx in range(3):
            t = ky * 3 + kx
            p2_ref[:, :, t * c_mid:(t + 1) * c_mid] = (
                hpad_ref[ky:ky + H, kx + PAD - 1:kx + PAD - 1 + W, :])
    p2 = p2_ref[...].reshape(H * W, 9 * c_mid)                      # bf16
    y = jnp.dot(p2, w2_ref[...], preferred_element_type=jnp.float32)
    y = jnp.maximum(y + b2_ref[...], 0.0)                           # (H*W, c_out_p) f32
    y_ref[0] = y.reshape(H, W, c_out_p).astype(y_ref.dtype)


def _padded_vmem_bytes(shape, dtype):
    """Rough VMEM footprint of one buffer after (sublane, lane) tile padding."""
    itemsize = jnp.dtype(dtype).itemsize
    sub_tile = max(8, 32 // itemsize)
    s = list(shape)
    s[-1] = -(-s[-1] // 128) * 128
    if len(s) >= 2:
        s[-2] = -(-s[-2] // sub_tile) * sub_tile
    n = 1
    for d in s:
        n *= d
    return n * itemsize


def double_conv(x_nchw, w1, b1, g1, be1, m1, v1, w2, b2, g2, be2, m2, v2,
                *, eps=1e-5):
    """DoubleConv forward (inference).

    x_nchw: (B, C_in, H, W) like the PyTorch module.
    w1: (3, 3, C_in, C_out) HWIO, b1: (C_out,)      -- first Conv2d
    g1, be1, m1, v1: (C_out,)                       -- first BatchNorm2d (eval)
    w2: (3, 3, C_out, C_out), b2: (C_out,)          -- second Conv2d
    g2, be2, m2, v2: (C_out,)                       -- second BatchNorm2d (eval)
    Returns (B, C_out, H, W) float32.
    """
    B, c_in, H, W = x_nchw.shape
    c_mid = w1.shape[-1]
    c_out = w2.shape[-1]
    PAD = _HALO_PAD

    # Fold eval-mode BatchNorm into the conv weights & biases (tiny, trace time).
    s1 = g1 / jnp.sqrt(v1 + eps)
    s2 = g2 / jnp.sqrt(v2 + eps)
    w1f = (w1 * s1).reshape(9 * c_in, c_mid).astype(jnp.bfloat16)
    b1f = (b1 * s1 + (be1 - m1 * s1)).reshape(1, c_mid).astype(jnp.float32)
    w2f = (w2 * s2).reshape(9 * c_mid, c_out)
    b2f = (b2 * s2 + (be2 - m2 * s2)).reshape(1, c_out)

    # Pad conv2 output channels to a multiple of 128 -> lane-dense HBM stores.
    c_out_p = -(-c_out // 128) * 128
    if c_out_p != c_out:
        w2f = jnp.pad(w2f, ((0, 0), (0, c_out_p - c_out)))
        b2f = jnp.pad(b2f, ((0, 0), (0, c_out_p - c_out)))
    w2f = w2f.astype(jnp.bfloat16)
    b2f = b2f.astype(jnp.float32)

    # NCHW -> NHWC, cast to bf16, add the 1-pixel zero halo (single fused XLA pass).
    x = jnp.transpose(x_nchw, (0, 2, 3, 1)).astype(jnp.bfloat16)
    x = jnp.pad(x, ((0, 0), (1, 1), (1, 1), (0, 0)))

    kernel = functools.partial(_double_conv_kernel,
                               H=H, W=W, c_in=c_in, c_mid=c_mid, c_out_p=c_out_p)

    scratch_shapes = [
        pltpu.VMEM((H, W, 9 * c_in), jnp.bfloat16),            # conv1 im2col patches
        pltpu.VMEM((H + 2, W + 2 * PAD, c_mid), jnp.bfloat16),  # zero-halo intermediate
        pltpu.VMEM((H, W, 9 * c_mid), jnp.bfloat16),           # conv2 im2col patches
    ]

    # Explicit scoped-VMEM budget: 2x (double-buffer) for every pipelined block
    # plus the persistent scratches, with headroom for live values / spills.
    vmem_need = (
        2 * _padded_vmem_bytes((1, H + 2, W + 2, c_in), jnp.bfloat16)
        + 2 * _padded_vmem_bytes((1, H, W, c_out_p), jnp.float32)
        + 2 * _padded_vmem_bytes(w1f.shape, jnp.bfloat16)
        + 2 * _padded_vmem_bytes(b1f.shape, jnp.float32)
        + 2 * _padded_vmem_bytes(w2f.shape, jnp.bfloat16)
        + 2 * _padded_vmem_bytes(b2f.shape, jnp.float32)
        + _padded_vmem_bytes((H, W, 9 * c_in), jnp.bfloat16)
        + _padded_vmem_bytes((H + 2, W + 2 * PAD, c_mid), jnp.bfloat16)
        + _padded_vmem_bytes((H, W, 9 * c_mid), jnp.bfloat16))
    vmem_limit = int(min(max(2 * vmem_need, 32 * 1024 * 1024), 100 * 1024 * 1024))

    y_nhwc_p = pl.pallas_call(
        kernel,
        out_shape=jax.ShapeDtypeStruct((B, H, W, c_out_p), jnp.float32),
        grid_spec=pltpu.PrefetchScalarGridSpec(
            num_scalar_prefetch=0,
            grid=(B,),
            in_specs=[
                pl.BlockSpec((1, H + 2, W + 2, c_in), lambda b: (b, 0, 0, 0)),
                pl.BlockSpec((9 * c_in, c_mid), lambda b: (0, 0)),
                pl.BlockSpec((1, c_mid), lambda b: (0, 0)),
                pl.BlockSpec((9 * c_mid, c_out_p), lambda b: (0, 0)),
                pl.BlockSpec((1, c_out_p), lambda b: (0, 0)),
            ],
            out_specs=pl.BlockSpec((1, H, W, c_out_p), lambda b: (b, 0, 0, 0)),
            scratch_shapes=scratch_shapes,
        ),
        compiler_params=pltpu.CompilerParams(
            dimension_semantics=("parallel",),   # batch across TCs on multi-core chips
            vmem_limit_bytes=vmem_limit),
    )(x, w1f, b1f, w2f, b2f)

    y_nhwc = y_nhwc_p[..., :c_out]               # drop the lane padding
    return jnp.transpose(y_nhwc, (0, 3, 1, 2))


def _reference(x_nchw, w1, b1, g1, be1, m1, v1, w2, b2, g2, be2, m2, v2,
               eps=1e-5):
    """Pure-JAX DoubleConv forward (conv -> BN(eval) -> ReLU, twice), f32."""
    x = jnp.transpose(x_nchw, (0, 2, 3, 1))
    dn = ("NHWC", "HWIO", "NHWC")
    y = lax.conv_general_dilated(x, w1, (1, 1), "SAME", dimension_numbers=dn,
                                 precision=lax.Precision.HIGHEST) + b1
    y = (y - m1) / jnp.sqrt(v1 + eps) * g1 + be1
    y = jnp.maximum(y, 0.0)
    y = lax.conv_general_dilated(y, w2, (1, 1), "SAME", dimension_numbers=dn,
                                 precision=lax.Precision.HIGHEST) + b2
    y = (y - m2) / jnp.sqrt(v2 + eps) * g2 + be2
    y = jnp.maximum(y, 0.0)
    return jnp.transpose(y, (0, 3, 1, 2))


if __name__ == "__main__":
    key = jax.random.PRNGKey(0)
    ks = jax.random.split(key, 13)
    B, c_in, c_out, H, W = 2, 4, 32, 16, 16

    x = jax.random.normal(ks[0], (B, c_in, H, W), jnp.float32)
    w1 = 0.2 * jax.random.normal(ks[1], (3, 3, c_in, c_out), jnp.float32)
    b1 = 0.1 * jax.random.normal(ks[2], (c_out,), jnp.float32)
    g1 = 1.0 + 0.1 * jax.random.normal(ks[3], (c_out,), jnp.float32)
    be1 = 0.1 * jax.random.normal(ks[4], (c_out,), jnp.float32)
    m1 = 0.1 * jax.random.normal(ks[5], (c_out,), jnp.float32)
    v1 = 1.0 + 0.1 * jax.random.uniform(ks[6], (c_out,), jnp.float32)
    w2 = 0.1 * jax.random.normal(ks[7], (3, 3, c_out, c_out), jnp.float32)
    b2 = 0.1 * jax.random.normal(ks[8], (c_out,), jnp.float32)
    g2 = 1.0 + 0.1 * jax.random.normal(ks[9], (c_out,), jnp.float32)
    be2 = 0.1 * jax.random.normal(ks[10], (c_out,), jnp.float32)
    m2 = 0.1 * jax.random.normal(ks[11], (c_out,), jnp.float32)
    v2 = 1.0 + 0.1 * jax.random.uniform(ks[12], (c_out,), jnp.float32)

    out = double_conv(x, w1, b1, g1, be1, m1, v1, w2, b2, g2, be2, m2, v2)
    out = jax.block_until_ready(out)
    assert out.shape == (B, c_out, H, W), out.shape

    ref = _reference(x, w1, b1, g1, be1, m1, v1, w2, b2, g2, be2, m2, v2)
    max_err = float(jnp.max(jnp.abs(out - ref)))
    assert jnp.allclose(out, ref, atol=4e-2, rtol=4e-2), max_err

    print("KERNEL_OK")
</pallas_src>

<mosaic_0001>
module attributes {stable_mosaic.version = 11 : i64} {
  func.func @_double_conv_kernel(%arg0: i32, %arg1: memref<1x18x18x4xbf16, #tpu.memory_space<vmem>>, %arg2: memref<36x32xbf16, #tpu.memory_space<vmem>>, %arg3: memref<1x32xf32, #tpu.memory_space<vmem>>, %arg4: memref<288x128xbf16, #tpu.memory_space<vmem>>, %arg5: memref<1x128xf32, #tpu.memory_space<vmem>>, %arg6: memref<1x16x16x128xf32, #tpu.memory_space<vmem>>, %arg7: memref<16x16x36xbf16, #tpu.memory_space<vmem>>, %arg8: memref<18x48x32xbf16, #tpu.memory_space<vmem>>, %arg9: memref<16x16x288xbf16, #tpu.memory_space<vmem>>) attributes {dimension_semantics = [#tpu.dimension_semantics<parallel>], iteration_bounds = array<i64: 2>, scalar_prefetch = 0 : i64, scratch_operands = 3 : i64, tpu.core_type = #tpu.core_type<tc>, window_params = [{transform_indices = @transform_0, window_bounds = array<i64: 1, 18, 18, 4>}, {pipeline_mode = #tpu.pipeline_mode<synchronous>, transform_indices = @transform_1, window_bounds = array<i64: 36, 32>}, {pipeline_mode = #tpu.pipeline_mode<synchronous>, transform_indices = @transform_2, window_bounds = array<i64: 1, 32>}, {pipeline_mode = #tpu.pipeline_mode<synchronous>, transform_indices = @transform_3, window_bounds = array<i64: 288, 128>}, {pipeline_mode = #tpu.pipeline_mode<synchronous>, transform_indices = @transform_4, window_bounds = array<i64: 1, 128>}, {transform_indices = @transform_5, window_bounds = array<i64: 1, 16, 16, 128>}]} {
    %c0 = arith.constant 0 : index
    %c0_0 = arith.constant 0 : index
    %c0_1 = arith.constant 0 : index
    %c0_2 = arith.constant 0 : index
    %0 = vector.load %arg1[%c0, %c0_0, %c0_1, %c0_2] : memref<1x18x18x4xbf16, #tpu.memory_space<vmem>>, vector<1x16x16x4xbf16>
    %1 = vector.shape_cast %0 : vector<1x16x16x4xbf16> to vector<16x16x4xbf16>
    %c0_3 = arith.constant 0 : index
    %c0_4 = arith.constant 0 : index
    %c0_5 = arith.constant 0 : index
    %2 = vector.load %arg7[%c0_3, %c0_4, %c0_5] : memref<16x16x36xbf16, #tpu.memory_space<vmem>>, vector<16x16x4xbf16>
    tpu.vector_store %arg7[%c0_3, %c0_4, %c0_5], %1 {strides = array<i32>} : memref<16x16x36xbf16, #tpu.memory_space<vmem>>, vector<16x16x4xbf16>,
    %c0_6 = arith.constant 0 : index
    %c0_7 = arith.constant 0 : index
    %c1 = arith.constant 1 : index
    %c0_8 = arith.constant 0 : index
    %3 = vector.load %arg1[%c0_6, %c0_7, %c1, %c0_8] : memref<1x18x18x4xbf16, #tpu.memory_space<vmem>>, vector<1x16x16x4xbf16>
    %4 = vector.shape_cast %3 : vector<1x16x16x4xbf16> to vector<16x16x4xbf16>
    %c0_9 = arith.constant 0 : index
    %c0_10 = arith.constant 0 : index
    %c4 = arith.constant 4 : index
    %5 = vector.load %arg7[%c0_9, %c0_10, %c4] : memref<16x16x36xbf16, #tpu.memory_space<vmem>>, vector<16x16x4xbf16>
    tpu.vector_store %arg7[%c0_9, %c0_10, %c4], %4 {strides = array<i32>} : memref<16x16x36xbf16, #tpu.memory_space<vmem>>, vector<16x16x4xbf16>,
    %c0_11 = arith.constant 0 : index
    %c0_12 = arith.constant 0 : index
    %c2 = arith.constant 2 : index
    %c0_13 = arith.constant 0 : index
    %6 = vector.load %arg1[%c0_11, %c0_12, %c2, %c0_13] : memref<1x18x18x4xbf16, #tpu.memory_space<vmem>>, vector<1x16x16x4xbf16>
    %7 = vector.shape_cast %6 : vector<1x16x16x4xbf16> to vector<16x16x4xbf16>
    %c0_14 = arith.constant 0 : index
    %c0_15 = arith.constant 0 : index
    %c8 = arith.constant 8 : index
    %8 = vector.load %arg7[%c0_14, %c0_15, %c8] : memref<16x16x36xbf16, #tpu.memory_space<vmem>>, vector<16x16x4xbf16>
    tpu.vector_store %arg7[%c0_14, %c0_15, %c8], %7 {strides = array<i32>} : memref<16x16x36xbf16, #tpu.memory_space<vmem>>, vector<16x16x4xbf16>,
    %c0_16 = arith.constant 0 : index
    %c1_17 = arith.constant 1 : index
    %c0_18 = arith.constant 0 : index
    %c0_19 = arith.constant 0 : index
    %9 = vector.load %arg1[%c0_16, %c1_17, %c0_18, %c0_19] : memref<1x18x18x4xbf16, #tpu.memory_space<vmem>>, vector<1x16x16x4xbf16>
    %10 = vector.shape_cast %9 : vector<1x16x16x4xbf16> to vector<16x16x4xbf16>
    %c0_20 = arith.constant 0 : index
    %c0_21 = arith.constant 0 : index
    %c12 = arith.constant 12 : index
    %11 = vector.load %arg7[%c0_20, %c0_21, %c12] : memref<16x16x36xbf16, #tpu.memory_space<vmem>>, vector<16x16x4xbf16>
    tpu.vector_store %arg7[%c0_20, %c0_21, %c12], %10 {strides = array<i32>} : memref<16x16x36xbf16, #tpu.memory_space<vmem>>, vector<16x16x4xbf16>,
    %c0_22 = arith.constant 0 : index
    %c1_23 = arith.constant 1 : index
    %c1_24 = arith.constant 1 : index
    %c0_25 = arith.constant 0 : index
    %12 = vector.load %arg1[%c0_22, %c1_23, %c1_24, %c0_25] : memref<1x18x18x4xbf16, #tpu.memory_space<vmem>>, vector<1x16x16x4xbf16>
    %13 = vector.shape_cast %12 : vector<1x16x16x4xbf16> to vector<16x16x4xbf16>
    %c0_26 = arith.constant 0 : index
    %c0_27 = arith.constant 0 : index
    %c16 = arith.constant 16 : index
    %14 = vector.load %arg7[%c0_26, %c0_27, %c16] : memref<16x16x36xbf16, #tpu.memory_space<vmem>>, vector<16x16x4xbf16>
    tpu.vector_store %arg7[%c0_26, %c0_27, %c16], %13 {strides = array<i32>} : memref<16x16x36xbf16, #tpu.memory_space<vmem>>, vector<16x16x4xbf16>,
    %c0_28 = arith.constant 0 : index
    %c1_29 = arith.constant 1 : index
    %c2_30 = arith.constant 2 : index
    %c0_31 = arith.constant 0 : index
    %15 = vector.load %arg1[%c0_28, %c1_29, %c2_30, %c0_31] : memref<1x18x18x4xbf16, #tpu.memory_space<vmem>>, vector<1x16x16x4xbf16>
    %16 = vector.shape_cast %15 : vector<1x16x16x4xbf16> to vector<16x16x4xbf16>
    %c0_32 = arith.constant 0 : index
    %c0_33 = arith.constant 0 : index
    %c20 = arith.constant 20 : index
    %17 = vector.load %arg7[%c0_32, %c0_33, %c20] : memref<16x16x36xbf16, #tpu.memory_space<vmem>>, vector<16x16x4xbf16>
    tpu.vector_store %arg7[%c0_32, %c0_33, %c20], %16 {strides = array<i32>} : memref<16x16x36xbf16, #tpu.memory_space<vmem>>, vector<16x16x4xbf16>,
    %c0_34 = arith.constant 0 : index
    %c2_35 = arith.constant 2 : index
    %c0_36 = arith.constant 0 : index
    %c0_37 = arith.constant 0 : index
    %18 = vector.load %arg1[%c0_34, %c2_35, %c0_36, %c0_37] : memref<1x18x18x4xbf16, #tpu.memory_space<vmem>>, vector<1x16x16x4xbf16>
    %19 = vector.shape_cast %18 : vector<1x16x16x4xbf16> to vector<16x16x4xbf16>
    %c0_38 = arith.constant 0 : index
    %c0_39 = arith.constant 0 : index
    %c24 = arith.constant 24 : index
    %20 = vector.load %arg7[%c0_38, %c0_39, %c24] : memref<16x16x36xbf16, #tpu.memory_space<vmem>>, vector<16x16x4xbf16>
    tpu.vector_store %arg7[%c0_38, %c0_39, %c24], %19 {strides = array<i32>} : memref<16x16x36xbf16, #tpu.memory_space<vmem>>, vector<16x16x4xbf16>,
    %c0_40 = arith.constant 0 : index
    %c2_41 = arith.constant 2 : index
    %c1_42 = arith.constant 1 : index
    %c0_43 = arith.constant 0 : index
    %21 = vector.load %arg1[%c0_40, %c2_41, %c1_42, %c0_43] : memref<1x18x18x4xbf16, #tpu.memory_space<vmem>>, vector<1x16x16x4xbf16>
    %22 = vector.shape_cast %21 : vector<1x16x16x4xbf16> to vector<16x16x4xbf16>
    %c0_44 = arith.constant 0 : index
    %c0_45 = arith.constant 0 : index
    %c28 = arith.constant 28 : index
    %23 = vector.load %arg7[%c0_44, %c0_45, %c28] : memref<16x16x36xbf16, #tpu.memory_space<vmem>>, vector<16x16x4xbf16>
    tpu.vector_store %arg7[%c0_44, %c0_45, %c28], %22 {strides = array<i32>} : memref<16x16x36xbf16, #tpu.memory_space<vmem>>, vector<16x16x4xbf16>,
    %c0_46 = arith.constant 0 : index
    %c2_47 = arith.constant 2 : index
    %c2_48 = arith.constant 2 : index
    %c0_49 = arith.constant 0 : index
    %24 = vector.load %arg1[%c0_46, %c2_47, %c2_48, %c0_49] : memref<1x18x18x4xbf16, #tpu.memory_space<vmem>>, vector<1x16x16x4xbf16>
    %25 = vector.shape_cast %24 : vector<1x16x16x4xbf16> to vector<16x16x4xbf16>
    %c0_50 = arith.constant 0 : index
    %c0_51 = arith.constant 0 : index
    %c32 = arith.constant 32 : index
    %26 = vector.load %arg7[%c0_50, %c0_51, %c32] : memref<16x16x36xbf16, #tpu.memory_space<vmem>>, vector<16x16x4xbf16>
    tpu.vector_store %arg7[%c0_50, %c0_51, %c32], %25 {strides = array<i32>} : memref<16x16x36xbf16, #tpu.memory_space<vmem>>, vector<16x16x4xbf16>,
    %c0_52 = arith.constant 0 : index
    %c0_53 = arith.constant 0 : index
    %c0_54 = arith.constant 0 : index
    %27 = vector.load %arg7[%c0_52, %c0_53, %c0_54] : memref<16x16x36xbf16, #tpu.memory_space<vmem>>, vector<16x16x36xbf16>
    %28 = vector.shape_cast %27 : vector<16x16x36xbf16> to vector<256x36xbf16>
    %c0_55 = arith.constant 0 : index
    %c0_56 = arith.constant 0 : index
    %29 = vector.load %arg2[%c0_55, %c0_56] : memref<36x32xbf16, #tpu.memory_space<vmem>>, vector<36x32xbf16>
    %cst = arith.constant dense<0.000000e+00> : vector<256x32xf32>
    %30 = tpu.matmul %28, %29, %cst {dimension_numbers = #tpu.dot_dimension_numbers<[1], [0], [0], [1], [0, 0, 1, 1], [], []>} : vector<256x36xbf16>, vector<36x32xbf16>, vector<256x32xf32> -> vector<256x32xf32>
    %c0_57 = arith.constant 0 : index
    %c0_58 = arith.constant 0 : index
    %31 = vector.load %arg3[%c0_57, %c0_58] : memref<1x32xf32, #tpu.memory_space<vmem>>, vector<1x32xf32>
    %32 = vector.broadcast %31 : vector<1x32xf32> to vector<256x32xf32>
    %33 = arith.addf %30, %32 : vector<256x32xf32>
    %cst_59 = arith.constant 0.000000e+00 : f32
    %34 = vector.broadcast %cst_59 : f32 to vector<256x32xf32>
    %35 = arith.maximumf %33, %34 : vector<256x32xf32>
    %cst_60 = arith.constant 0.000000e+00 : bf16
    %36 = vector.broadcast %cst_60 : bf16 to vector<48x32xbf16>
    %cst_61 = arith.constant 0.000000e+00 : bf16
    %37 = vector.broadcast %cst_61 : bf16 to vector<16x16x32xbf16>
    %c0_62 = arith.constant 0 : index
    %c0_63 = arith.constant 0 : index
    %c0_64 = arith.constant 0 : index
    %38 = vector.load %arg8[%c0_62, %c0_63, %c0_64] : memref<18x48x32xbf16, #tpu.memory_space<vmem>>, vector<1x48x32xbf16>
    %39 = vector.shape_cast %38 : vector<1x48x32xbf16> to vector<48x32xbf16>
    %40 = vector.shape_cast %36 : vector<48x32xbf16> to vector<1x48x32xbf16>
    tpu.vector_store %arg8[%c0_62, %c0_63, %c0_64], %40 {strides = array<i32>} : memref<18x48x32xbf16, #tpu.memory_space<vmem>>, vector<1x48x32xbf16>,
    %c17 = arith.constant 17 : index
    %c0_65 = arith.constant 0 : index
    %c0_66 = arith.constant 0 : index
    %41 = vector.load %arg8[%c17, %c0_65, %c0_66] : memref<18x48x32xbf16, #tpu.memory_space<vmem>>, vector<1x48x32xbf16>
    %42 = vector.shape_cast %41 : vector<1x48x32xbf16> to vector<48x32xbf16>
    %43 = vector.shape_cast %36 : vector<48x32xbf16> to vector<1x48x32xbf16>
    tpu.vector_store %arg8[%c17, %c0_65, %c0_66], %43 {strides = array<i32>} : memref<18x48x32xbf16, #tpu.memory_space<vmem>>, vector<1x48x32xbf16>,
    %c1_67 = arith.constant 1 : index
    %c0_68 = arith.constant 0 : index
    %c0_69 = arith.constant 0 : index
    %44 = vector.load %arg8[%c1_67, %c0_68, %c0_69] : memref<18x48x32xbf16, #tpu.memory_space<vmem>>, vector<16x16x32xbf16>
    tpu.vector_store %arg8[%c1_67, %c0_68, %c0_69], %37 {strides = array<i32>} : memref<18x48x32xbf16, #tpu.memory_space<vmem>>, vector<16x16x32xbf16>,
    %c1_70 = arith.constant 1 : index
    %c32_71 = arith.constant 32 : index
    %c0_72 = arith.constant 0 : index
    %45 = vector.load %arg8[%c1_70, %c32_71, %c0_72] : memref<18x48x32xbf16, #tpu.memory_space<vmem>>, vector<16x16x32xbf16>
    tpu.vector_store %arg8[%c1_70, %c32_71, %c0_72], %37 {strides = array<i32>} : memref<18x48x32xbf16, #tpu.memory_space<vmem>>, vector<16x16x32xbf16>,
    %46 = arith.truncf %35 : vector<256x32xf32> to vector<256x32xbf16>
    %47 = vector.shape_cast %46 : vector<256x32xbf16> to vector<16x16x32xbf16>
    %c1_73 = arith.constant 1 : index
    %c16_74 = arith.constant 16 : index
    %c0_75 = arith.constant 0 : index
    %48 = vector.load %arg8[%c1_73, %c16_74, %c0_75] : memref<18x48x32xbf16, #tpu.memory_space<vmem>>, vector<16x16x32xbf16>
    tpu.vector_store %arg8[%c1_73, %c16_74, %c0_75], %47 {strides = array<i32>} : memref<18x48x32xbf16, #tpu.memory_space<vmem>>, vector<16x16x32xbf16>,
    %c0_76 = arith.constant 0 : index
    %c15 = arith.constant 15 : index
    %c0_77 = arith.constant 0 : index
    %49 = vector.load %arg8[%c0_76, %c15, %c0_77] : memref<18x48x32xbf16, #tpu.memory_space<vmem>>, vector<16x16x32xbf16>
    %c0_78 = arith.constant 0 : index
    %c0_79 = arith.constant 0 : index
    %c0_80 = arith.constant 0 : index
    %50 = vector.load %arg9[%c0_78, %c0_79, %c0_80] : memref<16x16x288xbf16, #tpu.memory_space<vmem>>, vector<16x16x32xbf16>
    tpu.vector_store %arg9[%c0_78, %c0_79, %c0_80], %49 {strides = array<i32>} : memref<16x16x288xbf16, #tpu.memory_space<vmem>>, vector<16x16x32xbf16>,
    %c0_81 = arith.constant 0 : index
    %c16_82 = arith.constant 16 : index
    %c0_83 = arith.constant 0 : index
    %51 = vector.load %arg8[%c0_81, %c16_82, %c0_83] : memref<18x48x32xbf16, #tpu.memory_space<vmem>>, vector<16x16x32xbf16>
    %c0_84 = arith.constant 0 : index
    %c0_85 = arith.constant 0 : index
    %c32_86 = arith.constant 32 : index
    %52 = vector.load %arg9[%c0_84, %c0_85, %c32_86] : memref<16x16x288xbf16, #tpu.memory_space<vmem>>, vector<16x16x32xbf16>
    tpu.vector_store %arg9[%c0_84, %c0_85, %c32_86], %51 {strides = array<i32>} : memref<16x16x288xbf16, #tpu.memory_space<vmem>>, vector<16x16x32xbf16>,
    %c0_87 = arith.constant 0 : index
    %c17_88 = arith.constant 17 : index
    %c0_89 = arith.constant 0 : index
    %53 = vector.load %arg8[%c0_87, %c17_88, %c0_89] : memref<18x48x32xbf16, #tpu.memory_space<vmem>>, vector<16x16x32xbf16>
    %c0_90 = arith.constant 0 : index
    %c0_91 = arith.constant 0 : index
    %c64 = arith.constant 64 : index
    %54 = vector.load %arg9[%c0_90, %c0_91, %c64] : memref<16x16x288xbf16, #tpu.memory_space<vmem>>, vector<16x16x32xbf16>
    tpu.vector_store %arg9[%c0_90, %c0_91, %c64], %53 {strides = array<i32>} : memref<16x16x288xbf16, #tpu.memory_space<vmem>>, vector<16x16x32xbf16>,
    %c1_92 = arith.constant 1 : index
    %c15_93 = arith.constant 15 : index
    %c0_94 = arith.constant 0 : index
    %55 = vector.load %arg8[%c1_92, %c15_93, %c0_94] : memref<18x48x32xbf16, #tpu.memory_space<vmem>>, vector<16x16x32xbf16>
    %c0_95 = arith.constant 0 : index
    %c0_96 = arith.constant 0 : index
    %c96 = arith.constant 96 : index
    %56 = vector.load %arg9[%c0_95, %c0_96, %c96] : memref<16x16x288xbf16, #tpu.memory_space<vmem>>, vector<16x16x32xbf16>
    tpu.vector_store %arg9[%c0_95, %c0_96, %c96], %55 {strides = array<i32>} : memref<16x16x288xbf16, #tpu.memory_space<vmem>>, vector<16x16x32xbf16>,
    %c1_97 = arith.constant 1 : index
    %c16_98 = arith.constant 16 : index
    %c0_99 = arith.constant 0 : index
    %57 = vector.load %arg8[%c1_97, %c16_98, %c0_99] : memref<18x48x32xbf16, #tpu.memory_space<vmem>>, vector<16x16x32xbf16>
    %c0_100 = arith.constant 0 : index
    %c0_101 = arith.constant 0 : index
    %c128 = arith.constant 128 : index
    %58 = vector.load %arg9[%c0_100, %c0_101, %c128] : memref<16x16x288xbf16, #tpu.memory_space<vmem>>, vector<16x16x32xbf16>
    tpu.vector_store %arg9[%c0_100, %c0_101, %c128], %57 {strides = array<i32>} : memref<16x16x288xbf16, #tpu.memory_space<vmem>>, vector<16x16x32xbf16>,
    %c1_102 = arith.constant 1 : index
    %c17_103 = arith.constant 17 : index
    %c0_104 = arith.constant 0 : index
    %59 = vector.load %arg8[%c1_102, %c17_103, %c0_104] : memref<18x48x32xbf16, #tpu.memory_space<vmem>>, vector<16x16x32xbf16>
    %c0_105 = arith.constant 0 : index
    %c0_106 = arith.constant 0 : index
    %c160 = arith.constant 160 : index
    %60 = vector.load %arg9[%c0_105, %c0_106, %c160] : memref<16x16x288xbf16, #tpu.memory_space<vmem>>, vector<16x16x32xbf16>
    tpu.vector_store %arg9[%c0_105, %c0_106, %c160], %59 {strides = array<i32>} : memref<16x16x288xbf16, #tpu.memory_space<vmem>>, vector<16x16x32xbf16>,
    %c2_107 = arith.constant 2 : index
    %c15_108 = arith.constant 15 : index
    %c0_109 = arith.constant 0 : index
    %61 = vector.load %arg8[%c2_107, %c15_108, %c0_109] : memref<18x48x32xbf16, #tpu.memory_space<vmem>>, vector<16x16x32xbf16>
    %c0_110 = arith.constant 0 : index
    %c0_111 = arith.constant 0 : index
    %c192 = arith.constant 192 : index
    %62 = vector.load %arg9[%c0_110, %c0_111, %c192] : memref<16x16x288xbf16, #tpu.memory_space<vmem>>, vector<16x16x32xbf16>
    tpu.vector_store %arg9[%c0_110, %c0_111, %c192], %61 {strides = array<i32>} : memref<16x16x288xbf16, #tpu.memory_space<vmem>>, vector<16x16x32xbf16>,
    %c2_112 = arith.constant 2 : index
    %c16_113 = arith.constant 16 : index
    %c0_114 = arith.constant 0 : index
    %63 = vector.load %arg8[%c2_112, %c16_113, %c0_114] : memref<18x48x32xbf16, #tpu.memory_space<vmem>>, vector<16x16x32xbf16>
    %c0_115 = arith.constant 0 : index
    %c0_116 = arith.constant 0 : index
    %c224 = arith.constant 224 : index
    %64 = vector.load %arg9[%c0_115, %c0_116, %c224] : memref<16x16x288xbf16, #tpu.memory_space<vmem>>, vector<16x16x32xbf16>
    tpu.vector_store %arg9[%c0_115, %c0_116, %c224], %63 {strides = array<i32>} : memref<16x16x288xbf16, #tpu.memory_space<vmem>>, vector<16x16x32xbf16>,
    %c2_117 = arith.constant 2 : index
    %c17_118 = arith.constant 17 : index
    %c0_119 = arith.constant 0 : index
    %65 = vector.load %arg8[%c2_117, %c17_118, %c0_119] : memref<18x48x32xbf16, #tpu.memory_space<vmem>>, vector<16x16x32xbf16>
    %c0_120 = arith.constant 0 : index
    %c0_121 = arith.constant 0 : index
    %c256 = arith.constant 256 : index
    %66 = vector.load %arg9[%c0_120, %c0_121, %c256] : memref<16x16x288xbf16, #tpu.memory_space<vmem>>, vector<16x16x32xbf16>
    tpu.vector_store %arg9[%c0_120, %c0_121, %c256], %65 {strides = array<i32>} : memref<16x16x288xbf16, #tpu.memory_space<vmem>>, vector<16x16x32xbf16>,
    %c0_122 = arith.constant 0 : index
    %c0_123 = arith.constant 0 : index
    %c0_124 = arith.constant 0 : index
    %67 = vector.load %arg9[%c0_122, %c0_123, %c0_124] : memref<16x16x288xbf16, #tpu.memory_space<vmem>>, vector<16x16x288xbf16>
    %68 = vector.shape_cast %67 : vector<16x16x288xbf16> to vector<256x288xbf16>
    %c0_125 = arith.constant 0 : index
    %c0_126 = arith.constant 0 : index
    %69 = vector.load %arg4[%c0_125, %c0_126] : memref<288x128xbf16, #tpu.memory_space<vmem>>, vector<288x128xbf16>
    %cst_127 = arith.constant dense<0.000000e+00> : vector<256x128xf32>
    %70 = tpu.matmul %68, %69, %cst_127 {dimension_numbers = #tpu.dot_dimension_numbers<[1], [0], [0], [1], [0, 0, 1, 1], [], []>} : vector<256x288xbf16>, vector<288x128xbf16>, vector<256x128xf32> -> vector<256x128xf32>
    %c0_128 = arith.constant 0 : index
    %c0_129 = arith.constant 0 : index
    %71 = vector.load %arg5[%c0_128, %c0_129] : memref<1x128xf32, #tpu.memory_space<vmem>>, vector<1x128xf32>
    %72 = vector.broadcast %71 : vector<1x128xf32> to vector<256x128xf32>
    %73 = arith.addf %70, %72 : vector<256x128xf32>
    %cst_130 = arith.constant 0.000000e+00 : f32
    %74 = vector.broadcast %cst_130 : f32 to vector<256x128xf32>
    %75 = arith.maximumf %73, %74 : vector<256x128xf32>
    %76 = vector.shape_cast %75 : vector<256x128xf32> to vector<16x16x128xf32>
    %c0_131 = arith.constant 0 : index
    %c0_132 = arith.constant 0 : index
    %c0_133 = arith.constant 0 : index
    %c0_134 = arith.constant 0 : index
    %77 = vector.load %arg6[%c0_131, %c0_132, %c0_133, %c0_134] : memref<1x16x16x128xf32, #tpu.memory_space<vmem>>, vector<1x16x16x128xf32>
    %78 = vector.shape_cast %77 : vector<1x16x16x128xf32> to vector<16x16x128xf32>
    %79 = vector.shape_cast %76 : vector<16x16x128xf32> to vector<1x16x16x128xf32>
    tpu.vector_store %arg6[%c0_131, %c0_132, %c0_133, %c0_134], %79 {strides = array<i32>} : memref<1x16x16x128xf32, #tpu.memory_space<vmem>>, vector<1x16x16x128xf32>,
    return
  }
  func.func @transform_0(%arg0: i32) -> (i32, i32, i32, i32) {
    %c0_i32 = arith.constant 0 : i32
    %c0_i32_0 = arith.constant 0 : i32
    %c0_i32_1 = arith.constant 0 : i32
    %c0_i32_2 = arith.constant 0 : i32
    return %arg0, %c0_i32, %c0_i32_0, %c0_i32_1 : i32, i32, i32, i32
  }
  func.func @transform_1(%arg0: i32) -> (i32, i32) {
    %c0_i32 = arith.constant 0 : i32
    %c0_i32_0 = arith.constant 0 : i32
    %c0_i32_1 = arith.constant 0 : i32
    return %c0_i32, %c0_i32_0 : i32, i32
  }
  func.func @transform_2(%arg0: i32) -> (i32, i32) {
    %c0_i32 = arith.constant 0 : i32
    %c0_i32_0 = arith.constant 0 : i32
    %c0_i32_1 = arith.constant 0 : i32
    return %c0_i32, %c0_i32_0 : i32, i32
  }
  func.func @transform_3(%arg0: i32) -> (i32, i32) {
    %c0_i32 = arith.constant 0 : i32
    %c0_i32_0 = arith.constant 0 : i32
    %c0_i32_1 = arith.constant 0 : i32
    return %c0_i32, %c0_i32_0 : i32, i32
  }
  func.func @transform_4(%arg0: i32) -> (i32, i32) {
    %c0_i32 = arith.constant 0 : i32
    %c0_i32_0 = arith.constant 0 : i32
    %c0_i32_1 = arith.constant 0 : i32
    return %c0_i32, %c0_i32_0 : i32, i32
  }
  func.func @transform_5(%arg0: i32) -> (i32, i32, i32, i32) {
    %c0_i32 = arith.constant 0 : i32
    %c0_i32_0 = arith.constant 0 : i32
    %c0_i32_1 = arith.constant 0 : i32
    %c0_i32_2 = arith.constant 0 : i32
    return %arg0, %c0_i32, %c0_i32_0, %c0_i32_1 : i32, i32, i32, i32
  }
}

</mosaic_0001>

<bundles_post_ra>
// kernel: tpu_custom_call.1
= control target key start
LH: loop header
LB: loop body
LE: loop exit
PB: predicated region body
PF: predicated region fallthrough
CT: control target
= control target key end

     0   :  { %10 = vsyncpa [#allocation6], 0  ;;  %s12285_s0 = inlined_call_operand.vmem [shape: bf16[2,18,18,4], index: 0, kind: input, shape index: {}]   ;;  %s12286_s1 = inlined_call_operand.vmem [shape: bf16[36,32], index: 1, kind: input, shape index: {}]   ;;  %s12287_s2 = inlined_call_operand.vmem [shape: f32[1,32], index: 2, kind: input, shape index: {}]   ;;  %s12288_s3 = inlined_call_operand.vmem [shape: bf16[288,128], index: 3, kind: input, shape index: {}]   ;;  %s12289_s4 = inlined_call_operand.vmem [shape: f32[1,128], index: 4, kind: input, shape index: {}]   ;;  %s12290_s5 = inlined_call_operand.hbm [shape: f32[2,16,16,128], index: 5, kind: output, shape index: {}]  }
   0x1   :  { %12 = vsyncpa [#allocation6 + $0x1], 0  ;;  %s9310_s18 = smov 0   ;;  %s9312_s19 = smov 0  }
   0x2   :  { %s9314_s20 = smov 0   ;;  %s9316_s21 = smov 0  }
   0x3 LB: > { %s9331_s22 = sadd.s32 4294967295, %s9266_s21   ;;  %s8331_s23 = sadd.s32 4294967294, %s9266_s21   ;;  %s9266_s21 = sphi %s9316_s21, %s12302_s21   ;;  %s9262_s20 = sphi %s9314_s20, %s12301_s20   ;;  %s9258_s19 = sphi %s9312_s19, %s12300_s19   ;;  %s9254_s18 = sphi %s9310_s18, %s12299_s18  }
   0x4   : > { %s9335_s24 = sadd.s32 1, %s9266_s21   ;;  %s135_s25 = sadd.s32 1, %s9262_s20 }
   0x5   : > { %s132_s26 = ssub.s32 %s9266_s21, %s9335_s24  ;;  %p145_p0 = scmp.ne.s32.totalorder %s9262_s20, %s9258_s19 }
   0x6   : > { %p133_p1 = scmp.eq.s32.totalorder %s132_s26, 0  ;;  %p146_p2 = scmp.eq.s32.totalorder %s9331_s22, 1 }
   0x7   : > { %p151_p3 = scmp.ne.s32.totalorder %s9258_s19, %s9254_s18  ;;  %p152_p4 = scmp.eq.s32.totalorder %s8331_s23, 1 }
   0x8   : > { %s9346_s27 = scalar_select %p133_p1, %s9262_s20, %s135_s25  }
   0x9   : > { %p9348_p5 = por %p146_p2, %p145_p0  ;;  %p9352_p6 = por %p152_p4, %p151_p3 }
   0xa   : > { %p8334_p7 = scmp.ge.s32.totalorder %s9266_s21, 1  ;;  %p190_p8 = scmp.lt.s32.totalorder %s9266_s21, 3 }
   0xc   : > { %p191_p9 = pnand %p8334_p7, %p190_p8 }
   0xd   : > { %p218_p10 = scmp.lt.s32.totalorder (!%p191_p9), %s9331_s22, 1  ;;  %s9268_s10 = smov (!%p191_p9), 4  }
   0xe   : > { %194 = sbr.rel (%p191_p9) target bundleno = 1830 (0x726), region = 40  ;;  %s9269_s11 = smov (!%p191_p9), 8  }
   0xf   : > { %s9270_s12 = smov (!%p191_p9), 12   ;;  %s9271_s13 = smov (!%p191_p9), 16  }
  0x10   : > { %s9272_s14 = smov (!%p191_p9), 20   ;;  %s9273_s15 = smov (!%p191_p9), 24  }
  0x11   : > { %s9274_s16 = smov (!%p191_p9), 28   ;;  %s9275_s17 = smov (!%p191_p9), 32  }
  0x12   : > { %s9277_s23 = smov (!%p191_p9), 64   ;;  %s9278_s25 = smov (!%p191_p9), 96  }
  0x13   : > { %s219_s30 = scalar_select %p218_p10, %s9331_s22, 1  ;;  %vm337_vm0 = vsmask.f32 3328  ;;  %vm338_vm1 = vsmask.f32 7440  ;;  %vm949_vm3 = vcmask 1042432  }
  0x14   : > { %vm9373_vm2 = vmor %vm337_vm0, %vm338_vm1  ;;  %vm950_vm4 = vcmask 1046532   ;;  %vm256_vm5 = vcmask 27648   ;;  %vm820_vm7 = vcmask 60448   ;;  %vm1160_vm8 = vcmask 93248   ;;  %s215_s26 = sand.u32 1, %s9258_s19  }
  0x15   : > { %s9147_s6 = smul.u32 216, %s219_s30  ;;  %vm9532_vm6 = vmor %vm949_vm3, %vm950_vm4  ;;  %vm1354_vm9 = vcmask 126048   ;;  %vm1915_vm10 = vcmask 158848   ;;  %vm2252_vm11 = vcmask 191648   ;;  %vm2446_vm12 = vcmask 224448   ;;  %s8335_s30 = sshll.u32 %s215_s26, 8 }
  0x16   : > { %vm3007_vm13 = vcmask 257248   ;;  %vm3562_vm14 = vcmask 1041408   ;;  %vm3344_vm15 = vcmask 290048   ;;  %vm3513_vm0 = vcmask 293888  }
  0x17   : > { %s9363_s9 = scalar_lea.vmem %s12285_s0, %s9147_s6  ;;  %vm3687_vm1 = vcmask 257024   ;;  %vm3878_vm3 = vsmask.f32 256  ;;  %vm3879_vm4 = vsmask.f32 4368  ;;  %s11913_s6 = scalar_lea.vmem [#allocation5], %s8335_s30 }
  0x18   : > { %v289_v0 = vld [vmem:[%s9363_s9] sm:$0xf]  ;;  %v290_v1 = vld [vmem:[%s9363_s9 + $0x4] sm:$0xf]  ;;  %v292_v6 = vld [vmem:[%s9363_s9 + $0xc] sm:$0xf] }
  0x19   : > { %v341_v2 = vshrl.u32 %v289_v0, 16  ;;  %v344_v3 = vshll.u32 %v289_v0, 16  ;;  %v350_v4 = vshll.u32 %v290_v1, 16  ;;  %v354_v5 = vshrl.u32 %v290_v1, 16  ;;  %v293_v7 = vld [vmem:[%s9363_s9 + $0x10] sm:$0xf] }
  0x1a   : > { %v365_v8 = vshrl.u32 %v292_v6, 16  ;;  %v368_v9 = vshll.u32 %v292_v6, 16  ;;  %v298_v13 = vld [vmem:[%s9363_s9 + $0x24] sm:$0xf]  ;;  %v291_v14 = vld [vmem:[%s9363_s9 + $0x8] sm:$0x1] }
  0x1b   : > { %v343_v10 = vrot.slane %v341_v2, 4  ;;  %v346_v11 = vrot.slane %v344_v3, 5  ;;  %v356_v12 = vrot.slane %v354_v5, 4  ;;  %v374_v17 = vshll.u32 %v293_v7, 16  ;;  %v294_v26 = vld [vmem:[%s9363_s9 + $0x14] sm:$0x1] }
  0x1c   : > { %v367_v15 = vrot.slane %v365_v8, 4  ;;  %v370_v16 = vrot.slane %v368_v9, 5  ;;  %v352_v19 = vrot.slane %v350_v4, 5  ;;  %v378_v20 = vshrl.u32 %v293_v7, 16  ;;  %v299_v31 = vld [vmem:[%s9363_s9 + $0x28] sm:$0xf] }
  0x1d   : > { %v347_v18 = vor.u32 %v346_v11, %v343_v10  ;;  %v413_v21 = vshrl.u32 %v298_v13, 16  ;;  %v376_v24 = vrot.slane %v374_v17, 5  ;;  %v416_v25 = vshll.u32 %v298_v13, 16  ;;  %v295_v34 = vld [vmem:[%s9363_s9 + $0x18] sm:$0xf]  ;;  %s9224_s30 = scalar_lea.hbm %s12290_s5, 512 }
  0x1e   : > { %v371_v23 = vor.u32 %v370_v16, %v367_v15  ;;  %v357_v28 = vor.u32 %v356_v12, %v352_v19  ;;  %v360_v29 = vshll.u32 %v291_v14, 16  ;;  %v380_v30 = vrot.slane %v378_v20, 4  ;;  %v296_v41 = vld [vmem:[%s9363_s9 + $0x1c] sm:$0xf]  ;;  %v302_v45 = vld [vmem:[%s9363_s9 + $0x34] sm:$0xf] }
  0x1f   : > { %v348_v27 = vrot.slane %v347_v18, 4  ;;  %v415_v33 = vrot.slane %v413_v21, 4  ;;  %v418_v36 = vrot.slane %v416_v25, 5  ;;  %v384_v38 = vshll.u32 %v294_v26, 16  ;;  %v300_v50 = vld [vmem:[%s9363_s9 + $0x2c] sm:$0x1] }
  0x20   : > { %v372_v32 = vrot.slane %v371_v23, 4  ;;  %v381_v37 = vor.u32 %v380_v30, %v376_v24  ;;  %v422_v40 = vshll.u32 %v299_v31, 16  ;;  %v358_v42 = vrot.slane %v357_v28, 4  ;;  %v297_v2 = vld [vmem:[%s9363_s9 + $0x20] sm:$0x1] }
  0x21   : > { %v353_v35 = vsel %vm9373_vm2, %v348_v27, %v352_v19  ;;  %v362_v43 = vrot.slane %v360_v29, 5  ;;  %v426_v44 = vshrl.u32 %v299_v31, 16  ;;  %v389_v46 = vshrl.u32 %v295_v34, 16  ;;  %v304_v5 = vld [vmem:[%s9363_s9 + $0x3c] sm:$0xf] }
  0x22   : > { %724 = vrot.lane.b32.xlu0 %v353_v35, %s9268_s10  ;;  %v377_v39 = vsel %vm9373_vm2, %v372_v32, %v376_v24  ;;  %v382_v47 = vrot.slane %v381_v37, 4  ;;  %v386_v48 = vrot.slane %v384_v38, 5  ;;  %v392_v49 = vshll.u32 %v295_v34, 16  ;;  %v303_v6 = vld [vmem:[%s9363_s9 + $0x38] sm:$0x1] }
  0x23   : > { %728 = vrot.lane.b32.xlu1 %v377_v39, %s9268_s10  ;;  %v419_v51 = vor.u32 %v418_v36, %v415_v33  ;;  %v391_v52 = vrot.slane %v389_v46, 4  ;;  %v398_v53 = vshll.u32 %v296_v41, 16  ;;  %v424_v54 = vrot.slane %v422_v40, 5  ;;  %v307_v15 = vld [vmem:[%s9363_s9 + $0x48] sm:$0xf] }
  0x24   : > { %v446_v55 = vshll.u32 %v302_v45, 16  ;;  %v394_v56 = vrot.slane %v392_v49, 5  ;;  %v402_v57 = vshrl.u32 %v296_v41, 16  ;;  %v363_v58 = vsel %vm9373_vm2, %v358_v42, %v362_v43  ;;  %v305_v20 = vld [vmem:[%s9363_s9 + $0x40] sm:$0xf] }
  0x25   : > { %v450_v59 = vshrl.u32 %v302_v45, 16  ;;  %v428_v60 = vrot.slane %v426_v44, 4  ;;  %v432_v61 = vshll.u32 %v300_v50, 16  ;;  %v387_v62 = vsel %vm9373_vm2, %v382_v47, %v386_v48  ;;  %v301_v21 = vld [vmem:[%s9363_s9 + $0x30] sm:$0xf] }
  0x26   : > { %v395_v63 = vor.u32 %v394_v56, %v391_v52  ;;  %v400_v0 = vrot.slane %v398_v53, 5  ;;  %v404_v1 = vrot.slane %v402_v57, 4  ;;  %v420_v3 = vrot.slane %v419_v51, 4  ;;  %v308_v23 = vld [vmem:[%s9363_s9 + $0x4c] sm:$0xf] }
  0x27   : > { %v429_v4 = vor.u32 %v428_v60, %v424_v54  ;;  %v9397_v7 = vrot.slane %v446_v55, 5  ;;  %v452_v9 = vrot.slane %v450_v59, 4  ;;  %v434_v10 = vrot.slane %v432_v61, 5  ;;  %v311_v41 = vld [vmem:[%s9363_s9 + $0x58] sm:$0xf] }
  0x28   : > { %v396_v8 = vrot.slane %v395_v63, 4  ;;  %v405_v11 = vor.u32 %v404_v1, %v400_v0  ;;  %v408_v12 = vshll.u32 %v297_v2, 16  ;;  %v461_v16 = vshrl.u32 %v304_v5, 16  ;;  %v309_v49 = vld [vmem:[%s9363_s9 + $0x50] sm:$0x1] }
  0x29   : > { %v430_v14 = vrot.slane %v429_v4, 4  ;;  %v464_v17 = vshll.u32 %v304_v5, 16  ;;  %v425_v18 = vsel %vm9373_vm2, %v420_v3, %v424_v54  ;;  %v456_v19 = vshll.u32 %v303_v6, 16  ;;  %v313_v53 = vld [vmem:[%s9363_s9 + $0x60] sm:$0xf] }
  0x2a   : > { %726 = vrot.lane.b32.xlu0 %v363_v58, %s9268_s10  ;;  %v401_v13 = vsel %vm9373_vm2, %v396_v8, %v400_v0  ;;  %v406_v24 = vrot.slane %v405_v11, 4  ;;  %v410_v25 = vrot.slane %v408_v12, 5  ;;  %v463_v26 = vrot.slane %v461_v16, 4  ;;  %v306_v61 = vld [vmem:[%s9363_s9 + $0x44] sm:$0x1] }
  0x2b   : > { %730 = vrot.lane.b32.xlu1 %v387_v62, %s9268_s10  ;;  %732 = vrot.lane.b32.xlu2 %v401_v13, %s9268_s10  ;;  %v466_v27 = vrot.slane %v464_v17, 5  ;;  %v453_v28 = vor.u32 %v452_v9, %v9397_v7  ;;  %v485_v29 = vshrl.u32 %v307_v15, 16  ;;  %v488_v30 = vshll.u32 %v307_v15, 16  ;;  %v310_v3 = vld [vmem:[%s9363_s9 + $0x54] sm:$0xf] }
  0x2c   : > { %v498_v31 = vshrl.u32 %v308_v23, 16  ;;  %v435_v32 = vsel %vm9373_vm2, %v430_v14, %v434_v10  ;;  %v470_v34 = vshll.u32 %v305_v20, 16  ;;  %v437_v35 = vshrl.u32 %v301_v21, 16  ;;  %v312_v4 = vld [vmem:[%s9363_s9 + $0x5c] sm:$0x1] }
  0x2d   : > { %v467_v33 = vor.u32 %v466_v27, %v463_v26  ;;  %v458_v36 = vrot.slane %v456_v19, 5  ;;  %v440_v37 = vshll.u32 %v301_v21, 16  ;;  %v494_v38 = vshll.u32 %v308_v23, 16  ;;  %v316_v13 = vld [vmem:[%s9363_s9 + $0x6c] sm:$0xf] }
  0x2e   : > { %v411_v39 = vsel %vm9373_vm2, %v406_v24, %v410_v25  ;;  %v474_v40 = vshrl.u32 %v305_v20, 16  ;;  %v439_v42 = vrot.slane %v437_v35, 4  ;;  %v454_v43 = vrot.slane %v453_v28, 4 }
  0x2f   : > { %v487_v44 = vrot.slane %v485_v29, 4  ;;  %v490_v45 = vrot.slane %v488_v30, 5  ;;  %v442_v46 = vrot.slane %v440_v37, 5  ;;  %v468_v47 = vrot.slane %v467_v33, 4 }
  0x30   : > { %v472_v48 = vrot.slane %v470_v34, 5  ;;  %v500_v50 = vrot.slane %v498_v31, 4  ;;  %v518_v51 = vshll.u32 %v311_v41, 16  ;;  %v496_v54 = vrot.slane %v494_v38, 5 }
  0x31   : > { %v443_v52 = vor.u32 %v442_v46, %v439_v42  ;;  %v522_v55 = vshrl.u32 %v311_v41, 16  ;;  %v476_v56 = vrot.slane %v474_v40, 4  ;;  %v459_v57 = vsel %vm9373_vm2, %v454_v43, %v458_v36  ;;  %v320_v41 = vld [vmem:[%s9363_s9 + $0x7c] sm:$0xf]  ;;  %v322_v46 = vld [vmem:[%s9363_s9 + $0x84] sm:$0xf] }
  0x32   : > { %736 = vrot.lane.b32.xlu0 %v425_v18, %s9268_s10  ;;  %v491_v58 = vor.u32 %v490_v45, %v487_v44  ;;  %v504_v60 = vshll.u32 %v309_v49, 16  ;;  %v473_v62 = vsel %vm9373_vm2, %v468_v47, %v472_v48  ;;  %v501_v63 = vor.u32 %v500_v50, %v496_v54  ;;  %v314_v18 = vld [vmem:[%s9363_s9 + $0x64] sm:$0xf]  ;;  %v318_v44 = vld [vmem:[%s9363_s9 + $0x74] sm:$0x1] }
  0x33   : > { %738 = vrot.lane.b32.xlu1 %v435_v32, %s9268_s10  ;;  %734 = vrot.lane.b32.xlu2 %v411_v39, %s9268_s10  ;;  %v444_v59 = vrot.slane %v443_v52, 4  ;;  %v533_v0 = vshrl.u32 %v313_v53, 16  ;;  %v536_v1 = vshll.u32 %v313_v53, 16  ;;  %v9425_v2 = vrot.slane %v518_v51, 5 }
  0x34   : > { %v524_v5 = vrot.slane %v522_v55, 4  ;;  %v477_v8 = vor.u32 %v476_v56, %v472_v48  ;;  %v480_v9 = vshll.u32 %v306_v61, 16  ;;  %v492_v10 = vrot.slane %v491_v58, 4  ;;  %v315_v55 = vld [vmem:[%s9363_s9 + $0x68] sm:$0x1] }
  0x35   : > { %v449_v6 = vsel %vm9373_vm2, %v444_v59, %v9397_v7  ;;  %v506_v11 = vrot.slane %v504_v60, 5  ;;  %v502_v12 = vrot.slane %v501_v63, 4  ;;  %v535_v14 = vrot.slane %v533_v0, 4  ;;  %v317_v7 = vld [vmem:[%s9363_s9 + $0x70] sm:$0xf] }
  0x36   : > { %v538_v15 = vrot.slane %v536_v1, 5  ;;  %v509_v16 = vshrl.u32 %v310_v3, 16  ;;  %v528_v17 = vshll.u32 %v312_v4, 16  ;;  %v512_v19 = vshll.u32 %v310_v3, 16  ;;  %v319_v60 = vld [vmem:[%s9363_s9 + $0x78] sm:$0xf] }
  0x37   : > { %v525_v20 = vor.u32 %v524_v5, %v9425_v2  ;;  %v478_v21 = vrot.slane %v477_v8, 4  ;;  %v482_v23 = vrot.slane %v480_v9, 5  ;;  %v497_v25 = vsel %vm9373_vm2, %v492_v10, %v496_v54  ;;  %v325_v0 = vld [vmem:[%s9363_s9 + $0x90] sm:$0xf]  ;;  %v321_v8 = vld [vmem:[%s9363_s9 + $0x80] sm:$0x1] }
  0x38   : > { %v511_v24 = vrot.slane %v509_v16, 4  ;;  %v557_v26 = vshrl.u32 %v316_v13, 16  ;;  %v560_v27 = vshll.u32 %v316_v13, 16  ;;  %v514_v28 = vrot.slane %v512_v19, 5 }
  0x39   : > { %v507_v29 = vsel %vm9373_vm2, %v502_v12, %v506_v11  ;;  %v570_v30 = vshrl.u32 %v317_v7, 16  ;;  %v539_v31 = vor.u32 %v538_v15, %v535_v14  ;;  %v542_v32 = vshll.u32 %v314_v18, 16  ;;  %v323_v14 = vld [vmem:[%s9363_s9 + $0x88] sm:$0xf] }
  0x3a   : > { %742 = vrot.lane.b32.xlu0 %v459_v57, %s9268_s10  ;;  %v530_v33 = vrot.slane %v528_v17, 5  ;;  %v566_v34 = vshll.u32 %v317_v7, 16  ;;  %v526_v35 = vrot.slane %v525_v20, 4  ;;  %v483_v36 = vsel %vm9373_vm2, %v478_v21, %v482_v23  ;;  %v326_v21 = vld [vmem:[%s9363_s9 + $0x94] sm:$0xf] }
  0x3b   : > { %744 = vrot.lane.b32.xlu1 %v473_v62, %s9268_s10  ;;  %740 = vrot.lane.b32.xlu2 %v449_v6, %s9268_s10  ;;  %v546_v37 = vshrl.u32 %v314_v18, 16  ;;  %v515_v38 = vor.u32 %v514_v28, %v511_v24  ;;  %v559_v39 = vrot.slane %v557_v26, 4  ;;  %v562_v40 = vrot.slane %v560_v27, 5 }
  0x3c   : > { %v540_v42 = vrot.slane %v539_v31, 4  ;;  %v544_v43 = vrot.slane %v542_v32, 5  ;;  %v572_v45 = vrot.slane %v570_v30, 4  ;;  %v531_v47 = vsel %vm9373_vm2, %v526_v35, %v530_v33  ;;  %v329_v35 = vld [vmem:[%s9363_s9 + $0xa0] sm:$0xf] }
  0x3d   : > { %v568_v48 = vrot.slane %v566_v34, 5  ;;  %v516_v49 = vrot.slane %v515_v38, 4  ;;  %v548_v50 = vrot.slane %v546_v37, 4  ;;  %v563_v51 = vor.u32 %v562_v40, %v559_v39  ;;  %v327_v38 = vld [vmem:[%s9363_s9 + $0x98] sm:$0x1] }
  0x3e   : > { %v590_v52 = vshll.u32 %v320_v41, 16  ;;  %v594_v53 = vshrl.u32 %v320_v41, 16  ;;  %v576_v54 = vshll.u32 %v318_v44, 16  ;;  %v545_v56 = vsel %vm9373_vm2, %v540_v42, %v544_v43  ;;  %v331_v42 = vld [vmem:[%s9363_s9 + $0xa8] sm:$0xf] }
  0x3f   : > { %v573_v57 = vor.u32 %v572_v45, %v568_v48  ;;  %v605_v58 = vshrl.u32 %v322_v46, 16  ;;  %v608_v59 = vshll.u32 %v322_v46, 16  ;;  %v581_v61 = vshrl.u32 %v319_v60, 16 }
  0x40   : > { %v584_v62 = vshll.u32 %v319_v60, 16  ;;  %v521_v63 = vsel %vm9373_vm2, %v516_v49, %v9425_v2  ;;  %v549_v1 = vor.u32 %v548_v50, %v544_v43  ;;  %v552_v3 = vshll.u32 %v315_v55, 16  ;;  %v324_v49 = vld [vmem:[%s9363_s9 + $0x8c] sm:$0x1] }
  0x41   : > { %v564_v4 = vrot.slane %v563_v51, 4  ;;  %v9463_v5 = vrot.slane %v590_v52, 5  ;;  %v596_v6 = vrot.slane %v594_v53, 4  ;;  %v574_v9 = vrot.slane %v573_v57, 4 }
  0x42   : > { %748 = vrot.lane.b32.xlu0 %v497_v25, %s9268_s10  ;;  %v578_v10 = vrot.slane %v576_v54, 5  ;;  %v607_v11 = vrot.slane %v605_v58, 4  ;;  %v610_v12 = vrot.slane %v608_v59, 5  ;;  %v629_v13 = vshrl.u32 %v325_v0, 16  ;;  %v328_v54 = vld [vmem:[%s9363_s9 + $0x9c] sm:$0xf] }
  0x43   : > { %750 = vrot.lane.b32.xlu1 %v507_v29, %s9268_s10  ;;  %746 = vrot.lane.b32.xlu2 %v483_v36, %s9268_s10  ;;  %v632_v2 = vshll.u32 %v325_v0, 16  ;;  %v583_v15 = vrot.slane %v581_v61, 4  ;;  %v586_v16 = vrot.slane %v584_v62, 5  ;;  %v550_v17 = vrot.slane %v549_v1, 4  ;;  %v330_v61 = vld [vmem:[%s9363_s9 + $0xa4] sm:$0x1] }
  0x44   : > { %v554_v18 = vrot.slane %v552_v3, 5  ;;  %v569_v19 = vsel %vm9373_vm2, %v564_v4, %v568_v48  ;;  %v597_v20 = vor.u32 %v596_v6, %v9463_v5  ;;  %v600_v7 = vshll.u32 %v321_v8, 16  ;;  %v334_v3 = vld [vmem:[%s9363_s9 + $0xb4] sm:$0xf]  ;;  %v332_v8 = vld [vmem:[%s9363_s9 + $0xac] sm:$0xf] }
  0x45   : > { %v579_v23 = vsel %vm9373_vm2, %v574_v9, %v578_v10  ;;  %v642_v24 = vshrl.u32 %v326_v21, 16  ;;  %v611_v25 = vor.u32 %v610_v12, %v607_v11  ;;  %v614_v26 = vshll.u32 %v323_v14, 16 }
  0x46   : > { %v631_v27 = vrot.slane %v629_v13, 4  ;;  %v634_v28 = vrot.slane %v632_v2, 5  ;;  %v587_v29 = vor.u32 %v586_v16, %v583_v15  ;;  %v638_v30 = vshll.u32 %v326_v21, 16 }
  0x47   : > { %v555_v31 = vsel %vm9373_vm2, %v550_v17, %v554_v18  ;;  %v618_v32 = vshrl.u32 %v323_v14, 16  ;;  %v598_v33 = vrot.slane %v597_v20, 4  ;;  %v602_v34 = vrot.slane %v600_v7, 5  ;;  %v335_v14 = vld [vmem:[%s9363_s9 + $0xb8] sm:$0xf] }
  0x48   : > { %v612_v36 = vrot.slane %v611_v25, 4  ;;  %v616_v37 = vrot.slane %v614_v26, 5  ;;  %v644_v39 = vrot.slane %v642_v24, 4  ;;  %v635_v40 = vor.u32 %v634_v28, %v631_v27 }
  0x49   : > { %v588_v41 = vrot.slane %v587_v29, 4  ;;  %v640_v43 = vrot.slane %v638_v30, 5  ;;  %v620_v44 = vrot.slane %v618_v32, 4  ;;  %v603_v45 = vsel %vm9373_vm2, %v598_v33, %v602_v34  ;;  %v336_v32 = vld [vmem:[%s9363_s9 + $0xbc] sm:$0x1] }
  0x4a   : > { %754 = vrot.lane.b32.xlu0 %v531_v47, %s9268_s10  ;;  %v662_v46 = vshll.u32 %v329_v35, 16  ;;  %v666_v47 = vshrl.u32 %v329_v35, 16  ;;  %v648_v48 = vshll.u32 %v327_v38, 16  ;;  %v617_v50 = vsel %vm9373_vm2, %v612_v36, %v616_v37  ;;  %v333_v38 = vld [vmem:[%s9363_s9 + $0xb0] sm:$0x1] }
  0x4b   : > { %756 = vrot.lane.b32.xlu1 %v545_v56, %s9268_s10  ;;  %752 = vrot.lane.b32.xlu2 %v521_v63, %s9268_s10  ;;  %v645_v51 = vor.u32 %v644_v39, %v640_v43  ;;  %v677_v52 = vshrl.u32 %v331_v42, 16  ;;  %v680_v53 = vshll.u32 %v331_v42, 16  ;;  %v636_v55 = vrot.slane %v635_v40, 4 }
  0x4c   : > { %v593_v56 = vsel %vm9373_vm2, %v588_v41, %v9463_v5  ;;  %v621_v57 = vor.u32 %v620_v44, %v616_v37  ;;  %v624_v58 = vshll.u32 %v324_v49, 16  ;;  %v653_v59 = vshrl.u32 %v328_v54, 16 }
  0x4d   : > { %v656_v60 = vshll.u32 %v328_v54, 16  ;;  %v664_v62 = vrot.slane %v662_v46, 5  ;;  %v668_v63 = vrot.slane %v666_v47, 4  ;;  %v646_v0 = vrot.slane %v645_v51, 4  ;;  %v854_v46 = vld [vmem:[%s9363_s9 + $0x4] sm:$0xf] }
  0x4e   : > { %v650_v1 = vrot.slane %v648_v48, 5  ;;  %v679_v4 = vrot.slane %v677_v52, 4  ;;  %v682_v6 = vrot.slane %v680_v53, 5  ;;  %v641_v5 = vsel %vm9373_vm2, %v636_v55, %v640_v43  ;;  %v855_v53 = vld [vmem:[%s9363_s9 + $0x8] sm:$0x1] }
  0x4f   : > { %v622_v9 = vrot.slane %v621_v57, 4  ;;  %v626_v10 = vrot.slane %v624_v58, 5  ;;  %v655_v11 = vrot.slane %v653_v59, 4  ;;  %v658_v12 = vrot.slane %v656_v60, 5  ;;  %v856_v55 = vld [vmem:[%s9363_s9 + $0xc] sm:$0xe] }
  0x50   : > { %v669_v13 = vor.u32 %v668_v63, %v664_v62  ;;  %v672_v2 = vshll.u32 %v330_v61, 16  ;;  %v701_v15 = vshrl.u32 %v334_v3, 16  ;;  %v704_v16 = vshll.u32 %v334_v3, 16  ;;  %v853_v60 = vld [vmem:[%s9363_s9] sm:$0xe] }
  0x51   : > { %v651_v17 = vsel %vm9373_vm2, %v646_v0, %v650_v1  ;;  %v714_v18 = vshrl.u32 %v335_v14, 16  ;;  %v686_v20 = vshll.u32 %v332_v8, 16  ;;  %v710_v7 = vshll.u32 %v335_v14, 16  ;;  %v224_v61 = vld [vmem:[%s9363_s9] sm:$0xf] }
  0x52   : > { %760 = vrot.lane.b32.xlu0 %v569_v19, %s9268_s10  ;;  %v683_v19 = vor.u32 %v682_v6, %v679_v4  ;;  %v627_v21 = vsel %vm9373_vm2, %v622_v9, %v626_v10  ;;  %v659_v24 = vor.u32 %v658_v12, %v655_v11  ;;  %v670_v25 = vrot.slane %v669_v13, 4  ;;  %257 = vst.msk [vmem:[#allocation2] sm:$0xf] %vm256_vm5, %v224_v61  ;;  %v859_v4 = vld [vmem:[%s9363_s9 + $0x18] sm:$0xe] }
  0x53   : > { %762 = vrot.lane.b32.xlu1 %v579_v23, %s9268_s10  ;;  %758 = vrot.lane.b32.xlu2 %v555_v31, %s9268_s10  ;;  %v690_v23 = vshrl.u32 %v332_v8, 16  ;;  %v674_v26 = vrot.slane %v672_v2, 5  ;;  %v703_v27 = vrot.slane %v701_v15, 4  ;;  %v706_v28 = vrot.slane %v704_v16, 5  ;;  %v860_v6 = vld [vmem:[%s9363_s9 + $0x1c] sm:$0xf] }
  0x54   : > { %v684_v29 = vrot.slane %v683_v19, 4  ;;  %v688_v30 = vrot.slane %v686_v20, 5  ;;  %v716_v31 = vrot.slane %v714_v18, 4  ;;  %v712_v33 = vrot.slane %v710_v7, 5  ;;  %v861_v8 = vld [vmem:[%s9363_s9 + $0x20] sm:$0x1] }
  0x55   : > { %v660_v34 = vrot.slane %v659_v24, 4  ;;  %v692_v35 = vrot.slane %v690_v23, 4  ;;  %v675_v36 = vsel %vm9373_vm2, %v670_v25, %v674_v26  ;;  %v707_v37 = vor.u32 %v706_v28, %v703_v27  ;;  %v863_v11 = vld [vmem:[%s9363_s9 + $0x28] sm:$0xf]  ;;  %v228_v13 = vld [vmem:[%s9363_s9 + $0x18] sm:$0xf] }
  0x56   : > { %v689_v39 = vsel %vm9373_vm2, %v684_v29, %v688_v30  ;;  %v717_v40 = vor.u32 %v716_v31, %v712_v33  ;;  %v720_v41 = vshll.u32 %v336_v32, 16  ;;  %v696_v44 = vshll.u32 %v333_v38, 16  ;;  %v858_v2 = vld [vmem:[%s9363_s9 + $0x14] sm:$0x1]  ;;  %261 = vst.msk [vmem:[#allocation2 + $0x10] sm:$0xf] %vm256_vm5, %v228_v13 }
  0x57   : > { %v665_v42 = vsel %vm9373_vm2, %v660_v34, %v664_v62  ;;  %v693_v43 = vor.u32 %v692_v35, %v688_v30  ;;  %v954_v52 = vrot.slane %v854_v46, 5  ;;  %v957_v59 = vrot.slane %v855_v53, 5  ;;  %v225_v14 = vld [vmem:[%s9363_s9 + $0x4] sm:$0xf]  ;;  %v864_v7 = vld [vmem:[%s9363_s9 + $0x2c] sm:$0x1] }
  0x58   : > { %v718_v47 = vrot.slane %v717_v40, 4  ;;  %v722_v48 = vrot.slane %v720_v41, 5  ;;  %v8338_v63 = vrot.slane %v856_v55, 9  ;;  %v8337_v1 = vrot.slane %v853_v60, 9  ;;  %258 = vst.msk [vmem:[#allocation2 + $0x4] sm:$0xf] %vm256_vm5, %v225_v14 }
  0x59   : > { %v694_v49 = vrot.slane %v693_v43, 4  ;;  %v956_v58 = vrot.slane %v954_v52, 4  ;;  %v8339_v9 = vrot.slane %v859_v4, 9  ;;  %v968_v10 = vrot.slane %v860_v6, 5  ;;  %v865_v23 = vld [vmem:[%s9363_s9 + $0x30] sm:$0xe] }
  0x5a   : > { %766 = vrot.lane.b32.xlu0 %v603_v45, %s9268_s10  ;;  %v708_v45 = vrot.slane %v707_v37, 4  ;;  %v723_v54 = vsel %vm9373_vm2, %v718_v47, %v722_v48  ;;  %v955_v12 = vsel %vm9532_vm6, %v8337_v1, %v954_v52  ;;  %v971_v16 = vrot.slane %v861_v8, 5  ;;  %v866_v24 = vld [vmem:[%s9363_s9 + $0x34] sm:$0xf]  ;;  %v229_v28 = vld [vmem:[%s9363_s9 + $0x1c] sm:$0xf] }
  0x5b   : > { %768 = vrot.lane.b32.xlu1 %v617_v50, %s9268_s10  ;;  %764 = vrot.lane.b32.xlu2 %v593_v56, %s9268_s10  ;;  %v698_v50 = vrot.slane %v696_v44, 5  ;;  %v857_v56 = vld [vmem:[%s9363_s9 + $0x10] sm:$0xf]  ;;  %v958_v3 = vsel %vm9532_vm6, %v956_v58, %v957_v59  ;;  %v970_v15 = vrot.slane %v968_v10, 4  ;;  %v964_v19 = vrot.slane %v858_v2, 5 }
  0x5c   : > { %v713_v51 = vsel %vm9373_vm2, %v708_v45, %v712_v33  ;;  %v961_v0 = vrot.slane %v857_v56, 5  ;;  %v969_v20 = vsel %vm9532_vm6, %v8339_v9, %v968_v10  ;;  %v978_v26 = vrot.slane %v864_v7, 5  ;;  %v226_v29 = vld [vmem:[%s9363_s9 + $0xc] sm:$0xf]  ;;  %v862_v30 = vld [vmem:[%s9363_s9 + $0x24] sm:$0xe] }
  0x5d   : > { %v699_v57 = vsel %vm9373_vm2, %v694_v49, %v698_v50  ;;  %262 = vst.msk [vmem:[#allocation2 + $0x14] sm:$0xf] %vm256_vm5, %v229_v28  ;;  %v230_v31 = vld [vmem:[%s9363_s9 + $0x24] sm:$0xf]  ;;  %v8341_v32 = vrot.slane %v865_v23, 9  ;;  %v982_v33 = vrot.slane %v866_v24, 5 }
  0x5e   : > { %v963_v18 = vrot.slane %v961_v0, 4  ;;  %259 = vst.msk [vmem:[#allocation2 + $0x8] sm:$0xf] %vm256_vm5, %v226_v29  ;;  %v8340_v34 = vrot.slane %v862_v30, 9  ;;  %v869_v37 = vld [vmem:[%s9363_s9 + $0x40] sm:$0xf] }
  0x5f   : > { %263 = vst.msk [vmem:[#allocation2 + $0x18] sm:$0xf] %vm256_vm5, %v230_v31  ;;  %v870_v40 = vld [vmem:[%s9363_s9 + $0x44] sm:$0x1]  ;;  %v232_v44 = vld [vmem:[%s9363_s9 + $0x30] sm:$0xf] }
  0x60   : > { %v965_v27 = vsel %vm9532_vm6, %v963_v18, %v964_v19  ;;  %v227_v45 = vld [vmem:[%s9363_s9 + $0x10] sm:$0xf]  ;;  %v867_v46 = vld [vmem:[%s9363_s9 + $0x38] sm:$0x1]  ;;  %265 = vst.msk [vmem:[#allocation2 + $0x20] sm:$0xf] %vm256_vm5, %v232_v44 }
  0x61   : > { %v233_v47 = vld [vmem:[%s9363_s9 + $0x34] sm:$0xf]  ;;  %v872_v48 = vld [vmem:[%s9363_s9 + $0x4c] sm:$0xf]  ;;  %v992_v50 = vrot.slane %v870_v40, 5  ;;  %v985_v52 = vrot.slane %v867_v46, 5 }
  0x62   : > { %772 = vrot.lane.b32.xlu0 %v641_v5, %s9268_s10  ;;  %v962_v5 = vsel %vm9532_vm6, %v8338_v63, %v961_v0  ;;  %260 = vst.msk [vmem:[#allocation2 + $0xc] sm:$0xf] %vm256_vm5, %v227_v45  ;;  %v873_v56 = vld [vmem:[%s9363_s9 + $0x50] sm:$0x1]  ;;  %v874_v58 = vld [vmem:[%s9363_s9 + $0x54] sm:$0xe] }
  0x63   : > { %774 = vrot.lane.b32.xlu1 %v651_v17, %s9268_s10  ;;  %770 = vrot.lane.b32.xlu2 %v627_v21, %s9268_s10  ;;  %v975_v17 = vrot.slane %v863_v11, 5  ;;  %v972_v21 = vsel %vm9532_vm6, %v970_v15, %v971_v16  ;;  %266 = vst.msk [vmem:[#allocation2 + $0x24] sm:$0xf] %vm256_vm5, %v233_v47  ;;  %v875_v59 = vld [vmem:[%s9363_s9 + $0x58] sm:$0xf]  ;;  %v999_v1 = vrot.slane %v873_v56, 5 }
  0x64   : > { %v235_v61 = vld [vmem:[%s9363_s9 + $0x40] sm:$0xf]  ;;  %v231_v63 = vld [vmem:[%s9363_s9 + $0x28] sm:$0xf]  ;;  %v8344_v6 = vrot.slane %v874_v58, 9 }
  0x65   : > { %v977_v25 = vrot.slane %v975_v17, 4  ;;  %v976_v43 = vsel %vm9532_vm6, %v8340_v34, %v975_v17  ;;  %268 = vst.msk [vmem:[#allocation2 + $0x2c] sm:$0xf] %vm256_vm5, %v235_v61  ;;  %v236_v8 = vld [vmem:[%s9363_s9 + $0x48] sm:$0xf] }
  0x66   : > { %264 = vst.msk [vmem:[#allocation2 + $0x1c] sm:$0xf] %vm256_vm5, %v231_v63  ;;  %v878_v13 = vld [vmem:[%s9363_s9 + $0x64] sm:$0xf]  ;;  %v879_v15 = vld [vmem:[%s9363_s9 + $0x68] sm:$0x1] }
  0x67   : > { %v979_v35 = vsel %vm9532_vm6, %v977_v25, %v978_v26  ;;  %269 = vst.msk [vmem:[#allocation2 + $0x30] sm:$0xf] %vm256_vm5, %v236_v8  ;;  %v1010_v17 = vrot.slane %v878_v13, 5  ;;  %v238_v19 = vld [vmem:[%s9363_s9 + $0x54] sm:$0xf]  ;;  %v1013_v25 = vrot.slane %v879_v15, 5 }
  0x68   : > { %v881_v7 = vld [vmem:[%s9363_s9 + $0x70] sm:$0xf]  ;;  %271 = vst.msk [vmem:[#allocation2 + $0x38] sm:$0xf] %vm256_vm5, %v238_v19  ;;  %v239_v26 = vld [vmem:[%s9363_s9 + $0x58] sm:$0xf] }
  0x69   : > { %v1012_v24 = vrot.slane %v1010_v17, 4  ;;  %v1017_v31 = vrot.slane %v881_v7, 5  ;;  %272 = vst.msk [vmem:[#allocation2 + $0x3c] sm:$0xf] %vm256_vm5, %v239_v26  ;;  %v242_v46 = vld [vmem:[%s9363_s9 + $0x6c] sm:$0xf] }
  0x6a   : > { %778 = vrot.lane.b32.xlu0 %v675_v36, %s9268_s10  ;;  %v868_v36 = vld [vmem:[%s9363_s9 + $0x3c] sm:$0xe]  ;;  %275 = vst.msk [vmem:[#allocation2 + $0x48] sm:$0xf] %vm256_vm5, %v242_v46  ;;  %v244_v58 = vld [vmem:[%s9363_s9 + $0x78] sm:$0xf] }
  0x6b   : > { %780 = vrot.lane.b32.xlu1 %v689_v39, %s9268_s10  ;;  %776 = vrot.lane.b32.xlu2 %v665_v42, %s9268_s10  ;;  %v983_v39 = vsel %vm9532_vm6, %v8341_v32, %v982_v33  ;;  %v8342_v41 = vrot.slane %v868_v36, 9  ;;  %v989_v42 = vrot.slane %v869_v37, 5  ;;  %v1014_v34 = vsel %vm9532_vm6, %v1012_v24, %v1013_v25  ;;  %v884_v36 = vld [vmem:[%s9363_s9 + $0x7c] sm:$0xf]  ;;  %v885_v61 = vld [vmem:[%s9363_s9 + $0x80] sm:$0x1] }
  0x6c   : > { %v1019_v40 = vrot.slane %v1017_v31, 4  ;;  %v1024_v45 = vrot.slane %v884_v36, 5  ;;  %277 = vst.msk [vmem:[#allocation2 + $0x50] sm:$0xf] %vm256_vm5, %v244_v58  ;;  %v892_v13 = vld [vmem:[%s9363_s9 + $0x9c] sm:$0xe] }
  0x6d   : > { %v991_v49 = vrot.slane %v989_v42, 4  ;;  %v990_v53 = vsel %vm9532_vm6, %v8342_v41, %v989_v42  ;;  %v880_v42 = vld [vmem:[%s9363_s9 + $0x6c] sm:$0xe]  ;;  %v247_v15 = vld [vmem:[%s9363_s9 + $0x88] sm:$0xf]  ;;  %v8350_v7 = vrot.slane %v892_v13, 9 }
  0x6e   : > { %v889_v19 = vld [vmem:[%s9363_s9 + $0x90] sm:$0xe]  ;;  %280 = vst.msk [vmem:[#allocation2 + $0x5c] sm:$0xf] %vm256_vm5, %v247_v15  ;;  %v246_v36 = vld [vmem:[%s9363_s9 + $0x84] sm:$0xf] }
  0x6f   : > { %v8349_v25 = vrot.slane %v889_v19, 9  ;;  %279 = vst.msk [vmem:[#allocation2 + $0x58] sm:$0xf] %vm256_vm5, %v246_v36  ;;  %v254_v58 = vld [vmem:[%s9363_s9 + $0xb4] sm:$0xf] }
  0x70   : > { %287 = vst.msk [vmem:[#allocation2 + $0x78] sm:$0xf] %vm256_vm5, %v254_v58  ;;  %v8359_v15 = vld [vmem:[%s9363_s9 + $0x30] sm:$0xf]  ;;  %v8361_v19 = vld [vmem:[%s9363_s9 + $0x3c] sm:$0xf] }
  0x71   : > { %v8379_v58 = vld [vmem:[%s9363_s9 + $0xa8] sm:$0xf]  ;;  %v10780_v62 = vld [vmem:[%s12287_s2] ss:$0 sm:$0xff] }
  0x72   : > { %784 = vrot.lane.b32.xlu0 %v713_v51, %s9268_s10  ;;  %v984_v51 = vrot.slane %v982_v33, 4  ;;  %v882_v33 = vld [vmem:[%s9363_s9 + $0x74] sm:$0x1] }
  0x73   : > { %786 = vrot.lane.b32.xlu1 %v723_v54, %s9268_s10  ;;  %782 = vrot.lane.b32.xlu2 %v699_v57, %s9268_s10  ;;  %v996_v54 = vrot.slane %v872_v48, 5  ;;  %v993_v57 = vsel %vm9532_vm6, %v991_v49, %v992_v50  ;;  %v1020_v41 = vrot.slane %v882_v33, 5  ;;  %v8346_v48 = vrot.slane %v880_v42, 9  ;;  %v886_v50 = vld [vmem:[%s9363_s9 + $0x84] sm:$0xe]  ;;  %s8266_s10 = sshll.u32 %s11913_s6, 4  ;;  %s8267_s10 = int_to_ptr.vmem [resolvable:$true] %s8266_s10 }
  0x74   : > { %v986_v60 = vsel %vm9532_vm6, %v984_v51, %v985_v52  ;;  %v887_v51 = vld [vmem:[%s9363_s9 + $0x88] sm:$0xf]  ;;  %v251_v42 = vld [vmem:[%s9363_s9 + $0xa0] sm:$0xf] }
  0x75   : > { %v998_v0 = vrot.slane %v996_v54, 4  ;;  %v1021_v49 = vsel %vm9532_vm6, %v1019_v40, %v1020_v41  ;;  %v1031_v56 = vrot.slane %v887_v51, 5  ;;  %284 = vst.msk [vmem:[#allocation2 + $0x6c] sm:$0xf] %vm256_vm5, %v251_v42 }
  0x77   : > { %v1000_v11 = vsel %vm9532_vm6, %v998_v0, %v999_v1  ;;  %v1033_v0 = vrot.slane %v1031_v56, 4 }
  0x7a   : > { %1066 = vrot.lane.b32.xlu0 %v958_v3, %s9269_s11  ;;  %v871_v3 = vld [vmem:[%s9363_s9 + $0x48] sm:$0xe] }
  0x7b   : > { %1068 = vrot.lane.b32.xlu1 %v962_v5, %s9269_s11  ;;  %1064 = vrot.lane.b32.xlu2 %v955_v12, %s9269_s11  ;;  %v1003_v5 = vrot.slane %v875_v59, 5  ;;  %v8343_v10 = vrot.slane %v871_v3, 9  ;;  %v877_v12 = vld [vmem:[%s9363_s9 + $0x60] sm:$0xe]  ;;  %v245_v3 = vld [vmem:[%s9363_s9 + $0x7c] sm:$0xf] }
  0x7c   : > { %v8345_v16 = vrot.slane %v877_v12, 9  ;;  %v240_v59 = vld [vmem:[%s9363_s9 + $0x60] sm:$0xf]  ;;  %278 = vst.msk [vmem:[#allocation2 + $0x54] sm:$0xf] %vm256_vm5, %v245_v3 }
  0x7d   : > { %v1004_v14 = vsel %vm9532_vm6, %v8344_v6, %v1003_v5  ;;  %v997_v18 = vsel %vm9532_vm6, %v8343_v10, %v996_v54  ;;  %v1005_v28 = vrot.slane %v1003_v5, 4  ;;  %v888_v54 = vld [vmem:[%s9363_s9 + $0x8c] sm:$0x1]  ;;  %273 = vst.msk [vmem:[#allocation2 + $0x40] sm:$0xf] %vm256_vm5, %v240_v59  ;;  %v1026_v6 = vrot.slane %v1024_v45, 4 }
  0x7e   : > { %v1011_v30 = vsel %vm9532_vm6, %v8345_v16, %v1010_v17  ;;  %v1034_v1 = vrot.slane %v888_v54, 5  ;;  %v1027_v5 = vrot.slane %v885_v61, 5  ;;  %v243_v16 = vld [vmem:[%s9363_s9 + $0x70] sm:$0xf]  ;;  %v252_v3 = vld [vmem:[%s9363_s9 + $0xa8] sm:$0xf] }
  0x7f   : > { %276 = vst.msk [vmem:[#allocation2 + $0x4c] sm:$0xf] %vm256_vm5, %v243_v16  ;;  %v8357_v16 = vld [vmem:[%s9363_s9 + $0x24] sm:$0xf] }
  0x80   : > { %v1035_v12 = vsel %vm9532_vm6, %v1033_v0, %v1034_v1  ;;  %v8353_v0 = vld [vmem:[%s9363_s9 + $0xc] sm:$0xf]  ;;  %285 = vst.msk [vmem:[#allocation2 + $0x70] sm:$0xf] %vm256_vm5, %v252_v3 }
  0x82   : > { %1072 = vrot.lane.b32.xlu0 %v969_v20, %s9269_s11  ;;  %v234_v20 = vld [vmem:[%s9363_s9 + $0x3c] sm:$0xf] }
  0x83   : > { %1074 = vrot.lane.b32.xlu1 %v972_v21, %s9269_s11  ;;  %1070 = vrot.lane.b32.xlu2 %v965_v27, %s9269_s11  ;;  %v876_v21 = vld [vmem:[%s9363_s9 + $0x5c] sm:$0x1]  ;;  %267 = vst.msk [vmem:[#allocation2 + $0x28] sm:$0xf] %vm256_vm5, %v234_v20 }
  0x84   : > { %v1006_v29 = vrot.slane %v876_v21, 5 }
  0x85   : > { %v733_v38 = vpop.permute.xlu2 %732 }
  0x86   : > { %825 = vst.msk [vmem:[#allocation2 + $0x10] sm:$0xf] %vm820_vm7, %v733_v38  ;;  %v1007_v37 = vsel %vm9532_vm6, %v1005_v28, %v1006_v29  ;;  %v241_v38 = vld [vmem:[%s9363_s9 + $0x64] sm:$0xf]  ;;  %v896_v28 = vld [vmem:[%s9363_s9 + $0xac] sm:$0xf] }
  0x87   : > { %274 = vst.msk [vmem:[#allocation2 + $0x44] sm:$0xf] %vm256_vm5, %v241_v38  ;;  %v1052_v33 = vrot.slane %v896_v28, 5  ;;  %v894_v38 = vld [vmem:[%s9363_s9 + $0xa4] sm:$0x1] }
  0x88   : > { %v8363_v28 = vld [vmem:[%s9363_s9 + $0x48] sm:$0xf] }
  0x89   : > { %v1054_v40 = vrot.slane %v1052_v33, 4 }
  0x8a   : > { %1078 = vrot.lane.b32.xlu0 %v979_v35, %s9269_s11  ;;  %v883_v35 = vld [vmem:[%s9363_s9 + $0x78] sm:$0xe] }
  0x8b   : > { %1080 = vrot.lane.b32.xlu1 %v983_v39, %s9269_s11  ;;  %1076 = vrot.lane.b32.xlu2 %v976_v43, %s9269_s11  ;;  %v237_v39 = vld [vmem:[%s9363_s9 + $0x4c] sm:$0xf]  ;;  %v8347_v44 = vrot.slane %v883_v35, 9  ;;  %v250_v35 = vld [vmem:[%s9363_s9 + $0x9c] sm:$0xf] }
  0x8c   : > { %270 = vst.msk [vmem:[#allocation2 + $0x34] sm:$0xf] %vm256_vm5, %v237_v39 }
  0x8d   : > { %v735_v55 = vpop.permute.xlu2 %734  ;;  %283 = vst.msk [vmem:[#allocation2 + $0x68] sm:$0xf] %vm256_vm5, %v250_v35 }
  0x8e   : > { %826 = vst.msk [vmem:[#allocation2 + $0x14] sm:$0xf] %vm820_vm7, %v735_v55  ;;  %v8348_v55 = vrot.slane %v886_v50, 9 }
  0x90   : > { %v1032_v8 = vsel %vm9532_vm6, %v8348_v55, %v1031_v56  ;;  %v898_v56 = vld [vmem:[%s9363_s9 + $0xb4] sm:$0xe] }
  0x92   : > { %1084 = vrot.lane.b32.xlu0 %v990_v53, %s9269_s11  ;;  %v1025_v53 = vsel %vm9532_vm6, %v8347_v44, %v1024_v45  ;;  %v1048_v45 = vrot.slane %v894_v38, 5 }
  0x93   : > { %1086 = vrot.lane.b32.xlu1 %v993_v57, %s9269_s11  ;;  %1082 = vrot.lane.b32.xlu2 %v986_v60, %s9269_s11  ;;  %v1018_v57 = vsel %vm9532_vm6, %v8346_v48, %v1017_v31  ;;  %v890_v60 = vld [vmem:[%s9363_s9 + $0x94] sm:$0xf]  ;;  %v897_v31 = vld [vmem:[%s9363_s9 + $0xb0] sm:$0x1] }
  0x94   : > { %v725_v4 = vpop.permute.xlu0 %724  ;;  %v1055_v41 = vrot.slane %v897_v31, 5  ;;  %v8367_v31 = vld [vmem:[%s9363_s9 + $0x60] sm:$0xf] }
  0x95   : > { %821 = vst.msk [vmem:[#allocation2] sm:$0xf] %vm820_vm7, %v725_v4  ;;  %v729_v9 = vpop.permute.xlu1 %728  ;;  %v741_v2 = vpop.permute.xlu2 %740 }
  0x96   : > { %823 = vst.msk [vmem:[#allocation2 + $0x8] sm:$0xf] %vm820_vm7, %v729_v9  ;;  %v1038_v9 = vrot.slane %v890_v60, 5  ;;  %v1056_v50 = vsel %vm9532_vm6, %v1054_v40, %v1055_v41  ;;  %v8352_v60 = vrot.slane %v898_v56, 9  ;;  %v8369_v40 = vld [vmem:[%s9363_s9 + $0x6c] sm:$0xf] }
  0x97   : > { %829 = vst.msk [vmem:[#allocation2 + $0x20] sm:$0xf] %vm820_vm7, %v741_v2  ;;  %v893_v2 = vld [vmem:[%s9363_s9 + $0xa0] sm:$0xf] }
  0x98   : > { %v1040_v17 = vrot.slane %v1038_v9, 4  ;;  %v1045_v21 = vrot.slane %v893_v2, 5  ;;  %v8358_v2 = vld [vmem:[%s9363_s9 + $0x28] sm:$0xf] }
  0x9a   : > { %1090 = vrot.lane.b32.xlu0 %v1000_v11, %s9269_s11  ;;  %v891_v11 = vld [vmem:[%s9363_s9 + $0x98] sm:$0x1]  ;;  %v1047_v44 = vrot.slane %v1045_v21, 4 }
  0x9b   : > { %1092 = vrot.lane.b32.xlu1 %v1004_v14, %s9269_s11  ;;  %1088 = vrot.lane.b32.xlu2 %v997_v18, %s9269_s11  ;;  %v1028_v14 = vsel %vm9532_vm6, %v1026_v6, %v1027_v5  ;;  %v1041_v18 = vrot.slane %v891_v11, 5  ;;  %v8355_v5 = vld [vmem:[%s9363_s9 + $0x18] sm:$0xf] }
  0x9c   : > { %v727_v23 = vpop.permute.xlu0 %726  ;;  %v1049_v51 = vsel %vm9532_vm6, %v1047_v44, %v1048_v45  ;;  %v255_v11 = vld [vmem:[%s9363_s9 + $0xb8] sm:$0xf]  ;;  %v8374_v45 = vld [vmem:[%s9363_s9 + $0x88] sm:$0xf] }
  0x9d   : > { %822 = vst.msk [vmem:[#allocation2 + $0x4] sm:$0xf] %vm820_vm7, %v727_v23  ;;  %v731_v27 = vpop.permute.xlu1 %730  ;;  %v747_v32 = vpop.permute.xlu2 %746  ;;  %v248_v23 = vld [vmem:[%s9363_s9 + $0x90] sm:$0xf]  ;;  %v1042_v26 = vsel %vm9532_vm6, %v1040_v17, %v1041_v18 }
  0x9e   : > { %824 = vst.msk [vmem:[#allocation2 + $0xc] sm:$0xf] %vm820_vm7, %v731_v27  ;;  %v895_v27 = vld [vmem:[%s9363_s9 + $0xa8] sm:$0xe] }
  0x9f   : > { %832 = vst.msk [vmem:[#allocation2 + $0x2c] sm:$0xf] %vm820_vm7, %v747_v32  ;;  %v8351_v32 = vrot.slane %v895_v27, 9  ;;  %v8365_v27 = vld [vmem:[%s9363_s9 + $0x54] sm:$0xf] }
  0xa0   : > { %281 = vst.msk [vmem:[#allocation2 + $0x60] sm:$0xf] %vm256_vm5, %v248_v23 }
  0xa1   : > { %v1053_v46 = vsel %vm9532_vm6, %v8351_v32, %v1052_v33  ;;  %288 = vst.msk [vmem:[#allocation2 + $0x7c] sm:$0xf] %vm256_vm5, %v255_v11  ;;  %v8368_v33 = vld [vmem:[%s9363_s9 + $0x64] sm:$0xf] }
  0xa2   : > { %1096 = vrot.lane.b32.xlu0 %v1011_v30, %s9269_s11  ;;  %v1046_v30 = vsel %vm9532_vm6, %v8350_v7, %v1045_v21  ;;  %v8362_v7 = vld [vmem:[%s9363_s9 + $0x40] sm:$0xf]  ;;  %v8360_v21 = vld [vmem:[%s9363_s9 + $0x34] sm:$0xf] }
  0xa3   : > { %1098 = vrot.lane.b32.xlu1 %v1014_v34, %s9269_s11  ;;  %1094 = vrot.lane.b32.xlu2 %v1007_v37, %s9269_s11  ;;  %v1039_v34 = vsel %vm9532_vm6, %v8349_v25, %v1038_v9  ;;  %v899_v37 = vld [vmem:[%s9363_s9 + $0xb8] sm:$0xf]  ;;  %v8356_v9 = vld [vmem:[%s9363_s9 + $0x1c] sm:$0xf] }
  0xa4   : > { %v737_v43 = vpop.permute.xlu0 %736  ;;  %v8364_v25 = vld [vmem:[%s9363_s9 + $0x4c] sm:$0xf] }
  0xa5   : > { %827 = vst.msk [vmem:[#allocation2 + $0x18] sm:$0xf] %vm820_vm7, %v737_v43  ;;  %v739_v47 = vpop.permute.xlu1 %738  ;;  %v753_v52 = vpop.permute.xlu2 %752 }
  0xa6   : > { %828 = vst.msk [vmem:[#allocation2 + $0x1c] sm:$0xf] %vm820_vm7, %v739_v47  ;;  %v1059_v47 = vrot.slane %v899_v37, 5  ;;  %v8370_v37 = vld [vmem:[%s9363_s9 + $0x70] sm:$0xf] }
  0xa7   : > { %835 = vst.msk [vmem:[#allocation2 + $0x38] sm:$0xf] %vm820_vm7, %v753_v52  ;;  %v253_v52 = vld [vmem:[%s9363_s9 + $0xac] sm:$0xf] }
  0xa8   : > { %v1061_v54 = vrot.slane %v1059_v47, 4  ;;  %286 = vst.msk [vmem:[#allocation2 + $0x74] sm:$0xf] %vm256_vm5, %v253_v52  ;;  %v1060_v1 = vsel %vm9532_vm6, %v8352_v60, %v1059_v47  ;;  %v8375_v52 = vld [vmem:[%s9363_s9 + $0x90] sm:$0xf] }
  0xaa   : > { %1102 = vrot.lane.b32.xlu0 %v1021_v49, %s9269_s11  ;;  %v900_v49 = vld [vmem:[%s9363_s9 + $0xbc] sm:$0x1] }
  0xab   : > { %1104 = vrot.lane.b32.xlu1 %v1025_v53, %s9269_s11  ;;  %1100 = vrot.lane.b32.xlu2 %v1018_v57, %s9269_s11  ;;  %v249_v53 = vld [vmem:[%s9363_s9 + $0x94] sm:$0xf]  ;;  %v1062_v55 = vrot.slane %v900_v49, 5 }
  0xac   : > { %v743_v63 = vpop.permute.xlu0 %742  ;;  %282 = vst.msk [vmem:[#allocation2 + $0x64] sm:$0xf] %vm256_vm5, %v249_v53  ;;  %v8376_v49 = vld [vmem:[%s9363_s9 + $0x94] sm:$0xf]  ;;  %v8385_v53 = vld [vmem:[%s9363_s9 + $0xc] sm:$0xf]  ;;  %vm10913_vm5 = vmor %vm3878_vm3, %vm3879_vm4 }
  0xad   : > { %830 = vst.msk [vmem:[#allocation2 + $0x24] sm:$0xf] %vm820_vm7, %v743_v63  ;;  %v745_v4 = vpop.permute.xlu1 %744  ;;  %v759_v10 = vpop.permute.xlu2 %758  ;;  %v1063_v61 = vsel %vm9532_vm6, %v1061_v54, %v1062_v55  ;;  %v1436_v56 = vshrl.u32 %v8385_v53, 16 }
  0xae   : > { %831 = vst.msk [vmem:[#allocation2 + $0x28] sm:$0xf] %vm820_vm7, %v745_v4 }
  0xaf   : > { %838 = vst.msk [vmem:[#allocation2 + $0x44] sm:$0xf] %vm820_vm7, %v759_v10  ;;  %v8354_v10 = vld [vmem:[%s9363_s9 + $0x10] sm:$0xf] }
  0xb2   : > { %1108 = vrot.lane.b32.xlu0 %v1032_v8, %s9269_s11 }
  0xb3   : > { %1110 = vrot.lane.b32.xlu1 %v1035_v12, %s9269_s11  ;;  %1106 = vrot.lane.b32.xlu2 %v1028_v14, %s9269_s11 }
  0xb4   : > { %v749_v20 = vpop.permute.xlu0 %748 }
  0xb5   : > { %833 = vst.msk [vmem:[#allocation2 + $0x30] sm:$0xf] %vm820_vm7, %v749_v20  ;;  %v751_v24 = vpop.permute.xlu1 %750  ;;  %v765_v29 = vpop.permute.xlu2 %764 }
  0xb6   : > { %834 = vst.msk [vmem:[#allocation2 + $0x34] sm:$0xf] %vm820_vm7, %v751_v24 }
  0xb7   : > { %841 = vst.msk [vmem:[#allocation2 + $0x50] sm:$0xf] %vm820_vm7, %v765_v29 }
  0xba   : > { %1114 = vrot.lane.b32.xlu0 %v1042_v26, %s9269_s11 }
  0xbb   : > { %1116 = vrot.lane.b32.xlu1 %v1046_v30, %s9269_s11  ;;  %1112 = vrot.lane.b32.xlu2 %v1039_v34, %s9269_s11  ;;  %v8366_v34 = vld [vmem:[%s9363_s9 + $0x58] sm:$0xf] }
  0xbc   : > { %v755_v39 = vpop.permute.xlu0 %754 }
  0xbd   : > { %836 = vst.msk [vmem:[#allocation2 + $0x3c] sm:$0xf] %vm820_vm7, %v755_v39  ;;  %v757_v43 = vpop.permute.xlu1 %756  ;;  %v771_v48 = vpop.permute.xlu2 %770  ;;  %v8371_v39 = vld [vmem:[%s9363_s9 + $0x78] sm:$0xf] }
  0xbe   : > { %837 = vst.msk [vmem:[#allocation2 + $0x40] sm:$0xf] %vm820_vm7, %v757_v43  ;;  %v8373_v43 = vld [vmem:[%s9363_s9 + $0x84] sm:$0xf] }
  0xbf   : > { %844 = vst.msk [vmem:[#allocation2 + $0x5c] sm:$0xf] %vm820_vm7, %v771_v48 }
  0xc2   : > { %1120 = vrot.lane.b32.xlu0 %v1053_v46, %s9269_s11  ;;  %v8372_v46 = vld [vmem:[%s9363_s9 + $0x7c] sm:$0xf] }
  0xc3   : > { %1122 = vrot.lane.b32.xlu1 %v1056_v50, %s9269_s11  ;;  %1118 = vrot.lane.b32.xlu2 %v1049_v51, %s9269_s11  ;;  %v8377_v51 = vld [vmem:[%s9363_s9 + $0x9c] sm:$0xf] }
  0xc4   : > { %v761_v57 = vpop.permute.xlu0 %760 }
  0xc5   : > { %839 = vst.msk [vmem:[#allocation2 + $0x48] sm:$0xf] %vm820_vm7, %v761_v57  ;;  %v763_v59 = vpop.permute.xlu1 %762  ;;  %v777_v63 = vpop.permute.xlu2 %776  ;;  %v1439_v57 = vshll.u32 %v8385_v53, 16  ;;  %v8384_v53 = vld [vmem:[%s9363_s9 + $0xc4] sm:$0xf] }
  0xc6   : > { %840 = vst.msk [vmem:[#allocation2 + $0x4c] sm:$0xf] %vm820_vm7, %v763_v59  ;;  %v8386_v59 = vld [vmem:[%s9363_s9 + $0x10] sm:$0xf] }
  0xc7   : > { %847 = vst.msk [vmem:[#allocation2 + $0x68] sm:$0xf] %vm820_vm7, %v777_v63  ;;  %v1449_v63 = vshrl.u32 %v8386_v59, 16  ;;  %v1445_v3 = vshll.u32 %v8386_v59, 16 }
  0xca   : > { %1126 = vrot.lane.b32.xlu0 %v1063_v61, %s9269_s11  ;;  %v8380_v61 = vld [vmem:[%s9363_s9 + $0xac] sm:$0xf] }
  0xcb   : > { %1258 = vrot.lane.b32.xlu1 %v8353_v0, %s9270_s12  ;;  %1124 = vrot.lane.b32.xlu2 %v1060_v1, %s9269_s11  ;;  %v1438_v0 = vrot.slane %v1436_v56, 4  ;;  %v1441_v1 = vrot.slane %v1439_v57, 5 }
  0xcc   : > { %v767_v4 = vpop.permute.xlu0 %766 }
  0xcd   : > { %842 = vst.msk [vmem:[#allocation2 + $0x54] sm:$0xf] %vm820_vm7, %v767_v4  ;;  %v769_v6 = vpop.permute.xlu1 %768  ;;  %v783_v8 = vpop.permute.xlu2 %782  ;;  %v8378_v4 = vld [vmem:[%s9363_s9 + $0xa0] sm:$0xf] }
  0xce   : > { %843 = vst.msk [vmem:[#allocation2 + $0x58] sm:$0xf] %vm820_vm7, %v769_v6  ;;  %v8389_v6 = vld [vmem:[%s9363_s9 + $0x1c] sm:$0xf] }
  0xcf   : > { %850 = vst.msk [vmem:[#allocation2 + $0x74] sm:$0xf] %vm820_vm7, %v783_v8  ;;  %v8387_v8 = vld [vmem:[%s9363_s9 + $0x14] sm:$0x1] }
  0xd2   : > { %1262 = vrot.lane.b32.xlu0 %v8355_v5, %s9270_s12 }
  0xd3   : > { %1264 = vrot.lane.b32.xlu1 %v8356_v9, %s9270_s12  ;;  %1260 = vrot.lane.b32.xlu2 %v8354_v10, %s9270_s12  ;;  %v1451_v9 = vrot.slane %v1449_v63, 4  ;;  %v1442_v10 = vor.u32 %v1441_v1, %v1438_v0 }
  0xd4   : > { %v773_v12 = vpop.permute.xlu0 %772 }
  0xd5   : > { %845 = vst.msk [vmem:[#allocation2 + $0x60] sm:$0xf] %vm820_vm7, %v773_v12  ;;  %v775_v13 = vpop.permute.xlu1 %774  ;;  %v1065_v14 = vpop.permute.xlu2 %1064  ;;  %v8391_v12 = vld [vmem:[%s9363_s9 + $0x24] sm:$0xf] }
  0xd6   : > { %846 = vst.msk [vmem:[#allocation2 + $0x64] sm:$0xf] %vm820_vm7, %v775_v13  ;;  %v1447_v13 = vrot.slane %v1445_v3, 5  ;;  %v8396_v3 = vld [vmem:[%s9363_s9 + $0x38] sm:$0x1] }
  0xd7   : > { %1161 = vst.msk [vmem:[#allocation2] sm:$0xf] %vm1160_vm8, %v1065_v14  ;;  %v1473_v14 = vshrl.u32 %v8389_v6, 16 }
  0xda   : > { %1268 = vrot.lane.b32.xlu0 %v8358_v2, %s9270_s12  ;;  %v1469_v2 = vshll.u32 %v8389_v6, 16 }
  0xdb   : > { %1270 = vrot.lane.b32.xlu1 %v8359_v15, %s9270_s12  ;;  %1266 = vrot.lane.b32.xlu2 %v8357_v16, %s9270_s12  ;;  %v8382_v15 = vld [vmem:[%s9363_s9 + $0xb8] sm:$0xf]  ;;  %v8383_v16 = vld [vmem:[%s9363_s9 + $0xc0] sm:$0xf] }
  0xdc   : > { %v779_v17 = vpop.permute.xlu0 %778 }
  0xdd   : > { %848 = vst.msk [vmem:[#allocation2 + $0x6c] sm:$0xf] %vm820_vm7, %v779_v17  ;;  %v781_v18 = vpop.permute.xlu1 %780  ;;  %v1071_v20 = vpop.permute.xlu2 %1070 }
  0xde   : > { %849 = vst.msk [vmem:[#allocation2 + $0x70] sm:$0xf] %vm820_vm7, %v781_v18  ;;  %v1455_v18 = vshll.u32 %v8387_v8, 16  ;;  %v8400_v8 = vld [vmem:[%s9363_s9 + $0x48] sm:$0xf] }
  0xdf   : > { %1164 = vst.msk [vmem:[#allocation2 + $0xc] sm:$0xf] %vm1160_vm8, %v1071_v20  ;;  %v1484_v20 = vshrl.u32 %v8391_v12, 16 }
  0xe2   : > { %1274 = vrot.lane.b32.xlu0 %v8361_v19, %s9270_s12  ;;  %v1452_v19 = vor.u32 %v1451_v9, %v1447_v13 }
  0xe3   : > { %1276 = vrot.lane.b32.xlu1 %v8362_v7, %s9270_s12  ;;  %1272 = vrot.lane.b32.xlu2 %v8360_v21, %s9270_s12  ;;  %v1487_v7 = vshll.u32 %v8391_v12, 16  ;;  %v8388_v21 = vld [vmem:[%s9363_s9 + $0x18] sm:$0xf] }
  0xe4   : > { %v785_v23 = vpop.permute.xlu0 %784 }
  0xe5   : > { %851 = vst.msk [vmem:[#allocation2 + $0x78] sm:$0xf] %vm820_vm7, %v785_v23  ;;  %v787_v24 = vpop.permute.xlu1 %786  ;;  %v1077_v26 = vpop.permute.xlu2 %1076  ;;  %v1443_v23 = vrot.slane %v1442_v10, 4 }
  0xe6   : > { %852 = vst.msk [vmem:[#allocation2 + $0x7c] sm:$0xf] %vm820_vm7, %v787_v24  ;;  %v9857_v24 = vrot.slane %v1469_v2, 5  ;;  %vm4457_vm7 = vcmask 519424  }
  0xe7   : > { %1167 = vst.msk [vmem:[#allocation2 + $0x18] sm:$0xf] %vm1160_vm8, %v1077_v26  ;;  %v8381_v26 = vld [vmem:[%s9363_s9 + $0xb4] sm:$0xf] }
  0xea   : > { %1280 = vrot.lane.b32.xlu0 %v8364_v25, %s9270_s12  ;;  %v1475_v25 = vrot.slane %v1473_v14, 4  ;;  %v1527_v14 = vshll.u32 %v8396_v3, 16 }
  0xeb   : > { %1282 = vrot.lane.b32.xlu1 %v8365_v27, %s9270_s12  ;;  %1278 = vrot.lane.b32.xlu2 %v8363_v28, %s9270_s12  ;;  %v1460_v27 = vshrl.u32 %v8388_v21, 16  ;;  %v1463_v28 = vshll.u32 %v8388_v21, 16 }
  0xec   : > { %v1067_v29 = vpop.permute.xlu0 %1066 }
  0xed   : > { %1162 = vst.msk [vmem:[#allocation2 + $0x4] sm:$0xf] %vm1160_vm8, %v1067_v29  ;;  %v1069_v30 = vpop.permute.xlu1 %1068  ;;  %v1083_v32 = vpop.permute.xlu2 %1082  ;;  %v8390_v29 = vld [vmem:[%s9363_s9 + $0x20] sm:$0x1] }
  0xee   : > { %1163 = vst.msk [vmem:[#allocation2 + $0x8] sm:$0xf] %vm1160_vm8, %v1069_v30 }
  0xef   : > { %1170 = vst.msk [vmem:[#allocation2 + $0x24] sm:$0xf] %vm1160_vm8, %v1083_v32  ;;  %v1457_v32 = vrot.slane %v1455_v18, 5  ;;  %v1559_v18 = vshll.u32 %v8400_v8, 16 }
  0xf2   : > { %1286 = vrot.lane.b32.xlu0 %v8367_v31, %s9270_s12  ;;  %v1453_v31 = vrot.slane %v1452_v19, 4  ;;  %v8397_v19 = vld [vmem:[%s9363_s9 + $0x3c] sm:$0xf] }
  0xf3   : > { %1288 = vrot.lane.b32.xlu1 %v8368_v33, %s9270_s12  ;;  %1284 = vrot.lane.b32.xlu2 %v8366_v34, %s9270_s12  ;;  %v8394_v33 = vld [vmem:[%s9363_s9 + $0x30] sm:$0xf]  ;;  %v1486_v34 = vrot.slane %v1484_v20, 4  ;;  %v1532_v21 = vshrl.u32 %v8397_v19, 16 }
  0xf4   : > { %v1073_v35 = vpop.permute.xlu0 %1072 }
  0xf5   : > { %1165 = vst.msk [vmem:[#allocation2 + $0x10] sm:$0xf] %vm1160_vm8, %v1073_v35  ;;  %v1075_v36 = vpop.permute.xlu1 %1074  ;;  %v1089_v38 = vpop.permute.xlu2 %1088  ;;  %v1489_v35 = vrot.slane %v1487_v7, 5 }
  0xf6   : > { %1166 = vst.msk [vmem:[#allocation2 + $0x14] sm:$0xf] %vm1160_vm8, %v1075_v36 }
  0xf7   : > { %1173 = vst.msk [vmem:[#allocation2 + $0x30] sm:$0xf] %vm1160_vm8, %v1089_v38  ;;  %v8392_v38 = vld [vmem:[%s9363_s9 + $0x28] sm:$0xf] }
  0xfa   : > { %1292 = vrot.lane.b32.xlu0 %v8370_v37, %s9270_s12  ;;  %v8395_v37 = vld [vmem:[%s9363_s9 + $0x34] sm:$0xf] }
  0xfb   : > { %1294 = vrot.lane.b32.xlu1 %v8371_v39, %s9270_s12  ;;  %1290 = vrot.lane.b32.xlu2 %v8369_v40, %s9270_s12  ;;  %v1448_v39 = vsel %vm9373_vm2, %v1443_v23, %v1447_v13  ;;  %v1476_v40 = vor.u32 %v1475_v25, %v9857_v24  ;;  %v1535_v23 = vshll.u32 %v8397_v19, 16 }
  0xfc   : > { %v1079_v41 = vpop.permute.xlu0 %1078 }
  0xfd   : > { %1168 = vst.msk [vmem:[#allocation2 + $0x1c] sm:$0xf] %vm1160_vm8, %v1079_v41  ;;  %v1081_v42 = vpop.permute.xlu1 %1080  ;;  %v1095_v44 = vpop.permute.xlu2 %1094  ;;  %v1462_v41 = vrot.slane %v1460_v27, 4 }
  0xfe   : > { %1169 = vst.msk [vmem:[#allocation2 + $0x20] sm:$0xf] %vm1160_vm8, %v1081_v42  ;;  %v1465_v42 = vrot.slane %v1463_v28, 5 }
  0xff   : > { %1176 = vst.msk [vmem:[#allocation2 + $0x3c] sm:$0xf] %vm1160_vm8, %v1095_v44  ;;  %v1508_v44 = vshrl.u32 %v8394_v33, 16 }
 0x100   : > { %v1466_v56 = vor.u32 %v1465_v42, %v1462_v41 }
 0x102   : > { %1298 = vrot.lane.b32.xlu0 %v8373_v43, %s9270_s12  ;;  %v1479_v43 = vshll.u32 %v8390_v29, 16  ;;  %v1467_v9 = vrot.slane %v1466_v56, 4  ;;  %v8399_v29 = vld [vmem:[%s9363_s9 + $0x44] sm:$0x1] }
 0x103   : > { %1300 = vrot.lane.b32.xlu1 %v8374_v45, %s9270_s12  ;;  %1296 = vrot.lane.b32.xlu2 %v8372_v46, %s9270_s12  ;;  %v1511_v45 = vshll.u32 %v8394_v33, 16  ;;  %v1521_v46 = vshrl.u32 %v8395_v37, 16  ;;  %v8403_v33 = vld [vmem:[%s9363_s9 + $0x54] sm:$0xf] }
 0x104   : > { %v1085_v47 = vpop.permute.xlu0 %1084  ;;  %v1481_v57 = vrot.slane %v1479_v43, 5  ;;  %v1472_v25 = vsel %vm9373_vm2, %v1467_v9, %v9857_v24 }
 0x105   : > { %1171 = vst.msk [vmem:[#allocation2 + $0x28] sm:$0xf] %vm1160_vm8, %v1085_v47  ;;  %v1087_v48 = vpop.permute.xlu1 %1086  ;;  %v1101_v50 = vpop.permute.xlu2 %1100  ;;  %v1513_v59 = vrot.slane %v1511_v45, 5  ;;  %v1580_v45 = vshrl.u32 %v8403_v33, 16 }
 0x106   : > { %1172 = vst.msk [vmem:[#allocation2 + $0x2c] sm:$0xf] %vm1160_vm8, %v1087_v48  ;;  %v1458_v48 = vsel %vm9373_vm2, %v1453_v31, %v1457_v32  ;;  %v1529_v32 = vrot.slane %v1527_v14, 5 }
 0x107   : > { %1179 = vst.msk [vmem:[#allocation2 + $0x48] sm:$0xf] %vm1160_vm8, %v1101_v50  ;;  %v1490_v50 = vor.u32 %v1489_v35, %v1486_v34  ;;  %v1561_v35 = vrot.slane %v1559_v18, 5 }
 0x109   : > { %v1491_v0 = vrot.slane %v1490_v50, 4 }
 0x10a   : > { %1304 = vrot.lane.b32.xlu0 %v8376_v49, %s9270_s12  ;;  %v1517_v49 = vshll.u32 %v8395_v37, 16  ;;  %v8401_v37 = vld [vmem:[%s9363_s9 + $0x4c] sm:$0xf] }
 0x10b   : > { %1306 = vrot.lane.b32.xlu1 %v8377_v51, %s9270_s12  ;;  %1302 = vrot.lane.b32.xlu2 %v8375_v52, %s9270_s12  ;;  %v1493_v51 = vshll.u32 %v8392_v38, 16  ;;  %v1477_v52 = vrot.slane %v1476_v40, 4  ;;  %v1551_v40 = vshll.u32 %v8399_v29, 16 }
 0x10c   : > { %v1091_v54 = vpop.permute.xlu0 %1090  ;;  %v9878_v63 = vrot.slane %v1517_v49, 5 }
 0x10d   : > { %1174 = vst.msk [vmem:[#allocation2 + $0x34] sm:$0xf] %vm1160_vm8, %v1091_v54  ;;  %v1093_v55 = vpop.permute.xlu1 %1092  ;;  %v1107_v60 = vpop.permute.xlu2 %1106  ;;  %v1497_v54 = vshrl.u32 %v8392_v38, 16  ;;  %v1495_v1 = vrot.slane %v1493_v51, 5  ;;  %v1534_v38 = vrot.slane %v1532_v21, 4  ;;  %v1565_v51 = vshll.u32 %v8401_v37, 16 }
 0x10e   : > { %1175 = vst.msk [vmem:[#allocation2 + $0x38] sm:$0xf] %vm1160_vm8, %v1093_v55  ;;  %v8398_v55 = vld [vmem:[%s9363_s9 + $0x40] sm:$0xf] }
 0x10f   : > { %1182 = vst.msk [vmem:[#allocation2 + $0x54] sm:$0xf] %vm1160_vm8, %v1107_v60  ;;  %v1523_v60 = vrot.slane %v1521_v46, 4  ;;  %v1541_v6 = vshll.u32 %v8398_v55, 16  ;;  %v1499_v10 = vrot.slane %v1497_v54, 4  ;;  %v1583_v46 = vshll.u32 %v8403_v33, 16 }
 0x110   : > { %v1553_v54 = vrot.slane %v1551_v40, 5  ;;  %v8408_v33 = vld [vmem:[%s9363_s9 + $0x68] sm:$0x1] }
 0x111   : > { %v1524_v2 = vor.u32 %v1523_v60, %v9878_v63  ;;  %v9893_v20 = vrot.slane %v1541_v6, 5  ;;  %v8407_v60 = vld [vmem:[%s9363_s9 + $0x64] sm:$0xf] }
 0x112   : > { %1310 = vrot.lane.b32.xlu0 %v8379_v58, %s9270_s12  ;;  %v1510_v58 = vrot.slane %v1508_v44, 4  ;;  %v8404_v44 = vld [vmem:[%s9363_s9 + $0x58] sm:$0xf] }
 0x113   : > { %1312 = vrot.lane.b32.xlu1 %v8380_v61, %s9270_s12  ;;  %1308 = vrot.lane.b32.xlu2 %v8378_v4, %s9270_s12  ;;  %v1593_v49 = vshrl.u32 %v8404_v44, 16 }
 0x114   : > { %v1097_v5 = vpop.permute.xlu0 %1096  ;;  %v1514_v12 = vor.u32 %v1513_v59, %v1510_v58  ;;  %v1582_v58 = vrot.slane %v1580_v45, 4  ;;  %v1585_v59 = vrot.slane %v1583_v46, 5  ;;  %v1623_v46 = vshll.u32 %v8408_v33, 16 }
 0x115   : > { %1177 = vst.msk [vmem:[#allocation2 + $0x40] sm:$0xf] %vm1160_vm8, %v1097_v5  ;;  %v1099_v11 = vpop.permute.xlu1 %1098  ;;  %v1113_v17 = vpop.permute.xlu2 %1112  ;;  %v1545_v5 = vshrl.u32 %v8398_v55, 16  ;;  %v1589_v55 = vshll.u32 %v8404_v44, 16  ;;  %v1595_v3 = vrot.slane %v1593_v49, 4 }
 0x116   : > { %1178 = vst.msk [vmem:[#allocation2 + $0x44] sm:$0xf] %vm1160_vm8, %v1099_v11  ;;  %v1482_v11 = vsel %vm9373_vm2, %v1477_v52, %v1481_v57  ;;  %v1515_v28 = vrot.slane %v1514_v12, 4  ;;  %v1569_v57 = vshrl.u32 %v8401_v37, 16  ;;  %v1613_v12 = vshll.u32 %v8407_v60, 16 }
 0x117   : > { %1185 = vst.msk [vmem:[#allocation2 + $0x60] sm:$0xf] %vm1160_vm8, %v1113_v17  ;;  %v1556_v17 = vshrl.u32 %v8400_v8, 16  ;;  %v1547_v7 = vrot.slane %v1545_v5, 4  ;;  %v8409_v5 = vld [vmem:[%s9363_s9 + $0x6c] sm:$0xf] }
 0x118   : > { %v1520_v43 = vsel %vm9373_vm2, %v1515_v28, %v9878_v63  ;;  %v1591_v9 = vrot.slane %v1589_v55, 5  ;;  %v1628_v18 = vshrl.u32 %v8409_v5, 16  ;;  %v1631_v19 = vshll.u32 %v8409_v5, 16 }
 0x119   : > { %v1558_v34 = vrot.slane %v1556_v17, 4 }
 0x11a   : > { %1316 = vrot.lane.b32.xlu0 %v8382_v15, %s9270_s12  ;;  %v8393_v15 = vld [vmem:[%s9363_s9 + $0x2c] sm:$0x1]  ;;  %v1596_v17 = vor.u32 %v1595_v3, %v1591_v9  ;;  %v8414_v3 = vld [vmem:[%s9363_s9 + $0x80] sm:$0x1] }
 0x11b   : > { %1318 = vrot.lane.b32.xlu1 %v8383_v16, %s9270_s12  ;;  %1314 = vrot.lane.b32.xlu2 %v8381_v26, %s9270_s12  ;;  %v1496_v16 = vsel %vm9373_vm2, %v1491_v0, %v1495_v1  ;;  %v1500_v26 = vor.u32 %v1499_v10, %v1495_v1  ;;  %v1503_v27 = vshll.u32 %v8393_v15, 16  ;;  %v1562_v50 = vor.u32 %v1561_v35, %v1558_v34  ;;  %v8405_v1 = vld [vmem:[%s9363_s9 + $0x5c] sm:$0x1]  ;;  %v8402_v15 = vld [vmem:[%s9363_s9 + $0x50] sm:$0x1] }
 0x11c   : > { %v1103_v30 = vpop.permute.xlu0 %1102  ;;  %v1567_v0 = vrot.slane %v1565_v51, 5  ;;  %v1571_v10 = vrot.slane %v1569_v57, 4  ;;  %v1599_v14 = vshll.u32 %v8405_v1, 16  ;;  %v1597_v34 = vrot.slane %v1596_v17, 4  ;;  %v8411_v17 = vld [vmem:[%s9363_s9 + $0x74] sm:$0x1] }
 0x11d   : > { %1180 = vst.msk [vmem:[#allocation2 + $0x4c] sm:$0xf] %vm1160_vm8, %v1103_v30  ;;  %v1105_v36 = vpop.permute.xlu1 %1104  ;;  %v1119_v47 = vpop.permute.xlu2 %1118  ;;  %v1525_v30 = vrot.slane %v1524_v2, 4  ;;  %v1501_v41 = vrot.slane %v1500_v26, 4  ;;  %v1505_v42 = vrot.slane %v1503_v27, 5  ;;  %v1563_v63 = vrot.slane %v1562_v50, 4 }
 0x11e   : > { %1181 = vst.msk [vmem:[#allocation2 + $0x50] sm:$0xf] %vm1160_vm8, %v1105_v36  ;;  %v1548_v36 = vor.u32 %v1547_v7, %v9893_v20  ;;  %v8406_v7 = vld [vmem:[%s9363_s9 + $0x60] sm:$0xf]  ;;  %v1575_v26 = vshll.u32 %v8402_v15, 16  ;;  %v1601_v35 = vrot.slane %v1599_v14, 5 }
 0x11f   : > { %1188 = vst.msk [vmem:[#allocation2 + $0x6c] sm:$0xf] %vm1160_vm8, %v1119_v47  ;;  %v1506_v56 = vsel %vm9373_vm2, %v1501_v41, %v1505_v42  ;;  %v1604_v27 = vshrl.u32 %v8406_v7, 16  ;;  %v1607_v28 = vshll.u32 %v8406_v7, 16  ;;  %v1671_v15 = vshll.u32 %v8414_v3, 16 }
 0x120   : > { %v1549_v52 = vrot.slane %v1548_v36, 4  ;;  %v1630_v36 = vrot.slane %v1628_v18, 4  ;;  %v1577_v41 = vrot.slane %v1575_v26, 5  ;;  %v1602_v49 = vsel %vm9373_vm2, %v1597_v34, %v1601_v35 }
 0x121   : > { %v1606_v42 = vrot.slane %v1604_v27, 4 }
 0x122   : > { %1819 = vrot.lane.b32.xlu0 %v1448_v39, %s9271_s13  ;;  %v1537_v39 = vrot.slane %v1535_v23, 5  ;;  %v1554_v8 = vsel %vm9373_vm2, %v1549_v52, %v1553_v54  ;;  %v8412_v23 = vld [vmem:[%s9363_s9 + $0x78] sm:$0xf] }
 0x123   : > { %1821 = vrot.lane.b32.xlu1 %v1458_v48, %s9271_s13  ;;  %1320 = vrot.lane.b32.xlu2 %v8384_v53, %s9270_s12  ;;  %v1530_v48 = vsel %vm9373_vm2, %v1525_v30, %v1529_v32  ;;  %v9937_v30 = vrot.slane %v1613_v12, 5  ;;  %v1652_v37 = vshrl.u32 %v8412_v23, 16 }
 0x124   : > { %v1109_v61 = vpop.permute.xlu0 %1108  ;;  %v1538_v53 = vor.u32 %v1537_v39, %v1534_v38  ;;  %v1655_v38 = vshll.u32 %v8412_v23, 16  ;;  %v8410_v39 = vld [vmem:[%s9363_s9 + $0x70] sm:$0xf]  ;;  %v8415_v23 = vld [vmem:[%s9363_s9 + $0x84] sm:$0xf] }
 0x125   : > { %1183 = vst.msk [vmem:[#allocation2 + $0x58] sm:$0xf] %vm1160_vm8, %v1109_v61  ;;  %v1111_v4 = vpop.permute.xlu1 %1110  ;;  %v1125_v13 = vpop.permute.xlu2 %1124  ;;  %v1637_v52 = vshll.u32 %v8410_v39, 16  ;;  %v1641_v57 = vshrl.u32 %v8410_v39, 16  ;;  %v1679_v26 = vshll.u32 %v8415_v23, 16 }
 0x126   : > { %1184 = vst.msk [vmem:[#allocation2 + $0x5c] sm:$0xf] %vm1160_vm8, %v1111_v4  ;;  %v1539_v6 = vrot.slane %v1538_v53, 4  ;;  %v1654_v53 = vrot.slane %v1652_v37, 4  ;;  %v1657_v54 = vrot.slane %v1655_v38, 5  ;;  %v1673_v37 = vrot.slane %v1671_v15, 5 }
 0x127   : > { %1191 = vst.msk [vmem:[#allocation2 + $0x78] sm:$0xf] %vm1160_vm8, %v1125_v13  ;;  %v1617_v13 = vshrl.u32 %v8407_v60, 16  ;;  %v1625_v60 = vrot.slane %v1623_v46, 5  ;;  %v1639_v1 = vrot.slane %v1637_v52, 5  ;;  %v1643_v12 = vrot.slane %v1641_v57, 4 }
 0x128   : > { %v1544_v21 = vsel %vm9373_vm2, %v1539_v6, %v9893_v20  ;;  %v1633_v20 = vrot.slane %v1631_v19, 5  ;;  %v1658_v6 = vor.u32 %v1657_v54, %v1654_v53 }
 0x12a   : > { %1825 = vrot.lane.b32.xlu0 %v1482_v11, %s9271_s13  ;;  %v1586_v11 = vor.u32 %v1585_v59, %v1582_v58  ;;  %v1634_v51 = vor.u32 %v1633_v20, %v1630_v36  ;;  %v1659_v27 = vrot.slane %v1658_v6, 4  ;;  %v8417_v20 = vld [vmem:[%s9363_s9 + $0x8c] sm:$0x1] }
 0x12b   : > { %1827 = vrot.lane.b32.xlu1 %v1496_v16, %s9271_s13  ;;  %1823 = vrot.lane.b32.xlu2 %v1472_v25, %s9271_s13  ;;  %v1568_v16 = vsel %vm9373_vm2, %v1563_v63, %v1567_v0  ;;  %v1572_v25 = vor.u32 %v1571_v10, %v1567_v0 }
 0x12c   : > { %v1115_v31 = vpop.permute.xlu0 %1114  ;;  %v1587_v29 = vrot.slane %v1586_v11, 4  ;;  %v1635_v0 = vrot.slane %v1634_v51, 4 }
 0x12d   : > { %1186 = vst.msk [vmem:[#allocation2 + $0x64] sm:$0xf] %vm1160_vm8, %v1115_v31  ;;  %v1117_v24 = vpop.permute.xlu1 %1116  ;;  %v1261_v47 = vpop.permute.xlu2 %1260  ;;  %v1619_v31 = vrot.slane %v1617_v13, 4  ;;  %v1573_v40 = vrot.slane %v1572_v25, 4  ;;  %v1676_v25 = vshrl.u32 %v8415_v23, 16 }
 0x12e   : > { %1187 = vst.msk [vmem:[#allocation2 + $0x68] sm:$0xf] %vm1160_vm8, %v1117_v24  ;;  %v1592_v44 = vsel %vm9373_vm2, %v1587_v29, %v1591_v9  ;;  %v1640_v18 = vsel %vm9373_vm2, %v1635_v0, %v1639_v1  ;;  %v1644_v29 = vor.u32 %v1643_v12, %v1639_v1  ;;  %v8424_v23 = vld [vmem:[%s9363_s9 + $0xa8] sm:$0xf] }
 0x12f   : > { %1356 = vst.msk [vmem:[#allocation2 + $0x4] sm:$0xf] %vm1354_vm9, %v1261_v47  ;;  %v1620_v45 = vor.u32 %v1619_v31, %v9937_v30  ;;  %v8413_v47 = vld [vmem:[%s9363_s9 + $0x7c] sm:$0xf]  ;;  %v1647_v31 = vshll.u32 %v8411_v17, 16 }
 0x130   : > { %v1665_v50 = vshrl.u32 %v8413_v47, 16  ;;  %v1661_v55 = vshll.u32 %v8413_v47, 16  ;;  %v1695_v47 = vshll.u32 %v8417_v20, 16  ;;  %v8420_v17 = vld [vmem:[%s9363_s9 + $0x98] sm:$0x1] }
 0x131   : > { %v1621_v59 = vrot.slane %v1620_v45, 4 }
 0x132   : > { %1831 = vrot.lane.b32.xlu0 %v1520_v43, %s9271_s13  ;;  %v1609_v43 = vrot.slane %v1607_v28, 5  ;;  %v1663_v9 = vrot.slane %v1661_v55, 5 }
 0x133   : > { %1833 = vrot.lane.b32.xlu1 %v1530_v48, %s9271_s13  ;;  %1829 = vrot.lane.b32.xlu2 %v1506_v56, %s9271_s13  ;;  %v1578_v56 = vsel %vm9373_vm2, %v1573_v40, %v1577_v41  ;;  %v1626_v13 = vsel %vm9373_vm2, %v1621_v59, %v1625_v60  ;;  %v8419_v40 = vld [vmem:[%s9363_s9 + $0x94] sm:$0xf]  ;;  %v1678_v41 = vrot.slane %v1676_v25, 4 }
 0x134   : > { %v1121_v61 = vpop.permute.xlu0 %1120  ;;  %v1610_v58 = vor.u32 %v1609_v43, %v1606_v42  ;;  %v1681_v42 = vrot.slane %v1679_v26, 5  ;;  %v1645_v43 = vrot.slane %v1644_v29, 4  ;;  %v1664_v45 = vsel %vm9373_vm2, %v1659_v27, %v1663_v9 }
 0x135   : > { %1189 = vst.msk [vmem:[#allocation2 + $0x70] sm:$0xf] %vm1160_vm8, %v1121_v61  ;;  %v1123_v4 = vpop.permute.xlu1 %1122  ;;  %v1267_v2 = vpop.permute.xlu2 %1266  ;;  %v8416_v61 = vld [vmem:[%s9363_s9 + $0x88] sm:$0xf]  ;;  %v1709_v53 = vshll.u32 %v8419_v40, 16  ;;  %v1713_v59 = vshrl.u32 %v8419_v40, 16 }
 0x136   : > { %1190 = vst.msk [vmem:[#allocation2 + $0x74] sm:$0xf] %vm1160_vm8, %v1123_v4  ;;  %v1667_v4 = vrot.slane %v1665_v50, 4  ;;  %v1685_v10 = vshll.u32 %v8416_v61, 16  ;;  %v1611_v11 = vrot.slane %v1610_v58, 4  ;;  %v1748_v29 = vshrl.u32 %v8424_v23, 16 }
 0x137   : > { %1359 = vst.msk [vmem:[#allocation2 + $0x10] sm:$0xf] %vm1354_vm9, %v1267_v2  ;;  %v1689_v2 = vshrl.u32 %v8416_v61, 16  ;;  %v1697_v61 = vrot.slane %v1695_v47, 5  ;;  %v1711_v3 = vrot.slane %v1709_v53, 5  ;;  %v1715_v12 = vrot.slane %v1713_v59, 4 }
 0x138   : > { %v1668_v19 = vor.u32 %v1667_v4, %v1663_v9  ;;  %v1616_v28 = vsel %vm9373_vm2, %v1611_v11, %v9937_v30  ;;  %v8423_v4 = vld [vmem:[%s9363_s9 + $0xa4] sm:$0x1]  ;;  %v8428_v40 = vld [vmem:[%s9363_s9 + $0xb8] sm:$0xf] }
 0x139   : > { %v1691_v33 = vrot.slane %v1689_v2, 4  ;;  %v1716_v27 = vor.u32 %v1715_v12, %v1711_v3  ;;  %v8431_v47 = vld [vmem:[%s9363_s9 + $0xc4] sm:$0xf] }
 0x13a   : > { %1837 = vrot.lane.b32.xlu0 %v1554_v8, %s9271_s13  ;;  %v8418_v8 = vld [vmem:[%s9363_s9 + $0x90] sm:$0xf] }
 0x13b   : > { %1839 = vrot.lane.b32.xlu1 %v1568_v16, %s9271_s13  ;;  %1835 = vrot.lane.b32.xlu2 %v1544_v21, %s9271_s13  ;;  %v8421_v16 = vld [vmem:[%s9363_s9 + $0x9c] sm:$0xf]  ;;  %v1700_v7 = vshrl.u32 %v8418_v8, 16  ;;  %v1703_v21 = vshll.u32 %v8418_v8, 16 }
 0x13c   : > { %v1127_v32 = vpop.permute.xlu0 %1126  ;;  %v1724_v34 = vshrl.u32 %v8421_v16, 16  ;;  %v1727_v35 = vshll.u32 %v8421_v16, 16  ;;  %v1743_v16 = vshll.u32 %v8423_v4, 16 }
 0x13d   : > { %1192 = vst.msk [vmem:[#allocation2 + $0x7c] sm:$0xf] %vm1160_vm8, %v1127_v32  ;;  %v1259_v24 = vpop.permute.xlu1 %1258  ;;  %v1273_v48 = vpop.permute.xlu2 %1272  ;;  %v9974_v32 = vrot.slane %v1685_v10, 5  ;;  %v1702_v38 = vrot.slane %v1700_v7, 4  ;;  %v1705_v39 = vrot.slane %v1703_v21, 5  ;;  %vm5018_vm8 = vcmask 781824  }
 0x13e   : > { %1355 = vst.msk [vmem:[#allocation2] sm:$0xf] %vm1354_vm9, %v1259_v24  ;;  %v1669_v24 = vrot.slane %v1668_v19, 4  ;;  %v1726_v54 = vrot.slane %v1724_v34, 4  ;;  %v1729_v55 = vrot.slane %v1727_v35, 5 }
 0x13f   : > { %1362 = vst.msk [vmem:[#allocation2 + $0x1c] sm:$0xf] %vm1354_vm9, %v1273_v48  ;;  %v1692_v46 = vor.u32 %v1691_v33, %v9974_v32  ;;  %v8422_v48 = vld [vmem:[%s9363_s9 + $0xa0] sm:$0xf]  ;;  %v1706_v52 = vor.u32 %v1705_v39, %v1702_v38  ;;  %v8427_v10 = vld [vmem:[%s9363_s9 + $0xb4] sm:$0xf] }
 0x140   : > { %v1674_v50 = vsel %vm9373_vm2, %v1669_v24, %v1673_v37  ;;  %v1737_v51 = vshrl.u32 %v8422_v48, 16  ;;  %v1733_v57 = vshll.u32 %v8422_v48, 16  ;;  %v1772_v7 = vshrl.u32 %v8427_v10, 16  ;;  %v8426_v33 = vld [vmem:[%s9363_s9 + $0xb0] sm:$0x1] }
 0x141   : > { %v1693_v60 = vrot.slane %v1692_v46, 4  ;;  %v1707_v1 = vrot.slane %v1706_v52, 4  ;;  %v1775_v21 = vshll.u32 %v8427_v10, 16  ;;  %v1745_v24 = vrot.slane %v1743_v16, 5  ;;  %v8430_v37 = vld [vmem:[%s9363_s9 + $0xc0] sm:$0xf] }
 0x142   : > { %1843 = vrot.lane.b32.xlu0 %v1592_v44, %s9271_s13  ;;  %v1649_v44 = vrot.slane %v1647_v31, 5  ;;  %v1739_v6 = vrot.slane %v1737_v51, 4  ;;  %v1735_v11 = vrot.slane %v1733_v57, 5  ;;  %v1751_v31 = vshll.u32 %v8424_v23, 16  ;;  %v8434_v23 = vld [vmem:[%s9363_s9 + $0x10] sm:$0xf] }
 0x143   : > { %1845 = vrot.lane.b32.xlu1 %v1602_v49, %s9271_s13  ;;  %1841 = vrot.lane.b32.xlu2 %v1578_v56, %s9271_s13  ;;  %v1682_v56 = vor.u32 %v1681_v42, %v1678_v41  ;;  %v1774_v38 = vrot.slane %v1772_v7, 4  ;;  %v1717_v41 = vrot.slane %v1716_v27, 4  ;;  %v1767_v46 = vshll.u32 %v8426_v33, 16 }
 0x144   : > { %v1263_v63 = vpop.permute.xlu0 %1262  ;;  %v1650_v58 = vsel %vm9373_vm2, %v1645_v43, %v1649_v44  ;;  %v1740_v19 = vor.u32 %v1739_v6, %v1735_v11  ;;  %v1750_v43 = vrot.slane %v1748_v29, 4  ;;  %v1753_v44 = vrot.slane %v1751_v31, 5 }
 0x145   : > { %1357 = vst.msk [vmem:[#allocation2 + $0x8] sm:$0xf] %vm1354_vm9, %v1263_v63  ;;  %v1265_v5 = vpop.permute.xlu1 %1264  ;;  %v1279_v14 = vpop.permute.xlu2 %1278  ;;  %v8425_v63 = vld [vmem:[%s9363_s9 + $0xac] sm:$0xf]  ;;  %v1683_v9 = vrot.slane %v1682_v56, 4  ;;  %v1796_v48 = vshrl.u32 %v8430_v37, 16 }
 0x146   : > { %1358 = vst.msk [vmem:[#allocation2 + $0xc] sm:$0xf] %vm1354_vm9, %v1265_v5  ;;  %v1730_v5 = vor.u32 %v1729_v55, %v1726_v54  ;;  %v1757_v2 = vshll.u32 %v8425_v63, 16  ;;  %v1741_v20 = vrot.slane %v1740_v19, 4  ;;  %v1809_v52 = vshrl.u32 %v8431_v47, 16 }
 0x147   : > { %1365 = vst.msk [vmem:[#allocation2 + $0x28] sm:$0xf] %vm1354_vm9, %v1279_v14  ;;  %v1761_v14 = vshrl.u32 %v8425_v63, 16  ;;  %v1688_v26 = vsel %vm9373_vm2, %v1683_v9, %v9974_v32  ;;  %v1777_v32 = vrot.slane %v1775_v21, 5  ;;  %v1781_v54 = vshll.u32 %v8428_v40, 16 }
 0x148   : > { %v1731_v25 = vrot.slane %v1730_v5, 4  ;;  %v10011_v34 = vrot.slane %v1757_v2, 5  ;;  %v1746_v51 = vsel %vm9373_vm2, %v1741_v20, %v1745_v24  ;;  %v1805_v55 = vshll.u32 %v8431_v47, 16  ;;  %v8432_v5 = vld [vmem:[%s9363_s9 + $0xc8] sm:$0x1] }
 0x149   : > { %v1763_v35 = vrot.slane %v1761_v14, 4  ;;  %v1778_v53 = vor.u32 %v1777_v32, %v1774_v38  ;;  %v1785_v57 = vshrl.u32 %v8428_v40, 16  ;;  %v1811_v4 = vrot.slane %v1809_v52, 4  ;;  %v8429_v2 = vld [vmem:[%s9363_s9 + $0xbc] sm:$0x1] }
 0x14a   : > { %1849 = vrot.lane.b32.xlu0 %v1626_v13, %s9271_s13  ;;  %v1698_v13 = vsel %vm9373_vm2, %v1693_v60, %v1697_v61  ;;  %v1736_v39 = vsel %vm9373_vm2, %v1731_v25, %v1735_v11  ;;  %v1769_v60 = vrot.slane %v1767_v46, 5  ;;  %v1798_v61 = vrot.slane %v1796_v48, 4  ;;  %v8436_v20 = vld [vmem:[%s9363_s9 + $0x18] sm:$0xe]  ;;  %v8437_v24 = vld [vmem:[%s9363_s9 + $0x1c] sm:$0xf] }
 0x14b   : > { %1851 = vrot.lane.b32.xlu1 %v1640_v18, %s9271_s13  ;;  %1847 = vrot.lane.b32.xlu2 %v1616_v28, %s9271_s13  ;;  %v1712_v18 = vsel %vm9373_vm2, %v1707_v1, %v1711_v3  ;;  %v1719_v28 = vshll.u32 %v8420_v17, 16  ;;  %v1779_v1 = vrot.slane %v1778_v53, 4  ;;  %v1783_v3 = vrot.slane %v1781_v54, 5  ;;  %v8439_v47 = vld [vmem:[%s9363_s9 + $0x24] sm:$0xe] }
 0x14c   : > { %v1269_v36 = vpop.permute.xlu0 %1268  ;;  %v1787_v10 = vrot.slane %v1785_v57, 4  ;;  %v1815_v16 = vshll.u32 %v8432_v5, 16  ;;  %v1791_v19 = vshll.u32 %v8429_v2, 16  ;;  %v2046_v33 = vrot.slane %v8434_v23, 5  ;;  %v8438_v53 = vld [vmem:[%s9363_s9 + $0x20] sm:$0x1] }
 0x14d   : > { %1360 = vst.msk [vmem:[#allocation2 + $0x14] sm:$0xf] %vm1354_vm9, %v1269_v36  ;;  %v1271_v30 = vpop.permute.xlu1 %1270  ;;  %v1285_v49 = vpop.permute.xlu2 %1284  ;;  %v1721_v42 = vrot.slane %v1719_v28, 5  ;;  %v1784_v14 = vsel %vm9373_vm2, %v1779_v1, %v1783_v3  ;;  %v8482_v40 = vrot.slane %v8436_v20, 9  ;;  %v8483_v52 = vrot.slane %v8439_v47, 9 }
 0x14e   : > { %1361 = vst.msk [vmem:[#allocation2 + $0x18] sm:$0xf] %vm1354_vm9, %v1271_v30  ;;  %v1793_v29 = vrot.slane %v1791_v19, 5  ;;  %v2048_v38 = vrot.slane %v2046_v33, 4  ;;  %v8444_v1 = vld [vmem:[%s9363_s9 + $0x38] sm:$0x1] }
 0x14f   : > { %1368 = vst.msk [vmem:[#allocation2 + $0x34] sm:$0xf] %vm1354_vm9, %v1285_v49  ;;  %v1799_v49 = vshll.u32 %v8430_v37, 16  ;;  %v1722_v56 = vsel %vm9373_vm2, %v1717_v41, %v1721_v42  ;;  %v2053_v41 = vrot.slane %v8437_v24, 5 }
 0x151   : > { %v1801_v63 = vrot.slane %v1799_v49, 5  ;;  %v2054_v48 = vsel %vm9532_vm6, %v8482_v40, %v2053_v41  ;;  %v8441_v49 = vld [vmem:[%s9363_s9 + $0x2c] sm:$0x1] }
 0x152   : > { %1855 = vrot.lane.b32.xlu0 %v1664_v45, %s9271_s13  ;;  %v1764_v45 = vor.u32 %v1763_v35, %v10011_v34  ;;  %v8435_v35 = vld [vmem:[%s9363_s9 + $0x14] sm:$0x1]  ;;  %v2063_v57 = vrot.slane %v8441_v49, 5  ;;  %v8458_v49 = vld [vmem:[%s9363_s9 + $0x70] sm:$0xf] }
 0x153   : > { %1857 = vrot.lane.b32.xlu1 %v1674_v50, %s9271_s13  ;;  %1853 = vrot.lane.b32.xlu2 %v1650_v58, %s9271_s13  ;;  %v1754_v58 = vor.u32 %v1753_v44, %v1750_v43  ;;  %v1802_v12 = vor.u32 %v1801_v63, %v1798_v61  ;;  %v2049_v32 = vrot.slane %v8435_v35, 5 }
 0x154   : > { %v1275_v0 = vpop.permute.xlu0 %1274  ;;  %v1765_v59 = vrot.slane %v1764_v45, 4  ;;  %v8440_v45 = vld [vmem:[%s9363_s9 + $0x28] sm:$0xf] }
 0x155   : > { %1363 = vst.msk [vmem:[#allocation2 + $0x20] sm:$0xf] %vm1354_vm9, %v1275_v0  ;;  %v1277_v8 = vpop.permute.xlu1 %1276  ;;  %v1291_v15 = vpop.permute.xlu2 %1290  ;;  %v1755_v9 = vrot.slane %v1754_v58, 4  ;;  %v1803_v7 = vrot.slane %v1802_v12, 4  ;;  %v2050_v44 = vsel %vm9532_vm6, %v2048_v38, %v2049_v32  ;;  %v8454_v32 = vld [vmem:[%s9363_s9 + $0x60] sm:$0xe] }
 0x156   : > { %1364 = vst.msk [vmem:[#allocation2 + $0x24] sm:$0xf] %vm1354_vm9, %v1277_v8  ;;  %v1807_v8 = vrot.slane %v1805_v55, 5  ;;  %v1770_v11 = vsel %vm9373_vm2, %v1765_v59, %v1769_v60  ;;  %v8443_v55 = vld [vmem:[%s9363_s9 + $0x34] sm:$0xf]  ;;  %v2055_v59 = vrot.slane %v2053_v41, 4 }
 0x157   : > { %1371 = vst.msk [vmem:[#allocation2 + $0x40] sm:$0xf] %vm1354_vm9, %v1291_v15  ;;  %v1760_v17 = vsel %vm9373_vm2, %v1755_v9, %v10011_v34  ;;  %v2056_v60 = vrot.slane %v8438_v53, 5  ;;  %v2067_v63 = vrot.slane %v8443_v55, 5  ;;  %v2070_v9 = vrot.slane %v8444_v1, 5 }
 0x158   : > { %v1812_v15 = vor.u32 %v1811_v4, %v1807_v8  ;;  %v1808_v31 = vsel %vm9373_vm2, %v1803_v7, %v1807_v8  ;;  %v8445_v4 = vld [vmem:[%s9363_s9 + $0x3c] sm:$0xe]  ;;  %v8450_v7 = vld [vmem:[%s9363_s9 + $0x50] sm:$0x1]  ;;  %v8459_v53 = vld [vmem:[%s9363_s9 + $0x74] sm:$0x1] }
 0x159   : > { %v2057_v5 = vsel %vm9532_vm6, %v2055_v59, %v2056_v60  ;;  %v2069_v8 = vrot.slane %v2067_v63, 4  ;;  %v8485_v12 = vrot.slane %v8445_v4, 9  ;;  %v8461_v59 = vld [vmem:[%s9363_s9 + $0x7c] sm:$0xf] }
 0x15a   : > { %1861 = vrot.lane.b32.xlu0 %v1698_v13, %s9271_s13  ;;  %v1813_v25 = vrot.slane %v1812_v15, 4  ;;  %v2109_v4 = vrot.slane %v8461_v59, 5 }
 0x15b   : > { %1863 = vrot.lane.b32.xlu1 %v1712_v18, %s9271_s13  ;;  %1859 = vrot.lane.b32.xlu2 %v1688_v26, %s9271_s13  ;;  %v1788_v18 = vor.u32 %v1787_v10, %v1783_v3  ;;  %v1817_v26 = vrot.slane %v1815_v16, 5  ;;  %v8442_v10 = vld [vmem:[%s9363_s9 + $0x30] sm:$0xe]  ;;  %v2071_v15 = vsel %vm9532_vm6, %v2069_v8, %v2070_v9  ;;  %v8449_v16 = vld [vmem:[%s9363_s9 + $0x4c] sm:$0xf] }
 0x15c   : > { %v1281_v36 = vpop.permute.xlu0 %1280  ;;  %v8463_v9 = vld [vmem:[%s9363_s9 + $0x84] sm:$0xe] }
 0x15d   : > { %1366 = vst.msk [vmem:[#allocation2 + $0x2c] sm:$0xf] %vm1354_vm9, %v1281_v36  ;;  %v1283_v30 = vpop.permute.xlu1 %1282  ;;  %v1297_v50 = vpop.permute.xlu2 %1296  ;;  %v1789_v28 = vrot.slane %v1788_v18, 4  ;;  %v1818_v36 = vsel %vm9373_vm2, %v1813_v25, %v1817_v26  ;;  %v8448_v18 = vld [vmem:[%s9363_s9 + $0x48] sm:$0xe] }
 0x15e   : > { %1367 = vst.msk [vmem:[#allocation2 + $0x30] sm:$0xf] %vm1354_vm9, %v1283_v30  ;;  %v8486_v25 = vrot.slane %v8448_v18, 9  ;;  %v8447_v26 = vld [vmem:[%s9363_s9 + $0x44] sm:$0x1] }
 0x15f   : > { %1374 = vst.msk [vmem:[#allocation2 + $0x4c] sm:$0xf] %vm1354_vm9, %v1297_v50  ;;  %v1794_v37 = vsel %vm9373_vm2, %v1789_v28, %v1793_v29  ;;  %v2060_v50 = vrot.slane %v8440_v45, 5  ;;  %v8452_v28 = vld [vmem:[%s9363_s9 + $0x58] sm:$0xf]  ;;  %v2077_v35 = vrot.slane %v8447_v26, 5 }
 0x160   : > { %v2088_v20 = vrot.slane %v8452_v28, 5  ;;  %v8468_v26 = vld [vmem:[%s9363_s9 + $0x98] sm:$0x1] }
 0x161   : > { %v2061_v61 = vsel %vm9532_vm6, %v8483_v52, %v2060_v50 }
 0x162   : > { %1867 = vrot.lane.b32.xlu0 %v1736_v39, %s9271_s13  ;;  %v8433_v39 = vld [vmem:[%s9363_s9 + $0xc] sm:$0xe]  ;;  %v2090_v40 = vrot.slane %v2088_v20, 4 }
 0x163   : > { %1869 = vrot.lane.b32.xlu1 %v1746_v51, %s9271_s13  ;;  %1865 = vrot.lane.b32.xlu2 %v1722_v56, %s9271_s13  ;;  %v8481_v43 = vrot.slane %v8433_v39, 9  ;;  %v2062_v56 = vrot.slane %v2060_v50, 4  ;;  %v8455_v39 = vld [vmem:[%s9363_s9 + $0x64] sm:$0xf] }
 0x164   : > { %v1287_v0 = vpop.permute.xlu0 %1286  ;;  %v2095_v45 = vrot.slane %v8455_v39, 5 }
 0x165   : > { %1369 = vst.msk [vmem:[#allocation2 + $0x38] sm:$0xf] %vm1354_vm9, %v1287_v0  ;;  %v1289_v6 = vpop.permute.xlu1 %1288  ;;  %v1303_v13 = vpop.permute.xlu2 %1302  ;;  %v2047_v51 = vsel %vm9532_vm6, %v8481_v43, %v2046_v33  ;;  %v2064_v3 = vsel %vm9532_vm6, %v2062_v56, %v2063_v57  ;;  %v8456_v57 = vld [vmem:[%s9363_s9 + $0x68] sm:$0x1] }
 0x166   : > { %1370 = vst.msk [vmem:[#allocation2 + $0x3c] sm:$0xf] %vm1354_vm9, %v1289_v6  ;;  %v8446_v6 = vld [vmem:[%s9363_s9 + $0x40] sm:$0xf]  ;;  %v2098_v1 = vrot.slane %v8456_v57, 5 }
 0x167   : > { %1377 = vst.msk [vmem:[#allocation2 + $0x58] sm:$0xf] %vm1354_vm9, %v1303_v13  ;;  %v2074_v13 = vrot.slane %v8446_v6, 5  ;;  %v8477_v57 = vld [vmem:[%s9363_s9 + $0xbc] sm:$0x1] }
 0x169   : > { %v2075_v19 = vsel %vm9532_vm6, %v8485_v12, %v2074_v13  ;;  %v2111_v12 = vrot.slane %v2109_v4, 4 }
 0x16a   : > { %1873 = vrot.lane.b32.xlu0 %v1770_v11, %s9271_s13 }
 0x16b   : > { %1875 = vrot.lane.b32.xlu1 %v1784_v14, %s9271_s13  ;;  %1871 = vrot.lane.b32.xlu2 %v1760_v17, %s9271_s13  ;;  %v8484_v14 = vrot.slane %v8442_v10, 9  ;;  %v8464_v10 = vld [vmem:[%s9363_s9 + $0x88] sm:$0xf] }
 0x16c   : > { %v1293_v21 = vpop.permute.xlu0 %1292 }
 0x16d   : > { %1372 = vst.msk [vmem:[#allocation2 + $0x44] sm:$0xf] %vm1354_vm9, %v1293_v21  ;;  %v1295_v27 = vpop.permute.xlu1 %1294  ;;  %v1309_v34 = vpop.permute.xlu2 %1308  ;;  %v2081_v21 = vrot.slane %v8449_v16, 5  ;;  %v2068_v23 = vsel %vm9532_vm6, %v8484_v14, %v2067_v63  ;;  %v2116_v16 = vrot.slane %v8464_v10, 5 }
 0x16e   : > { %1373 = vst.msk [vmem:[#allocation2 + $0x48] sm:$0xf] %vm1354_vm9, %v1295_v27 }
 0x16f   : > { %1380 = vst.msk [vmem:[#allocation2 + $0x64] sm:$0xf] %vm1354_vm9, %v1309_v34  ;;  %v2083_v29 = vrot.slane %v2081_v21, 4  ;;  %v2076_v34 = vrot.slane %v2074_v13, 4 }
 0x172   : > { %1879 = vrot.lane.b32.xlu0 %v1808_v31, %s9271_s13  ;;  %v2084_v31 = vrot.slane %v8450_v7, 5  ;;  %v8467_v7 = vld [vmem:[%s9363_s9 + $0x94] sm:$0xf] }
 0x173   : > { %1881 = vrot.lane.b32.xlu1 %v1818_v36, %s9271_s13  ;;  %1877 = vrot.lane.b32.xlu2 %v1794_v37, %s9271_s13  ;;  %v2082_v36 = vsel %vm9532_vm6, %v8486_v25, %v2081_v21  ;;  %v8453_v37 = vld [vmem:[%s9363_s9 + $0x5c] sm:$0x1] }
 0x174   : > { %v1299_v30 = vpop.permute.xlu0 %1298  ;;  %v2085_v38 = vsel %vm9532_vm6, %v2083_v29, %v2084_v31  ;;  %v2091_v41 = vrot.slane %v8453_v37, 5  ;;  %v8465_v31 = vld [vmem:[%s9363_s9 + $0x8c] sm:$0x1] }
 0x175   : > { %1375 = vst.msk [vmem:[#allocation2 + $0x50] sm:$0xf] %vm1354_vm9, %v1299_v30  ;;  %v1301_v42 = vpop.permute.xlu1 %1300  ;;  %v1315_v46 = vpop.permute.xlu2 %1314  ;;  %v2078_v30 = vsel %vm9532_vm6, %v2076_v34, %v2077_v35  ;;  %v8470_v34 = vld [vmem:[%s9363_s9 + $0xa0] sm:$0xf]  ;;  %v2119_v37 = vrot.slane %v8465_v31, 5 }
 0x176   : > { %1376 = vst.msk [vmem:[#allocation2 + $0x54] sm:$0xf] %vm1354_vm9, %v1301_v42  ;;  %v8451_v42 = vld [vmem:[%s9363_s9 + $0x54] sm:$0xe]  ;;  %v8498_v31 = vld [vmem:[%s9363_s9 + $0x1c] sm:$0xf] }
 0x177   : > { %1383 = vst.msk [vmem:[#allocation2 + $0x70] sm:$0xf] %vm1354_vm9, %v1315_v46  ;;  %v8487_v47 = vrot.slane %v8451_v42, 9  ;;  %v8473_v42 = vld [vmem:[%s9363_s9 + $0xac] sm:$0xf] }
 0x179   : > { %v2089_v55 = vsel %vm9532_vm6, %v8487_v47, %v2088_v20 }
 0x17a   : > { %2158 = vrot.lane.b32.xlu0 %v2050_v44, %s9272_s14  ;;  %v8488_v44 = vrot.slane %v8454_v32, 9  ;;  %v2130_v32 = vrot.slane %v8470_v34, 5 }
 0x17b   : > { %2160 = vrot.lane.b32.xlu1 %v2054_v48, %s9272_s14  ;;  %2156 = vrot.lane.b32.xlu2 %v2047_v51, %s9272_s14  ;;  %v2092_v48 = vsel %vm9532_vm6, %v2090_v40, %v2091_v41  ;;  %v8457_v51 = vld [vmem:[%s9363_s9 + $0x6c] sm:$0xe]  ;;  %v8472_v41 = vld [vmem:[%s9363_s9 + $0xa8] sm:$0xe] }
 0x17c   : > { %v1305_v54 = vpop.permute.xlu0 %1304  ;;  %v2096_v52 = vsel %vm9532_vm6, %v8488_v44, %v2095_v45  ;;  %v8489_v56 = vrot.slane %v8457_v51, 9  ;;  %v2132_v44 = vrot.slane %v2130_v32, 4 }
 0x17d   : > { %1378 = vst.msk [vmem:[#allocation2 + $0x5c] sm:$0xf] %vm1354_vm9, %v1305_v54  ;;  %v1307_v58 = vpop.permute.xlu1 %1306  ;;  %v1321_v0 = vpop.permute.xlu2 %1320  ;;  %v2102_v54 = vrot.slane %v8458_v49, 5  ;;  %v2137_v49 = vrot.slane %v8473_v42, 5 }
 0x17e   : > { %1379 = vst.msk [vmem:[#allocation2 + $0x60] sm:$0xf] %vm1354_vm9, %v1307_v58 }
 0x17f   : > { %1386 = vst.msk [vmem:[#allocation2 + $0x7c] sm:$0xf] %vm1354_vm9, %v1321_v0  ;;  %v2104_v60 = vrot.slane %v2102_v54, 4  ;;  %v2097_v0 = vrot.slane %v2095_v45, 4 }
 0x182   : > { %2164 = vrot.lane.b32.xlu0 %v2061_v61, %s9272_s14  ;;  %v2105_v61 = vrot.slane %v8459_v53, 5  ;;  %v8476_v53 = vld [vmem:[%s9363_s9 + $0xb8] sm:$0xf] }
 0x183   : > { %2166 = vrot.lane.b32.xlu1 %v2064_v3, %s9272_s14  ;;  %2162 = vrot.lane.b32.xlu2 %v2057_v5, %s9272_s14  ;;  %v2103_v3 = vsel %vm9532_vm6, %v8489_v56, %v2102_v54  ;;  %v8462_v5 = vld [vmem:[%s9363_s9 + $0x80] sm:$0x1] }
 0x184   : > { %v1311_v11 = vpop.permute.xlu0 %1310  ;;  %v2106_v8 = vsel %vm9532_vm6, %v2104_v60, %v2105_v61  ;;  %v2112_v13 = vrot.slane %v8462_v5, 5  ;;  %v8474_v61 = vld [vmem:[%s9363_s9 + $0xb0] sm:$0x1] }
 0x185   : > { %1381 = vst.msk [vmem:[#allocation2 + $0x68] sm:$0xf] %vm1354_vm9, %v1311_v11  ;;  %v1313_v2 = vpop.permute.xlu1 %1312  ;;  %v1824_v17 = vpop.permute.xlu2 %1823  ;;  %v2099_v11 = vsel %vm9532_vm6, %v2097_v0, %v2098_v1  ;;  %v8479_v0 = vld [vmem:[%s9363_s9 + $0xc4] sm:$0xf]  ;;  %v2140_v5 = vrot.slane %v8474_v61, 5 }
 0x186   : > { %1382 = vst.msk [vmem:[#allocation2 + $0x6c] sm:$0xf] %vm1354_vm9, %v1313_v2  ;;  %v8460_v2 = vld [vmem:[%s9363_s9 + $0x78] sm:$0xe]  ;;  %v8517_v61 = vld [vmem:[%s9363_s9 + $0x90] sm:$0xf] }
 0x187   : > { %1918 = vst.msk [vmem:[#allocation2 + $0x8] sm:$0xf] %vm1915_vm10, %v1824_v17  ;;  %v8490_v18 = vrot.slane %v8460_v2, 9 }
 0x189   : > { %v2110_v28 = vsel %vm9532_vm6, %v8490_v18, %v2109_v4 }
 0x18a   : > { %2170 = vrot.lane.b32.xlu0 %v2071_v15, %s9272_s14  ;;  %v8491_v15 = vrot.slane %v8463_v9, 9  ;;  %v2151_v9 = vrot.slane %v8479_v0, 5  ;;  %v8518_v0 = vld [vmem:[%s9363_s9 + $0x94] sm:$0xf] }
 0x18b   : > { %2172 = vrot.lane.b32.xlu1 %v2075_v19, %s9272_s14  ;;  %2168 = vrot.lane.b32.xlu2 %v2068_v23, %s9272_s14  ;;  %v2113_v19 = vsel %vm9532_vm6, %v2111_v12, %v2112_v13  ;;  %v8466_v23 = vld [vmem:[%s9363_s9 + $0x90] sm:$0xe] }
 0x18c   : > { %v1317_v27 = vpop.permute.xlu0 %1316  ;;  %v2117_v25 = vsel %vm9532_vm6, %v8491_v15, %v2116_v16  ;;  %v8492_v29 = vrot.slane %v8466_v23, 9  ;;  %v2153_v2 = vrot.slane %v2151_v9, 4  ;;  %v8478_v15 = vld [vmem:[%s9363_s9 + $0xc0] sm:$0xe] }
 0x18d   : > { %1384 = vst.msk [vmem:[#allocation2 + $0x74] sm:$0xf] %vm1354_vm9, %v1317_v27  ;;  %v1319_v33 = vpop.permute.xlu1 %1318  ;;  %v1830_v24 = vpop.permute.xlu2 %1829  ;;  %v2123_v27 = vrot.slane %v8467_v7, 5  ;;  %v8496_v18 = vrot.slane %v8478_v15, 9  ;;  %v8530_v15 = vld [vmem:[%s9363_s9 + $0x1c] sm:$0xf] }
 0x18e   : > { %1385 = vst.msk [vmem:[#allocation2 + $0x78] sm:$0xf] %vm1354_vm9, %v1319_v33  ;;  %vm5547_vm9 = vcmask 1044224  }
 0x18f   : > { %1921 = vst.msk [vmem:[#allocation2 + $0x14] sm:$0xf] %vm1915_vm10, %v1830_v24  ;;  %v2125_v35 = vrot.slane %v2123_v27, 4  ;;  %v2118_v24 = vrot.slane %v2116_v16, 4  ;;  %v2152_v23 = vsel %vm9532_vm6, %v8496_v18, %v2151_v9  ;;  %v8519_v9 = vld [vmem:[%s9363_s9 + $0x9c] sm:$0xf] }
 0x190   : > { %v2541_v18 = vshrl.u32 %v8530_v15, 16 }
 0x192   : > { %2176 = vrot.lane.b32.xlu0 %v2082_v36, %s9272_s14  ;;  %v2126_v36 = vrot.slane %v8468_v26, 5 }
 0x193   : > { %2178 = vrot.lane.b32.xlu1 %v2085_v38, %s9272_s14  ;;  %2174 = vrot.lane.b32.xlu2 %v2078_v30, %s9272_s14  ;;  %v2124_v38 = vsel %vm9532_vm6, %v8492_v29, %v2123_v27  ;;  %v8471_v30 = vld [vmem:[%s9363_s9 + $0xa4] sm:$0x1]  ;;  %v8500_v29 = vld [vmem:[%s9363_s9 + $0x28] sm:$0xf] }
 0x194   : > { %v1820_v43 = vpop.permute.xlu0 %1819  ;;  %v2127_v40 = vsel %vm9532_vm6, %v2125_v35, %v2126_v36  ;;  %v2133_v45 = vrot.slane %v8471_v30, 5  ;;  %v8499_v27 = vld [vmem:[%s9363_s9 + $0x24] sm:$0xf]  ;;  %v8502_v35 = vld [vmem:[%s9363_s9 + $0x34] sm:$0xf] }
 0x195   : > { %1916 = vst.msk [vmem:[#allocation2] sm:$0xf] %vm1915_vm10, %v1820_v43  ;;  %v1822_v46 = vpop.permute.xlu1 %1821  ;;  %v1836_v50 = vpop.permute.xlu2 %1835  ;;  %v2120_v43 = vsel %vm9532_vm6, %v2118_v24, %v2119_v37  ;;  %v8501_v24 = vld [vmem:[%s9363_s9 + $0x30] sm:$0xf]  ;;  %v8506_v30 = vld [vmem:[%s9363_s9 + $0x4c] sm:$0xf] }
 0x196   : > { %1917 = vst.msk [vmem:[#allocation2 + $0x4] sm:$0xf] %vm1915_vm10, %v1822_v46  ;;  %v8469_v46 = vld [vmem:[%s9363_s9 + $0x9c] sm:$0xe] }
 0x197   : > { %1924 = vst.msk [vmem:[#allocation2 + $0x20] sm:$0xf] %vm1915_vm10, %v1836_v50  ;;  %v8493_v51 = vrot.slane %v8469_v46, 9  ;;  %v8507_v46 = vld [vmem:[%s9363_s9 + $0x54] sm:$0xf] }
 0x199   : > { %v2131_v59 = vsel %vm9532_vm6, %v8493_v51, %v2130_v32  ;;  %v8505_v32 = vld [vmem:[%s9363_s9 + $0x48] sm:$0xf]  ;;  %v8512_v51 = vld [vmem:[%s9363_s9 + $0x70] sm:$0xf] }
 0x19a   : > { %2182 = vrot.lane.b32.xlu0 %v2092_v48, %s9272_s14  ;;  %v8494_v48 = vrot.slane %v8472_v41, 9 }
 0x19b   : > { %2184 = vrot.lane.b32.xlu1 %v2096_v52, %s9272_s14  ;;  %2180 = vrot.lane.b32.xlu2 %v2089_v55, %s9272_s14  ;;  %v2134_v52 = vsel %vm9532_vm6, %v2132_v44, %v2133_v45  ;;  %v8475_v55 = vld [vmem:[%s9363_s9 + $0xb4] sm:$0xe]  ;;  %v8509_v45 = vld [vmem:[%s9363_s9 + $0x60] sm:$0xf] }
 0x19c   : > { %v1826_v58 = vpop.permute.xlu0 %1825  ;;  %v2138_v56 = vsel %vm9532_vm6, %v8494_v48, %v2137_v49  ;;  %v8495_v60 = vrot.slane %v8475_v55, 9  ;;  %v8514_v55 = vld [vmem:[%s9363_s9 + $0x7c] sm:$0xf] }
 0x19d   : > { %1919 = vst.msk [vmem:[#allocation2 + $0xc] sm:$0xf] %vm1915_vm10, %v1826_v58  ;;  %v1828_v63 = vpop.permute.xlu1 %1827  ;;  %v1842_v6 = vpop.permute.xlu2 %1841  ;;  %v2144_v58 = vrot.slane %v8476_v53, 5 }
 0x19e   : > { %1920 = vst.msk [vmem:[#allocation2 + $0x10] sm:$0xf] %vm1915_vm10, %v1828_v63 }
 0x19f   : > { %1927 = vst.msk [vmem:[#allocation2 + $0x2c] sm:$0xf] %vm1915_vm10, %v1842_v6  ;;  %v2146_v1 = vrot.slane %v2144_v58, 4  ;;  %v2139_v6 = vrot.slane %v2137_v49, 4  ;;  %v8511_v49 = vld [vmem:[%s9363_s9 + $0x6c] sm:$0xf] }
 0x1a1   : > { %v2141_v13 = vsel %vm9532_vm6, %v2139_v6, %v2140_v5  ;;  %v8520_v6 = vld [vmem:[%s9363_s9 + $0xa0] sm:$0xf] }
 0x1a2   : > { %2188 = vrot.lane.b32.xlu0 %v2103_v3, %s9272_s14  ;;  %v2147_v3 = vrot.slane %v8477_v57, 5  ;;  %v8515_v57 = vld [vmem:[%s9363_s9 + $0x84] sm:$0xf] }
 0x1a3   : > { %2190 = vrot.lane.b32.xlu1 %v2106_v8, %s9272_s14  ;;  %2186 = vrot.lane.b32.xlu2 %v2099_v11, %s9272_s14  ;;  %v2145_v8 = vsel %vm9532_vm6, %v8495_v60, %v2144_v58  ;;  %v8480_v11 = vld [vmem:[%s9363_s9 + $0xc8] sm:$0x1]  ;;  %v8513_v58 = vld [vmem:[%s9363_s9 + $0x78] sm:$0xf] }
 0x1a4   : > { %v1832_v14 = vpop.permute.xlu0 %1831  ;;  %v2148_v12 = vsel %vm9532_vm6, %v2146_v1, %v2147_v3  ;;  %v8516_v1 = vld [vmem:[%s9363_s9 + $0x88] sm:$0xf] }
 0x1a5   : > { %1922 = vst.msk [vmem:[#allocation2 + $0x18] sm:$0xf] %vm1915_vm10, %v1832_v14  ;;  %v1834_v17 = vpop.permute.xlu1 %1833  ;;  %v1848_v21 = vpop.permute.xlu2 %1847  ;;  %v2154_v14 = vrot.slane %v8480_v11, 5 }
 0x1a6   : > { %1923 = vst.msk [vmem:[#allocation2 + $0x1c] sm:$0xf] %vm1915_vm10, %v1834_v17 }
 0x1a7   : > { %1930 = vst.msk [vmem:[#allocation2 + $0x38] sm:$0xf] %vm1915_vm10, %v1848_v21  ;;  %v8497_v21 = vld [vmem:[%s9363_s9 + $0x18] sm:$0xf] }
 0x1aa   : > { %2194 = vrot.lane.b32.xlu0 %v2113_v19, %s9272_s14  ;;  %v2155_v19 = vsel %vm9532_vm6, %v2153_v2, %v2154_v14  ;;  %v8523_v14 = vld [vmem:[%s9363_s9 + $0xb4] sm:$0xf] }
 0x1ab   : > { %2196 = vrot.lane.b32.xlu1 %v2117_v25, %s9272_s14  ;;  %2192 = vrot.lane.b32.xlu2 %v2110_v28, %s9272_s14 }
 0x1ac   : > { %v1838_v33 = vpop.permute.xlu0 %1837 }
 0x1ad   : > { %1925 = vst.msk [vmem:[#allocation2 + $0x24] sm:$0xf] %vm1915_vm10, %v1838_v33  ;;  %v1840_v20 = vpop.permute.xlu1 %1839  ;;  %v1854_v39 = vpop.permute.xlu2 %1853 }
 0x1ae   : > { %1926 = vst.msk [vmem:[#allocation2 + $0x28] sm:$0xf] %vm1915_vm10, %v1840_v20  ;;  %v8503_v20 = vld [vmem:[%s9363_s9 + $0x3c] sm:$0xf] }
 0x1af   : > { %1933 = vst.msk [vmem:[#allocation2 + $0x44] sm:$0xf] %vm1915_vm10, %v1854_v39 }
 0x1b2   : > { %2200 = vrot.lane.b32.xlu0 %v2124_v38, %s9272_s14 }
 0x1b3   : > { %2202 = vrot.lane.b32.xlu1 %v2127_v40, %s9272_s14  ;;  %2198 = vrot.lane.b32.xlu2 %v2120_v43, %s9272_s14  ;;  %v8504_v40 = vld [vmem:[%s9363_s9 + $0x40] sm:$0xf]  ;;  %v8508_v43 = vld [vmem:[%s9363_s9 + $0x58] sm:$0xf] }
 0x1b4   : > { %v1844_v47 = vpop.permute.xlu0 %1843 }
 0x1b5   : > { %1928 = vst.msk [vmem:[#allocation2 + $0x30] sm:$0xf] %vm1915_vm10, %v1844_v47  ;;  %v1846_v50 = vpop.permute.xlu1 %1845  ;;  %v1860_v54 = vpop.permute.xlu2 %1859 }
 0x1b6   : > { %1929 = vst.msk [vmem:[#allocation2 + $0x34] sm:$0xf] %vm1915_vm10, %v1846_v50 }
 0x1b7   : > { %1936 = vst.msk [vmem:[#allocation2 + $0x50] sm:$0xf] %vm1915_vm10, %v1860_v54 }
 0x1ba   : > { %2206 = vrot.lane.b32.xlu0 %v2134_v52, %s9272_s14  ;;  %v8510_v52 = vld [vmem:[%s9363_s9 + $0x64] sm:$0xf] }
 0x1bb   : > { %2208 = vrot.lane.b32.xlu1 %v2138_v56, %s9272_s14  ;;  %2204 = vrot.lane.b32.xlu2 %v2131_v59, %s9272_s14 }
 0x1bc   : > { %v1850_v63 = vpop.permute.xlu0 %1849 }
 0x1bd   : > { %1931 = vst.msk [vmem:[#allocation2 + $0x3c] sm:$0xf] %vm1915_vm10, %v1850_v63  ;;  %v1852_v4 = vpop.permute.xlu1 %1851  ;;  %v1866_v10 = vpop.permute.xlu2 %1865 }
 0x1be   : > { %1932 = vst.msk [vmem:[#allocation2 + $0x40] sm:$0xf] %vm1915_vm10, %v1852_v4 }
 0x1bf   : > { %1939 = vst.msk [vmem:[#allocation2 + $0x5c] sm:$0xf] %vm1915_vm10, %v1866_v10  ;;  %v8529_v10 = vld [vmem:[%s9363_s9 + $0x18] sm:$0xf] }
 0x1c0   : > { %v2531_v2 = vshll.u32 %v8529_v10, 16 }
 0x1c2   : > { %2212 = vrot.lane.b32.xlu0 %v2145_v8, %s9272_s14  ;;  %v8521_v8 = vld [vmem:[%s9363_s9 + $0xa8] sm:$0xf] }
 0x1c3   : > { %2214 = vrot.lane.b32.xlu1 %v2148_v12, %s9272_s14  ;;  %2210 = vrot.lane.b32.xlu2 %v2141_v13, %s9272_s14  ;;  %v2528_v13 = vshrl.u32 %v8529_v10, 16  ;;  %v8528_v10 = vld [vmem:[%s9363_s9 + $0xd0] sm:$0xf] }
 0x1c4   : > { %v1856_v16 = vpop.permute.xlu0 %1855 }
 0x1c5   : > { %1934 = vst.msk [vmem:[#allocation2 + $0x48] sm:$0xf] %vm1915_vm10, %v1856_v16  ;;  %v1858_v17 = vpop.permute.xlu1 %1857  ;;  %v1872_v7 = vpop.permute.xlu2 %1871 }
 0x1c6   : > { %1935 = vst.msk [vmem:[#allocation2 + $0x4c] sm:$0xf] %vm1915_vm10, %v1858_v17  ;;  %v8524_v17 = vld [vmem:[%s9363_s9 + $0xb8] sm:$0xf] }
 0x1c7   : > { %1942 = vst.msk [vmem:[#allocation2 + $0x68] sm:$0xf] %vm1915_vm10, %v1872_v7  ;;  %v2533_v7 = vrot.slane %v2531_v2, 5 }
 0x1ca   : > { %2218 = vrot.lane.b32.xlu0 %v2155_v19, %s9272_s14  ;;  %v2530_v19 = vrot.slane %v2528_v13, 4 }
 0x1cb   : > { %2350 = vrot.lane.b32.xlu1 %v8497_v21, %s9273_s15  ;;  %2216 = vrot.lane.b32.xlu2 %v2152_v23, %s9272_s14  ;;  %v2537_v21 = vshll.u32 %v8530_v15, 16  ;;  %v8522_v23 = vld [vmem:[%s9363_s9 + $0xac] sm:$0xf] }
 0x1cc   : > { %v1862_v25 = vpop.permute.xlu0 %1861 }
 0x1cd   : > { %1937 = vst.msk [vmem:[#allocation2 + $0x54] sm:$0xf] %vm1915_vm10, %v1862_v25  ;;  %v1864_v26 = vpop.permute.xlu1 %1863  ;;  %v1878_v28 = vpop.permute.xlu2 %1877  ;;  %v8533_v25 = vld [vmem:[%s9363_s9 + $0x28] sm:$0xf] }
 0x1ce   : > { %1938 = vst.msk [vmem:[#allocation2 + $0x58] sm:$0xf] %vm1915_vm10, %v1864_v26 }
 0x1cf   : > { %1945 = vst.msk [vmem:[#allocation2 + $0x74] sm:$0xf] %vm1915_vm10, %v1878_v28  ;;  %v2543_v28 = vrot.slane %v2541_v18, 4 }
 0x1d2   : > { %2354 = vrot.lane.b32.xlu0 %v8499_v27, %s9273_s15  ;;  %v8531_v27 = vld [vmem:[%s9363_s9 + $0x20] sm:$0x1] }
 0x1d3   : > { %2356 = vrot.lane.b32.xlu1 %v8500_v29, %s9273_s15  ;;  %2352 = vrot.lane.b32.xlu2 %v8498_v31, %s9273_s15  ;;  %v2534_v29 = vor.u32 %v2533_v7, %v2530_v19 }
 0x1d4   : > { %v1868_v33 = vpop.permute.xlu0 %1867 }
 0x1d5   : > { %1940 = vst.msk [vmem:[#allocation2 + $0x60] sm:$0xf] %vm1915_vm10, %v1868_v33  ;;  %v1870_v34 = vpop.permute.xlu1 %1869  ;;  %v2157_v36 = vpop.permute.xlu2 %2156  ;;  %v8535_v33 = vld [vmem:[%s9363_s9 + $0x30] sm:$0xf] }
 0x1d6   : > { %1941 = vst.msk [vmem:[#allocation2 + $0x64] sm:$0xf] %vm1915_vm10, %v1870_v34  ;;  %v2539_v34 = vrot.slane %v2537_v21, 5  ;;  %v8540_v21 = vld [vmem:[%s9363_s9 + $0x44] sm:$0x1] }
 0x1d7   : > { %2253 = vst.msk [vmem:[#allocation2] sm:$0xf] %vm2252_vm11, %v2157_v36  ;;  %v2565_v36 = vshrl.u32 %v8533_v25, 16 }
 0x1da   : > { %2360 = vrot.lane.b32.xlu0 %v8502_v35, %s9273_s15  ;;  %v2561_v35 = vshll.u32 %v8533_v25, 16 }
 0x1db   : > { %2362 = vrot.lane.b32.xlu1 %v8503_v20, %s9273_s15  ;;  %2358 = vrot.lane.b32.xlu2 %v8501_v24, %s9273_s15  ;;  %v8526_v20 = vld [vmem:[%s9363_s9 + $0xc4] sm:$0xf]  ;;  %v8527_v24 = vld [vmem:[%s9363_s9 + $0xcc] sm:$0xf] }
 0x1dc   : > { %v1874_v37 = vpop.permute.xlu0 %1873 }
 0x1dd   : > { %1943 = vst.msk [vmem:[#allocation2 + $0x6c] sm:$0xf] %vm1915_vm10, %v1874_v37  ;;  %v1876_v38 = vpop.permute.xlu1 %1875  ;;  %v2163_v39 = vpop.permute.xlu2 %2162 }
 0x1de   : > { %1944 = vst.msk [vmem:[#allocation2 + $0x70] sm:$0xf] %vm1915_vm10, %v1876_v38  ;;  %v2547_v38 = vshll.u32 %v8531_v27, 16  ;;  %v8544_v27 = vld [vmem:[%s9363_s9 + $0x54] sm:$0xf] }
 0x1df   : > { %2256 = vst.msk [vmem:[#allocation2 + $0xc] sm:$0xf] %vm2252_vm11, %v2163_v39  ;;  %v2576_v39 = vshrl.u32 %v8535_v33, 16 }
 0x1e2   : > { %2366 = vrot.lane.b32.xlu0 %v8505_v32, %s9273_s15  ;;  %v2544_v32 = vor.u32 %v2543_v28, %v2539_v34 }
 0x1e3   : > { %2368 = vrot.lane.b32.xlu1 %v8506_v30, %s9273_s15  ;;  %2364 = vrot.lane.b32.xlu2 %v8504_v40, %s9273_s15  ;;  %v2579_v30 = vshll.u32 %v8535_v33, 16  ;;  %v8532_v40 = vld [vmem:[%s9363_s9 + $0x24] sm:$0xf] }
 0x1e4   : > { %v1880_v41 = vpop.permute.xlu0 %1879 }
 0x1e5   : > { %1946 = vst.msk [vmem:[#allocation2 + $0x78] sm:$0xf] %vm1915_vm10, %v1880_v41  ;;  %v1882_v42 = vpop.permute.xlu1 %1881  ;;  %v2169_v44 = vpop.permute.xlu2 %2168  ;;  %v2535_v41 = vrot.slane %v2534_v29, 4 }
 0x1e6   : > { %1947 = vst.msk [vmem:[#allocation2 + $0x7c] sm:$0xf] %vm1915_vm10, %v1882_v42  ;;  %v10329_v42 = vrot.slane %v2561_v35, 5 }
 0x1e7   : > { %2259 = vst.msk [vmem:[#allocation2 + $0x18] sm:$0xf] %vm2252_vm11, %v2169_v44  ;;  %v8525_v44 = vld [vmem:[%s9363_s9 + $0xc0] sm:$0xf] }
 0x1ea   : > { %2372 = vrot.lane.b32.xlu0 %v8508_v43, %s9273_s15  ;;  %v2567_v43 = vrot.slane %v2565_v36, 4  ;;  %v2619_v36 = vshll.u32 %v8540_v21, 16 }
 0x1eb   : > { %2374 = vrot.lane.b32.xlu1 %v8509_v45, %s9273_s15  ;;  %2370 = vrot.lane.b32.xlu2 %v8507_v46, %s9273_s15  ;;  %v2552_v45 = vshrl.u32 %v8532_v40, 16  ;;  %v2555_v46 = vshll.u32 %v8532_v40, 16 }
 0x1ec   : > { %v2159_v47 = vpop.permute.xlu0 %2158 }
 0x1ed   : > { %2254 = vst.msk [vmem:[#allocation2 + $0x4] sm:$0xf] %vm2252_vm11, %v2159_v47  ;;  %v2161_v48 = vpop.permute.xlu1 %2160  ;;  %v2175_v50 = vpop.permute.xlu2 %2174  ;;  %v8534_v47 = vld [vmem:[%s9363_s9 + $0x2c] sm:$0x1] }
 0x1ee   : > { %2255 = vst.msk [vmem:[#allocation2 + $0x8] sm:$0xf] %vm2252_vm11, %v2161_v48 }
 0x1ef   : > { %2262 = vst.msk [vmem:[#allocation2 + $0x24] sm:$0xf] %vm2252_vm11, %v2175_v50  ;;  %v2549_v50 = vrot.slane %v2547_v38, 5  ;;  %v2651_v38 = vshll.u32 %v8544_v27, 16 }
 0x1f2   : > { %2378 = vrot.lane.b32.xlu0 %v8511_v49, %s9273_s15  ;;  %v2545_v49 = vrot.slane %v2544_v32, 4  ;;  %v8541_v32 = vld [vmem:[%s9363_s9 + $0x48] sm:$0xf] }
 0x1f3   : > { %2380 = vrot.lane.b32.xlu1 %v8512_v51, %s9273_s15  ;;  %2376 = vrot.lane.b32.xlu2 %v8510_v52, %s9273_s15  ;;  %v8538_v51 = vld [vmem:[%s9363_s9 + $0x3c] sm:$0xf]  ;;  %v2578_v52 = vrot.slane %v2576_v39, 4  ;;  %v2624_v40 = vshrl.u32 %v8541_v32, 16 }
 0x1f4   : > { %v2165_v53 = vpop.permute.xlu0 %2164 }
 0x1f5   : > { %2257 = vst.msk [vmem:[#allocation2 + $0x10] sm:$0xf] %vm2252_vm11, %v2165_v53  ;;  %v2167_v54 = vpop.permute.xlu1 %2166  ;;  %v2181_v56 = vpop.permute.xlu2 %2180  ;;  %v2581_v53 = vrot.slane %v2579_v30, 5 }
 0x1f6   : > { %2258 = vst.msk [vmem:[#allocation2 + $0x14] sm:$0xf] %vm2252_vm11, %v2167_v54 }
 0x1f7   : > { %2265 = vst.msk [vmem:[#allocation2 + $0x30] sm:$0xf] %vm2252_vm11, %v2181_v56  ;;  %v8536_v56 = vld [vmem:[%s9363_s9 + $0x34] sm:$0xf] }
 0x1fa   : > { %2384 = vrot.lane.b32.xlu0 %v8514_v55, %s9273_s15  ;;  %v8539_v55 = vld [vmem:[%s9363_s9 + $0x40] sm:$0xf] }
 0x1fb   : > { %2386 = vrot.lane.b32.xlu1 %v8515_v57, %s9273_s15  ;;  %2382 = vrot.lane.b32.xlu2 %v8513_v58, %s9273_s15  ;;  %v2540_v57 = vsel %vm9373_vm2, %v2535_v41, %v2539_v34  ;;  %v2568_v58 = vor.u32 %v2567_v43, %v10329_v42  ;;  %v2627_v41 = vshll.u32 %v8541_v32, 16 }
 0x1fc   : > { %v2171_v59 = vpop.permute.xlu0 %2170 }
 0x1fd   : > { %2260 = vst.msk [vmem:[#allocation2 + $0x1c] sm:$0xf] %vm2252_vm11, %v2171_v59  ;;  %v2173_v60 = vpop.permute.xlu1 %2172  ;;  %v2187_v63 = vpop.permute.xlu2 %2186  ;;  %v2554_v59 = vrot.slane %v2552_v45, 4 }
 0x1fe   : > { %2261 = vst.msk [vmem:[#allocation2 + $0x20] sm:$0xf] %vm2252_vm11, %v2173_v60  ;;  %v2557_v60 = vrot.slane %v2555_v46, 5 }
 0x1ff   : > { %2268 = vst.msk [vmem:[#allocation2 + $0x3c] sm:$0xf] %vm2252_vm11, %v2187_v63  ;;  %v2600_v63 = vshrl.u32 %v8538_v51, 16 }
 0x200   : > { %v2558_v13 = vor.u32 %v2557_v60, %v2554_v59 }
 0x202   : > { %2390 = vrot.lane.b32.xlu0 %v8517_v61, %s9273_s15  ;;  %v2571_v61 = vshll.u32 %v8534_v47, 16  ;;  %v2559_v28 = vrot.slane %v2558_v13, 4  ;;  %v8543_v47 = vld [vmem:[%s9363_s9 + $0x50] sm:$0x1] }
 0x203   : > { %2392 = vrot.lane.b32.xlu1 %v8518_v0, %s9273_s15  ;;  %2388 = vrot.lane.b32.xlu2 %v8516_v1, %s9273_s15  ;;  %v2603_v0 = vshll.u32 %v8538_v51, 16  ;;  %v2613_v1 = vshrl.u32 %v8539_v55, 16  ;;  %v8547_v51 = vld [vmem:[%s9363_s9 + $0x60] sm:$0xf] }
 0x204   : > { %v2177_v3 = vpop.permute.xlu0 %2176  ;;  %v2573_v2 = vrot.slane %v2571_v61, 5  ;;  %v2564_v43 = vsel %vm9373_vm2, %v2559_v28, %v10329_v42 }
 0x205   : > { %2263 = vst.msk [vmem:[#allocation2 + $0x28] sm:$0xf] %vm2252_vm11, %v2177_v3  ;;  %v2179_v4 = vpop.permute.xlu1 %2178  ;;  %v2193_v5 = vpop.permute.xlu2 %2192  ;;  %v2605_v15 = vrot.slane %v2603_v0, 5  ;;  %v2672_v0 = vshrl.u32 %v8547_v51, 16 }
 0x206   : > { %2264 = vst.msk [vmem:[#allocation2 + $0x2c] sm:$0xf] %vm2252_vm11, %v2179_v4  ;;  %v2550_v4 = vsel %vm9373_vm2, %v2545_v49, %v2549_v50  ;;  %v2621_v50 = vrot.slane %v2619_v36, 5 }
 0x207   : > { %2271 = vst.msk [vmem:[#allocation2 + $0x48] sm:$0xf] %vm2252_vm11, %v2193_v5  ;;  %v2582_v5 = vor.u32 %v2581_v53, %v2578_v52  ;;  %v2653_v53 = vrot.slane %v2651_v38, 5 }
 0x209   : > { %v2583_v19 = vrot.slane %v2582_v5, 4 }
 0x20a   : > { %2396 = vrot.lane.b32.xlu0 %v8520_v6, %s9273_s15  ;;  %v2609_v6 = vshll.u32 %v8539_v55, 16  ;;  %v8545_v55 = vld [vmem:[%s9363_s9 + $0x58] sm:$0xf] }
 0x20b   : > { %2398 = vrot.lane.b32.xlu1 %v8521_v8, %s9273_s15  ;;  %2394 = vrot.lane.b32.xlu2 %v8519_v9, %s9273_s15  ;;  %v2585_v8 = vshll.u32 %v8536_v56, 16  ;;  %v2569_v9 = vrot.slane %v2568_v58, 4  ;;  %v2643_v58 = vshll.u32 %v8543_v47, 16 }
 0x20c   : > { %v2183_v11 = vpop.permute.xlu0 %2182  ;;  %v10350_v18 = vrot.slane %v2609_v6, 5 }
 0x20d   : > { %2266 = vst.msk [vmem:[#allocation2 + $0x34] sm:$0xf] %vm2252_vm11, %v2183_v11  ;;  %v2185_v12 = vpop.permute.xlu1 %2184  ;;  %v2199_v16 = vpop.permute.xlu2 %2198  ;;  %v2589_v11 = vshrl.u32 %v8536_v56, 16  ;;  %v2587_v7 = vrot.slane %v2585_v8, 5  ;;  %v2626_v56 = vrot.slane %v2624_v40, 4  ;;  %v2657_v8 = vshll.u32 %v8545_v55, 16 }
 0x20e   : > { %2267 = vst.msk [vmem:[#allocation2 + $0x38] sm:$0xf] %vm2252_vm11, %v2185_v12  ;;  %v8542_v12 = vld [vmem:[%s9363_s9 + $0x4c] sm:$0xf] }
 0x20f   : > { %2274 = vst.msk [vmem:[#allocation2 + $0x54] sm:$0xf] %vm2252_vm11, %v2199_v16  ;;  %v2615_v16 = vrot.slane %v2613_v1, 4  ;;  %v2633_v25 = vshll.u32 %v8542_v12, 16  ;;  %v2591_v29 = vrot.slane %v2589_v11, 4  ;;  %v2675_v1 = vshll.u32 %v8547_v51, 16 }
 0x210   : > { %v2645_v11 = vrot.slane %v2643_v58, 5  ;;  %v8552_v51 = vld [vmem:[%s9363_s9 + $0x74] sm:$0x1] }
 0x211   : > { %v2616_v35 = vor.u32 %v2615_v16, %v10350_v18  ;;  %v10365_v39 = vrot.slane %v2633_v25, 5  ;;  %v8551_v16 = vld [vmem:[%s9363_s9 + $0x70] sm:$0xf] }
 0x212   : > { %2402 = vrot.lane.b32.xlu0 %v8523_v14, %s9273_s15  ;;  %v2602_v14 = vrot.slane %v2600_v63, 4  ;;  %v8548_v63 = vld [vmem:[%s9363_s9 + $0x64] sm:$0xf] }
 0x213   : > { %2404 = vrot.lane.b32.xlu1 %v8524_v17, %s9273_s15  ;;  %2400 = vrot.lane.b32.xlu2 %v8522_v23, %s9273_s15  ;;  %v2685_v6 = vshrl.u32 %v8548_v63, 16 }
 0x214   : > { %v2189_v26 = vpop.permute.xlu0 %2188  ;;  %v2606_v33 = vor.u32 %v2605_v15, %v2602_v14  ;;  %v2674_v14 = vrot.slane %v2672_v0, 4  ;;  %v2677_v15 = vrot.slane %v2675_v1, 5  ;;  %v2715_v1 = vshll.u32 %v8552_v51, 16 }
 0x215   : > { %2269 = vst.msk [vmem:[#allocation2 + $0x40] sm:$0xf] %vm2252_vm11, %v2189_v26  ;;  %v2191_v31 = vpop.permute.xlu1 %2190  ;;  %v2205_v37 = vpop.permute.xlu2 %2204  ;;  %v2637_v26 = vshrl.u32 %v8542_v12, 16  ;;  %v2681_v12 = vshll.u32 %v8548_v63, 16  ;;  %v2687_v21 = vrot.slane %v2685_v6, 4 }
 0x216   : > { %2270 = vst.msk [vmem:[#allocation2 + $0x44] sm:$0xf] %vm2252_vm11, %v2191_v31  ;;  %v2574_v31 = vsel %vm9373_vm2, %v2569_v9, %v2573_v2  ;;  %v2607_v46 = vrot.slane %v2606_v33, 4  ;;  %v2661_v2 = vshrl.u32 %v8545_v55, 16  ;;  %v2705_v33 = vshll.u32 %v8551_v16, 16 }
 0x217   : > { %2277 = vst.msk [vmem:[#allocation2 + $0x60] sm:$0xf] %vm2252_vm11, %v2205_v37  ;;  %v2648_v37 = vshrl.u32 %v8544_v27, 16  ;;  %v2639_v30 = vrot.slane %v2637_v26, 4  ;;  %v8553_v26 = vld [vmem:[%s9363_s9 + $0x78] sm:$0xf] }
 0x218   : > { %v2612_v61 = vsel %vm9373_vm2, %v2607_v46, %v10350_v18  ;;  %v2683_v28 = vrot.slane %v2681_v12, 5  ;;  %v2720_v38 = vshrl.u32 %v8553_v26, 16  ;;  %v2723_v32 = vshll.u32 %v8553_v26, 16 }
 0x219   : > { %v2650_v52 = vrot.slane %v2648_v37, 4 }
 0x21a   : > { %2408 = vrot.lane.b32.xlu0 %v8526_v20, %s9273_s15  ;;  %v8537_v20 = vld [vmem:[%s9363_s9 + $0x38] sm:$0x1]  ;;  %v2688_v37 = vor.u32 %v2687_v21, %v2683_v28  ;;  %v8558_v21 = vld [vmem:[%s9363_s9 + $0x8c] sm:$0x1] }
 0x21b   : > { %2410 = vrot.lane.b32.xlu1 %v8527_v24, %s9273_s15  ;;  %2406 = vrot.lane.b32.xlu2 %v8525_v44, %s9273_s15  ;;  %v2588_v24 = vsel %vm9373_vm2, %v2583_v19, %v2587_v7  ;;  %v2592_v44 = vor.u32 %v2591_v29, %v2587_v7  ;;  %v2595_v45 = vshll.u32 %v8537_v20, 16  ;;  %v2654_v5 = vor.u32 %v2653_v53, %v2650_v52  ;;  %v8549_v7 = vld [vmem:[%s9363_s9 + $0x68] sm:$0x1]  ;;  %v8546_v20 = vld [vmem:[%s9363_s9 + $0x5c] sm:$0x1] }
 0x21c   : > { %v2195_v48 = vpop.permute.xlu0 %2194  ;;  %v2659_v19 = vrot.slane %v2657_v8, 5  ;;  %v2663_v29 = vrot.slane %v2661_v2, 4  ;;  %v2691_v36 = vshll.u32 %v8549_v7, 16  ;;  %v2689_v52 = vrot.slane %v2688_v37, 4  ;;  %v8555_v37 = vld [vmem:[%s9363_s9 + $0x80] sm:$0x1] }
 0x21d   : > { %2272 = vst.msk [vmem:[#allocation2 + $0x4c] sm:$0xf] %vm2252_vm11, %v2195_v48  ;;  %v2197_v54 = vpop.permute.xlu1 %2196  ;;  %v2211_v3 = vpop.permute.xlu2 %2210  ;;  %v2617_v48 = vrot.slane %v2616_v35, 4  ;;  %v2593_v59 = vrot.slane %v2592_v44, 4  ;;  %v2597_v60 = vrot.slane %v2595_v45, 5  ;;  %v2655_v18 = vrot.slane %v2654_v5, 4 }
 0x21e   : > { %2273 = vst.msk [vmem:[#allocation2 + $0x50] sm:$0xf] %vm2252_vm11, %v2197_v54  ;;  %v2640_v54 = vor.u32 %v2639_v30, %v10365_v39  ;;  %v8550_v30 = vld [vmem:[%s9363_s9 + $0x6c] sm:$0xf]  ;;  %v2667_v44 = vshll.u32 %v8546_v20, 16  ;;  %v2693_v53 = vrot.slane %v2691_v36, 5 }
 0x21f   : > { %2280 = vst.msk [vmem:[#allocation2 + $0x6c] sm:$0xf] %vm2252_vm11, %v2211_v3  ;;  %v2598_v13 = vsel %vm9373_vm2, %v2593_v59, %v2597_v60  ;;  %v2696_v45 = vshrl.u32 %v8550_v30, 16  ;;  %v2699_v46 = vshll.u32 %v8550_v30, 16  ;;  %v2763_v20 = vshll.u32 %v8558_v21, 16 }
 0x220   : > { %v2641_v9 = vrot.slane %v2640_v54, 4  ;;  %v2722_v54 = vrot.slane %v2720_v38, 4  ;;  %v2669_v59 = vrot.slane %v2667_v44, 5  ;;  %v2694_v6 = vsel %vm9373_vm2, %v2689_v52, %v2693_v53 }
 0x221   : > { %v2698_v60 = vrot.slane %v2696_v45, 4 }
 0x222   : > { %2911 = vrot.lane.b32.xlu0 %v2540_v57, %s9274_s16  ;;  %v2629_v57 = vrot.slane %v2627_v41, 5  ;;  %v2646_v27 = vsel %vm9373_vm2, %v2641_v9, %v2645_v11  ;;  %v8556_v41 = vld [vmem:[%s9363_s9 + $0x84] sm:$0xf] }
 0x223   : > { %2913 = vrot.lane.b32.xlu1 %v2550_v4, %s9274_s16  ;;  %2412 = vrot.lane.b32.xlu2 %v8528_v10, %s9273_s15  ;;  %v2622_v4 = vsel %vm9373_vm2, %v2617_v48, %v2621_v50  ;;  %v10409_v48 = vrot.slane %v2705_v33, 5  ;;  %v2744_v55 = vshrl.u32 %v8556_v41, 16 }
 0x224   : > { %v2201_v17 = vpop.permute.xlu0 %2200  ;;  %v2630_v10 = vor.u32 %v2629_v57, %v2626_v56  ;;  %v2747_v56 = vshll.u32 %v8556_v41, 16  ;;  %v8554_v57 = vld [vmem:[%s9363_s9 + $0x7c] sm:$0xf]  ;;  %v8559_v41 = vld [vmem:[%s9363_s9 + $0x90] sm:$0xf] }
 0x225   : > { %2275 = vst.msk [vmem:[#allocation2 + $0x58] sm:$0xf] %vm2252_vm11, %v2201_v17  ;;  %v2203_v23 = vpop.permute.xlu1 %2202  ;;  %v2217_v34 = vpop.permute.xlu2 %2216  ;;  %v2729_v9 = vshll.u32 %v8554_v57, 16  ;;  %v2733_v2 = vshrl.u32 %v8554_v57, 16  ;;  %v2771_v44 = vshll.u32 %v8559_v41, 16 }
 0x226   : > { %2276 = vst.msk [vmem:[#allocation2 + $0x5c] sm:$0xf] %vm2252_vm11, %v2203_v23  ;;  %v2631_v25 = vrot.slane %v2630_v10, 4  ;;  %v2746_v10 = vrot.slane %v2744_v55, 4  ;;  %v2749_v11 = vrot.slane %v2747_v56, 5  ;;  %v2765_v55 = vrot.slane %v2763_v20, 5 }
 0x227   : > { %2283 = vst.msk [vmem:[#allocation2 + $0x78] sm:$0xf] %vm2252_vm11, %v2217_v34  ;;  %v2709_v34 = vshrl.u32 %v8551_v16, 16  ;;  %v2717_v16 = vrot.slane %v2715_v1, 5  ;;  %v2731_v7 = vrot.slane %v2729_v9, 5  ;;  %v2735_v33 = vrot.slane %v2733_v2, 4 }
 0x228   : > { %v2636_v40 = vsel %vm9373_vm2, %v2631_v25, %v10365_v39  ;;  %v2725_v39 = vrot.slane %v2723_v32, 5  ;;  %v2750_v25 = vor.u32 %v2749_v11, %v2746_v10 }
 0x22a   : > { %2917 = vrot.lane.b32.xlu0 %v2574_v31, %s9274_s16  ;;  %v2678_v31 = vor.u32 %v2677_v15, %v2674_v14  ;;  %v2726_v8 = vor.u32 %v2725_v39, %v2722_v54  ;;  %v2751_v45 = vrot.slane %v2750_v25, 4  ;;  %v8561_v39 = vld [vmem:[%s9363_s9 + $0x98] sm:$0x1] }
 0x22b   : > { %2919 = vrot.lane.b32.xlu1 %v2588_v24, %s9274_s16  ;;  %2915 = vrot.lane.b32.xlu2 %v2564_v43, %s9274_s16  ;;  %v2660_v24 = vsel %vm9373_vm2, %v2655_v18, %v2659_v19  ;;  %v2664_v43 = vor.u32 %v2663_v29, %v2659_v19 }
 0x22c   : > { %v2207_v49 = vpop.permute.xlu0 %2206  ;;  %v2679_v47 = vrot.slane %v2678_v31, 4  ;;  %v2727_v19 = vrot.slane %v2726_v8, 4 }
 0x22d   : > { %2278 = vst.msk [vmem:[#allocation2 + $0x64] sm:$0xf] %vm2252_vm11, %v2207_v49  ;;  %v2209_v42 = vpop.permute.xlu1 %2208  ;;  %v2353_v3 = vpop.permute.xlu2 %2352  ;;  %v2711_v49 = vrot.slane %v2709_v34, 4  ;;  %v2665_v58 = vrot.slane %v2664_v43, 4  ;;  %v2768_v43 = vshrl.u32 %v8559_v41, 16 }
 0x22e   : > { %2279 = vst.msk [vmem:[#allocation2 + $0x68] sm:$0xf] %vm2252_vm11, %v2209_v42  ;;  %v2684_v63 = vsel %vm9373_vm2, %v2679_v47, %v2683_v28  ;;  %v2732_v38 = vsel %vm9373_vm2, %v2727_v19, %v2731_v7  ;;  %v2736_v47 = vor.u32 %v2735_v33, %v2731_v7  ;;  %v8568_v41 = vld [vmem:[%s9363_s9 + $0xb4] sm:$0xf] }
 0x22f   : > { %2448 = vst.msk [vmem:[#allocation2 + $0x4] sm:$0xf] %vm2446_vm12, %v2353_v3  ;;  %v2712_v0 = vor.u32 %v2711_v49, %v10409_v48  ;;  %v8557_v3 = vld [vmem:[%s9363_s9 + $0x88] sm:$0xf]  ;;  %v2739_v49 = vshll.u32 %v8555_v37, 16 }
 0x230   : > { %v2757_v5 = vshrl.u32 %v8557_v3, 16  ;;  %v2753_v12 = vshll.u32 %v8557_v3, 16  ;;  %v2787_v3 = vshll.u32 %v8561_v39, 16  ;;  %v8564_v37 = vld [vmem:[%s9363_s9 + $0xa4] sm:$0x1] }
 0x231   : > { %v2713_v15 = vrot.slane %v2712_v0, 4 }
 0x232   : > { %2923 = vrot.lane.b32.xlu0 %v2612_v61, %s9274_s16  ;;  %v2701_v61 = vrot.slane %v2699_v46, 5  ;;  %v2755_v28 = vrot.slane %v2753_v12, 5 }
 0x233   : > { %2925 = vrot.lane.b32.xlu1 %v2622_v4, %s9274_s16  ;;  %2921 = vrot.lane.b32.xlu2 %v2598_v13, %s9274_s16  ;;  %v2670_v13 = vsel %vm9373_vm2, %v2665_v58, %v2669_v59  ;;  %v2718_v34 = vsel %vm9373_vm2, %v2713_v15, %v2717_v16  ;;  %v8563_v58 = vld [vmem:[%s9363_s9 + $0xa0] sm:$0xf]  ;;  %v2770_v59 = vrot.slane %v2768_v43, 4 }
 0x234   : > { %v2213_v17 = vpop.permute.xlu0 %2212  ;;  %v2702_v14 = vor.u32 %v2701_v61, %v2698_v60  ;;  %v2773_v60 = vrot.slane %v2771_v44, 5  ;;  %v2737_v61 = vrot.slane %v2736_v47, 4  ;;  %v2756_v0 = vsel %vm9373_vm2, %v2751_v45, %v2755_v28 }
 0x235   : > { %2281 = vst.msk [vmem:[#allocation2 + $0x70] sm:$0xf] %vm2252_vm11, %v2213_v17  ;;  %v2215_v23 = vpop.permute.xlu1 %2214  ;;  %v2359_v35 = vpop.permute.xlu2 %2358  ;;  %v8560_v17 = vld [vmem:[%s9363_s9 + $0x94] sm:$0xf]  ;;  %v2801_v10 = vshll.u32 %v8563_v58, 16  ;;  %v2805_v15 = vshrl.u32 %v8563_v58, 16 }
 0x236   : > { %2282 = vst.msk [vmem:[#allocation2 + $0x74] sm:$0xf] %vm2252_vm11, %v2215_v23  ;;  %v2759_v23 = vrot.slane %v2757_v5, 4  ;;  %v2777_v29 = vshll.u32 %v8560_v17, 16  ;;  %v2703_v31 = vrot.slane %v2702_v14, 4  ;;  %v2840_v47 = vshrl.u32 %v8568_v41, 16 }
 0x237   : > { %2451 = vst.msk [vmem:[#allocation2 + $0x10] sm:$0xf] %vm2446_vm12, %v2359_v35  ;;  %v2781_v35 = vshrl.u32 %v8560_v17, 16  ;;  %v2789_v17 = vrot.slane %v2787_v3, 5  ;;  %v2803_v21 = vrot.slane %v2801_v10, 5  ;;  %v2807_v33 = vrot.slane %v2805_v15, 4 }
 0x238   : > { %v2760_v32 = vor.u32 %v2759_v23, %v2755_v28  ;;  %v2708_v46 = vsel %vm9373_vm2, %v2703_v31, %v10409_v48  ;;  %v8567_v23 = vld [vmem:[%s9363_s9 + $0xb0] sm:$0x1]  ;;  %v8572_v58 = vld [vmem:[%s9363_s9 + $0xc4] sm:$0xf] }
 0x239   : > { %v2783_v51 = vrot.slane %v2781_v35, 4  ;;  %v2808_v45 = vor.u32 %v2807_v33, %v2803_v21  ;;  %v8575_v3 = vld [vmem:[%s9363_s9 + $0xd0] sm:$0xf] }
 0x23a   : > { %2929 = vrot.lane.b32.xlu0 %v2646_v27, %s9274_s16  ;;  %v8562_v27 = vld [vmem:[%s9363_s9 + $0x9c] sm:$0xf] }
 0x23b   : > { %2931 = vrot.lane.b32.xlu1 %v2660_v24, %s9274_s16  ;;  %2927 = vrot.lane.b32.xlu2 %v2636_v40, %s9274_s16  ;;  %v8565_v24 = vld [vmem:[%s9363_s9 + $0xa8] sm:$0xf]  ;;  %v2792_v30 = vshrl.u32 %v8562_v27, 16  ;;  %v2795_v40 = vshll.u32 %v8562_v27, 16 }
 0x23c   : > { %v2219_v50 = vpop.permute.xlu0 %2218  ;;  %v2816_v52 = vshrl.u32 %v8565_v24, 16  ;;  %v2819_v53 = vshll.u32 %v8565_v24, 16  ;;  %v2835_v24 = vshll.u32 %v8567_v23, 16 }
 0x23d   : > { %2284 = vst.msk [vmem:[#allocation2 + $0x7c] sm:$0xf] %vm2252_vm11, %v2219_v50  ;;  %v2351_v42 = vpop.permute.xlu1 %2350  ;;  %v2365_v4 = vpop.permute.xlu2 %2364  ;;  %v10446_v50 = vrot.slane %v2777_v29, 5  ;;  %v2794_v56 = vrot.slane %v2792_v30, 4  ;;  %v2797_v57 = vrot.slane %v2795_v40, 5 }
 0x23e   : > { %2447 = vst.msk [vmem:[#allocation2] sm:$0xf] %vm2446_vm12, %v2351_v42  ;;  %v2761_v42 = vrot.slane %v2760_v32, 4  ;;  %v2818_v11 = vrot.slane %v2816_v52, 4  ;;  %v2821_v12 = vrot.slane %v2819_v53, 5 }
 0x23f   : > { %2454 = vst.msk [vmem:[#allocation2 + $0x1c] sm:$0xf] %vm2446_vm12, %v2365_v4  ;;  %v2784_v1 = vor.u32 %v2783_v51, %v10446_v50  ;;  %v8566_v4 = vld [vmem:[%s9363_s9 + $0xac] sm:$0xf]  ;;  %v2798_v9 = vor.u32 %v2797_v57, %v2794_v56  ;;  %v8571_v29 = vld [vmem:[%s9363_s9 + $0xc0] sm:$0xf] }
 0x240   : > { %v2766_v5 = vsel %vm9373_vm2, %v2761_v42, %v2765_v55  ;;  %v2829_v8 = vshrl.u32 %v8566_v4, 16  ;;  %v2825_v2 = vshll.u32 %v8566_v4, 16  ;;  %v2864_v30 = vshrl.u32 %v8571_v29, 16  ;;  %v8570_v51 = vld [vmem:[%s9363_s9 + $0xbc] sm:$0x1] }
 0x241   : > { %v2785_v16 = vrot.slane %v2784_v1, 4  ;;  %v2799_v7 = vrot.slane %v2798_v9, 4  ;;  %v2867_v40 = vshll.u32 %v8571_v29, 16  ;;  %v2837_v42 = vrot.slane %v2835_v24, 5  ;;  %v8574_v55 = vld [vmem:[%s9363_s9 + $0xcc] sm:$0xf] }
 0x242   : > { %2935 = vrot.lane.b32.xlu0 %v2684_v63, %s9274_s16  ;;  %v2741_v63 = vrot.slane %v2739_v49, 5  ;;  %v2831_v25 = vrot.slane %v2829_v8, 4  ;;  %v2827_v31 = vrot.slane %v2825_v2, 5  ;;  %v2843_v49 = vshll.u32 %v8568_v41, 16  ;;  %v8578_v41 = vld [vmem:[%s9363_s9 + $0x1c] sm:$0xf] }
 0x243   : > { %2937 = vrot.lane.b32.xlu1 %v2694_v6, %s9274_s16  ;;  %2933 = vrot.lane.b32.xlu2 %v2670_v13, %s9274_s16  ;;  %v2774_v13 = vor.u32 %v2773_v60, %v2770_v59  ;;  %v2866_v56 = vrot.slane %v2864_v30, 4  ;;  %v2809_v59 = vrot.slane %v2808_v45, 4  ;;  %v2859_v1 = vshll.u32 %v8570_v51, 16 }
 0x244   : > { %v2355_v18 = vpop.permute.xlu0 %2354  ;;  %v2742_v14 = vsel %vm9373_vm2, %v2737_v61, %v2741_v63  ;;  %v2832_v32 = vor.u32 %v2831_v25, %v2827_v31  ;;  %v2842_v61 = vrot.slane %v2840_v47, 4  ;;  %v2845_v63 = vrot.slane %v2843_v49, 5 }
 0x245   : > { %2449 = vst.msk [vmem:[#allocation2 + $0x8] sm:$0xf] %vm2446_vm12, %v2355_v18  ;;  %v2357_v26 = vpop.permute.xlu1 %2356  ;;  %v2371_v36 = vpop.permute.xlu2 %2370  ;;  %v8569_v18 = vld [vmem:[%s9363_s9 + $0xb8] sm:$0xf]  ;;  %v2775_v28 = vrot.slane %v2774_v13, 4  ;;  %v2888_v4 = vshrl.u32 %v8574_v55, 16 }
 0x246   : > { %2450 = vst.msk [vmem:[#allocation2 + $0xc] sm:$0xf] %vm2446_vm12, %v2357_v26  ;;  %v2822_v26 = vor.u32 %v2821_v12, %v2818_v11  ;;  %v2849_v35 = vshll.u32 %v8569_v18, 16  ;;  %v2833_v39 = vrot.slane %v2832_v32, 4  ;;  %v2901_v9 = vshrl.u32 %v8575_v3, 16 }
 0x247   : > { %2457 = vst.msk [vmem:[#allocation2 + $0x28] sm:$0xf] %vm2446_vm12, %v2371_v36  ;;  %v2853_v36 = vshrl.u32 %v8569_v18, 16  ;;  %v2780_v44 = vsel %vm9373_vm2, %v2775_v28, %v10446_v50  ;;  %v2869_v50 = vrot.slane %v2867_v40, 5  ;;  %v2873_v11 = vshll.u32 %v8572_v58, 16 }
 0x248   : > { %v2823_v43 = vrot.slane %v2822_v26, 4  ;;  %v10483_v52 = vrot.slane %v2849_v35, 5  ;;  %v2838_v8 = vsel %vm9373_vm2, %v2833_v39, %v2837_v42  ;;  %v2897_v12 = vshll.u32 %v8575_v3, 16  ;;  %v8576_v26 = vld [vmem:[%s9363_s9 + $0xd4] sm:$0x1] }
 0x249   : > { %v2855_v53 = vrot.slane %v2853_v36, 4  ;;  %v2870_v10 = vor.u32 %v2869_v50, %v2866_v56  ;;  %v2877_v2 = vshrl.u32 %v8572_v58, 16  ;;  %v2903_v23 = vrot.slane %v2901_v9, 4  ;;  %v8573_v35 = vld [vmem:[%s9363_s9 + $0xc8] sm:$0x1] }
 0x24a   : > { %2941 = vrot.lane.b32.xlu0 %v2718_v34, %s9274_s16  ;;  %v2790_v34 = vsel %vm9373_vm2, %v2785_v16, %v2789_v17  ;;  %v2828_v57 = vsel %vm9373_vm2, %v2823_v43, %v2827_v31  ;;  %v2861_v16 = vrot.slane %v2859_v1, 5  ;;  %v2890_v17 = vrot.slane %v2888_v4, 4  ;;  %v8580_v39 = vld [vmem:[%s9363_s9 + $0x24] sm:$0xe]  ;;  %v8581_v42 = vld [vmem:[%s9363_s9 + $0x28] sm:$0xf] }
 0x24b   : > { %2943 = vrot.lane.b32.xlu1 %v2732_v38, %s9274_s16  ;;  %2939 = vrot.lane.b32.xlu2 %v2708_v46, %s9274_s16  ;;  %v2804_v38 = vsel %vm9373_vm2, %v2799_v7, %v2803_v21  ;;  %v2811_v46 = vshll.u32 %v8564_v37, 16  ;;  %v2871_v7 = vrot.slane %v2870_v10, 4  ;;  %v2875_v21 = vrot.slane %v2873_v11, 5 }
 0x24c   : > { %v2361_v54 = vpop.permute.xlu0 %2360  ;;  %v2879_v29 = vrot.slane %v2877_v2, 4  ;;  %v2907_v24 = vshll.u32 %v8576_v26, 16  ;;  %v2883_v32 = vshll.u32 %v8573_v35, 16  ;;  %v3138_v51 = vrot.slane %v8578_v41, 5  ;;  %v8582_v2 = vld [vmem:[%s9363_s9 + $0x2c] sm:$0x1] }
 0x24d   : > { %2452 = vst.msk [vmem:[#allocation2 + $0x14] sm:$0xf] %vm2446_vm12, %v2361_v54  ;;  %v2363_v48 = vpop.permute.xlu1 %2362  ;;  %v2377_v6 = vpop.permute.xlu2 %2376  ;;  %v2813_v60 = vrot.slane %v2811_v46, 5  ;;  %v2876_v36 = vsel %vm9373_vm2, %v2871_v7, %v2875_v21  ;;  %v8626_v58 = vrot.slane %v8580_v39, 9 }
 0x24e   : > { %2453 = vst.msk [vmem:[#allocation2 + $0x18] sm:$0xf] %vm2446_vm12, %v2363_v48  ;;  %v2885_v47 = vrot.slane %v2883_v32, 5  ;;  %v3140_v56 = vrot.slane %v3138_v51, 4 }
 0x24f   : > { %2460 = vst.msk [vmem:[#allocation2 + $0x34] sm:$0xf] %vm2446_vm12, %v2377_v6  ;;  %v2891_v6 = vshll.u32 %v8574_v55, 16  ;;  %v2814_v13 = vsel %vm9373_vm2, %v2809_v59, %v2813_v60  ;;  %v3145_v59 = vrot.slane %v8581_v42, 5  ;;  %v8592_v42 = vld [vmem:[%s9363_s9 + $0x54] sm:$0xe] }
 0x251   : > { %v2893_v18 = vrot.slane %v2891_v6, 5  ;;  %v3146_v3 = vsel %vm9532_vm6, %v8626_v58, %v3145_v59  ;;  %v8583_v6 = vld [vmem:[%s9363_s9 + $0x30] sm:$0xe] }
 0x252   : > { %2947 = vrot.lane.b32.xlu0 %v2756_v0, %s9274_s16  ;;  %v2856_v0 = vor.u32 %v2855_v53, %v10483_v52  ;;  %v8579_v53 = vld [vmem:[%s9363_s9 + $0x20] sm:$0x1]  ;;  %v8627_v9 = vrot.slane %v8583_v6, 9 }
 0x253   : > { %2949 = vrot.lane.b32.xlu1 %v2766_v5, %s9274_s16  ;;  %2945 = vrot.lane.b32.xlu2 %v2742_v14, %s9274_s16  ;;  %v2846_v14 = vor.u32 %v2845_v63, %v2842_v61  ;;  %v2894_v33 = vor.u32 %v2893_v18, %v2890_v17  ;;  %v3141_v50 = vrot.slane %v8579_v53, 5  ;;  %v8584_v61 = vld [vmem:[%s9363_s9 + $0x34] sm:$0xf]  ;;  %v8594_v53 = vld [vmem:[%s9363_s9 + $0x5c] sm:$0x1] }
 0x254   : > { %v2367_v19 = vpop.permute.xlu0 %2366  ;;  %v2857_v15 = vrot.slane %v2856_v0, 4  ;;  %v3152_v4 = vrot.slane %v8584_v61, 5  ;;  %v3176_v39 = vrot.slane %v8594_v53, 5 }
 0x255   : > { %2455 = vst.msk [vmem:[#allocation2 + $0x20] sm:$0xf] %vm2446_vm12, %v2367_v19  ;;  %v2369_v27 = vpop.permute.xlu1 %2368  ;;  %v2383_v20 = vpop.permute.xlu2 %2382  ;;  %v2847_v28 = vrot.slane %v2846_v14, 4  ;;  %v2895_v30 = vrot.slane %v2894_v33, 4  ;;  %v3142_v0 = vsel %vm9532_vm6, %v3140_v56, %v3141_v50  ;;  %v3147_v14 = vrot.slane %v3145_v59, 4 }
 0x256   : > { %2456 = vst.msk [vmem:[#allocation2 + $0x24] sm:$0xf] %vm2446_vm12, %v2369_v27  ;;  %v2899_v27 = vrot.slane %v2897_v12, 5  ;;  %v2862_v31 = vsel %vm9373_vm2, %v2857_v15, %v2861_v16  ;;  %v3154_v11 = vrot.slane %v3152_v4, 4  ;;  %v3148_v15 = vrot.slane %v8582_v2, 5 }
 0x257   : > { %2463 = vst.msk [vmem:[#allocation2 + $0x40] sm:$0xf] %vm2446_vm12, %v2383_v20  ;;  %v2852_v37 = vsel %vm9373_vm2, %v2847_v28, %v10483_v52  ;;  %v3153_v17 = vsel %vm9532_vm6, %v8627_v9, %v3152_v4  ;;  %v8630_v50 = vrot.slane %v8592_v42, 9  ;;  %v8596_v4 = vld [vmem:[%s9363_s9 + $0x64] sm:$0xf] }
 0x258   : > { %v2904_v20 = vor.u32 %v2903_v23, %v2899_v27  ;;  %v2900_v49 = vsel %vm9373_vm2, %v2895_v30, %v2899_v27 }
 0x25a   : > { %2953 = vrot.lane.b32.xlu0 %v2790_v34, %s9274_s16  ;;  %v2905_v43 = vrot.slane %v2904_v20, 4 }
 0x25b   : > { %2955 = vrot.lane.b32.xlu1 %v2804_v38, %s9274_s16  ;;  %2951 = vrot.lane.b32.xlu2 %v2780_v44, %s9274_s16  ;;  %v2880_v38 = vor.u32 %v2879_v29, %v2875_v21  ;;  %v2909_v44 = vrot.slane %v2907_v24, 5  ;;  %v8587_v21 = vld [vmem:[%s9363_s9 + $0x40] sm:$0xf]  ;;  %v8589_v24 = vld [vmem:[%s9363_s9 + $0x48] sm:$0xe] }
 0x25c   : > { %v2373_v54 = vpop.permute.xlu0 %2372  ;;  %v3159_v26 = vrot.slane %v8587_v21, 5  ;;  %v3413_v21 = vld [vmem:[%s12286_s1 + $0x10] sm:$0x3] }
 0x25d   : > { %2458 = vst.msk [vmem:[#allocation2 + $0x2c] sm:$0xf] %vm2446_vm12, %v2373_v54  ;;  %v2375_v48 = vpop.permute.xlu1 %2374  ;;  %v2389_v5 = vpop.permute.xlu2 %2388  ;;  %v2881_v46 = vrot.slane %v2880_v38, 4  ;;  %v2910_v54 = vsel %vm9373_vm2, %v2905_v43, %v2909_v44  ;;  %v8629_v38 = vrot.slane %v8589_v24, 9  ;;  %v8586_v44 = vld [vmem:[%s9363_s9 + $0x3c] sm:$0xe] }
 0x25e   : > { %2459 = vst.msk [vmem:[#allocation2 + $0x30] sm:$0xf] %vm2446_vm12, %v2375_v48  ;;  %v3161_v29 = vrot.slane %v3159_v26, 4  ;;  %v9078_v24 = vld [vmem:[%s12286_s1] sm:$0xff] }
 0x25f   : > { %2466 = vst.msk [vmem:[#allocation2 + $0x4c] sm:$0xf] %vm2446_vm12, %v2389_v5  ;;  %v2886_v55 = vsel %vm9373_vm2, %v2881_v46, %v2885_v47  ;;  %v8585_v5 = vld [vmem:[%s9363_s9 + $0x38] sm:$0x1] }
 0x260   : > { %v3155_v12 = vrot.slane %v8585_v5, 5  ;;  %v8597_v5 = vld [vmem:[%s9363_s9 + $0x68] sm:$0x1] }
 0x261   : > { %v3183_v9 = vrot.slane %v8597_v5, 5  ;;  %v8608_v5 = vld [vmem:[%s9363_s9 + $0x94] sm:$0xf] }
 0x262   : > { %2959 = vrot.lane.b32.xlu0 %v2828_v57, %s9274_s16  ;;  %v8577_v57 = vld [vmem:[%s9363_s9 + $0x18] sm:$0xe]  ;;  %v3156_v18 = vsel %vm9532_vm6, %v3154_v11, %v3155_v12 }
 0x263   : > { %2961 = vrot.lane.b32.xlu1 %v2838_v8, %s9274_s16  ;;  %2957 = vrot.lane.b32.xlu2 %v2814_v13, %s9274_s16  ;;  %v8625_v63 = vrot.slane %v8577_v57, 9 }
 0x264   : > { %v2379_v19 = vpop.permute.xlu0 %2378 }
 0x265   : > { %2461 = vst.msk [vmem:[#allocation2 + $0x38] sm:$0xf] %vm2446_vm12, %v2379_v19  ;;  %v2381_v25 = vpop.permute.xlu1 %2380  ;;  %v2395_v34 = vpop.permute.xlu2 %2394  ;;  %v3139_v8 = vsel %vm9532_vm6, %v8625_v63, %v3138_v51  ;;  %v3149_v19 = vsel %vm9532_vm6, %v3147_v14, %v3148_v15  ;;  %v8593_v51 = vld [vmem:[%s9363_s9 + $0x58] sm:$0xf] }
 0x266   : > { %2462 = vst.msk [vmem:[#allocation2 + $0x3c] sm:$0xf] %vm2446_vm12, %v2381_v25  ;;  %v8588_v25 = vld [vmem:[%s9363_s9 + $0x44] sm:$0x1] }
 0x267   : > { %2469 = vst.msk [vmem:[#allocation2 + $0x58] sm:$0xf] %vm2446_vm12, %v2395_v34  ;;  %v3162_v27 = vrot.slane %v8588_v25, 5  ;;  %v3507_v25 = vunpack.c.l.b16 %v3413_v21 }
 0x26a   : > { %2965 = vrot.lane.b32.xlu0 %v2862_v31, %s9274_s16  ;;  %v3163_v31 = vsel %vm9532_vm6, %v3161_v29, %v3162_v27  ;;  %v3510_v27 = vpack.c.b16 %v3507_v25, %v3507_v25 }
 0x26b   : > { %2967 = vrot.lane.b32.xlu1 %v2876_v36, %s9274_s16  ;;  %2963 = vrot.lane.b32.xlu2 %v2852_v37, %s9274_s16  ;;  %v8590_v37 = vld [vmem:[%s9363_s9 + $0x4c] sm:$0xf] }
 0x26c   : > { %v2385_v40 = vpop.permute.xlu0 %2384  ;;  %v3166_v32 = vrot.slane %v8590_v37, 5 }
 0x26d   : > { %2464 = vst.msk [vmem:[#allocation2 + $0x44] sm:$0xf] %vm2446_vm12, %v2385_v40  ;;  %v2387_v45 = vpop.permute.xlu1 %2386  ;;  %v2401_v52 = vpop.permute.xlu2 %2400 }
 0x26e   : > { %2465 = vst.msk [vmem:[#allocation2 + $0x48] sm:$0xf] %vm2446_vm12, %v2387_v45  ;;  %v3167_v40 = vsel %vm9532_vm6, %v8629_v38, %v3166_v32  ;;  %v8628_v45 = vrot.slane %v8586_v44, 9  ;;  %v3168_v61 = vrot.slane %v3166_v32, 4  ;;  %v8602_v38 = vld [vmem:[%s9363_s9 + $0x7c] sm:$0xf] }
 0x26f   : > { %2472 = vst.msk [vmem:[#allocation2 + $0x64] sm:$0xf] %vm2446_vm12, %v2401_v52 }
 0x270   : > { %v3160_v47 = vsel %vm9532_vm6, %v8628_v45, %v3159_v26 }
 0x272   : > { %2971 = vrot.lane.b32.xlu0 %v2900_v49, %s9274_s16 }
 0x273   : > { %2973 = vrot.lane.b32.xlu1 %v2910_v54, %s9274_s16  ;;  %2969 = vrot.lane.b32.xlu2 %v2886_v55, %s9274_s16  ;;  %v3173_v54 = vrot.slane %v8593_v51, 5 }
 0x274   : > { %v2391_v48 = vpop.permute.xlu0 %2390 }
 0x275   : > { %2467 = vst.msk [vmem:[#allocation2 + $0x50] sm:$0xf] %vm2446_vm12, %v2391_v48  ;;  %v2393_v60 = vpop.permute.xlu1 %2392  ;;  %v2407_v1 = vpop.permute.xlu2 %2406  ;;  %v3175_v56 = vrot.slane %v3173_v54, 4  ;;  %v3174_v48 = vsel %vm9532_vm6, %v8630_v50, %v3173_v54  ;;  %v8605_v50 = vld [vmem:[%s9363_s9 + $0x88] sm:$0xf] }
 0x276   : > { %2468 = vst.msk [vmem:[#allocation2 + $0x54] sm:$0xf] %vm2446_vm12, %v2393_v60  ;;  %v8591_v60 = vld [vmem:[%s9363_s9 + $0x50] sm:$0x1] }
 0x277   : > { %2475 = vst.msk [vmem:[#allocation2 + $0x70] sm:$0xf] %vm2446_vm12, %v2407_v1  ;;  %v3177_v57 = vsel %vm9532_vm6, %v3175_v56, %v3176_v39  ;;  %v3169_v63 = vrot.slane %v8591_v60, 5 }
 0x279   : > { %v3170_v1 = vsel %vm9532_vm6, %v3168_v61, %v3169_v63 }
 0x27a   : > { %3250 = vrot.lane.b32.xlu0 %v3142_v0, %s9275_s17 }
 0x27b   : > { %3252 = vrot.lane.b32.xlu1 %v3146_v3, %s9275_s17  ;;  %3248 = vrot.lane.b32.xlu2 %v3139_v8, %s9275_s17  ;;  %v3180_v8 = vrot.slane %v8596_v4, 5 }
 0x27c   : > { %v2397_v10 = vpop.permute.xlu0 %2396 }
 0x27d   : > { %2470 = vst.msk [vmem:[#allocation2 + $0x5c] sm:$0xf] %vm2446_vm12, %v2397_v10  ;;  %v2399_v13 = vpop.permute.xlu1 %2398  ;;  %v2413_v16 = vpop.permute.xlu2 %2412  ;;  %v3182_v11 = vrot.slane %v3180_v8, 4 }
 0x27e   : > { %2471 = vst.msk [vmem:[#allocation2 + $0x60] sm:$0xf] %vm2446_vm12, %v2399_v13 }
 0x27f   : > { %2478 = vst.msk [vmem:[#allocation2 + $0x7c] sm:$0xf] %vm2446_vm12, %v2413_v16  ;;  %v3184_v12 = vsel %vm9532_vm6, %v3182_v11, %v3183_v9  ;;  %v3208_v9 = vrot.slane %v8608_v5, 5 }
 0x282   : > { %3256 = vrot.lane.b32.xlu0 %v3153_v17, %s9275_s17  ;;  %v8598_v17 = vld [vmem:[%s9363_s9 + $0x6c] sm:$0xe] }
 0x283   : > { %3258 = vrot.lane.b32.xlu1 %v3156_v18, %s9275_s17  ;;  %3254 = vrot.lane.b32.xlu2 %v3149_v19, %s9275_s17  ;;  %v8599_v18 = vld [vmem:[%s9363_s9 + $0x70] sm:$0xf]  ;;  %v8632_v19 = vrot.slane %v8598_v17, 9 }
 0x284   : > { %v2403_v7 = vpop.permute.xlu0 %2402 }
 0x285   : > { %2473 = vst.msk [vmem:[#allocation2 + $0x68] sm:$0xf] %vm2446_vm12, %v2403_v7  ;;  %v2405_v23 = vpop.permute.xlu1 %2404  ;;  %v2916_v28 = vpop.permute.xlu2 %2915  ;;  %v3187_v7 = vrot.slane %v8599_v18, 5  ;;  %v8612_v18 = vld [vmem:[%s9363_s9 + $0xa4] sm:$0x1] }
 0x286   : > { %2474 = vst.msk [vmem:[#allocation2 + $0x6c] sm:$0xf] %vm2446_vm12, %v2405_v23 }
 0x287   : > { %3010 = vst.msk [vmem:[#allocation2 + $0x8] sm:$0xf] %vm3007_vm13, %v2916_v28  ;;  %v3188_v26 = vsel %vm9532_vm6, %v8632_v19, %v3187_v7  ;;  %v3564_v28 = vsel %vm3562_vm14, %v3510_v27, 0  ;;  %v8610_v19 = vld [vmem:[%s9363_s9 + $0x9c] sm:$0xe] }
 0x288   : > { %3571 = vmatpush.bf16.msra.mxu0 %v3564_v28  ;;  %v8636_v25 = vrot.slane %v8610_v19, 9 }
 0x28a   : > { %3262 = vrot.lane.b32.xlu0 %v3163_v31, %s9275_s17 }
 0x28b   : > { %3264 = vrot.lane.b32.xlu1 %v3167_v40, %s9275_s17  ;;  %3260 = vrot.lane.b32.xlu2 %v3160_v47, %s9275_s17  ;;  %v8603_v40 = vld [vmem:[%s9363_s9 + $0x80] sm:$0x1]  ;;  %v8600_v47 = vld [vmem:[%s9363_s9 + $0x74] sm:$0x1] }
 0x28c   : > { %v2409_v33 = vpop.permute.xlu0 %2408  ;;  %v3197_v45 = vrot.slane %v8603_v40, 5  ;;  %v3190_v51 = vrot.slane %v8600_v47, 5 }
 0x28d   : > { %2476 = vst.msk [vmem:[#allocation2 + $0x74] sm:$0xf] %vm2446_vm12, %v2409_v33  ;;  %v2411_v34 = vpop.permute.xlu1 %2410  ;;  %v2922_v35 = vpop.permute.xlu2 %2921  ;;  %v9079_v33 = vld [vmem:[%s12286_s1 + $0x8] sm:$0xff] }
 0x28e   : > { %2477 = vst.msk [vmem:[#allocation2 + $0x78] sm:$0xf] %vm2446_vm12, %v2411_v34  ;;  %v8595_v34 = vld [vmem:[%s9363_s9 + $0x60] sm:$0xe]  ;;  %3572 = vmatpush.bf16.msra.mxu0 %v9079_v33 }
 0x28f   : > { %3013 = vst.msk [vmem:[#allocation2 + $0x14] sm:$0xf] %vm3007_vm13, %v2922_v35  ;;  %v8631_v35 = vrot.slane %v8595_v34, 9 }
 0x292   : > { %3268 = vrot.lane.b32.xlu0 %v3174_v48, %s9275_s17  ;;  %3573 = vmatpush.bf16.msra.mxu0 %v9078_v24  ;;  %v3201_v48 = vrot.slane %v8605_v50, 5  ;;  %v8615_v24 = vld [vmem:[%s9363_s9 + $0xb0] sm:$0x1]  ;;  %v8619_v50 = vld [vmem:[%s9363_s9 + $0xc0] sm:$0xe] }
 0x293   : > { %3270 = vrot.lane.b32.xlu1 %v3177_v57, %s9275_s17  ;;  %3266 = vrot.lane.b32.xlu2 %v3170_v1, %s9275_s17 }
 0x294   : > { %v2912_v36 = vpop.permute.xlu0 %2911 }
 0x295   : > { %3008 = vst.msk [vmem:[#allocation2] sm:$0xf] %vm3007_vm13, %v2912_v36  ;;  %v2914_v20 = vpop.permute.xlu1 %2913  ;;  %v2928_v30 = vpop.permute.xlu2 %2927 }
 0x296   : > { %3009 = vst.msk [vmem:[#allocation2 + $0x4] sm:$0xf] %vm3007_vm13, %v2914_v20  ;;  %v3181_v20 = vsel %vm9532_vm6, %v8631_v35, %v3180_v8 }
 0x297   : > { %3016 = vst.msk [vmem:[#allocation2 + $0x20] sm:$0xf] %vm3007_vm13, %v2928_v30  ;;  %v3194_v30 = vrot.slane %v8602_v38, 5  ;;  %v3225_v38 = vrot.slane %v8615_v24, 5 }
 0x299   : > { %v3196_v44 = vrot.slane %v3194_v30, 4 }
 0x29a   : > { %3274 = vrot.lane.b32.xlu0 %v3184_v12, %s9275_s17 }
 0x29b   : > { %3276 = vrot.lane.b32.xlu1 %v3188_v26, %s9275_s17  ;;  %3272 = vrot.lane.b32.xlu2 %v3181_v20, %s9275_s17  ;;  %v3210_v26 = vrot.slane %v3208_v9, 4 }
 0x29c   : > { %v2918_v41 = vpop.permute.xlu0 %2917 }
 0x29d   : > { %3011 = vst.msk [vmem:[#allocation2 + $0xc] sm:$0xf] %vm3007_vm13, %v2918_v41  ;;  %v2920_v43 = vpop.permute.xlu1 %2919  ;;  %v2934_v46 = vpop.permute.xlu2 %2933  ;;  %v8601_v41 = vld [vmem:[%s9363_s9 + $0x78] sm:$0xe] }
 0x29e   : > { %3012 = vst.msk [vmem:[#allocation2 + $0x10] sm:$0xf] %vm3007_vm13, %v2920_v43 }
 0x29f   : > { %3019 = vst.msk [vmem:[#allocation2 + $0x2c] sm:$0xf] %vm3007_vm13, %v2934_v46  ;;  %v8633_v46 = vrot.slane %v8601_v41, 9 }
 0x2a1   : > { %v3195_v53 = vsel %vm9532_vm6, %v8633_v46, %v3194_v30 }
 0x2a2   : > { %3280 = vrot.lane.b32.xlu0 %v3195_v53, %s9275_s17 }
 0x2a4   : > { %v2924_v49 = vpop.permute.xlu0 %2923 }
 0x2a5   : > { %3014 = vst.msk [vmem:[#allocation2 + $0x18] sm:$0xf] %vm3007_vm13, %v2924_v49  ;;  %v2926_v52 = vpop.permute.xlu1 %2925  ;;  %v2940_v55 = vpop.permute.xlu2 %2939  ;;  %v3189_v49 = vrot.slane %v3187_v7, 4  ;;  %v8609_v7 = vld [vmem:[%s9363_s9 + $0x98] sm:$0x1] }
 0x2a6   : > { %3015 = vst.msk [vmem:[#allocation2 + $0x1c] sm:$0xf] %vm3007_vm13, %v2926_v52  ;;  %v3198_v52 = vsel %vm9532_vm6, %v3196_v44, %v3197_v45  ;;  %v3211_v27 = vrot.slane %v8609_v7, 5  ;;  %v8617_v44 = vld [vmem:[%s9363_s9 + $0xb8] sm:$0xf] }
 0x2a7   : > { %3022 = vst.msk [vmem:[#allocation2 + $0x38] sm:$0xf] %vm3007_vm13, %v2940_v55  ;;  %3282 = vrot.lane.b32.xlu1 %v3198_v52, %s9275_s17  ;;  %v3191_v54 = vsel %vm9532_vm6, %v3189_v49, %v3190_v51  ;;  %v8613_v45 = vld [vmem:[%s9363_s9 + $0xa8] sm:$0xe]  ;;  %v3229_v47 = vrot.slane %v8617_v44, 5 }
 0x2a8   : > { %3278 = vrot.lane.b32.xlu2 %v3191_v54, %s9275_s17  ;;  %v8637_v49 = vrot.slane %v8613_v45, 9 }
 0x2ac   : > { %v2930_v58 = vpop.permute.xlu0 %2929 }
 0x2ad   : > { %3017 = vst.msk [vmem:[#allocation2 + $0x24] sm:$0xf] %vm3007_vm13, %v2930_v58  ;;  %v2932_v59 = vpop.permute.xlu1 %2931  ;;  %v2946_v0 = vpop.permute.xlu2 %2945  ;;  %v8606_v58 = vld [vmem:[%s9363_s9 + $0x8c] sm:$0x1] }
 0x2ae   : > { %3018 = vst.msk [vmem:[#allocation2 + $0x28] sm:$0xf] %vm3007_vm13, %v2932_v59  ;;  %v3203_v59 = vrot.slane %v3201_v48, 4  ;;  %v3204_v60 = vrot.slane %v8606_v58, 5 }
 0x2af   : > { %3025 = vst.msk [vmem:[#allocation2 + $0x44] sm:$0xf] %vm3007_vm13, %v2946_v0 }
 0x2b0   : > { %v3205_v61 = vsel %vm9532_vm6, %v3203_v59, %v3204_v60  ;;  %v8639_v60 = vrot.slane %v8619_v50, 9 }
 0x2b1   : > { %3286 = vrot.lane.b32.xlu0 %v3205_v61, %s9275_s17  ;;  %v3231_v61 = vrot.slane %v3229_v47, 4 }
 0x2b4   : > { %v2936_v3 = vpop.permute.xlu0 %2935 }
 0x2b5   : > { %3020 = vst.msk [vmem:[#allocation2 + $0x30] sm:$0xf] %vm3007_vm13, %v2936_v3  ;;  %v2938_v6 = vpop.permute.xlu1 %2937  ;;  %v2952_v10 = vpop.permute.xlu2 %2951 }
 0x2b6   : > { %3021 = vst.msk [vmem:[#allocation2 + $0x34] sm:$0xf] %vm3007_vm13, %v2938_v6  ;;  %v8607_v6 = vld [vmem:[%s9363_s9 + $0x90] sm:$0xe] }
 0x2b7   : > { %3028 = vst.msk [vmem:[#allocation2 + $0x50] sm:$0xf] %vm3007_vm13, %v2952_v10  ;;  %v8635_v8 = vrot.slane %v8607_v6, 9  ;;  %v8604_v10 = vld [vmem:[%s9363_s9 + $0x84] sm:$0xe] }
 0x2b8   : > { %v8634_v11 = vrot.slane %v8604_v10, 9  ;;  %v8623_v10 = vld [vmem:[%s9363_s9 + $0xd0] sm:$0xf] }
 0x2b9   : > { %v3209_v12 = vsel %vm9532_vm6, %v8635_v8, %v3208_v9 }
 0x2ba   : > { %3288 = vrot.lane.b32.xlu1 %v3209_v12, %s9275_s17  ;;  %v8624_v12 = vld [vmem:[%s9363_s9 + $0xd4] sm:$0x1] }
 0x2bc   : > { %v2942_v13 = vpop.permute.xlu0 %2941 }
 0x2bd   : > { %3023 = vst.msk [vmem:[#allocation2 + $0x3c] sm:$0xf] %vm3007_vm13, %v2942_v13  ;;  %v2944_v2 = vpop.permute.xlu1 %2943  ;;  %v2958_v14 = vpop.permute.xlu2 %2957  ;;  %v3202_v13 = vsel %vm9532_vm6, %v8634_v11, %v3201_v48  ;;  %v8618_v48 = vld [vmem:[%s9363_s9 + $0xbc] sm:$0x1]  ;;  %v3243_v11 = vrot.slane %v8623_v10, 5 }
 0x2be   : > { %3024 = vst.msk [vmem:[#allocation2 + $0x40] sm:$0xf] %vm3007_vm13, %v2944_v2  ;;  %3284 = vrot.lane.b32.xlu2 %v3202_v13, %s9275_s17 }
 0x2bf   : > { %3031 = vst.msk [vmem:[#allocation2 + $0x5c] sm:$0xf] %vm3007_vm13, %v2958_v14  ;;  %v3245_v13 = vrot.slane %v3243_v11, 4 }
 0x2c4   : > { %v2948_v15 = vpop.permute.xlu0 %2947 }
 0x2c5   : > { %3026 = vst.msk [vmem:[#allocation2 + $0x48] sm:$0xf] %vm3007_vm13, %v2948_v15  ;;  %v2950_v16 = vpop.permute.xlu1 %2949  ;;  %v2964_v23 = vpop.permute.xlu2 %2963 }
 0x2c6   : > { %3027 = vst.msk [vmem:[#allocation2 + $0x4c] sm:$0xf] %vm3007_vm13, %v2950_v16  ;;  %v8611_v16 = vld [vmem:[%s9363_s9 + $0xa0] sm:$0xf] }
 0x2c7   : > { %3034 = vst.msk [vmem:[#allocation2 + $0x68] sm:$0xf] %vm3007_vm13, %v2964_v23  ;;  %v3215_v17 = vrot.slane %v8611_v16, 5  ;;  %v3218_v23 = vrot.slane %v8612_v18, 5  ;;  %v9276_v16 = vmov 0  }
 0x2c8   : > { %3690 = vst.msk [vmem:[#allocation3 + $0x8] sm:$0xf] %vm3687_vm1, %v9276_v16  ;;  %v8622_v18 = vld [vmem:[%s9363_s9 + $0xcc] sm:$0xe] }
 0x2c9   : > { %v3217_v21 = vrot.slane %v3215_v17, 4  ;;  %3689 = vst.msk [vmem:[#allocation3 + $0x4] sm:$0xf] %vm3687_vm1, %v9276_v16  ;;  %v8640_v19 = vrot.slane %v8622_v18, 9 }
 0x2ca   : > { %3691 = vst.msk [vmem:[#allocation3 + $0xc] sm:$0xf] %vm3687_vm1, %v9276_v16 }
 0x2cb   : > { %v3219_v28 = vsel %vm9532_vm6, %v3217_v21, %v3218_v23  ;;  %3692 = vst.msk [vmem:[#allocation3 + $0x10] sm:$0xf] %vm3687_vm1, %v9276_v16  ;;  %v3244_v7 = vsel %vm9532_vm6, %v8640_v19, %v3243_v11 }
 0x2cc   : > { %v2954_v29 = vpop.permute.xlu0 %2953  ;;  %3294 = vrot.lane.b32.xlu1 %v3219_v28, %s9275_s17  ;;  %3696 = vst.msk [vmem:[#allocation3 + $0x19c] sm:$0xf] %vm3687_vm1, %v9276_v16 }
 0x2cd   : > { %3029 = vst.msk [vmem:[#allocation2 + $0x54] sm:$0xf] %vm3007_vm13, %v2954_v29  ;;  %v2956_v31 = vpop.permute.xlu1 %2955  ;;  %v2970_v36 = vpop.permute.xlu2 %2969  ;;  %v3216_v29 = vsel %vm9532_vm6, %v8636_v25, %v3215_v17 }
 0x2ce   : > { %3030 = vst.msk [vmem:[#allocation2 + $0x58] sm:$0xf] %vm3007_vm13, %v2956_v31  ;;  %3292 = vrot.lane.b32.xlu0 %v3216_v29, %s9275_s17  ;;  %v3212_v31 = vsel %vm9532_vm6, %v3210_v26, %v3211_v27 }
 0x2cf   : > { %3037 = vst.msk [vmem:[#allocation2 + $0x74] sm:$0xf] %vm3007_vm13, %v2970_v36  ;;  %3290 = vrot.lane.b32.xlu2 %v3212_v31, %s9275_s17  ;;  %v8614_v36 = vld [vmem:[%s9363_s9 + $0xac] sm:$0xf]  ;;  %v4297_v21 = vld [vmem:[#allocation3 + $0x8] sm:$0xf] }
 0x2d0   : > { %v3222_v20 = vrot.slane %v8614_v36, 5  ;;  %3697 = vst.msk [vmem:[#allocation3 + $0x1a0] sm:$0xf] %vm3687_vm1, %v9276_v16 }
 0x2d1   : > { %3698 = vst.msk [vmem:[#allocation3 + $0x1a4] sm:$0xf] %vm3687_vm1, %v9276_v16 }
 0x2d2   : > { %v3223_v52 = vsel %vm9532_vm6, %v8637_v49, %v3222_v20  ;;  %3699 = vst.msk [vmem:[#allocation3 + $0x1a8] sm:$0xf] %vm3687_vm1, %v9276_v16  ;;  %v9145_v49 = vld [vmem:[%s12288_s3 + $0x88] sm:$0xff] }
 0x2d3   : > { %3703 = vst.msk [vmem:[#allocation3 + $0x1c] sm:$0xf] %vm3687_vm1, %v9276_v16  ;;  %8106 = vmatpush.bf16.msra.mxu3 %v9145_v49 }
 0x2d4   : > { %v2960_v37 = vpop.permute.xlu0 %2959  ;;  %3705 = vst.msk [vmem:[#allocation3 + $0x34] sm:$0xf] %vm3687_vm1, %v9276_v16 }
 0x2d5   : > { %3032 = vst.msk [vmem:[#allocation2 + $0x60] sm:$0xf] %vm3007_vm13, %v2960_v37  ;;  %v2962_v32 = vpop.permute.xlu1 %2961  ;;  %v3249_v43 = vpop.permute.xlu2 %3248  ;;  %v3224_v37 = vrot.slane %v3222_v20, 4 }
 0x2d6   : > { %3033 = vst.msk [vmem:[#allocation2 + $0x64] sm:$0xf] %vm3007_vm13, %v2962_v32 }
 0x2d7   : > { %3345 = vst.msk [vmem:[#allocation2] sm:$0xf] %vm3344_vm15, %v3249_v43  ;;  %v3226_v32 = vsel %vm9532_vm6, %v3224_v37, %v3225_v38  ;;  %v8616_v43 = vld [vmem:[%s9363_s9 + $0xb4] sm:$0xe]  ;;  %3296 = vrot.lane.b32.xlu2 %v3223_v52, %s9275_s17  ;;  %v4298_v37 = vld [vmem:[#allocation3 + $0xc] sm:$0xf] }
 0x2d8   : > { %3298 = vrot.lane.b32.xlu0 %v3226_v32, %s9275_s17  ;;  %v8638_v46 = vrot.slane %v8616_v43, 9  ;;  %3707 = vst.msk [vmem:[#allocation3 + $0x4c] sm:$0xf] %vm3687_vm1, %v9276_v16 }
 0x2d9   : > { %3709 = vst.msk [vmem:[#allocation3 + $0x64] sm:$0xf] %vm3687_vm1, %v9276_v16 }
 0x2da   : > { %v3230_v51 = vsel %vm9532_vm6, %v8638_v46, %v3229_v47  ;;  %3711 = vst.msk [vmem:[#allocation3 + $0x7c] sm:$0xf] %vm3687_vm1, %v9276_v16 }
 0x2db   : > { %3300 = vrot.lane.b32.xlu1 %v3230_v51, %s9275_s17  ;;  %3713 = vst.msk [vmem:[#allocation3 + $0x94] sm:$0xf] %vm3687_vm1, %v9276_v16 }
 0x2dc   : > { %v2966_v39 = vpop.permute.xlu0 %2965  ;;  %3715 = vst.msk [vmem:[#allocation3 + $0xac] sm:$0xf] %vm3687_vm1, %v9276_v16 }
 0x2dd   : > { %3035 = vst.msk [vmem:[#allocation2 + $0x6c] sm:$0xf] %vm3007_vm13, %v2966_v39  ;;  %v2968_v42 = vpop.permute.xlu1 %2967  ;;  %v3255_v55 = vpop.permute.xlu2 %3254 }
 0x2de   : > { %3036 = vst.msk [vmem:[#allocation2 + $0x70] sm:$0xf] %vm3007_vm13, %v2968_v42  ;;  %v8620_v42 = vld [vmem:[%s9363_s9 + $0xc4] sm:$0xf] }
 0x2df   : > { %3348 = vst.msk [vmem:[#allocation2 + $0xc] sm:$0xf] %vm3344_vm15, %v3255_v55  ;;  %v3236_v55 = vrot.slane %v8620_v42, 5 }
 0x2e0   : > { %3717 = vst.msk [vmem:[#allocation3 + $0xc4] sm:$0xf] %vm3687_vm1, %v9276_v16 }
 0x2e1   : > { %v3238_v58 = vrot.slane %v3236_v55, 4  ;;  %3719 = vst.msk [vmem:[#allocation3 + $0xdc] sm:$0xf] %vm3687_vm1, %v9276_v16 }
 0x2e2   : > { %3721 = vst.msk [vmem:[#allocation3 + $0xf4] sm:$0xf] %vm3687_vm1, %v9276_v16 }
 0x2e3   : > { %3723 = vst.msk [vmem:[#allocation3 + $0x10c] sm:$0xf] %vm3687_vm1, %v9276_v16 }
 0x2e4   : > { %v2972_v56 = vpop.permute.xlu0 %2971  ;;  %3725 = vst.msk [vmem:[#allocation3 + $0x124] sm:$0xf] %vm3687_vm1, %v9276_v16 }
 0x2e5   : > { %3038 = vst.msk [vmem:[#allocation2 + $0x78] sm:$0xf] %vm3007_vm13, %v2972_v56  ;;  %v2974_v57 = vpop.permute.xlu1 %2973  ;;  %v3261_v2 = vpop.permute.xlu2 %3260  ;;  %v8621_v56 = vld [vmem:[%s9363_s9 + $0xc8] sm:$0x1] }
 0x2e6   : > { %3039 = vst.msk [vmem:[#allocation2 + $0x7c] sm:$0xf] %vm3007_vm13, %v2974_v57  ;;  %v3239_v59 = vrot.slane %v8621_v56, 5  ;;  %v3833_v56 = vld [vmem:[#allocation3 + $0x1c] sm:$0x8] }
 0x2e7   : > { %3351 = vst.msk [vmem:[#allocation2 + $0x18] sm:$0xf] %vm3344_vm15, %v3261_v2  ;;  %v3246_v2 = vrot.slane %v8624_v12, 5 }
 0x2e8   : > { %3727 = vst.msk [vmem:[#allocation3 + $0x13c] sm:$0xf] %vm3687_vm1, %v9276_v16 }
 0x2e9   : > { %3729 = vst.msk [vmem:[#allocation3 + $0x154] sm:$0xf] %vm3687_vm1, %v9276_v16 }
 0x2ea   : > { %3731 = vst.msk [vmem:[#allocation3 + $0x16c] sm:$0xf] %vm3687_vm1, %v9276_v16 }
 0x2eb   : > { %3733 = vst.msk [vmem:[#allocation3 + $0x184] sm:$0xf] %vm3687_vm1, %v9276_v16 }
 0x2ec   : > { %v3251_v63 = vpop.permute.xlu0 %3250  ;;  %3734 = vst.msk [vmem:[#allocation3 + $0x28] sm:$0xf] %vm3687_vm1, %v9276_v16 }
 0x2ed   : > { %3346 = vst.msk [vmem:[#allocation2 + $0x4] sm:$0xf] %vm3344_vm15, %v3251_v63  ;;  %v3253_v0 = vpop.permute.xlu1 %3252  ;;  %v3267_v33 = vpop.permute.xlu2 %3266  ;;  %v3232_v63 = vrot.slane %v8618_v48, 5 }
 0x2ee   : > { %3347 = vst.msk [vmem:[#allocation2 + $0x8] sm:$0xf] %vm3344_vm15, %v3253_v0  ;;  %v3240_v0 = vsel %vm9532_vm6, %v3238_v58, %v3239_v59  ;;  %v3836_v58 = vld [vmem:[#allocation3 + $0x34] sm:$0x8] }
 0x2ef   : > { %3354 = vst.msk [vmem:[#allocation2 + $0x24] sm:$0xf] %vm3344_vm15, %v3267_v33  ;;  %3306 = vrot.lane.b32.xlu1 %v3240_v0, %s9275_s17 }
 0x2f0   : > { %3736 = vst.msk [vmem:[#allocation3 + $0x40] sm:$0xf] %vm3687_vm1, %v9276_v16 }
 0x2f1   : > { %3738 = vst.msk [vmem:[#allocation3 + $0x58] sm:$0xf] %vm3687_vm1, %v9276_v16 }
 0x2f2   : > { %3740 = vst.msk [vmem:[#allocation3 + $0x70] sm:$0xf] %vm3687_vm1, %v9276_v16 }
 0x2f3   : > { %3742 = vst.msk [vmem:[#allocation3 + $0x88] sm:$0xf] %vm3687_vm1, %v9276_v16 }
 0x2f4   : > { %v9062_v1 = vld [vmem:[#allocation2] sm:$0xff]  ;;  %v3257_v3 = vpop.permute.xlu0 %3256  ;;  %3744 = vst.msk [vmem:[#allocation3 + $0xa0] sm:$0xf] %vm3687_vm1, %v9276_v16 }
 0x2f5   : > { %v3259_v4 = vpop.permute.xlu1 %3258  ;;  %3349 = vst.msk [vmem:[#allocation2 + $0x10] sm:$0xf] %vm3344_vm15, %v3257_v3  ;;  %8713 = vmatmul.msk.bf16.vlgmr.msra.gmra.mxu0 %vm3513_vm0, %v9062_v1  ;;  %v9063_v15 = vld [vmem:[#allocation2 + $0x8] sm:$0xff]  ;;  %v3273_v53 = vpop.permute.xlu2 %3272  ;;  %v3237_v1 = vsel %vm9532_vm6, %v8639_v60, %v3236_v55  ;;  %v3233_v3 = vsel %vm9532_vm6, %v3231_v61, %v3232_v63  ;;  %v9144_v55 = vld [vmem:[%s12288_s3 + $0x80] sm:$0xff] }
 0x2f6   : > { %3350 = vst.msk [vmem:[#allocation2 + $0x14] sm:$0xf] %vm3344_vm15, %v3259_v4  ;;  %3304 = vrot.lane.b32.xlu0 %v3237_v1, %s9275_s17  ;;  %3302 = vrot.lane.b32.xlu2 %v3233_v3, %s9275_s17 }
 0x2f7   : > { %3357 = vst.msk [vmem:[#allocation2 + $0x30] sm:$0xf] %vm3344_vm15, %v3273_v53  ;;  %4361 = vrot.lane.b32.xlu1 %v4297_v21, %s9275_s17  ;;  %v6927_v48 = vld [vmem:[#allocation3 + $0x40] sm:$0x1]  ;;  %8107 = vmatpush.bf16.msra.mxu3 %v9144_v55 }
 0x2f8   : > { %3746 = vst.msk [vmem:[#allocation3 + $0xb8] sm:$0xf] %vm3687_vm1, %v9276_v16  ;;  %v6993_v3 = vshll.u32 %v6927_v48, 16  ;;  %v10880_v18 = vld [vmem:[#allocation3 + $0x58] sm:$0x1] }
 0x2f9   : > { %3748 = vst.msk [vmem:[#allocation3 + $0xd0] sm:$0xf] %vm3687_vm1, %v9276_v16 }
 0x2fa   : > { %3750 = vst.msk [vmem:[#allocation3 + $0xe8] sm:$0xf] %vm3687_vm1, %v9276_v16 }
 0x2fb   : > { %3752 = vst.msk [vmem:[#allocation3 + $0x100] sm:$0xf] %vm3687_vm1, %v9276_v16 }
 0x2fc   : > { %v3263_v14 = vpop.permute.xlu0 %3262  ;;  %3754 = vst.msk [vmem:[#allocation3 + $0x118] sm:$0xf] %vm3687_vm1, %v9276_v16 }
 0x2fd   : > { %3352 = vst.msk [vmem:[#allocation2 + $0x1c] sm:$0xf] %vm3344_vm15, %v3263_v14  ;;  %v3265_v34 = vpop.permute.xlu1 %3264  ;;  %v9064_v35 = vld [vmem:[#allocation2 + $0x10] sm:$0xff]  ;;  %v3247_v14 = vsel %vm9532_vm6, %v3245_v13, %v3246_v2  ;;  %vm7873_vm6 = vcmask 261120  }
 0x2fe   : > { %3353 = vst.msk [vmem:[#allocation2 + $0x20] sm:$0xf] %vm3344_vm15, %v3265_v34  ;;  %3310 = vrot.lane.b32.xlu0 %v3247_v14, %s9275_s17  ;;  %3308 = vrot.lane.b32.xlu2 %v3244_v7, %s9275_s17  ;;  %v10873_v14 = vrot.slane %v6993_v3, 5 }
 0x2ff   : > { %3756 = vst.msk [vmem:[#allocation3 + $0x130] sm:$0xf] %vm3687_vm1, %v9276_v16 }
 0x300   : > { %3758 = vst.msk [vmem:[#allocation3 + $0x148] sm:$0xf] %vm3687_vm1, %v9276_v16 }
 0x301   : > { %3760 = vst.msk [vmem:[#allocation3 + $0x160] sm:$0xf] %vm3687_vm1, %v9276_v16 }
 0x302   : > { %v3279_v57 = vpop.permute.xlu2 %3278  ;;  %3762 = vst.msk [vmem:[#allocation3 + $0x178] sm:$0xf] %vm3687_vm1, %v9276_v16 }
 0x303   : > { %3360 = vst.msk [vmem:[#allocation2 + $0x3c] sm:$0xf] %vm3344_vm15, %v3279_v57 }
 0x304   : > { %v3269_v40 = vpop.permute.xlu0 %3268  ;;  %v9065_v41 = vld [vmem:[#allocation2 + $0x18] sm:$0xff]  ;;  %3764 = vst.msk [vmem:[#allocation3 + $0x190] sm:$0xf] %vm3687_vm1, %v9276_v16 }
 0x305   : > { %8714 = vmatmul.msk.bf16.gmra.mxu0 %vm3513_vm0, %v9063_v15  ;;  %v3271_v30 = vpop.permute.xlu1 %3270  ;;  %3355 = vst.msk [vmem:[#allocation2 + $0x28] sm:$0xf] %vm3344_vm15, %v3269_v40  ;;  %v9066_v39 = vld [vmem:[#allocation2 + $0x20] sm:$0xff] }
 0x306   : > { %3356 = vst.msk [vmem:[#allocation2 + $0x2c] sm:$0xf] %vm3344_vm15, %v3271_v30  ;;  %4363 = vrot.lane.b32.xlu2 %v4298_v37, %s9275_s17 }
 0x30c   : > { %v3275_v54 = vpop.permute.xlu0 %3274 }
 0x30d   : > { %3358 = vst.msk [vmem:[#allocation2 + $0x34] sm:$0xf] %vm3344_vm15, %v3275_v54  ;;  %v3277_v4 = vpop.permute.xlu1 %3276  ;;  %v9067_v6 = vld [vmem:[#allocation2 + $0x28] sm:$0xff] }
 0x30e   : > { %3359 = vst.msk [vmem:[#allocation2 + $0x38] sm:$0xf] %vm3344_vm15, %v3277_v4  ;;  %v3926_v4 = vshrl.u32 %v3836_v58, 16 }
 0x314   : > { %v3281_v8 = vpop.permute.xlu0 %3280  ;;  %v9068_v9 = vld [vmem:[#allocation2 + $0x30] sm:$0xff] }
 0x315   : > { %8715 = vmatmul.msk.bf16.gmra.mxu0 %vm3513_vm0, %v9064_v35  ;;  %3361 = vst.msk [vmem:[#allocation2 + $0x40] sm:$0xf] %vm3344_vm15, %v3281_v8  ;;  %v9069_v23 = vld [vmem:[#allocation2 + $0x38] sm:$0xff] }
 0x318   : > { %v3285_v15 = vpop.permute.xlu2 %3284 }
 0x319   : > { %v3283_v5 = vpop.permute.xlu1 %3282  ;;  %3363 = vst.msk [vmem:[#allocation2 + $0x48] sm:$0xf] %vm3344_vm15, %v3285_v15  ;;  %v10875_v15 = vrot.slane %v3926_v4, 11 }
 0x31a   : > { %3362 = vst.msk [vmem:[#allocation2 + $0x44] sm:$0xf] %vm3344_vm15, %v3283_v5 }
 0x321   : > { %v9070_v25 = vld [vmem:[#allocation2 + $0x40] sm:$0xff] }
 0x323   : > { %v3287_v17 = vpop.permute.xlu0 %3286 }
 0x324   : > { %3364 = vst.msk [vmem:[#allocation2 + $0x4c] sm:$0xf] %vm3344_vm15, %v3287_v17 }
 0x325   : > { %8716 = vmatmul.msk.bf16.gmra.mxu0 %vm3513_vm0, %v9065_v41 }
 0x329   : > { %v3291_v57 = vpop.permute.xlu2 %3290 }
 0x32a   : > { %3366 = vst.msk [vmem:[#allocation2 + $0x54] sm:$0xf] %vm3344_vm15, %v3291_v57 }
 0x32b   : > { %v9071_v24 = vld [vmem:[#allocation2 + $0x48] sm:$0xff] }
 0x32c   : > { %v3289_v47 = vpop.permute.xlu1 %3288 }
 0x32d   : > { %3365 = vst.msk [vmem:[#allocation2 + $0x50] sm:$0xf] %vm3344_vm15, %v3289_v47 }
 0x331   : > { %v3297_v17 = vpop.permute.xlu2 %3296 }
 0x332   : > { %3369 = vst.msk [vmem:[#allocation2 + $0x60] sm:$0xf] %vm3344_vm15, %v3297_v17 }
 0x335   : > { %8717 = vmatmul.msk.bf16.gmra.mxu0 %vm3513_vm0, %v9066_v39 }
 0x33e   : > { %v3295_v5 = vpop.permute.xlu1 %3294 }
 0x33f   : > { %3368 = vst.msk [vmem:[#allocation2 + $0x5c] sm:$0xf] %vm3344_vm15, %v3295_v5 }
 0x340   : > { %v3293_v0 = vpop.permute.xlu0 %3292 }
 0x341   : > { %3367 = vst.msk [vmem:[#allocation2 + $0x58] sm:$0xf] %vm3344_vm15, %v3293_v0 }
 0x345   : > { %8718 = vmatmul.msk.bf16.gmra.mxu0 %vm3513_vm0, %v9067_v6  ;;  %v3904_v6 = vshrl.u32 %v3833_v56, 16 }
 0x347   : > { %v10877_v16 = vrot.slane %v3904_v6, 11 }
 0x34d   : > { %v3301_v5 = vpop.permute.xlu1 %3300 }
 0x34e   : > { %3371 = vst.msk [vmem:[#allocation2 + $0x68] sm:$0xf] %vm3344_vm15, %v3301_v5 }
 0x355   : > { %8719 = vmatmul.msk.bf16.gmra.mxu0 %vm3513_vm0, %v9068_v9 }
 0x365   : > { %8720 = vmatmul.msk.bf16.gmra.mxu0 %vm3513_vm0, %v9069_v23 }
 0x372   : > { %v3575_v26 = vpop.f32.mrf.mxu0 }
 0x373   : > { %v3576_v27 = vadd.f32 %v10780_v62, %v3575_v26 }
 0x375   : > { %v3655_v28 = vmax.f32 %v3576_v27, 0.0  ;;  %8721 = vmatmul.msk.bf16.gmra.mxu0 %vm3513_vm0, %v9070_v25 }
 0x377   : > { %v3766_v29 = vpack.c.bf16 %v3655_v28, %v3655_v28  ;;  %v9072_v28 = vld [vmem:[#allocation2 + $0x50] sm:$0xff] }
 0x379   : > { %3798 = vst.msk [vmem:[#allocation3 + $0x20] sm:$0xf] %vm3687_vm1, %v3766_v29  ;;  %v3299_v29 = vpop.permute.xlu0 %3298 }
 0x37a   : > { %v3577_v31 = vpop.f32.mrf.mxu0  ;;  %3370 = vst.msk [vmem:[#allocation2 + $0x64] sm:$0xf] %vm3344_vm15, %v3299_v29 }
 0x37b   : > { %v3578_v33 = vadd.f32 %v10780_v62, %v3577_v31 }
 0x37d   : > { %v3656_v34 = vmax.f32 %v3578_v33, 0.0 }
 0x37f   : > { %v3767_v35 = vpack.c.bf16 %v3656_v34, %v3656_v34  ;;  %v7017_v34 = vshll.u32 %v10880_v18, 16 }
 0x380   : > { %v4299_v36 = vld [vmem:[#allocation3 + $0x20] sm:$0xf] }
 0x381   : > { %3799 = vst.msk [vmem:[#allocation3 + $0x24] sm:$0xf] %vm3687_vm1, %v3767_v35  ;;  %4365 = vrot.lane.b32.xlu0 %v4299_v36, %s9275_s17  ;;  %v10849_v51 = vld [vmem:[#allocation3 + $0x20] sm:$0xf] }
 0x382   : > { %v3580_v20 = vpop.f32.mrf.mxu0  ;;  %v3909_v50 = vshrl.u32 %v10849_v51, 16  ;;  %v3912_v13 = vshll.u32 %v10849_v51, 16 }
 0x383   : > { %v3581_v41 = vadd.f32 %v10780_v62, %v3580_v20 }
 0x384   : > { %v10865_v9 = vrot.slane %v3909_v50, 7 }
 0x385   : > { %8722 = vmatmul.msk.bf16.gmra.mxu0 %vm3513_vm0, %v9071_v24  ;;  %v3657_v44 = vmax.f32 %v3581_v41, 0.0 }
 0x386   : > { %v3916_v19 = vrot.slane %v10865_v9, 4 }
 0x387   : > { %v3768_v54 = vpack.c.bf16 %v3657_v44, %v3657_v44  ;;  %v10894_v44 = vor.u32 %v3912_v13, %v10865_v9 }
 0x388   : > { %v4300_v38 = vld [vmem:[#allocation3 + $0x24] sm:$0xf] }
 0x389   : > { %4367 = vrot.lane.b32.xlu1 %v4300_v38, %s9275_s17  ;;  %3800 = vst.msk [vmem:[#allocation3 + $0x38] sm:$0xf] %vm3687_vm1, %v3768_v54  ;;  %v10868_v11 = vld [vmem:[#allocation3 + $0x24] sm:$0xf] }
 0x38a   : > { %v3582_v32 = vpop.f32.mrf.mxu0  ;;  %v3918_v7 = vshrl.u32 %v10868_v11, 16  ;;  %v3921_v36 = vshll.u32 %v10868_v11, 16 }
 0x38b   : > { %v3583_v43 = vadd.f32 %v10780_v62, %v3582_v32 }
 0x38d   : > { %v3658_v52 = vmax.f32 %v3583_v43, 0.0 }
 0x38f   : > { %v3769_v59 = vpack.c.bf16 %v3658_v52, %v3658_v52 }
 0x390   : > { %v6925_v21 = vld [vmem:[#allocation3 + $0x38] sm:$0xf] }
 0x391   : > { %3801 = vst.msk [vmem:[#allocation3 + $0x3c] sm:$0xf] %vm3687_vm1, %v3769_v59  ;;  %v4301_v23 = vld [vmem:[#allocation3 + $0x38] sm:$0xf]  ;;  %v6974_v25 = vshrl.u32 %v6925_v21, 16  ;;  %v6977_v26 = vshll.u32 %v6925_v21, 16 }
 0x392   : > { %v3585_v30 = vpop.f32.mrf.mxu0  ;;  %4369 = vrot.lane.b32.xlu2 %v4301_v23, %s9275_s17  ;;  %v3837_v27 = vld [vmem:[#allocation3 + $0x38] sm:$0xf] }
 0x393   : > { %v3586_v45 = vadd.f32 %v10780_v62, %v3585_v30  ;;  %v3931_v35 = vshrl.u32 %v3837_v27, 16  ;;  %v6976_v20 = vrot.slane %v6974_v25, 4  ;;  %v6979_v24 = vrot.slane %v6977_v26, 5 }
 0x394   : > { %v3934_v54 = vshll.u32 %v3837_v27, 16 }
 0x395   : > { %v3659_v39 = vmax.f32 %v3586_v45, 0.0  ;;  %8723 = vmatmul.msk.bf16.gmra.mxu0 %vm3513_vm0, %v9072_v28  ;;  %v6980_v45 = vor.u32 %v6979_v24, %v6976_v20  ;;  %v6933_v28 = vld [vmem:[#allocation3 + $0x70] sm:$0x1] }
 0x397   : > { %v3770_v61 = vpack.c.bf16 %v3659_v39, %v3659_v39  ;;  %v6981_v39 = vrot.slane %v6980_v45, 4 }
 0x398   : > { %v6926_v37 = vld [vmem:[#allocation3 + $0x3c] sm:$0xf] }
 0x399   : > { %3802 = vst.msk [vmem:[#allocation3 + $0x50] sm:$0xf] %vm3687_vm1, %v3770_v61  ;;  %v4302_v38 = vld [vmem:[#allocation3 + $0x3c] sm:$0xf]  ;;  %v6983_v30 = vshll.u32 %v6926_v37, 16  ;;  %v3303_v61 = vpop.permute.xlu2 %3302 }
 0x39a   : > { %v3587_v40 = vpop.f32.mrf.mxu0  ;;  %4371 = vrot.lane.b32.xlu0 %v4302_v38, %s9275_s17  ;;  %3372 = vst.msk [vmem:[#allocation2 + $0x6c] sm:$0xf] %vm3344_vm15, %v3303_v61  ;;  %v3305_v61 = vpop.permute.xlu0 %3304 }
 0x39b   : > { %v3588_v53 = vadd.f32 %v10780_v62, %v3587_v40  ;;  %v6987_v40 = vshrl.u32 %v6926_v37, 16  ;;  %v6985_v51 = vrot.slane %v6983_v30, 5  ;;  %v7041_v30 = vshll.u32 %v6933_v28, 16  ;;  %3373 = vst.msk [vmem:[#allocation2 + $0x70] sm:$0xf] %vm3344_vm15, %v3305_v61 }
 0x39d   : > { %v3660_v60 = vmax.f32 %v3588_v53, 0.0  ;;  %v6989_v52 = vrot.slane %v6987_v40, 4  ;;  %v10899_v53 = vrot.slane %v3931_v35, 7  ;;  %v6986_v4 = vsel %vm9373_vm2, %v6981_v39, %v6985_v51 }
 0x39e   : > { %7389 = vst.msk [vmem:[#allocation4 + $0x8] sm:$0xf] %vm3687_vm1, %v6986_v4 }
 0x39f   : > { %v3771_v10 = vpack.c.bf16 %v3660_v60, %v3660_v60  ;;  %v6990_v57 = vor.u32 %v6989_v52, %v6985_v51  ;;  %v3938_v9 = vrot.slane %v10899_v53, 4 }
 0x3a0   : > { %v6928_v41 = vld [vmem:[#allocation3 + $0x50] sm:$0xf] }
 0x3a1   : > { %3803 = vst.msk [vmem:[#allocation3 + $0x54] sm:$0xf] %vm3687_vm1, %v3771_v10  ;;  %v4303_v43 = vld [vmem:[#allocation3 + $0x50] sm:$0xf]  ;;  %v7001_v47 = vshll.u32 %v6928_v41, 16  ;;  %v3309_v61 = vpop.permute.xlu2 %3308 }
 0x3a2   : > { %v3590_v46 = vpop.f32.mrf.mxu0  ;;  %4373 = vrot.lane.b32.xlu1 %v4303_v43, %s9275_s17  ;;  %v10935_v40 = vld [vmem:[#allocation3 + $0x50] sm:$0xf]  ;;  %3375 = vst.msk [vmem:[#allocation2 + $0x78] sm:$0xf] %vm3344_vm15, %v3309_v61 }
 0x3a3   : > { %v3591_v42 = vadd.f32 %v10780_v62, %v3590_v46  ;;  %v6998_v46 = vshrl.u32 %v6928_v41, 16  ;;  %v7003_v55 = vrot.slane %v7001_v47, 5 }
 0x3a5   : > { %v3661_v63 = vmax.f32 %v3591_v42, 0.0  ;;  %v7000_v42 = vrot.slane %v6998_v46, 4 }
 0x3a7   : > { %v3772_v12 = vpack.c.bf16 %v3661_v63, %v3661_v63  ;;  %v3936_v63 = vor.u32 %v3934_v54, %v10899_v53  ;;  %v7004_v0 = vor.u32 %v7003_v55, %v7000_v42  ;;  %v8787_v54 = vld [vmem:[#allocation4 + $0x8] sm:$0xf]  ;;  %v7043_v55 = vrot.slane %v7041_v30, 5 }
 0x3a8   : > { %v6929_v56 = vld [vmem:[#allocation3 + $0x54] sm:$0xf] }
 0x3a9   : > { %3804 = vst.msk [vmem:[#allocation3 + $0x68] sm:$0xf] %vm3687_vm1, %v3772_v12  ;;  %v7007_v48 = vshll.u32 %v6929_v56, 16  ;;  %v7011_v58 = vshrl.u32 %v6929_v56, 16  ;;  %v4304_v60 = vld [vmem:[#allocation3 + $0x54] sm:$0xf]  ;;  %v3937_v29 = vsel %vm10913_vm5, %v10875_v15, %v3936_v63  ;;  %v3915_v15 = vsel %vm10913_vm5, %v10877_v16, %v10894_v44 }
 0x3aa   : > { %v3592_v1 = vpop.f32.mrf.mxu0  ;;  %4375 = vrot.lane.b32.xlu2 %v4304_v60, %s9275_s17  ;;  %v7005_v17 = vrot.slane %v7004_v0, 4  ;;  %4269 = vst.msk [vmem:[#allocation4 + $0x30] sm:$0xf] %vm3687_vm1, %v3937_v29  ;;  %v3953_v56 = vshrl.u32 %v10935_v40, 16  ;;  %v3307_v60 = vpop.permute.xlu1 %3306  ;;  %v3841_v5 = vld [vmem:[#allocation3 + $0x54] sm:$0xf] }
 0x3ab   : > { %v3593_v8 = vadd.f32 %v10780_v62, %v3592_v1  ;;  %v7009_v10 = vrot.slane %v7007_v48, 5  ;;  %v7013_v12 = vrot.slane %v7011_v58, 4  ;;  %4267 = vst.msk [vmem:[#allocation4 + $0x18] sm:$0xf] %vm3687_vm1, %v3915_v15 }
 0x3ac   : > { %v3955_v63 = vrot.slane %v3953_v56, 7  ;;  %3374 = vst.msk [vmem:[#allocation2 + $0x74] sm:$0xf] %vm3344_vm15, %v3307_v60 }
 0x3ad   : > { %v3662_v2 = vmax.f32 %v3593_v8, 0.0  ;;  %v6991_v8 = vrot.slane %v6990_v57, 4  ;;  %v7014_v26 = vor.u32 %v7013_v12, %v7009_v10  ;;  %v7010_v20 = vsel %vm9373_vm2, %v7005_v17, %v7009_v10 }
 0x3ae   : > { %7391 = vst.msk [vmem:[#allocation4 + $0x20] sm:$0xf] %vm3687_vm1, %v7010_v20 }
 0x3af   : > { %v3773_v31 = vpack.c.bf16 %v3662_v2, %v3662_v2  ;;  %v3920_v2 = vrot.slane %v3918_v7, 7  ;;  %v6996_v27 = vsel %vm9373_vm2, %v6991_v8, %v10873_v14  ;;  %v7019_v7 = vrot.slane %v7017_v34, 5  ;;  %v9073_v14 = vld [vmem:[#allocation2 + $0x58] sm:$0xff] }
 0x3b0   : > { %v6931_v59 = vld [vmem:[#allocation3 + $0x68] sm:$0xf]  ;;  %7390 = vst.msk [vmem:[#allocation4 + $0x14] sm:$0xf] %vm3687_vm1, %v6996_v27  ;;  %v7015_v24 = vrot.slane %v7014_v26, 4  ;;  %8724 = vmatmul.msk.bf16.gmra.mxu0 %vm3513_vm0, %v9073_v14 }
 0x3b1   : > { %3805 = vst.msk [vmem:[#allocation3 + $0x6c] sm:$0xf] %vm3687_vm1, %v3773_v31  ;;  %v7022_v1 = vshrl.u32 %v6931_v59, 16  ;;  %v7025_v3 = vshll.u32 %v6931_v59, 16  ;;  %v4305_v6 = vld [vmem:[#allocation3 + $0x68] sm:$0xf]  ;;  %v3923_v16 = vor.u32 %v3921_v36, %v3920_v2 }
 0x3b2   : > { %v3595_v33 = vpop.f32.mrf.mxu0  ;;  %4377 = vrot.lane.b32.xlu0 %v4305_v6, %s9275_s17  ;;  %v7020_v47 = vsel %vm9373_vm2, %v7015_v24, %v7019_v7  ;;  %v3965_v2 = vshll.u32 %v3841_v5, 16  ;;  %v6936_v14 = vld [vmem:[#allocation3 + $0x88] sm:$0x1] }
 0x3b3   : > { %v3596_v32 = vadd.f32 %v10780_v62, %v3595_v33  ;;  %v7024_v18 = vrot.slane %v7022_v1, 4  ;;  %v7027_v21 = vrot.slane %v7025_v3, 5  ;;  %7392 = vst.msk [vmem:[#allocation4 + $0x2c] sm:$0xf] %vm3687_vm1, %v7020_v47  ;;  %v3924_v3 = vsel %vm10913_vm5, %v3916_v19, %v3923_v16  ;;  %v9074_v47 = vld [vmem:[#allocation2 + $0x60] sm:$0xff] }
 0x3b4   : > { %4268 = vst.msk [vmem:[#allocation4 + $0x24] sm:$0xf] %vm3687_vm1, %v3924_v3  ;;  %v3960_v19 = vrot.slane %v3955_v63, 4 }
 0x3b5   : > { %v3663_v49 = vmax.f32 %v3596_v32, 0.0  ;;  %v7028_v31 = vor.u32 %v7027_v21, %v7024_v18  ;;  %v3839_v18 = vld [vmem:[#allocation3 + $0x4c] sm:$0x8] }
 0x3b7   : > { %v3774_v50 = vpack.c.bf16 %v3663_v49, %v3663_v49  ;;  %v7029_v32 = vrot.slane %v7028_v31, 4  ;;  %v9082_v59 = vld [vmem:[#allocation4 + $0x10] sm:$0xf0] }
 0x3b8   : > { %v6932_v33 = vld [vmem:[#allocation3 + $0x6c] sm:$0xf]  ;;  %v8788_v0 = vor.u32 %v9082_v59, %v8787_v54 }
 0x3b9   : > { %3806 = vst.msk [vmem:[#allocation3 + $0x80] sm:$0xf] %vm3687_vm1, %v3774_v50  ;;  %v4306_v35 = vld [vmem:[#allocation3 + $0x6c] sm:$0xf]  ;;  %v7031_v37 = vshll.u32 %v6932_v33, 16  ;;  %v7035_v38 = vshrl.u32 %v6932_v33, 16 }
 0x3ba   : > { %v3597_v13 = vpop.f32.mrf.mxu0  ;;  %4379 = vrot.lane.b32.xlu1 %v4306_v35, %s9275_s17  ;;  %v3838_v50 = vld [vmem:[#allocation3 + $0x3c] sm:$0xf]  ;;  %9041 = vmatmul.msk.bf16.vlgmr.msra.gmra.mxu3 %vm7873_vm6, %v8788_v0  ;;  %v3948_v33 = vshrl.u32 %v3839_v18, 16  ;;  %v3956_v35 = vshll.u32 %v10935_v40, 16 }
 0x3bb   : > { %v3598_v23 = vadd.f32 %v10780_v62, %v3597_v13  ;;  %v7033_v41 = vrot.slane %v7031_v37, 5  ;;  %v7037_v43 = vrot.slane %v7035_v38, 4  ;;  %v3940_v11 = vshrl.u32 %v3838_v50, 16  ;;  %v3843_v38 = vld [vmem:[#allocation3 + $0x68] sm:$0xf] }
 0x3bc   : > { %v3943_v8 = vshll.u32 %v3838_v50, 16  ;;  %v3962_v13 = vshrl.u32 %v3841_v5, 16  ;;  %v8732_v30 = vrot.slane %v3948_v33, 11  ;;  %v3958_v15 = vor.u32 %v3956_v35, %v3955_v63  ;;  %v8799_v50 = vld [vmem:[#allocation4 + $0x20] sm:$0xf] }
 0x3bd   : > { %v3664_v34 = vmax.f32 %v3598_v23, 0.0  ;;  %v7038_v44 = vor.u32 %v7037_v43, %v7033_v41  ;;  %v7034_v42 = vsel %vm9373_vm2, %v7029_v32, %v7033_v41  ;;  %v3942_v4 = vrot.slane %v3940_v11, 7  ;;  %v3844_v63 = vld [vmem:[#allocation3 + $0x6c] sm:$0xf] }
 0x3be   : > { %7393 = vst.msk [vmem:[#allocation4 + $0x38] sm:$0xf] %vm3687_vm1, %v7034_v42  ;;  %v3964_v28 = vrot.slane %v3962_v13, 7  ;;  %v7065_v32 = vshll.u32 %v6936_v14, 16  ;;  %v3959_v42 = vsel %vm10913_vm5, %v8732_v30, %v3958_v15  ;;  %v3978_v56 = vshll.u32 %v3843_v38, 16 }
 0x3bf   : > { %v3775_v46 = vpack.c.bf16 %v3664_v34, %v3664_v34  ;;  %v7039_v36 = vrot.slane %v7038_v44, 4  ;;  %v3945_v17 = vor.u32 %v3943_v8, %v3942_v4  ;;  %4271 = vst.msk [vmem:[#allocation4 + $0x48] sm:$0xf] %vm3687_vm1, %v3959_v42  ;;  %v3984_v3 = vshrl.u32 %v3844_v63, 16  ;;  %v10994_v8 = vld [vmem:[#allocation3 + $0x8] sm:$0xf] }
 0x3c0   : > { %v6934_v45 = vld [vmem:[#allocation3 + $0x80] sm:$0xf]  ;;  %v3967_v37 = vor.u32 %v3965_v2, %v3964_v28  ;;  %8725 = vmatmul.msk.bf16.gmra.mxu0 %vm3513_vm0, %v9074_v47  ;;  %v3987_v28 = vshll.u32 %v3844_v63, 16  ;;  %v3311_v47 = vpop.permute.xlu0 %3310 }
 0x3c1   : > { %v4307_v49 = vld [vmem:[#allocation3 + $0x80] sm:$0xf]  ;;  %v7046_v51 = vshrl.u32 %v6934_v45, 16  ;;  %v7049_v52 = vshll.u32 %v6934_v45, 16  ;;  %3807 = vst.msk [vmem:[#allocation3 + $0x84] sm:$0xf] %vm3687_vm1, %v3775_v46  ;;  %v7044_v6 = vsel %vm9373_vm2, %v7039_v36, %v7043_v55  ;;  %v3946_v29 = vsel %vm10913_vm5, %v3938_v9, %v3945_v17 }
 0x3c2   : > { %4381 = vrot.lane.b32.xlu2 %v4307_v49, %s9275_s17  ;;  %v3600_v39 = vpop.f32.mrf.mxu0  ;;  %7394 = vst.msk [vmem:[#allocation4 + $0x44] sm:$0xf] %vm3687_vm1, %v7044_v6  ;;  %v3842_v45 = vld [vmem:[#allocation3 + $0x64] sm:$0x8]  ;;  %v3975_v46 = vshrl.u32 %v3843_v38, 16  ;;  %v3968_v40 = vsel %vm10913_vm5, %v3960_v19, %v3967_v37  ;;  %v3887_v9 = vshrl.u32 %v10994_v8, 16 }
 0x3c3   : > { %v7048_v57 = vrot.slane %v7046_v51, 4  ;;  %v7051_v48 = vrot.slane %v7049_v52, 5  ;;  %v3601_v58 = vadd.f32 %v10780_v62, %v3600_v39  ;;  %4270 = vst.msk [vmem:[#allocation4 + $0x3c] sm:$0xf] %vm3687_vm1, %v3946_v29  ;;  %v9085_v49 = vld [vmem:[#allocation4 + $0x28] sm:$0xf0] }
 0x3c4   : > { %v7067_v52 = vrot.slane %v7065_v32, 5  ;;  %v3970_v39 = vshrl.u32 %v3842_v45, 16  ;;  %v10979_v55 = vrot.slane %v3975_v46, 7  ;;  %4272 = vst.msk [vmem:[#allocation4 + $0x54] sm:$0xf] %vm3687_vm1, %v3968_v40  ;;  %v8800_v11 = vor.u32 %v9085_v49, %v8799_v50  ;;  %v9075_v32 = vld [vmem:[#allocation2 + $0x68] sm:$0xff] }
 0x3c5   : > { %v3665_v1 = vmax.f32 %v3601_v58, 0.0  ;;  %v7052_v10 = vor.u32 %v7051_v48, %v7048_v57  ;;  %3376 = vst.msk [vmem:[#allocation2 + $0x7c] sm:$0xf] %vm3344_vm15, %v3311_v47 }
 0x3c6   : > { %v8733_v58 = vrot.slane %v3970_v39, 11  ;;  %v3980_v60 = vor.u32 %v3978_v56, %v10979_v55  ;;  %v3982_v38 = vrot.slane %v10979_v55, 4 }
 0x3c7   : > { %v3776_v12 = vpack.c.bf16 %v3665_v1, %v3665_v1  ;;  %v7053_v53 = vrot.slane %v7052_v10, 4  ;;  %v3832_v10 = vld [vmem:[#allocation3 + $0xc] sm:$0xf] }
 0x3c8   : > { %v6935_v21 = vld [vmem:[#allocation3 + $0x84] sm:$0xf]  ;;  %v3981_v1 = vsel %vm10913_vm5, %v8733_v58, %v3980_v60  ;;  %v3896_v19 = vshrl.u32 %v3832_v10, 16  ;;  %v3899_v18 = vshll.u32 %v3832_v10, 16  ;;  %v4364_v58 = vpop.permute.xlu2 %4363 }
 0x3c9   : > { %3808 = vst.msk [vmem:[#allocation3 + $0x98] sm:$0xf] %vm3687_vm1, %v3776_v12  ;;  %v4308_v23 = vld [vmem:[#allocation3 + $0x84] sm:$0xf]  ;;  %v7055_v26 = vshll.u32 %v6935_v21, 16  ;;  %v7059_v27 = vshrl.u32 %v6935_v21, 16 }
 0x3ca   : > { %4383 = vrot.lane.b32.xlu0 %v4308_v23, %s9275_s17  ;;  %v3602_v7 = vpop.f32.mrf.mxu0  ;;  %4273 = vst.msk [vmem:[#allocation4 + $0x60] sm:$0xf] %vm3687_vm1, %v3981_v1  ;;  %9042 = vmatmul.msk.bf16.gmra.mxu3 %vm7873_vm6, %v8800_v11  ;;  %v3986_v21 = vrot.slane %v3984_v3, 7  ;;  %v9088_v45 = vld [vmem:[#allocation4 + $0x40] sm:$0xf0] }
 0x3cb   : > { %v3603_v31 = vadd.f32 %v10780_v62, %v3602_v7  ;;  %v7057_v20 = vrot.slane %v7055_v26, 5  ;;  %v7061_v24 = vrot.slane %v7059_v27, 4  ;;  %v10999_v27 = vrot.slane %v3887_v9, 7  ;;  %v6939_v11 = vld [vmem:[#allocation3 + $0xa0] sm:$0x1] }
 0x3cc   : > { %v3898_v7 = vrot.slane %v3896_v19, 7  ;;  %v7089_v61 = vshll.u32 %v6939_v11, 16  ;;  %v3847_v63 = vld [vmem:[#allocation3 + $0x84] sm:$0xf] }
 0x3cd   : > { %v3666_v34 = vmax.f32 %v3603_v31, 0.0  ;;  %v7062_v41 = vor.u32 %v7061_v24, %v7057_v20  ;;  %v7058_v43 = vsel %vm9373_vm2, %v7053_v53, %v7057_v20  ;;  %v3894_v33 = vrot.slane %v10999_v27, 4  ;;  %v3846_v20 = vld [vmem:[#allocation3 + $0x80] sm:$0xf] }
 0x3ce   : > { %7395 = vst.msk [vmem:[#allocation4 + $0x50] sm:$0xf] %vm3687_vm1, %v7058_v43  ;;  %v3901_v35 = vor.u32 %v3899_v18, %v3898_v7  ;;  %v3989_v24 = vor.u32 %v3987_v28, %v3986_v21  ;;  %v3997_v37 = vshrl.u32 %v3846_v20, 16  ;;  %v4000_v43 = vshll.u32 %v3846_v20, 16 }
 0x3cf   : > { %v3777_v51 = vpack.c.bf16 %v3666_v34, %v3666_v34  ;;  %v7063_v16 = vrot.slane %v7062_v41, 4  ;;  %v3845_v41 = vld [vmem:[#allocation3 + $0x7c] sm:$0x8]  ;;  %v4006_v1 = vshrl.u32 %v3847_v63, 16  ;;  %v7091_v3 = vrot.slane %v7089_v61, 5 }
 0x3d0   : > { %v6937_v44 = vld [vmem:[#allocation3 + $0x98] sm:$0xf]  ;;  %v3902_v15 = vsel %vm10913_vm5, %v3894_v33, %v3901_v35  ;;  %v3992_v49 = vshrl.u32 %v3845_v41, 16  ;;  %8726 = vmatmul.msk.bf16.gmra.mxu0 %vm3513_vm0, %v9075_v32  ;;  %v3890_v33 = vshll.u32 %v10994_v8, 16  ;;  %v9076_v32 = vld [vmem:[#allocation2 + $0x70] sm:$0xff] }
 0x3d1   : > { %v4309_v54 = vld [vmem:[#allocation3 + $0x98] sm:$0xf]  ;;  %3809 = vst.msk [vmem:[#allocation3 + $0x9c] sm:$0xf] %vm3687_vm1, %v3777_v51  ;;  %v7068_v48 = vsel %vm9373_vm2, %v7063_v16, %v7067_v52  ;;  %v7070_v36 = vshrl.u32 %v6937_v44, 16  ;;  %v7073_v4 = vshll.u32 %v6937_v44, 16  ;;  %v3990_v52 = vsel %vm10913_vm5, %v3982_v38, %v3989_v24 }
 0x3d2   : > { %4385 = vrot.lane.b32.xlu1 %v4309_v54, %s9275_s17  ;;  %v3605_v57 = vpop.f32.mrf.mxu0  ;;  %7396 = vst.msk [vmem:[#allocation4 + $0x5c] sm:$0xf] %vm3687_vm1, %v7068_v48  ;;  %v3999_v51 = vrot.slane %v3997_v37, 7  ;;  %v8811_v44 = vld [vmem:[#allocation4 + $0x38] sm:$0xf]  ;;  %v8734_v54 = vrot.slane %v3992_v49, 11  ;;  %v3892_v38 = vor.u32 %v3890_v33, %v10999_v27 }
 0x3d3   : > { %v3606_v59 = vadd.f32 %v10780_v62, %v3605_v57  ;;  %v7072_v6 = vrot.slane %v7070_v36, 4  ;;  %v7075_v23 = vrot.slane %v7073_v4, 5  ;;  %4266 = vst.msk [vmem:[#allocation4 + $0xc] sm:$0xf] %vm3687_vm1, %v3902_v15  ;;  %v8812_v55 = vor.u32 %v9088_v45, %v8811_v44  ;;  %v6942_v41 = vld [vmem:[#allocation3 + $0xb8] sm:$0x1] }
 0x3d4   : > { %v4002_v39 = vor.u32 %v4000_v43, %v3999_v51  ;;  %4274 = vst.msk [vmem:[#allocation4 + $0x6c] sm:$0xf] %vm3687_vm1, %v3990_v52  ;;  %v4004_v18 = vrot.slane %v3999_v51, 4  ;;  %v3848_v43 = vld [vmem:[#allocation3 + $0x94] sm:$0x8]  ;;  %v7113_v49 = vshll.u32 %v6942_v41, 16  ;;  %v4362_v52 = vpop.permute.xlu1 %4361 }
 0x3d5   : > { %v3667_v0 = vmax.f32 %v3606_v59, 0.0  ;;  %v7076_v34 = vor.u32 %v7075_v23, %v7072_v6  ;;  %4459 = vst.msk [vmem:[#allocation4 + $0xc] sm:$0xf] %vm4457_vm7, %v4364_v58  ;;  %v4008_v6 = vrot.slane %v4006_v1, 7 }
 0x3d6   : > { %v4003_v36 = vsel %vm10913_vm5, %v8734_v54, %v4002_v39  ;;  %v7115_v54 = vrot.slane %v7113_v49, 5  ;;  %v4014_v39 = vshrl.u32 %v3848_v43, 16 }
 0x3d7   : > { %v3778_v5 = vpack.c.bf16 %v3667_v0, %v3667_v0  ;;  %v7077_v42 = vrot.slane %v7076_v34, 4  ;;  %4275 = vst.msk [vmem:[#allocation4 + $0x78] sm:$0xf] %vm3687_vm1, %v4003_v36 }
 0x3d8   : > { %v6938_v12 = vld [vmem:[#allocation3 + $0x9c] sm:$0xf]  ;;  %v8735_v58 = vrot.slane %v4014_v39, 11 }
 0x3d9   : > { %v4310_v13 = vld [vmem:[#allocation3 + $0x9c] sm:$0xf]  ;;  %v7079_v2 = vshll.u32 %v6938_v12, 16  ;;  %v7083_v17 = vshrl.u32 %v6938_v12, 16  ;;  %3810 = vst.msk [vmem:[#allocation3 + $0xb0] sm:$0xf] %vm3687_vm1, %v3778_v5 }
 0x3da   : > { %4387 = vrot.lane.b32.xlu2 %v4310_v13, %s9275_s17  ;;  %v3607_v26 = vpop.f32.mrf.mxu0  ;;  %9043 = vmatmul.msk.bf16.gmra.mxu3 %vm7873_vm6, %v8812_v55  ;;  %v4009_v5 = vshll.u32 %v3847_v63, 16  ;;  %v9091_v37 = vld [vmem:[#allocation4 + $0x58] sm:$0xf0] }
 0x3db   : > { %v7081_v29 = vrot.slane %v7079_v2, 5  ;;  %v7085_v53 = vrot.slane %v7083_v17, 4  ;;  %v3608_v31 = vadd.f32 %v10780_v62, %v3607_v26 }
 0x3dc   : > { %v4011_v21 = vor.u32 %v4009_v5, %v4008_v6 }
 0x3dd   : > { %v3668_v14 = vmax.f32 %v3608_v31, 0.0  ;;  %v7086_v30 = vor.u32 %v7085_v53, %v7081_v29  ;;  %v7082_v60 = vsel %vm9373_vm2, %v7077_v42, %v7081_v29  ;;  %v3830_v31 = vld [vmem:[#allocation3 + $0x4] sm:$0x8] }
 0x3de   : > { %7397 = vst.msk [vmem:[#allocation4 + $0x68] sm:$0xf] %vm3687_vm1, %v7082_v60  ;;  %v4012_v29 = vsel %vm10913_vm5, %v4004_v18, %v4011_v21  ;;  %v3882_v24 = vshrl.u32 %v3830_v31, 16 }
 0x3df   : > { %v3779_v46 = vpack.c.bf16 %v3668_v14, %v3668_v14  ;;  %v7087_v50 = vrot.slane %v7086_v30, 4  ;;  %v3849_v14 = vld [vmem:[#allocation3 + $0x98] sm:$0xf]  ;;  %4276 = vst.msk [vmem:[#allocation4 + $0x84] sm:$0xf] %vm3687_vm1, %v4012_v29 }
 0x3e0   : > { %v6940_v40 = vld [vmem:[#allocation3 + $0xb0] sm:$0xf]  ;;  %v4019_v34 = vshrl.u32 %v3849_v14, 16  ;;  %v8729_v15 = vrot.slane %v3882_v24, 11  ;;  %v4022_v27 = vshll.u32 %v3849_v14, 16  ;;  %8727 = vmatmul.msk.bf16.gmra.mxu0 %vm3513_vm0, %v9076_v32 }
 0x3e1   : > { %v4311_v16 = vld [vmem:[#allocation3 + $0xb0] sm:$0xf]  ;;  %3811 = vst.msk [vmem:[#allocation3 + $0xb4] sm:$0xf] %vm3687_vm1, %v3779_v46  ;;  %v7094_v57 = vshrl.u32 %v6940_v40, 16  ;;  %v7097_v59 = vshll.u32 %v6940_v40, 16  ;;  %v7092_v19 = vsel %vm9373_vm2, %v7087_v50, %v7091_v3 }
 0x3e2   : > { %4389 = vrot.lane.b32.xlu0 %v4311_v16, %s9275_s17  ;;  %v3610_v56 = vpop.f32.mrf.mxu0  ;;  %7398 = vst.msk [vmem:[#allocation4 + $0x74] sm:$0xf] %vm3687_vm1, %v7092_v19  ;;  %v4021_v8 = vrot.slane %v4019_v34, 7  ;;  %v3893_v51 = vsel %vm10913_vm5, %v8729_v15, %v3892_v38  ;;  %v8823_v40 = vld [vmem:[#allocation4 + $0x50] sm:$0xf] }
 0x3e3   : > { %v3611_v48 = vadd.f32 %v10780_v62, %v3610_v56  ;;  %v7096_v10 = vrot.slane %v7094_v57, 4  ;;  %v7099_v12 = vrot.slane %v7097_v59, 5  ;;  %4265 = vst.msk [vmem:[#allocation4] sm:$0xf] %vm3687_vm1, %v3893_v51  ;;  %v8824_v42 = vor.u32 %v9091_v37, %v8823_v40  ;;  %v3852_v18 = vld [vmem:[#allocation3 + $0xb0] sm:$0xf] }
 0x3e4   : > { %4458 = vst.msk [vmem:[#allocation4] sm:$0xf] %vm4457_vm7, %v4362_v52  ;;  %v4024_v50 = vor.u32 %v4022_v27, %v4021_v8  ;;  %v4026_v5 = vrot.slane %v4021_v8, 4  ;;  %v11065_v15 = vld [vmem:[%s12287_s2] ss:$0 sm:$0xff] }
 0x3e5   : > { %v3669_v0 = vmax.f32 %v3611_v48, 0.0  ;;  %v7100_v53 = vor.u32 %v7099_v12, %v7096_v10  ;;  %v3850_v48 = vld [vmem:[#allocation3 + $0x9c] sm:$0xf]  ;;  %v8835_v34 = vld [vmem:[#allocation4 + $0x68] sm:$0xf] }
 0x3e6   : > { %v4028_v59 = vshrl.u32 %v3850_v48, 16  ;;  %v4025_v60 = vsel %vm10913_vm5, %v8735_v58, %v4024_v50  ;;  %v6945_v52 = vld [vmem:[#allocation3 + $0xd0] sm:$0x1] }
 0x3e7   : > { %v3780_v4 = vpack.c.bf16 %v3669_v0, %v3669_v0  ;;  %v7101_v45 = vrot.slane %v7100_v53, 4  ;;  %v4031_v0 = vshll.u32 %v3850_v48, 16  ;;  %4277 = vst.msk [vmem:[#allocation4 + $0x90] sm:$0xf] %vm3687_vm1, %v4025_v60  ;;  %v7137_v39 = vshll.u32 %v6945_v52, 16 }
 0x3e8   : > { %v6941_v13 = vld [vmem:[#allocation3 + $0xb4] sm:$0xf]  ;;  %v4030_v63 = vrot.slane %v4028_v59, 7 }
 0x3e9   : > { %v4312_v9 = vld [vmem:[#allocation3 + $0xb4] sm:$0xf]  ;;  %v7103_v2 = vshll.u32 %v6941_v13, 16  ;;  %v7107_v17 = vshrl.u32 %v6941_v13, 16  ;;  %3812 = vst.msk [vmem:[#allocation3 + $0xc8] sm:$0xf] %vm3687_vm1, %v3780_v4 }
 0x3ea   : > { %4391 = vrot.lane.b32.xlu1 %v4312_v9, %s9275_s17  ;;  %v3612_v23 = vpop.f32.mrf.mxu0  ;;  %9044 = vmatmul.msk.bf16.gmra.mxu3 %vm7873_vm6, %v8824_v42  ;;  %v4033_v10 = vor.u32 %v4031_v0, %v4030_v63  ;;  %v7139_v50 = vrot.slane %v7137_v39, 5  ;;  %v3857_v39 = vld [vmem:[#allocation3 + $0xdc] sm:$0x8] }
 0x3eb   : > { %v7105_v26 = vrot.slane %v7103_v2, 5  ;;  %v7109_v7 = vrot.slane %v7107_v17, 4  ;;  %v3613_v28 = vadd.f32 %v10780_v62, %v3612_v23 }
 0x3ec   : > { %v4034_v19 = vsel %vm10913_vm5, %v4026_v5, %v4033_v10 }
 0x3ed   : > { %v7110_v35 = vor.u32 %v7109_v7, %v7105_v26  ;;  %v3670_v20 = vmax.f32 %v3613_v28, 0.0  ;;  %v7106_v44 = vsel %vm9373_vm2, %v7101_v45, %v7105_v26  ;;  %4278 = vst.msk [vmem:[#allocation4 + $0x9c] sm:$0xf] %vm3687_vm1, %v4034_v19  ;;  %v4041_v7 = vshrl.u32 %v3852_v18, 16  ;;  %v3851_v28 = vld [vmem:[#allocation3 + $0xac] sm:$0x8] }
 0x3ee   : > { %7399 = vst.msk [vmem:[#allocation4 + $0x80] sm:$0xf] %vm3687_vm1, %v7106_v44  ;;  %v4036_v53 = vshrl.u32 %v3851_v28, 16 }
 0x3ef   : > { %v3781_v30 = vpack.c.bf16 %v3670_v20, %v3670_v20  ;;  %v7111_v46 = vrot.slane %v7110_v35, 4  ;;  %v4043_v31 = vrot.slane %v4041_v7, 7  ;;  %v9094_v20 = vld [vmem:[#allocation4 + $0x70] sm:$0xf0] }
 0x3f0   : > { %v4313_v47 = vld [vmem:[#allocation3 + $0xc8] sm:$0xf]  ;;  %v8736_v37 = vrot.slane %v4036_v53, 11 }
 0x3f1   : > { %3813 = vst.msk [vmem:[#allocation3 + $0xcc] sm:$0xf] %vm3687_vm1, %v3781_v30  ;;  %4393 = vrot.lane.b32.xlu2 %v4313_v47, %s9275_s17  ;;  %v7116_v57 = vsel %vm9373_vm2, %v7111_v46, %v7115_v54  ;;  %v6943_v11 = vld [vmem:[#allocation3 + $0xc8] sm:$0xf]  ;;  %v8836_v30 = vor.u32 %v9094_v20, %v8835_v34  ;;  %v3853_v46 = vld [vmem:[#allocation3 + $0xb4] sm:$0xf] }
 0x3f2   : > { %v3615_v16 = vpop.f32.mrf.mxu0  ;;  %7400 = vst.msk [vmem:[#allocation4 + $0x8c] sm:$0xf] %vm3687_vm1, %v7116_v57  ;;  %v7118_v1 = vshrl.u32 %v6943_v11, 16  ;;  %v7121_v4 = vshll.u32 %v6943_v11, 16  ;;  %v4050_v8 = vshrl.u32 %v3853_v46, 16  ;;  %v4048_v42 = vrot.slane %v4043_v31, 4  ;;  %v4370_v57 = vpop.permute.xlu2 %4369 }
 0x3f3   : > { %v3616_v55 = vadd.f32 %v10780_v62, %v3615_v16  ;;  %v4366_v56 = vpop.permute.xlu0 %4365  ;;  %v4053_v16 = vshll.u32 %v3853_v46, 16  ;;  %4462 = vst.msk [vmem:[#allocation4 + $0x30] sm:$0xf] %vm4457_vm7, %v4370_v57 }
 0x3f4   : > { %4460 = vst.msk [vmem:[#allocation4 + $0x18] sm:$0xf] %vm4457_vm7, %v4366_v56  ;;  %v7120_v21 = vrot.slane %v7118_v1, 4  ;;  %v7123_v23 = vrot.slane %v7121_v4, 5  ;;  %v4052_v40 = vrot.slane %v4050_v8, 7 }
 0x3f5   : > { %v3671_v36 = vmax.f32 %v3616_v55, 0.0  ;;  %v8847_v10 = vld [vmem:[#allocation4 + $0x80] sm:$0xf] }
 0x3f6   : > { %v7124_v14 = vor.u32 %v7123_v23, %v7120_v21  ;;  %v4055_v55 = vor.u32 %v4053_v16, %v4052_v40 }
 0x3f7   : > { %v3782_v61 = vpack.c.bf16 %v3671_v36, %v3671_v36  ;;  %v3855_v36 = vld [vmem:[#allocation3 + $0xc8] sm:$0xf] }
 0x3f8   : > { %v4314_v3 = vld [vmem:[#allocation3 + $0xcc] sm:$0xf]  ;;  %v7125_v47 = vrot.slane %v7124_v14, 4  ;;  %v4056_v58 = vsel %vm10913_vm5, %v4048_v42, %v4055_v55  ;;  %v4063_v60 = vshrl.u32 %v3855_v36, 16  ;;  %v6948_v42 = vld [vmem:[#allocation3 + $0xe8] sm:$0x1] }
 0x3f9   : > { %v6944_v6 = vld [vmem:[#allocation3 + $0xcc] sm:$0xf]  ;;  %3814 = vst.msk [vmem:[#allocation3 + $0xe0] sm:$0xf] %vm3687_vm1, %v3782_v61  ;;  %4395 = vrot.lane.b32.xlu0 %v4314_v3, %s9275_s17  ;;  %v3854_v61 = vld [vmem:[#allocation3 + $0xc4] sm:$0x8] }
 0x3fa   : > { %v3617_v12 = vpop.f32.mrf.mxu0  ;;  %v7127_v2 = vshll.u32 %v6944_v6, 16  ;;  %v7131_v17 = vshrl.u32 %v6944_v6, 16  ;;  %9045 = vmatmul.msk.bf16.gmra.mxu3 %vm7873_vm6, %v8836_v30  ;;  %4280 = vst.msk [vmem:[#allocation4 + $0xb4] sm:$0xf] %vm3687_vm1, %v4056_v58  ;;  %v4058_v0 = vshrl.u32 %v3854_v61, 16  ;;  %v4065_v1 = vrot.slane %v4063_v60, 7 }
 0x3fb   : > { %v3618_v13 = vadd.f32 %v10780_v62, %v3617_v12  ;;  %v4368_v9 = vpop.permute.xlu1 %4367  ;;  %v4044_v62 = vshll.u32 %v3852_v18, 16  ;;  %v4066_v3 = vshll.u32 %v3855_v36, 16  ;;  %v9097_v4 = vld [vmem:[#allocation4 + $0x88] sm:$0xf0]  ;;  %v4080_v55 = vshrl.u32 %v3857_v39, 16 }
 0x3fc   : > { %4461 = vst.msk [vmem:[#allocation4 + $0x24] sm:$0xf] %vm4457_vm7, %v4368_v9  ;;  %v7129_v33 = vrot.slane %v7127_v2, 5  ;;  %v7133_v35 = vrot.slane %v7131_v17, 4  ;;  %v8737_v12 = vrot.slane %v4058_v0, 11  ;;  %v4070_v7 = vrot.slane %v4065_v1, 4 }
 0x3fd   : > { %v3672_v26 = vmax.f32 %v3618_v13, 0.0  ;;  %v4046_v38 = vor.u32 %v4044_v62, %v4043_v31  ;;  %v4068_v5 = vor.u32 %v4066_v3, %v4065_v1  ;;  %v8848_v13 = vor.u32 %v9097_v4, %v8847_v10  ;;  %v3856_v2 = vld [vmem:[#allocation3 + $0xcc] sm:$0xf] }
 0x3fe   : > { %v7134_v45 = vor.u32 %v7133_v35, %v7129_v33  ;;  %v7130_v27 = vsel %vm9373_vm2, %v7125_v47, %v7129_v33  ;;  %v4072_v17 = vshrl.u32 %v3856_v2, 16  ;;  %v5580_v33 = vld [vmem:[#allocation3 + $0x20] sm:$0xf]  ;;  %v7161_v57 = vshll.u32 %v6948_v42, 16 }
 0x3ff   : > { %v3783_v29 = vpack.c.bf16 %v3672_v26, %v3672_v26  ;;  %v4047_v43 = vsel %vm10913_vm5, %v8736_v37, %v4046_v38  ;;  %7401 = vst.msk [vmem:[#allocation4 + $0x98] sm:$0xf] %vm3687_vm1, %v7130_v27  ;;  %v4069_v19 = vsel %vm10913_vm5, %v8737_v12, %v4068_v5  ;;  %v4075_v26 = vshll.u32 %v3856_v2, 16 }
 0x400   : > { %v4315_v24 = vld [vmem:[#allocation3 + $0xe0] sm:$0xf]  ;;  %4279 = vst.msk [vmem:[#allocation4 + $0xa8] sm:$0xf] %vm3687_vm1, %v4047_v43  ;;  %v7135_v44 = vrot.slane %v7134_v45, 4  ;;  %v4074_v23 = vrot.slane %v4072_v17, 7 }
 0x401   : > { %3815 = vst.msk [vmem:[#allocation3 + $0xe4] sm:$0xf] %vm3687_vm1, %v3783_v29  ;;  %4397 = vrot.lane.b32.xlu1 %v4315_v24, %s9275_s17  ;;  %v6946_v18 = vld [vmem:[#allocation3 + $0xe0] sm:$0xf]  ;;  %v8738_v36 = vrot.slane %v4080_v55, 11 }
 0x402   : > { %v3620_v32 = vpop.f32.mrf.mxu0  ;;  %v7140_v11 = vsel %vm9373_vm2, %v7135_v44, %v7139_v50  ;;  %4281 = vst.msk [vmem:[#allocation4 + $0xc0] sm:$0xf] %vm3687_vm1, %v4069_v19  ;;  %v4077_v28 = vor.u32 %v4075_v26, %v4074_v23  ;;  %v7142_v29 = vshrl.u32 %v6946_v18, 16  ;;  %v7145_v53 = vshll.u32 %v6946_v18, 16  ;;  %v3858_v38 = vld [vmem:[#allocation3 + $0xe0] sm:$0xf] }
 0x403   : > { %v3621_v41 = vadd.f32 %v11065_v15, %v3620_v32  ;;  %7402 = vst.msk [vmem:[#allocation4 + $0xa4] sm:$0xf] %vm3687_vm1, %v7140_v11  ;;  %v4085_v32 = vshrl.u32 %v3858_v38, 16  ;;  %v5581_v18 = vld [vmem:[#allocation3 + $0x24] sm:$0xf] }
 0x404   : > { %v4376_v9 = vpop.permute.xlu2 %4375  ;;  %v4078_v35 = vsel %vm10913_vm5, %v4070_v7, %v4077_v28  ;;  %5612 = vst.msk [vmem:[#allocation4 + $0x4] sm:$0xf] %vm3687_vm1, %v5580_v33  ;;  %v7144_v20 = vrot.slane %v7142_v29, 4  ;;  %v7147_v24 = vrot.slane %v7145_v53, 5 }
 0x405   : > { %v3673_v49 = vmax.f32 %v3621_v41, 0.0  ;;  %4465 = vst.msk [vmem:[#allocation4 + $0x54] sm:$0xf] %vm4457_vm7, %v4376_v9  ;;  %v4087_v47 = vrot.slane %v4085_v32, 7 }
 0x406   : > { %4282 = vst.msk [vmem:[#allocation4 + $0xcc] sm:$0xf] %vm3687_vm1, %v4078_v35  ;;  %v7148_v30 = vor.u32 %v7147_v24, %v7144_v20  ;;  %v8859_v43 = vld [vmem:[#allocation4 + $0x98] sm:$0xf] }
 0x407   : > { %v3784_v51 = vpack.c.bf16 %v3673_v49, %v3673_v49  ;;  %5613 = vst.msk [vmem:[#allocation4 + $0x10] sm:$0xf] %vm3687_vm1, %v5581_v18 }
 0x408   : > { %v4316_v54 = vld [vmem:[#allocation3 + $0xe4] sm:$0xf]  ;;  %v7149_v8 = vrot.slane %v7148_v30, 4 }
 0x409   : > { %3816 = vst.msk [vmem:[#allocation3 + $0xf8] sm:$0xf] %vm3687_vm1, %v3784_v51  ;;  %4399 = vrot.lane.b32.xlu2 %v4316_v54, %s9275_s17  ;;  %v6947_v21 = vld [vmem:[#allocation3 + $0xe4] sm:$0xf] }
 0x40a   : > { %v3622_v56 = vpop.f32.mrf.mxu0  ;;  %9046 = vmatmul.msk.bf16.gmra.mxu3 %vm7873_vm6, %v8848_v13  ;;  %v7151_v31 = vshll.u32 %v6947_v21, 16  ;;  %v7155_v62 = vshrl.u32 %v6947_v21, 16  ;;  %v9100_v34 = vld [vmem:[#allocation4 + $0xa0] sm:$0xf0]  ;;  %v3859_v46 = vld [vmem:[#allocation3 + $0xe4] sm:$0xf] }
 0x40b   : > { %v3623_v48 = vadd.f32 %v11065_v15, %v3622_v56  ;;  %v8860_v45 = vor.u32 %v9100_v34, %v8859_v43  ;;  %v4094_v49 = vshrl.u32 %v3859_v46, 16  ;;  %v4097_v54 = vshll.u32 %v3859_v46, 16 }
 0x40c   : > { %v7153_v14 = vrot.slane %v7151_v31, 5  ;;  %v7157_v37 = vrot.slane %v7155_v62, 4  ;;  %v4372_v27 = vpop.permute.xlu0 %4371  ;;  %v4088_v56 = vshll.u32 %v3858_v38, 16  ;;  %v6951_v62 = vld [vmem:[#allocation3 + $0x100] sm:$0x1] }
 0x40d   : > { %v3674_v59 = vmax.f32 %v3623_v48, 0.0  ;;  %4463 = vst.msk [vmem:[#allocation4 + $0x3c] sm:$0xf] %vm4457_vm7, %v4372_v27  ;;  %v4096_v44 = vrot.slane %v4094_v49, 7  ;;  %v4092_v48 = vrot.slane %v4087_v47, 4  ;;  %v7185_v24 = vshll.u32 %v6951_v62, 16 }
 0x40e   : > { %v7158_v41 = vor.u32 %v7157_v37, %v7153_v14  ;;  %v7154_v50 = vsel %vm9373_vm2, %v7149_v8, %v7153_v14  ;;  %v5583_v14 = vld [vmem:[#allocation3 + $0x3c] sm:$0xf]  ;;  %v5582_v49 = vld [vmem:[#allocation3 + $0x38] sm:$0xf] }
 0x40f   : > { %v3785_v63 = vpack.c.bf16 %v3674_v59, %v3674_v59  ;;  %v4099_v58 = vor.u32 %v4097_v54, %v4096_v44  ;;  %7403 = vst.msk [vmem:[#allocation4 + $0xb0] sm:$0xf] %vm3687_vm1, %v7154_v50  ;;  %v4090_v59 = vor.u32 %v4088_v56, %v4087_v47  ;;  %v7187_v38 = vrot.slane %v7185_v24, 5  ;;  %v5585_v24 = vld [vmem:[#allocation3 + $0x54] sm:$0xf] }
 0x410   : > { %v4317_v6 = vld [vmem:[#allocation3 + $0xf8] sm:$0xf]  ;;  %v7159_v51 = vrot.slane %v7158_v41, 4  ;;  %5615 = vst.msk [vmem:[#allocation4 + $0x28] sm:$0xf] %vm3687_vm1, %v5583_v14 }
 0x411   : > { %3817 = vst.msk [vmem:[#allocation3 + $0xfc] sm:$0xf] %vm3687_vm1, %v3785_v63  ;;  %4401 = vrot.lane.b32.xlu0 %v4317_v6, %s9275_s17  ;;  %v6949_v52 = vld [vmem:[#allocation3 + $0xf8] sm:$0xf]  ;;  %v7163_v63 = vrot.slane %v7161_v57, 5  ;;  %v4100_v0 = vsel %vm10913_vm5, %v4092_v48, %v4099_v58  ;;  %v4091_v1 = vsel %vm10913_vm5, %v8738_v36, %v4090_v59 }
 0x412   : > { %v7166_v60 = vshrl.u32 %v6949_v52, 16  ;;  %v7169_v61 = vshll.u32 %v6949_v52, 16  ;;  %4284 = vst.msk [vmem:[#allocation4 + $0xe4] sm:$0xf] %vm3687_vm1, %v4100_v0  ;;  %v3625_v19 = vpop.f32.mrf.mxu0 }
 0x413   : > { %v7164_v6 = vsel %vm9373_vm2, %v7159_v51, %v7163_v63  ;;  %4283 = vst.msk [vmem:[#allocation4 + $0xd8] sm:$0xf] %vm3687_vm1, %v4091_v1  ;;  %v3626_v2 = vadd.f32 %v11065_v15, %v3625_v19  ;;  %v3861_v63 = vld [vmem:[#allocation3 + $0xf8] sm:$0xf] }
 0x414   : > { %v4374_v16 = vpop.permute.xlu1 %4373  ;;  %7404 = vst.msk [vmem:[#allocation4 + $0xbc] sm:$0xf] %vm3687_vm1, %v7164_v6  ;;  %v7168_v10 = vrot.slane %v7166_v60, 4  ;;  %v7171_v12 = vrot.slane %v7169_v61, 5  ;;  %v3860_v61 = vld [vmem:[#allocation3 + $0xf4] sm:$0x8] }
 0x415   : > { %4464 = vst.msk [vmem:[#allocation4 + $0x48] sm:$0xf] %vm4457_vm7, %v4374_v16  ;;  %v3675_v21 = vmax.f32 %v3626_v2, 0.0  ;;  %v5584_v16 = vld [vmem:[#allocation3 + $0x50] sm:$0xf]  ;;  %v4107_v6 = vshrl.u32 %v3861_v63, 16 }
 0x416   : > { %v7172_v17 = vor.u32 %v7171_v12, %v7168_v10  ;;  %v8871_v26 = vld [vmem:[#allocation4 + $0xb0] sm:$0xf]  ;;  %5614 = vst.msk [vmem:[#allocation4 + $0x1c] sm:$0xf] %vm3687_vm1, %v5582_v49  ;;  %v4110_v2 = vshll.u32 %v3861_v63, 16 }
 0x417   : > { %v3786_v28 = vpack.c.bf16 %v3675_v21, %v3675_v21  ;;  %5616 = vst.msk [vmem:[#allocation4 + $0x34] sm:$0xf] %vm3687_vm1, %v5584_v16  ;;  %v11140_v19 = vrot.slane %v4107_v6, 7 }
 0x418   : > { %v4318_v40 = vld [vmem:[#allocation3 + $0xfc] sm:$0xf]  ;;  %v7173_v31 = vrot.slane %v7172_v17, 4  ;;  %5617 = vst.msk [vmem:[#allocation4 + $0x40] sm:$0xf] %vm3687_vm1, %v5585_v24 }
 0x419   : > { %4403 = vrot.lane.b32.xlu1 %v4318_v40, %s9275_s17  ;;  %v6950_v11 = vld [vmem:[#allocation3 + $0xfc] sm:$0xf]  ;;  %3818 = vst.msk [vmem:[#allocation3 + $0x110] sm:$0xf] %vm3687_vm1, %v3786_v28 }
 0x41a   : > { %9047 = vmatmul.msk.bf16.gmra.mxu3 %vm7873_vm6, %v8860_v45  ;;  %v7175_v3 = vshll.u32 %v6950_v11, 16  ;;  %v7179_v4 = vshrl.u32 %v6950_v11, 16  ;;  %v3627_v35 = vpop.f32.mrf.mxu0  ;;  %v6954_v11 = vld [vmem:[#allocation3 + $0x118] sm:$0x1] }
 0x41b   : > { %v9103_v7 = vld [vmem:[#allocation4 + $0xb8] sm:$0xf0]  ;;  %v3628_v37 = vadd.f32 %v11065_v15, %v3627_v35  ;;  %v7209_v60 = vshll.u32 %v6954_v11, 16 }
 0x41c   : > { %v4382_v5 = vpop.permute.xlu2 %4381  ;;  %v7177_v13 = vrot.slane %v7175_v3, 5  ;;  %v7181_v9 = vrot.slane %v7179_v4, 4  ;;  %v8872_v29 = vor.u32 %v9103_v7, %v8871_v26  ;;  %v4102_v4 = vshrl.u32 %v3860_v61, 16 }
 0x41d   : > { %4468 = vst.msk [vmem:[#allocation4 + $0x78] sm:$0xf] %vm4457_vm7, %v4382_v5  ;;  %v3676_v34 = vmax.f32 %v3628_v37, 0.0  ;;  %v4112_v7 = vor.u32 %v4110_v2, %v11140_v19  ;;  %v5587_v2 = vld [vmem:[#allocation3 + $0x6c] sm:$0xf] }
 0x41e   : > { %v7182_v23 = vor.u32 %v7181_v9, %v7177_v13  ;;  %v7178_v20 = vsel %vm9373_vm2, %v7173_v31, %v7177_v13  ;;  %v7211_v13 = vrot.slane %v7209_v60, 5  ;;  %v8739_v9 = vrot.slane %v4102_v4, 11  ;;  %5619 = vst.msk [vmem:[#allocation4 + $0x58] sm:$0xf] %vm3687_vm1, %v5587_v2 }
 0x41f   : > { %7405 = vst.msk [vmem:[#allocation4 + $0xc8] sm:$0xf] %vm3687_vm1, %v7178_v20  ;;  %v3787_v30 = vpack.c.bf16 %v3676_v34, %v3676_v34 }
 0x420   : > { %v7183_v33 = vrot.slane %v7182_v23, 4  ;;  %v6952_v43 = vld [vmem:[#allocation3 + $0x110] sm:$0xf]  ;;  %v4113_v62 = vsel %vm10913_vm5, %v8739_v9, %v4112_v7 }
 0x421   : > { %v4319_v45 = vld [vmem:[#allocation3 + $0x110] sm:$0xf]  ;;  %v7190_v46 = vshrl.u32 %v6952_v43, 16  ;;  %v7193_v47 = vshll.u32 %v6952_v43, 16  ;;  %3819 = vst.msk [vmem:[#allocation3 + $0x114] sm:$0xf] %vm3687_vm1, %v3787_v30 }
 0x422   : > { %v7188_v32 = vsel %vm9373_vm2, %v7183_v33, %v7187_v38  ;;  %4405 = vrot.lane.b32.xlu2 %v4319_v45, %s9275_s17  ;;  %4285 = vst.msk [vmem:[#allocation4 + $0xf0] sm:$0xf] %vm3687_vm1, %v4113_v62 }
 0x423   : > { %7406 = vst.msk [vmem:[#allocation4 + $0xd4] sm:$0xf] %vm3687_vm1, %v7188_v32  ;;  %v7192_v51 = vrot.slane %v7190_v46, 4  ;;  %v7195_v52 = vrot.slane %v7193_v47, 5 }
 0x424   : > { %v4378_v53 = vpop.permute.xlu0 %4377 }
 0x425   : > { %4466 = vst.msk [vmem:[#allocation4 + $0x60] sm:$0xf] %vm4457_vm7, %v4378_v53  ;;  %v7196_v44 = vor.u32 %v7195_v52, %v7192_v51  ;;  %v6957_v51 = vld [vmem:[#allocation3 + $0x130] sm:$0x1]  ;;  %v3863_v52 = vld [vmem:[#allocation3 + $0x10c] sm:$0x8] }
 0x426   : > { %v8883_v54 = vld [vmem:[#allocation4 + $0xc8] sm:$0xf] }
 0x427   : > { %v7197_v36 = vrot.slane %v7196_v44, 4 }
 0x428   : > { %v6953_v50 = vld [vmem:[#allocation3 + $0x114] sm:$0xf] }
 0x429   : > { %v4320_v57 = vld [vmem:[#allocation3 + $0x114] sm:$0xf]  ;;  %v7199_v48 = vshll.u32 %v6953_v50, 16  ;;  %v7203_v58 = vshrl.u32 %v6953_v50, 16 }
 0x42a   : > { %9048 = vmatmul.msk.bf16.gmra.mxu3 %vm7873_vm6, %v8872_v29  ;;  %v9106_v39 = vld [vmem:[#allocation4 + $0xd0] sm:$0xf0]  ;;  %4407 = vrot.lane.b32.xlu0 %v4320_v57, %s9275_s17 }
 0x42b   : > { %v8884_v55 = vor.u32 %v9106_v39, %v8883_v54  ;;  %v7201_v0 = vrot.slane %v7199_v48, 5  ;;  %v7205_v1 = vrot.slane %v7203_v58, 4  ;;  %v7233_v54 = vshll.u32 %v6957_v51, 16  ;;  %v5586_v39 = vld [vmem:[#allocation3 + $0x68] sm:$0xf] }
 0x42c   : > { %v4380_v41 = vpop.permute.xlu1 %4379  ;;  %5618 = vst.msk [vmem:[#allocation4 + $0x4c] sm:$0xf] %vm3687_vm1, %v5586_v39 }
 0x42d   : > { %4467 = vst.msk [vmem:[#allocation4 + $0x6c] sm:$0xf] %vm4457_vm7, %v4380_v41  ;;  %v3630_v8 = vpop.f32.mrf.mxu0  ;;  %v7206_v5 = vor.u32 %v7205_v1, %v7201_v0  ;;  %v7202_v12 = vsel %vm9373_vm2, %v7197_v36, %v7201_v0  ;;  %v7235_v48 = vrot.slane %v7233_v54, 5 }
 0x42e   : > { %v3631_v27 = vadd.f32 %v11065_v15, %v3630_v8  ;;  %7407 = vst.msk [vmem:[#allocation4 + $0xe0] sm:$0xf] %vm3687_vm1, %v7202_v12 }
 0x42f   : > { %v7207_v17 = vrot.slane %v7206_v5, 4 }
 0x430   : > { %v3677_v40 = vmax.f32 %v3631_v27, 0.0  ;;  %v3864_v27 = vld [vmem:[#allocation3 + $0x110] sm:$0xf] }
 0x431   : > { %v7212_v53 = vsel %vm9373_vm2, %v7207_v17, %v7211_v13  ;;  %v4132_v36 = vshll.u32 %v3864_v27, 16 }
 0x432   : > { %v3788_v42 = vpack.c.bf16 %v3677_v40, %v3677_v40  ;;  %7408 = vst.msk [vmem:[#allocation4 + $0xec] sm:$0xf] %vm3687_vm1, %v7212_v53 }
 0x434   : > { %v4388_v56 = vpop.permute.xlu2 %4387  ;;  %3820 = vst.msk [vmem:[#allocation3 + $0x128] sm:$0xf] %vm3687_vm1, %v3788_v42  ;;  %v4124_v42 = vshrl.u32 %v3863_v52, 16  ;;  %v4490_v52 = vld [vmem:[#allocation3 + $0x8] sm:$0xf] }
 0x435   : > { %4471 = vst.msk [vmem:[#allocation4 + $0x9c] sm:$0xf] %vm4457_vm7, %v4388_v56  ;;  %v3632_v59 = vpop.f32.mrf.mxu0  ;;  %v8895_v32 = vld [vmem:[#allocation4 + $0xe0] sm:$0xf] }
 0x436   : > { %v3633_v3 = vadd.f32 %v11065_v15, %v3632_v59  ;;  %v8740_v58 = vrot.slane %v4124_v42, 11 }
 0x438   : > { %v3678_v10 = vmax.f32 %v3633_v3, 0.0 }
 0x439   : > { %v9109_v47 = vld [vmem:[#allocation4 + $0xe8] sm:$0xf0] }
 0x43a   : > { %9049 = vmatmul.msk.bf16.gmra.mxu3 %vm7873_vm6, %v8884_v55  ;;  %v3789_v18 = vpack.c.bf16 %v3678_v10, %v3678_v10  ;;  %v8896_v8 = vor.u32 %v9109_v47, %v8895_v32  ;;  %v4129_v55 = vshrl.u32 %v3864_v27, 16  ;;  %v4493_v32 = vld [vmem:[#allocation3 + $0x20] sm:$0xf] }
 0x43b   : > { %v6955_v23 = vld [vmem:[#allocation3 + $0x128] sm:$0xf]  ;;  %v4563_v27 = vshrl.u32 %v4493_v32, 16 }
 0x43c   : > { %v4384_v21 = vpop.permute.xlu0 %4383  ;;  %v4321_v26 = vld [vmem:[#allocation3 + $0x128] sm:$0xf]  ;;  %v7214_v28 = vshrl.u32 %v6955_v23, 16  ;;  %v7217_v29 = vshll.u32 %v6955_v23, 16  ;;  %3821 = vst.msk [vmem:[#allocation3 + $0x12c] sm:$0xf] %vm3687_vm1, %v3789_v18 }
 0x43d   : > { %4469 = vst.msk [vmem:[#allocation4 + $0x84] sm:$0xf] %vm4457_vm7, %v4384_v21  ;;  %4409 = vrot.lane.b32.xlu1 %v4321_v26, %s9275_s17  ;;  %v3635_v31 = vpop.f32.mrf.mxu0  ;;  %v11163_v11 = vrot.slane %v4129_v55, 7 }
 0x43e   : > { %v7216_v33 = vrot.slane %v7214_v28, 4  ;;  %v7219_v35 = vrot.slane %v7217_v29, 5  ;;  %v3636_v20 = vadd.f32 %v11065_v15, %v3635_v31 }
 0x43f   : > { %v4134_v1 = vor.u32 %v4132_v36, %v11163_v11  ;;  %v9077_v36 = vld [vmem:[#allocation2 + $0x78] sm:$0xff] }
 0x440   : > { %v7220_v14 = vor.u32 %v7219_v35, %v7216_v33  ;;  %v3679_v37 = vmax.f32 %v3636_v20, 0.0  ;;  %v6960_v20 = vld [vmem:[#allocation3 + $0x148] sm:$0x1]  ;;  %8728 = vmatmul.msk.bf16.gmra.mxu0 %vm3513_vm0, %v9077_v36 }
 0x441   : > { %v4135_v10 = vsel %vm10913_vm5, %v8740_v58, %v4134_v1  ;;  %v4496_v1 = vld [vmem:[#allocation3 + $0x38] sm:$0xf] }
 0x442   : > { %v7221_v38 = vrot.slane %v7220_v14, 4  ;;  %v3790_v34 = vpack.c.bf16 %v3679_v37, %v3679_v37  ;;  %4287 = vst.msk [vmem:[#allocation4 + $0x108] sm:$0xf] %vm3687_vm1, %v4135_v10 }
 0x443   : > { %v6956_v41 = vld [vmem:[#allocation3 + $0x12c] sm:$0xf] }
 0x444   : > { %v4386_v30 = vpop.permute.xlu1 %4385  ;;  %v4322_v43 = vld [vmem:[#allocation3 + $0x12c] sm:$0xf]  ;;  %v7223_v45 = vshll.u32 %v6956_v41, 16  ;;  %v7227_v46 = vshrl.u32 %v6956_v41, 16  ;;  %3822 = vst.msk [vmem:[#allocation3 + $0x140] sm:$0xf] %vm3687_vm1, %v3790_v34 }
 0x445   : > { %4470 = vst.msk [vmem:[#allocation4 + $0x90] sm:$0xf] %vm4457_vm7, %v4386_v30  ;;  %4411 = vrot.lane.b32.xlu2 %v4322_v43, %s9275_s17  ;;  %v3637_v49 = vpop.f32.mrf.mxu0  ;;  %v4494_v34 = vld [vmem:[#allocation3 + $0x24] sm:$0xf] }
 0x446   : > { %v7225_v40 = vrot.slane %v7223_v45, 5  ;;  %v7229_v16 = vrot.slane %v7227_v46, 4  ;;  %v3638_v44 = vadd.f32 %v11065_v15, %v3637_v49  ;;  %v4572_v46 = vshll.u32 %v4494_v34, 16 }
 0x447   : > { %v4576_v47 = vshrl.u32 %v4494_v34, 16 }
 0x448   : > { %v7230_v56 = vor.u32 %v7229_v16, %v7225_v40  ;;  %v3680_v50 = vmax.f32 %v3638_v44, 0.0  ;;  %v7226_v57 = vsel %vm9373_vm2, %v7221_v38, %v7225_v40  ;;  %v7257_v38 = vshll.u32 %v6960_v20, 16 }
 0x449   : > { %7409 = vst.msk [vmem:[#allocation4 + $0xf8] sm:$0xf] %vm3687_vm1, %v7226_v57  ;;  %v4566_v40 = vshll.u32 %v4493_v32, 16  ;;  %v4491_v57 = vld [vmem:[#allocation3 + $0xc] sm:$0xf] }
 0x44a   : > { %9050 = vmatmul.msk.bf16.gmra.mxu3 %vm7873_vm6, %v8896_v8  ;;  %v7231_v59 = vrot.slane %v7230_v56, 4  ;;  %v3791_v60 = vpack.c.bf16 %v3680_v50, %v3680_v50  ;;  %v7259_v45 = vrot.slane %v7257_v38, 5  ;;  %v4539_v56 = vshrl.u32 %v4490_v52, 16 }
 0x44b   : > { %v4394_v61 = vpop.permute.xlu2 %4393  ;;  %v6958_v63 = vld [vmem:[#allocation3 + $0x140] sm:$0xf]  ;;  %v4548_v10 = vshll.u32 %v4491_v57, 16 }
 0x44c   : > { %v4323_v0 = vld [vmem:[#allocation3 + $0x140] sm:$0xf]  ;;  %4474 = vst.msk [vmem:[#allocation4 + $0xc0] sm:$0xf] %vm4457_vm7, %v4394_v61  ;;  %v7238_v3 = vshrl.u32 %v6958_v63, 16  ;;  %v7241_v4 = vshll.u32 %v6958_v63, 16  ;;  %v7236_v6 = vsel %vm9373_vm2, %v7231_v59, %v7235_v48 }
 0x44d   : > { %3823 = vst.msk [vmem:[#allocation3 + $0x144] sm:$0xf] %vm3687_vm1, %v3791_v60  ;;  %4413 = vrot.lane.b32.xlu0 %v4323_v0, %s9275_s17  ;;  %v3640_v5 = vpop.f32.mrf.mxu0  ;;  %v4542_v48 = vshll.u32 %v4490_v52, 16  ;;  %v4541_v63 = vrot.slane %v4539_v56, 4 }
 0x44e   : > { %7410 = vst.msk [vmem:[#allocation4 + $0x104] sm:$0xf] %vm3687_vm1, %v7236_v6  ;;  %v7240_v12 = vrot.slane %v7238_v3, 4  ;;  %v7243_v13 = vrot.slane %v7241_v4, 5  ;;  %v3641_v9 = vadd.f32 %v11065_v15, %v3640_v5  ;;  %v11194_v4 = vrot.slane %v4572_v46, 5 }
 0x44f   : > { %v4544_v0 = vrot.slane %v4542_v48, 5  ;;  %v11196_v6 = vrot.slane %v4576_v47, 4 }
 0x450   : > { %v3681_v17 = vmax.f32 %v3641_v9, 0.0  ;;  %v7244_v18 = vor.u32 %v7243_v13, %v7240_v12  ;;  %v8907_v23 = vld [vmem:[#allocation4 + $0xf8] sm:$0xf]  ;;  %v4552_v12 = vshrl.u32 %v4491_v57, 16  ;;  %v6963_v13 = vld [vmem:[#allocation3 + $0x160] sm:$0x1] }
 0x451   : > { %v4545_v5 = vor.u32 %v4544_v0, %v4541_v63  ;;  %v11199_v9 = vrot.slane %v4563_v27, 4  ;;  %v4499_v27 = vld [vmem:[#allocation3 + $0x50] sm:$0xf] }
 0x452   : > { %v3792_v21 = vpack.c.bf16 %v3681_v17, %v3681_v17  ;;  %v7245_v62 = vrot.slane %v7244_v18, 4  ;;  %v4554_v38 = vrot.slane %v4552_v12, 4  ;;  %v4614_v0 = vshll.u32 %v4499_v27, 16 }
 0x454   : > { %v4390_v26 = vpop.permute.xlu0 %4389  ;;  %v6959_v7 = vld [vmem:[#allocation3 + $0x144] sm:$0xf]  ;;  %3824 = vst.msk [vmem:[#allocation3 + $0x158] sm:$0xf] %vm3687_vm1, %v3792_v21  ;;  %v4495_v21 = vld [vmem:[#allocation3 + $0x28] sm:$0x1] }
 0x455   : > { %v4324_v28 = vld [vmem:[#allocation3 + $0x144] sm:$0xf]  ;;  %4472 = vst.msk [vmem:[#allocation4 + $0xa8] sm:$0xf] %vm4457_vm7, %v4390_v26  ;;  %v7247_v29 = vshll.u32 %v6959_v7, 16  ;;  %v7251_v53 = vshrl.u32 %v6959_v7, 16  ;;  %v3642_v33 = vpop.f32.mrf.mxu0 }
 0x456   : > { %4415 = vrot.lane.b32.xlu1 %v4324_v28, %s9275_s17  ;;  %v9112_v31 = vld [vmem:[#allocation4 + $0x100] sm:$0xf0]  ;;  %v3643_v37 = vadd.f32 %v11065_v15, %v3642_v33  ;;  %v11201_v26 = vrot.slane %v4566_v40, 5  ;;  %v11210_v40 = vpop.f32.mrf.mxu3 }
 0x457   : > { %v8908_v35 = vor.u32 %v9112_v31, %v8907_v23  ;;  %v7249_v24 = vrot.slane %v7247_v29, 5  ;;  %v7253_v14 = vrot.slane %v7251_v53, 4  ;;  %v4587_v23 = vshrl.u32 %v4496_v1, 16 }
 0x458   : > { %v3682_v41 = vmax.f32 %v3643_v37, 0.0  ;;  %v7281_v53 = vshll.u32 %v6963_v13, 16  ;;  %v4590_v31 = vshll.u32 %v4496_v1, 16  ;;  %v4550_v37 = vrot.slane %v4548_v10, 5 }
 0x459   : > { %v7254_v30 = vor.u32 %v7253_v14, %v7249_v24  ;;  %v7250_v43 = vsel %vm9373_vm2, %v7245_v62, %v7249_v24  ;;  %v4546_v14 = vrot.slane %v4545_v5, 4  ;;  %v4589_v46 = vrot.slane %v4587_v23, 4 }
 0x45a   : > { %9051 = vmatmul.msk.bf16.gmra.mxu3 %vm7873_vm6, %v8908_v35  ;;  %7411 = vst.msk [vmem:[#allocation4 + $0x110] sm:$0xf] %vm3687_vm1, %v7250_v43  ;;  %v3793_v8 = vpack.c.bf16 %v3682_v41, %v3682_v41  ;;  %v4492_v43 = vld [vmem:[#allocation3 + $0x10] sm:$0x1]  ;;  %v4592_v47 = vrot.slane %v4590_v31, 5  ;;  %v7283_v52 = vrot.slane %v7281_v53, 5  ;;  %v4569_v56 = vor.u32 %v11201_v26, %v11199_v9 }
 0x45b   : > { %v7255_v49 = vrot.slane %v7254_v30, 4  ;;  %v6961_v16 = vld [vmem:[#allocation3 + $0x158] sm:$0xf] }
 0x45c   : > { %v4392_v51 = vpop.permute.xlu1 %4391  ;;  %v4325_v44 = vld [vmem:[#allocation3 + $0x158] sm:$0xf]  ;;  %v7262_v39 = vshrl.u32 %v6961_v16, 16  ;;  %v7265_v42 = vshll.u32 %v6961_v16, 16  ;;  %3825 = vst.msk [vmem:[#allocation3 + $0x15c] sm:$0xf] %vm3687_vm1, %v3793_v8  ;;  %v4551_v16 = vsel %vm9373_vm2, %v4546_v14, %v4550_v37  ;;  %v4593_v36 = vor.u32 %v4592_v47, %v4589_v46 }
 0x45d   : > { %4473 = vst.msk [vmem:[#allocation4 + $0xb4] sm:$0xf] %vm4457_vm7, %v4392_v51  ;;  %4417 = vrot.lane.b32.xlu2 %v4325_v44, %s9275_s17  ;;  %v7260_v55 = vsel %vm9373_vm2, %v7255_v49, %v7259_v45  ;;  %v3645_v50 = vpop.f32.mrf.mxu0  ;;  %v4582_v45 = vshll.u32 %v4495_v21, 16  ;;  %v4555_v44 = vor.u32 %v4554_v38, %v4550_v37  ;;  %v11227_v9 = vrot.slane %v4569_v56, 4 }
 0x45e   : > { %7412 = vst.msk [vmem:[#allocation4 + $0x11c] sm:$0xf] %vm3687_vm1, %v7260_v55  ;;  %v7264_v59 = vrot.slane %v7262_v39, 4  ;;  %v7267_v60 = vrot.slane %v7265_v42, 5  ;;  %v3646_v61 = vadd.f32 %v11065_v15, %v3645_v50  ;;  %v4579_v42 = vor.u32 %v11196_v6, %v11194_v4  ;;  %v11217_v55 = vld [vmem:[#allocation3 + $0x3c] sm:$0xf] }
 0x45f   : > { %v4500_v50 = vld [vmem:[#allocation3 + $0x54] sm:$0xf]  ;;  %v4556_v1 = vrot.slane %v4555_v44, 4  ;;  %v4600_v21 = vshrl.u32 %v11217_v55, 16  ;;  %v4575_v56 = vsel %vm9373_vm2, %v11227_v9, %v11194_v4 }
 0x460   : > { %v3683_v3 = vmax.f32 %v3646_v61, 0.0  ;;  %v7268_v2 = vor.u32 %v7267_v60, %v7264_v59  ;;  %v4611_v59 = vshrl.u32 %v4499_v27, 16  ;;  %v4620_v6 = vshll.u32 %v4500_v50, 16 }
 0x461   : > { %v8919_v18 = vld [vmem:[#allocation4 + $0x110] sm:$0xf]  ;;  %v4624_v5 = vshrl.u32 %v4500_v50, 16  ;;  %v4580_v13 = vrot.slane %v4579_v42, 4 }
 0x462   : > { %v3794_v17 = vpack.c.bf16 %v3683_v3, %v3683_v3  ;;  %v7269_v34 = vrot.slane %v7268_v2, 4  ;;  %v4503_v2 = vld [vmem:[#allocation3 + $0x6c] sm:$0xf]  ;;  %v4613_v23 = vrot.slane %v4611_v59, 4 }
 0x463   : > { %v4400_v54 = vpop.permute.xlu2 %4399  ;;  %v6962_v28 = vld [vmem:[#allocation3 + $0x15c] sm:$0xf]  ;;  %v4648_v14 = vshrl.u32 %v4503_v2, 16 }
 0x464   : > { %4477 = vst.msk [vmem:[#allocation4 + $0xe4] sm:$0xf] %vm4457_vm7, %v4400_v54  ;;  %v4326_v29 = vld [vmem:[#allocation3 + $0x15c] sm:$0xf]  ;;  %v7271_v62 = vshll.u32 %v6962_v28, 16  ;;  %v7275_v33 = vshrl.u32 %v6962_v28, 16 }
 0x465   : > { %3826 = vst.msk [vmem:[#allocation3 + $0x170] sm:$0xf] %vm3687_vm1, %v3794_v17  ;;  %4419 = vrot.lane.b32.xlu0 %v4326_v29, %s9275_s17  ;;  %v9115_v35 = vld [vmem:[#allocation4 + $0x118] sm:$0xf0]  ;;  %v3647_v20 = vpop.f32.mrf.mxu0  ;;  %v11229_v17 = vrot.slane %v4593_v36, 4  ;;  %v4616_v28 = vrot.slane %v4614_v0, 5 }
 0x466   : > { %v8920_v24 = vor.u32 %v9115_v35, %v8919_v18  ;;  %v7273_v32 = vrot.slane %v7271_v62, 5  ;;  %v7277_v30 = vrot.slane %v7275_v33, 4  ;;  %v3648_v41 = vadd.f32 %v11065_v15, %v3647_v20  ;;  %v6966_v29 = vld [vmem:[#allocation3 + $0x178] sm:$0x1]  ;;  %v4502_v0 = vld [vmem:[#allocation3 + $0x68] sm:$0xf] }
 0x467   : > { %v4558_v15 = vshll.u32 %v4492_v43, 16  ;;  %v4596_v18 = vshll.u32 %v11217_v55, 16  ;;  %v11236_v62 = vrot.slane %v4620_v6, 5  ;;  %v4626_v33 = vrot.slane %v4624_v5, 4  ;;  %v4508_v5 = vld [vmem:[#allocation3 + $0x98] sm:$0xf] }
 0x468   : > { %v7278_v49 = vor.u32 %v7277_v30, %v7273_v32  ;;  %v3684_v8 = vmax.f32 %v3648_v41, 0.0  ;;  %v7274_v51 = vsel %vm9373_vm2, %v7269_v34, %v7273_v32  ;;  %v4644_v35 = vshll.u32 %v4503_v2, 16  ;;  %v11238_v34 = vpop.f32.mrf.mxu3 }
 0x469   : > { %7413 = vst.msk [vmem:[#allocation4 + $0x128] sm:$0xf] %vm3687_vm1, %v7274_v51  ;;  %v4560_v3 = vrot.slane %v4558_v15, 5  ;;  %v7305_v43 = vshll.u32 %v6966_v29, 16  ;;  %v4617_v51 = vor.u32 %v4616_v28, %v4613_v23  ;;  %v4602_v15 = vrot.slane %v4600_v21, 4 }
 0x46a   : > { %9052 = vmatmul.msk.bf16.gmra.mxu3 %vm7873_vm6, %v8920_v24  ;;  %v7279_v54 = vrot.slane %v7278_v49, 4  ;;  %v3795_v39 = vpack.c.bf16 %v3684_v8, %v3684_v8  ;;  %v4501_v24 = vld [vmem:[#allocation3 + $0x58] sm:$0x1]  ;;  %v4627_v50 = vor.u32 %v4626_v33, %v11236_v62  ;;  %v4635_v23 = vshrl.u32 %v4502_v0, 16 }
 0x46b   : > { %v4396_v58 = vpop.permute.xlu0 %4395  ;;  %v4561_v31 = vsel %vm9373_vm2, %v4556_v1, %v4560_v3  ;;  %v4630_v44 = vshll.u32 %v4501_v24, 16  ;;  %v4618_v59 = vrot.slane %v4617_v51, 4  ;;  %v4683_v28 = vshrl.u32 %v4508_v5, 16 }
 0x46c   : > { %4475 = vst.msk [vmem:[#allocation4 + $0xcc] sm:$0xf] %vm4457_vm7, %v4396_v58  ;;  %v6964_v57 = vld [vmem:[#allocation3 + $0x170] sm:$0xf]  ;;  %v4584_v58 = vrot.slane %v4582_v45, 5  ;;  %v7284_v63 = vsel %vm9373_vm2, %v7279_v54, %v7283_v52  ;;  %v4114_v45 = vrot.slane %v11140_v19, 4 }
 0x46d   : > { %v4327_v48 = vld [vmem:[#allocation3 + $0x170] sm:$0xf]  ;;  %v7286_v60 = vshrl.u32 %v6964_v57, 16  ;;  %v7289_v61 = vshll.u32 %v6964_v57, 16  ;;  %3827 = vst.msk [vmem:[#allocation3 + $0x174] sm:$0xf] %vm3687_vm1, %v3795_v39  ;;  %4922 = vrot.lane.b32.xlu0 %v4551_v16, %s9277_s23 }
 0x46e   : > { %4421 = vrot.lane.b32.xlu1 %v4327_v48, %s9275_s17  ;;  %7414 = vst.msk [vmem:[#allocation4 + $0x134] sm:$0xf] %vm3687_vm1, %v7284_v63  ;;  %v4585_v41 = vsel %vm9373_vm2, %v4580_v13, %v4584_v58  ;;  %v4598_v16 = vrot.slane %v4596_v18, 5  ;;  %v4498_v19 = vld [vmem:[#allocation3 + $0x40] sm:$0x1]  ;;  %v11254_v57 = vrot.slane %v4644_v35, 5 }
 0x46f   : > { %v7288_v10 = vrot.slane %v7286_v60, 4  ;;  %v7291_v12 = vrot.slane %v7289_v61, 5  ;;  %v4650_v48 = vrot.slane %v4648_v14, 4  ;;  %v4505_v58 = vld [vmem:[#allocation3 + $0x80] sm:$0xf]  ;;  %v7307_v63 = vrot.slane %v7305_v43, 5 }
 0x470   : > { %v8931_v49 = vld [vmem:[#allocation4 + $0x128] sm:$0xf]  ;;  %v4504_v60 = vld [vmem:[#allocation3 + $0x70] sm:$0x1]  ;;  %v4599_v4 = vsel %vm9373_vm2, %v11229_v17, %v4598_v16  ;;  %v4632_v1 = vrot.slane %v4630_v44, 5  ;;  %v4603_v3 = vor.u32 %v4602_v15, %v4598_v16  ;;  %v4606_v6 = vshll.u32 %v4498_v19, 16 }
 0x471   : > { %v7292_v20 = vor.u32 %v7291_v12, %v7288_v10  ;;  %v4623_v12 = vsel %vm9373_vm2, %v4618_v59, %v11236_v62  ;;  %v4659_v13 = vshrl.u32 %v4505_v58, 16  ;;  %v4662_v9 = vshll.u32 %v4505_v58, 16  ;;  %v3868_v62 = vld [vmem:[#allocation3 + $0x12c] sm:$0xf] }
 0x472   : > { %v4628_v2 = vrot.slane %v4627_v50, 4  ;;  %v4651_v18 = vor.u32 %v4650_v48, %v11254_v57  ;;  %v4654_v21 = vshll.u32 %v4504_v60, 16  ;;  %v4686_v29 = vshll.u32 %v4508_v5, 16 }
 0x473   : > { %v4398_v7 = vpop.permute.xlu1 %4397  ;;  %v7293_v54 = vrot.slane %v7292_v20, 4  ;;  %v4661_v33 = vrot.slane %v4659_v13, 4  ;;  %v4664_v35 = vrot.slane %v4662_v9, 5  ;;  %v4160_v24 = vshrl.u32 %v3868_v62, 16  ;;  %v4510_v9 = vld [vmem:[#allocation3 + $0xa0] sm:$0x1] }
 0x474   : > { %4476 = vst.msk [vmem:[#allocation4 + $0xd8] sm:$0xf] %vm4457_vm7, %v4398_v7  ;;  %v3862_v7 = vld [vmem:[#allocation3 + $0xfc] sm:$0xf]  ;;  %v6965_v32 = vld [vmem:[#allocation3 + $0x174] sm:$0xf] }
 0x475   : > { %v4116_v53 = vshrl.u32 %v3862_v7, 16  ;;  %v4119_v38 = vshll.u32 %v3862_v7, 16  ;;  %v4328_v30 = vld [vmem:[#allocation3 + $0x174] sm:$0xf]  ;;  %v7295_v46 = vshll.u32 %v6965_v32, 16  ;;  %v7299_v47 = vshrl.u32 %v6965_v32, 16  ;;  %4928 = vrot.lane.b32.xlu0 %v4585_v41, %s9277_s23 }
 0x476   : > { %4423 = vrot.lane.b32.xlu2 %v4328_v30, %s9275_s17  ;;  %4924 = vrot.lane.b32.xlu1 %v4561_v31, %s9277_s23  ;;  %v9118_v8 = vld [vmem:[#allocation4 + $0x130] sm:$0xf0]  ;;  %v4638_v7 = vshll.u32 %v4502_v0, 16  ;;  %v11275_v31 = vld [vmem:[#allocation3 + $0x128] sm:$0xf]  ;;  %v4604_v14 = vrot.slane %v4603_v3, 4 }
 0x477   : > { %v4118_v37 = vrot.slane %v4116_v53, 7  ;;  %v8932_v27 = vor.u32 %v9118_v8, %v8931_v49  ;;  %v7297_v39 = vrot.slane %v7295_v46, 5  ;;  %v7301_v42 = vrot.slane %v7299_v47, 4  ;;  %v11271_v53 = vpop.f32.mrf.mxu3  ;;  %v4509_v41 = vld [vmem:[#allocation3 + $0x9c] sm:$0xf] }
 0x478   : > { %v4151_v20 = vshrl.u32 %v11275_v31, 16  ;;  %v4656_v32 = vrot.slane %v4654_v21, 5  ;;  %v4163_v46 = vshll.u32 %v3868_v62, 16  ;;  %v4637_v47 = vrot.slane %v4635_v23, 4 }
 0x479   : > { %v4121_v52 = vor.u32 %v4119_v38, %v4118_v37  ;;  %v7302_v36 = vor.u32 %v7301_v42, %v7297_v39  ;;  %v7298_v61 = vsel %vm9373_vm2, %v7293_v54, %v7297_v39  ;;  %v4608_v37 = vrot.slane %v4606_v6, 5 }
 0x47a   : > { %9053 = vmatmul.msk.bf16.gmra.mxu3 %vm7873_vm6, %v8932_v27  ;;  %7415 = vst.msk [vmem:[#allocation4 + $0x140] sm:$0xf] %vm3687_vm1, %v7298_v61  ;;  %v4652_v38 = vrot.slane %v4651_v18, 4  ;;  %v11278_v43 = vrot.slane %v4151_v20, 7  ;;  %v4640_v49 = vrot.slane %v4638_v7, 5  ;;  %v4685_v8 = vrot.slane %v4683_v28, 4 }
 0x47b   : > { %v4122_v55 = vsel %vm10913_vm5, %v4114_v45, %v4121_v52  ;;  %v7303_v10 = vrot.slane %v7302_v36, 4  ;;  %v4162_v45 = vrot.slane %v4160_v24, 7  ;;  %v4688_v51 = vrot.slane %v4686_v29, 5  ;;  %v5645_v52 = vld [vmem:[#allocation3 + $0x24] sm:$0xf] }
 0x47c   : > { %4286 = vst.msk [vmem:[#allocation4 + $0xfc] sm:$0xf] %vm3687_vm1, %v4122_v55  ;;  %v4665_v27 = vor.u32 %v4664_v35, %v4661_v33  ;;  %v4158_v44 = vrot.slane %v11278_v43, 4  ;;  %v4633_v54 = vsel %vm9373_vm2, %v4628_v2, %v4632_v1  ;;  %v4609_v39 = vsel %vm9373_vm2, %v4604_v14, %v4608_v37  ;;  %v4406_v1 = vpop.permute.xlu2 %4405  ;;  %v5646_v18 = vld [vmem:[#allocation3 + $0x28] sm:$0x1] }
 0x47d   : > { %v7308_v17 = vsel %vm9373_vm2, %v7303_v10, %v7307_v63  ;;  %4934 = vrot.lane.b32.xlu0 %v4623_v12, %s9277_s23  ;;  %v4165_v15 = vor.u32 %v4163_v46, %v4162_v45  ;;  %v4692_v42 = vshll.u32 %v4509_v41, 16  ;;  %v4696_v19 = vshrl.u32 %v4509_v41, 16  ;;  %v4507_v63 = vld [vmem:[#allocation3 + $0x88] sm:$0x1]  ;;  %4480 = vst.msk [vmem:[#allocation4 + $0x108] sm:$0xf] %vm4457_vm7, %v4406_v1 }
 0x47e   : > { %4930 = vrot.lane.b32.xlu1 %v4599_v4, %s9277_s23  ;;  %4926 = vrot.lane.b32.xlu2 %v4575_v56, %s9277_s23  ;;  %7416 = vst.msk [vmem:[#allocation4 + $0x14c] sm:$0xf] %vm3687_vm1, %v7308_v17  ;;  %v4657_v55 = vsel %vm9373_vm2, %v4652_v38, %v4656_v32  ;;  %v5702_v48 = vshll.u32 %v5645_v52, 16  ;;  %v5706_v58 = vshrl.u32 %v5645_v52, 16  ;;  %v4641_v60 = vor.u32 %v4640_v49, %v4637_v47  ;;  %v3865_v4 = vld [vmem:[#allocation3 + $0x114] sm:$0xf] }
 0x47f   : > { %v4166_v36 = vsel %vm10913_vm5, %v4158_v44, %v4165_v15  ;;  %v4689_v61 = vor.u32 %v4688_v51, %v4685_v8  ;;  %v4666_v3 = vrot.slane %v4665_v27, 4  ;;  %v4138_v10 = vshrl.u32 %v3865_v4, 16  ;;  %v11294_v12 = vpop.f32.mrf.mxu3  ;;  %v5589_v7 = vld [vmem:[#allocation3 + $0x84] sm:$0xf]  ;;  %v5644_v33 = vld [vmem:[#allocation3 + $0x20] sm:$0xf] }
 0x480   : > { %4290 = vst.msk [vmem:[#allocation4 + $0x12c] sm:$0xf] %vm3687_vm1, %v4166_v36  ;;  %v4694_v13 = vrot.slane %v4692_v42, 5  ;;  %v4698_v2 = vrot.slane %v4696_v19, 4  ;;  %v11298_v21 = vrot.slane %v5702_v48, 5  ;;  %v5708_v23 = vrot.slane %v5706_v58, 4 }
 0x481   : > { %v8943_v56 = vld [vmem:[#allocation4 + $0x140] sm:$0xf]  ;;  %v4140_v17 = vrot.slane %v4138_v10, 7  ;;  %v4642_v28 = vrot.slane %v4641_v60, 4  ;;  %v4690_v29 = vrot.slane %v4689_v61, 4  ;;  %v4678_v62 = vshll.u32 %v4507_v63, 16 }
 0x482   : > { %v4136_v24 = vrot.slane %v11163_v11, 4  ;;  %v4699_v32 = vor.u32 %v4698_v2, %v4694_v13  ;;  %v6206_v41 = vld [vmem:[#allocation3 + $0x38] sm:$0xf]  ;;  %5621 = vst.msk [vmem:[#allocation4 + $0x70] sm:$0xf] %vm3687_vm1, %v5589_v7  ;;  %v5709_v45 = vor.u32 %v5708_v23, %v11298_v21  ;;  %v5712_v11 = vshll.u32 %v5646_v18, 16 }
 0x483   : > { %v4402_v26 = vpop.permute.xlu0 %4401  ;;  %v4647_v37 = vsel %vm9373_vm2, %v4642_v28, %v11254_v57  ;;  %v4695_v38 = vsel %vm9373_vm2, %v4690_v29, %v4694_v13  ;;  %v5693_v46 = vshrl.u32 %v5644_v33, 16  ;;  %v5588_v57 = vld [vmem:[#allocation3 + $0x80] sm:$0xf]  ;;  %v6205_v49 = vld [vmem:[#allocation3 + $0x34] sm:$0x8]  ;;  %v5696_v8 = vshll.u32 %v5644_v33, 16 }
 0x484   : > { %4478 = vst.msk [vmem:[#allocation4 + $0xf0] sm:$0xf] %vm4457_vm7, %v4402_v26  ;;  %v4506_v26 = vld [vmem:[#allocation3 + $0x84] sm:$0xf]  ;;  %v4154_v52 = vshll.u32 %v11275_v31, 16  ;;  %v4700_v15 = vrot.slane %v4699_v32, 4 }
 0x485   : > { %v4668_v30 = vshll.u32 %v4506_v26, 16  ;;  %v4672_v16 = vshrl.u32 %v4506_v26, 16  ;;  %v9121_v50 = vld [vmem:[#allocation4 + $0x148] sm:$0xf0]  ;;  %4940 = vrot.lane.b32.xlu0 %v4657_v55, %s9277_s23  ;;  %v4141_v26 = vshll.u32 %v3865_v4, 16  ;;  %v5710_v55 = vrot.slane %v5709_v45, 4 }
 0x486   : > { %4936 = vrot.lane.b32.xlu1 %v4633_v54, %s9277_s23  ;;  %4932 = vrot.lane.b32.xlu2 %v4609_v39, %s9277_s23  ;;  %v8944_v59 = vor.u32 %v9121_v50, %v8943_v56  ;;  %v3866_v51 = vld [vmem:[#allocation3 + $0x124] sm:$0x8]  ;;  %5620 = vst.msk [vmem:[#allocation4 + $0x64] sm:$0xf] %vm3687_vm1, %v5588_v57  ;;  %v4680_v39 = vrot.slane %v4678_v62, 5  ;;  %v4156_v42 = vor.u32 %v4154_v52, %v11278_v43  ;;  %v5714_v56 = vrot.slane %v5712_v11, 5 }
 0x487   : > { %v4670_v6 = vrot.slane %v4668_v30, 5  ;;  %v4674_v5 = vrot.slane %v4672_v16, 4  ;;  %v4143_v14 = vor.u32 %v4141_v26, %v4140_v17  ;;  %v4702_v30 = vshll.u32 %v4510_v9, 16  ;;  %v5590_v19 = vld [vmem:[#allocation3 + $0x98] sm:$0xf] }
 0x488   : > { %v6259_v16 = vshrl.u32 %v6206_v41, 16  ;;  %v4146_v44 = vshrl.u32 %v3866_v51, 16  ;;  %5622 = vst.msk [vmem:[#allocation4 + $0x7c] sm:$0xf] %vm3687_vm1, %v5590_v19  ;;  %v5695_v48 = vrot.slane %v5693_v46, 4  ;;  %v5698_v58 = vrot.slane %v5696_v8, 5 }
 0x489   : > { %v4671_v35 = vsel %vm9373_vm2, %v4666_v3, %v4670_v6  ;;  %v4675_v20 = vor.u32 %v4674_v5, %v4670_v6  ;;  %v4144_v47 = vsel %vm10913_vm5, %v4136_v24, %v4143_v14  ;;  %v4704_v54 = vrot.slane %v4702_v30, 5  ;;  %v5053_v61 = vld [vmem:[#allocation3 + $0x24] sm:$0xf]  ;;  %v6207_v4 = vld [vmem:[#allocation3 + $0x3c] sm:$0xf] }
 0x48a   : > { %9054 = vmatmul.msk.bf16.gmra.mxu3 %vm7873_vm6, %v8944_v59  ;;  %4288 = vst.msk [vmem:[#allocation4 + $0x114] sm:$0xf] %vm3687_vm1, %v4144_v47  ;;  %v8741_v50 = vrot.slane %v4146_v44, 11  ;;  %v6254_v36 = vshrl.u32 %v6205_v49, 16  ;;  %v11320_v31 = vrot.slane %v6259_v16, 7  ;;  %v5715_v63 = vsel %vm9373_vm2, %v5710_v55, %v5714_v56 }
 0x48b   : > { %v4404_v0 = vpop.permute.xlu1 %4403  ;;  %v4676_v27 = vrot.slane %v4675_v20, 4  ;;  %v4705_v60 = vsel %vm9373_vm2, %v4700_v15, %v4704_v54  ;;  %v5591_v1 = vld [vmem:[#allocation3 + $0x9c] sm:$0xf]  ;;  %v5699_v3 = vor.u32 %v5698_v58, %v5695_v48  ;;  %v3872_v6 = vld [vmem:[#allocation3 + $0x154] sm:$0x8]  ;;  %v6268_v23 = vshrl.u32 %v6207_v4, 16 }
 0x48c   : > { %4479 = vst.msk [vmem:[#allocation4 + $0xfc] sm:$0xf] %vm4457_vm7, %v4404_v0  ;;  %v4157_v59 = vsel %vm10913_vm5, %v8741_v50, %v4156_v42  ;;  %v6262_v0 = vshll.u32 %v6206_v41, 16  ;;  %v3873_v5 = vld [vmem:[#allocation3 + $0x158] sm:$0xf]  ;;  %v8761_v13 = vrot.slane %v6254_v36, 11 }
 0x48d   : > { %4946 = vrot.lane.b32.xlu0 %v4695_v38, %s9277_s23  ;;  %v4681_v43 = vsel %vm9373_vm2, %v4676_v27, %v4680_v39  ;;  %4289 = vst.msk [vmem:[#allocation4 + $0x120] sm:$0xf] %vm3687_vm1, %v4157_v59  ;;  %v5592_v10 = vld [vmem:[#allocation3 + $0xb0] sm:$0xf]  ;;  %v4190_v2 = vshrl.u32 %v3872_v6, 16  ;;  %v4195_v18 = vshrl.u32 %v3873_v5, 16 }
 0x48e   : > { %4942 = vrot.lane.b32.xlu1 %v4671_v35, %s9277_s23  ;;  %4938 = vrot.lane.b32.xlu2 %v4647_v37, %s9277_s23  ;;  %v6264_v9 = vor.u32 %v6262_v0, %v11320_v31  ;;  %v11335_v17 = vld [vmem:[#allocation3 + $0x20] sm:$0xf]  ;;  %v5114_v26 = vshrl.u32 %v5053_v61, 16  ;;  %5623 = vst.msk [vmem:[#allocation4 + $0x88] sm:$0xf] %vm3687_vm1, %v5591_v1  ;;  %v4198_v29 = vshll.u32 %v3873_v5, 16 }
 0x48f   : > { %v8743_v7 = vrot.slane %v4190_v2, 11  ;;  %v11338_v28 = vrot.slane %v4195_v18, 7  ;;  %5624 = vst.msk [vmem:[#allocation4 + $0x94] sm:$0xf] %vm3687_vm1, %v5592_v10  ;;  %v5700_v62 = vrot.slane %v5699_v3, 4  ;;  %v5105_v24 = vshrl.u32 %v11335_v17, 16 }
 0x490   : > { %v5647_v33 = vld [vmem:[#allocation3 + $0x38] sm:$0xf]  ;;  %v5593_v35 = vld [vmem:[#allocation3 + $0xb4] sm:$0xf]  ;;  %v6265_v20 = vsel %vm10913_vm5, %v8761_v13, %v6264_v9  ;;  %v6270_v32 = vrot.slane %v6268_v23, 7  ;;  %v6271_v30 = vshll.u32 %v6207_v4, 16 }
 0x491   : > { %v4200_v14 = vor.u32 %v4198_v29, %v11338_v28  ;;  %5625 = vst.msk [vmem:[#allocation4 + $0xa0] sm:$0xf] %vm3687_vm1, %v5593_v35  ;;  %v5705_v37 = vsel %vm9373_vm2, %v5700_v62, %v11298_v21  ;;  %v6733_v38 = vld [vmem:[#allocation3 + $0x38] sm:$0xf]  ;;  %v5116_v41 = vrot.slane %v5114_v26, 7  ;;  %v5117_v45 = vshll.u32 %v5053_v61, 16 }
 0x492   : > { %v5717_v11 = vshrl.u32 %v5647_v33, 16  ;;  %v5720_v46 = vshll.u32 %v5647_v33, 16  ;;  %v6209_v47 = vld [vmem:[#allocation3 + $0x50] sm:$0xf]  ;;  %v3869_v21 = vld [vmem:[#allocation3 + $0x13c] sm:$0x8]  ;;  %v6273_v44 = vor.u32 %v6271_v30, %v6270_v32 }
 0x493   : > { %v4201_v57 = vsel %vm10913_vm5, %v8743_v7, %v4200_v14  ;;  %v3870_v49 = vld [vmem:[#allocation3 + $0x140] sm:$0xf]  ;;  %v5107_v51 = vrot.slane %v5105_v24, 7  ;;  %v5648_v52 = vld [vmem:[#allocation3 + $0x3c] sm:$0xf]  ;;  %v4168_v27 = vshrl.u32 %v3869_v21, 16  ;;  %v5119_v15 = vor.u32 %v5117_v45, %v5116_v41 }
 0x494   : > { %4293 = vst.msk [vmem:[#allocation4 + $0x150] sm:$0xf] %vm3687_vm1, %v4201_v57  ;;  %v4173_v16 = vshrl.u32 %v3870_v49, 16  ;;  %v5051_v54 = vld [vmem:[#allocation3 + $0x1c] sm:$0x8]  ;;  %v6281_v39 = vshrl.u32 %v6209_v47, 16 }
 0x495   : > { %6078 = vrot.lane.b32.xlu0 %v5715_v63, %s9275_s17  ;;  %v8742_v42 = vrot.slane %v4168_v27, 11  ;;  %v4176_v55 = vshll.u32 %v3870_v49, 16  ;;  %v6266_v56 = vrot.slane %v11320_v31, 4  ;;  %v5719_v50 = vrot.slane %v5717_v11, 4  ;;  %v6208_v36 = vld [vmem:[#allocation3 + $0x4c] sm:$0x8] }
 0x496   : > { %4948 = vrot.lane.b32.xlu1 %v4705_v60, %s9277_s23  ;;  %4944 = vrot.lane.b32.xlu2 %v4681_v43, %s9277_s23  ;;  %v4175_v19 = vrot.slane %v4173_v16, 7  ;;  %v5722_v48 = vrot.slane %v5720_v46, 5  ;;  %v5726_v58 = vshll.u32 %v5648_v52, 16  ;;  %v5112_v59 = vrot.slane %v5107_v51, 4  ;;  %v6734_v43 = vld [vmem:[#allocation3 + $0x3c] sm:$0xf] }
 0x497   : > { %v6274_v61 = vsel %vm10913_vm5, %v6266_v56, %v6273_v44  ;;  %v5730_v63 = vshrl.u32 %v5648_v52, 16  ;;  %v5100_v0 = vshrl.u32 %v5051_v54, 16  ;;  %v6276_v31 = vshrl.u32 %v6208_v36, 16  ;;  %v6210_v3 = vld [vmem:[#allocation3 + $0x54] sm:$0xf] }
 0x498   : > { %v4178_v60 = vor.u32 %v4176_v55, %v4175_v19  ;;  %v5120_v4 = vsel %vm10913_vm5, %v5112_v59, %v5119_v15  ;;  %v11363_v1 = vrot.slane %v6281_v39, 7  ;;  %v5723_v5 = vor.u32 %v5722_v48, %v5719_v50  ;;  %v5649_v9 = vld [vmem:[#allocation3 + $0x40] sm:$0x1]  ;;  %v3871_v2 = vld [vmem:[#allocation3 + $0x144] sm:$0xf] }
 0x499   : > { %v5728_v10 = vrot.slane %v5726_v58, 5  ;;  %v5108_v13 = vshll.u32 %v11335_v17, 16  ;;  %v6284_v23 = vshll.u32 %v6209_v47, 16  ;;  %v4182_v26 = vshrl.u32 %v3871_v2, 16  ;;  %v5595_v7 = vld [vmem:[#allocation3 + $0xcc] sm:$0xf] }
 0x49a   : > { %v4179_v6 = vsel %vm10913_vm5, %v8742_v42, %v4178_v60  ;;  %v5594_v29 = vld [vmem:[#allocation3 + $0xc8] sm:$0xf]  ;;  %v8745_v62 = vrot.slane %v5100_v0, 11  ;;  %v6290_v35 = vshrl.u32 %v6210_v3, 16  ;;  %v8762_v24 = vrot.slane %v6276_v31, 11 }
 0x49b   : > { %4291 = vst.msk [vmem:[#allocation4 + $0x138] sm:$0xf] %vm3687_vm1, %v4179_v6  ;;  %v5110_v33 = vor.u32 %v5108_v13, %v5107_v51  ;;  %v6286_v14 = vor.u32 %v6284_v23, %v11363_v1  ;;  %v4185_v17 = vshll.u32 %v3871_v2, 16  ;;  %v5650_v32 = vld [vmem:[#allocation3 + $0x50] sm:$0xf]  ;;  %v5736_v30 = vshll.u32 %v5649_v9, 16 }
 0x49c   : > { %v4408_v18 = vpop.permute.xlu0 %4407  ;;  %5627 = vst.msk [vmem:[#allocation4 + $0xb8] sm:$0xf] %vm3687_vm1, %v5595_v7  ;;  %v4180_v41 = vrot.slane %v4175_v19, 4  ;;  %v6292_v47 = vrot.slane %v6290_v35, 7  ;;  %v6293_v49 = vshll.u32 %v6210_v3, 16  ;;  %v5741_v52 = vshrl.u32 %v5650_v32, 16 }
 0x49d   : > { %6797 = vrot.lane.b32.xlu0 %v6733_v38, %s9278_s25  ;;  %4481 = vst.msk [vmem:[#allocation4 + $0x114] sm:$0xf] %vm4457_vm7, %v4408_v18  ;;  %v5724_v38 = vrot.slane %v5723_v5, 4  ;;  %v5111_v46 = vsel %vm10913_vm5, %v8745_v62, %v5110_v33  ;;  %v6287_v21 = vsel %vm10913_vm5, %v8762_v24, %v6286_v14  ;;  %v5055_v51 = vld [vmem:[#allocation3 + $0x38] sm:$0xf]  ;;  %v5738_v54 = vrot.slane %v5736_v30, 5 }
 0x49e   : > { %6605 = vrot.lane.b32.xlu1 %v6265_v20, %s9277_s23  ;;  %6076 = vrot.lane.b32.xlu2 %v5705_v37, %s9275_s17  ;;  %v5732_v20 = vrot.slane %v5730_v63, 4  ;;  %v4184_v37 = vrot.slane %v4182_v26, 7  ;;  %5626 = vst.msk [vmem:[#allocation4 + $0xac] sm:$0xf] %vm3687_vm1, %v5594_v29  ;;  %v11386_v16 = vld [vmem:[#allocation3 + $0x170] sm:$0xf]  ;;  %v6295_v56 = vor.u32 %v6293_v49, %v6292_v47 }
 0x49f   : > { %v4412_v8 = vpop.permute.xlu2 %4411  ;;  %v5729_v11 = vsel %vm9373_vm2, %v5724_v38, %v5728_v10  ;;  %v3877_v44 = vld [vmem:[#allocation3 + $0x174] sm:$0xf]  ;;  %v5744_v42 = vshll.u32 %v5650_v32, 16  ;;  %v4217_v19 = vshrl.u32 %v11386_v16, 16  ;;  %v5127_v48 = vshrl.u32 %v5055_v51, 16 }
 0x4a0   : > { %4483 = vst.msk [vmem:[#allocation4 + $0x12c] sm:$0xf] %vm4457_vm7, %v4412_v8  ;;  %v4187_v45 = vor.u32 %v4185_v17, %v4184_v37  ;;  %v5733_v57 = vor.u32 %v5732_v20, %v5728_v10  ;;  %v5054_v8 = vld [vmem:[#allocation3 + $0x34] sm:$0x8]  ;;  %v4226_v55 = vshrl.u32 %v3877_v44, 16  ;;  %v4229_v60 = vshll.u32 %v3877_v44, 16 }
 0x4a1   : > { %v5651_v39 = vld [vmem:[#allocation3 + $0x54] sm:$0xf]  ;;  %v5596_v58 = vld [vmem:[#allocation3 + $0xe0] sm:$0xf]  ;;  %v11390_v36 = vrot.slane %v4217_v19, 7  ;;  %v5743_v63 = vrot.slane %v5741_v52, 4 }
 0x4a2   : > { %v4188_v27 = vsel %vm10913_vm5, %v4180_v41, %v4187_v45  ;;  %v5734_v50 = vrot.slane %v5733_v57, 4  ;;  %v4228_v59 = vrot.slane %v4226_v55, 7  ;;  %5628 = vst.msk [vmem:[#allocation4 + $0xc4] sm:$0xf] %vm3687_vm1, %v5596_v58  ;;  %v5750_v0 = vshll.u32 %v5651_v39, 16 }
 0x4a3   : > { %4292 = vst.msk [vmem:[#allocation4 + $0x144] sm:$0xf] %vm3687_vm1, %v4188_v27  ;;  %v5754_v31 = vshrl.u32 %v5651_v39, 16  ;;  %v4224_v3 = vrot.slane %v11390_v36, 4  ;;  %v11399_v13 = vrot.slane %v5127_v48, 7  ;;  %v5130_v23 = vshll.u32 %v5055_v51, 16 }
 0x4a4   : > { %v4231_v6 = vor.u32 %v4229_v60, %v4228_v59  ;;  %v5739_v10 = vsel %vm9373_vm2, %v5734_v50, %v5738_v54  ;;  %v5056_v9 = vld [vmem:[#allocation3 + $0x3c] sm:$0xf]  ;;  %v6213_v26 = vld [vmem:[#allocation3 + $0x6c] sm:$0xf]  ;;  %v5752_v62 = vrot.slane %v5750_v0, 5  ;;  %v4202_v52 = vrot.slane %v11338_v28, 4 }
 0x4a5   : > { %5453 = vrot.lane.b32.xlu0 %v5120_v4, %s9278_s25  ;;  %v5746_v4 = vrot.slane %v5744_v42, 5  ;;  %v5756_v33 = vrot.slane %v5754_v31, 4  ;;  %v5136_v35 = vshrl.u32 %v5056_v9, 16  ;;  %v5597_v20 = vld [vmem:[#allocation3 + $0xe4] sm:$0xf]  ;;  %v5132_v24 = vor.u32 %v5130_v23, %v11399_v13 }
 0x4a6   : > { %6799 = vrot.lane.b32.xlu1 %v6734_v43, %s9278_s25  ;;  %6607 = vrot.lane.b32.xlu2 %v6274_v61, %s9277_s23  ;;  %v6288_v43 = vrot.slane %v11363_v1, 4  ;;  %v5122_v61 = vshrl.u32 %v5054_v8, 16  ;;  %v6736_v1 = vld [vmem:[#allocation3 + $0x54] sm:$0xf]  ;;  %v4232_v2 = vsel %vm10913_vm5, %v4224_v3, %v4231_v6  ;;  %v11409_v14 = vld [vmem:[#allocation3 + $0x68] sm:$0xf] }
 0x4a7   : > { %4296 = vst.msk [vmem:[#allocation4 + $0x174] sm:$0xf] %vm3687_vm1, %v4232_v2  ;;  %v5747_v29 = vor.u32 %v5746_v4, %v5743_v63  ;;  %v3874_v37 = vld [vmem:[#allocation3 + $0x15c] sm:$0xf]  ;;  %v5652_v17 = vld [vmem:[#allocation3 + $0x58] sm:$0x1]  ;;  %v5757_v57 = vor.u32 %v5756_v33, %v5752_v62 }
 0x4a8   : > { %v6296_v5 = vsel %vm10913_vm5, %v6288_v43, %v6295_v56  ;;  %v8746_v18 = vrot.slane %v5122_v61, 11  ;;  %v6312_v38 = vshrl.u32 %v6213_v26, 16  ;;  %v4204_v32 = vshrl.u32 %v3874_v37, 16  ;;  %5629 = vst.msk [vmem:[#allocation4 + $0xd0] sm:$0xf] %vm3687_vm1, %v5597_v20 }
 0x4a9   : > { %v5748_v30 = vrot.slane %v5747_v29, 4  ;;  %v6303_v41 = vshrl.u32 %v11409_v14, 16  ;;  %v6735_v47 = vld [vmem:[#allocation3 + $0x50] sm:$0xf]  ;;  %v5138_v49 = vrot.slane %v5136_v35, 7  ;;  %v5139_v44 = vshll.u32 %v5056_v9, 16 }
 0x4aa   : > { %v4206_v45 = vrot.slane %v4204_v32, 7  ;;  %v6314_v51 = vrot.slane %v6312_v38, 7  ;;  %v3875_v54 = vld [vmem:[#allocation3 + $0x16c] sm:$0x8]  ;;  %v4220_v39 = vshll.u32 %v11386_v16, 16  ;;  %v6315_v55 = vshll.u32 %v6213_v26, 16 }
 0x4ab   : > { %v5753_v8 = vsel %vm9373_vm2, %v5748_v30, %v5752_v62  ;;  %v6305_v19 = vrot.slane %v6303_v41, 7  ;;  %v4212_v50 = vshrl.u32 %v3875_v54, 16  ;;  %v5598_v48 = vld [vmem:[#allocation3 + $0xf8] sm:$0xf]  ;;  %v5758_v58 = vrot.slane %v5757_v57, 4 }
 0x4ac   : > { %v5141_v59 = vor.u32 %v5139_v44, %v5138_v49  ;;  %v5057_v60 = vld [vmem:[#allocation3 + $0x4c] sm:$0x8]  ;;  %v4222_v43 = vor.u32 %v4220_v39, %v11390_v36  ;;  %v6317_v61 = vor.u32 %v6315_v55, %v6314_v51  ;;  %v6211_v63 = vld [vmem:[#allocation3 + $0x64] sm:$0x8]  ;;  %v5134_v4 = vrot.slane %v11399_v13, 4 }
 0x4ad   : > { %6609 = vrot.lane.b32.xlu0 %v6287_v21, %s9277_s23  ;;  %v5760_v21 = vshll.u32 %v5652_v17, 16  ;;  %v8744_v16 = vrot.slane %v4212_v50, 11  ;;  %v5654_v31 = vld [vmem:[#allocation3 + $0x6c] sm:$0xf]  ;;  %5630 = vst.msk [vmem:[#allocation4 + $0xdc] sm:$0xf] %vm3687_vm1, %v5598_v48 }
 0x4ae   : > { %6080 = vrot.lane.b32.xlu1 %v5729_v11, %s9275_s17  ;;  %5451 = vrot.lane.b32.xlu2 %v5111_v46, %s9278_s25  ;;  %v4207_v11 = vshll.u32 %v3874_v37, 16  ;;  %v5133_v46 = vsel %vm10913_vm5, %v8746_v18, %v5132_v24  ;;  %v6310_v3 = vrot.slane %v6305_v19, 4  ;;  %v5142_v36 = vsel %vm10913_vm5, %v5134_v4, %v5141_v59  ;;  %v5059_v2 = vld [vmem:[#allocation3 + $0x54] sm:$0xf]  ;;  %v5655_v32 = vld [vmem:[#allocation3 + $0x70] sm:$0x1] }
 0x4af   : > { %v4410_v15 = vpop.permute.xlu1 %4409  ;;  %v5762_v28 = vrot.slane %v5760_v21, 5  ;;  %v4223_v6 = vsel %vm10913_vm5, %v8744_v16, %v4222_v43  ;;  %v5144_v9 = vshrl.u32 %v5057_v60, 16  ;;  %v5774_v18 = vshll.u32 %v5654_v31, 16  ;;  %v5653_v30 = vld [vmem:[#allocation3 + $0x68] sm:$0xf] }
 0x4b0   : > { %4482 = vst.msk [vmem:[#allocation4 + $0x120] sm:$0xf] %vm4457_vm7, %v4410_v15  ;;  %v4209_v27 = vor.u32 %v4207_v11, %v4206_v45  ;;  %v5058_v15 = vld [vmem:[#allocation3 + $0x50] sm:$0xf]  ;;  %v6318_v13 = vsel %vm10913_vm5, %v6310_v3, %v6317_v61  ;;  %v5778_v23 = vshrl.u32 %v5654_v31, 16  ;;  %v6306_v26 = vshll.u32 %v11409_v14, 16 }
 0x4b1   : > { %v5149_v0 = vshrl.u32 %v5058_v15, 16  ;;  %4295 = vst.msk [vmem:[#allocation4 + $0x168] sm:$0xf] %vm3687_vm1, %v4223_v6  ;;  %v5152_v62 = vshll.u32 %v5058_v15, 16  ;;  %v5158_v20 = vshrl.u32 %v5059_v2, 16  ;;  %v8747_v24 = vrot.slane %v5144_v9, 11 }
 0x4b2   : > { %v4210_v56 = vsel %vm10913_vm5, %v4202_v52, %v4209_v27  ;;  %v6308_v35 = vor.u32 %v6306_v26, %v6305_v19  ;;  %v5776_v17 = vrot.slane %v5774_v18, 5  ;;  %v5780_v38 = vrot.slane %v5778_v23, 4  ;;  %v6737_v41 = vld [vmem:[#allocation3 + $0x68] sm:$0xf]  ;;  %v6215_v57 = vld [vmem:[#allocation3 + $0x80] sm:$0xf] }
 0x4b3   : > { %4294 = vst.msk [vmem:[#allocation4 + $0x15c] sm:$0xf] %vm3687_vm1, %v4210_v56  ;;  %v5160_v45 = vrot.slane %v5158_v20, 7  ;;  %v5161_v21 = vshll.u32 %v5059_v2, 16  ;;  %v5765_v49 = vshrl.u32 %v5653_v30, 16  ;;  %v6325_v27 = vshrl.u32 %v6215_v57, 16 }
 0x4b4   : > { %v6214_v54 = vld [vmem:[#allocation3 + $0x7c] sm:$0x8]  ;;  %v5600_v55 = vld [vmem:[#allocation3 + $0x110] sm:$0xf]  ;;  %v6738_v50 = vld [vmem:[#allocation3 + $0x6c] sm:$0xf] }
 0x4b5   : > { %6803 = vrot.lane.b32.xlu0 %v6736_v1, %s9278_s25  ;;  %v5151_v1 = vrot.slane %v5149_v0, 7  ;;  %v5163_v52 = vor.u32 %v5161_v21, %v5160_v45  ;;  %v6320_v48 = vshrl.u32 %v6214_v54, 16  ;;  %5632 = vst.msk [vmem:[#allocation4 + $0xf4] sm:$0xf] %vm3687_vm1, %v5600_v55  ;;  %v6216_v59 = vld [vmem:[#allocation3 + $0x84] sm:$0xf] }
 0x4b6   : > { %6611 = vrot.lane.b32.xlu1 %v6296_v5, %s9277_s23  ;;  %6082 = vrot.lane.b32.xlu2 %v5739_v10, %s9275_s17  ;;  %v5763_v5 = vsel %vm9373_vm2, %v5758_v58, %v5762_v28  ;;  %v6298_v10 = vshrl.u32 %v6211_v63, 16  ;;  %v11454_v58 = vrot.slane %v6325_v27, 7  ;;  %v6328_v60 = vshll.u32 %v6215_v57, 16  ;;  %v5062_v61 = vld [vmem:[#allocation3 + $0x6c] sm:$0xf]  ;;  %v9135_v57 = vld [vmem:[%s12288_s3 + $0x38] sm:$0xff] }
 0x4b7   : > { %v4418_v7 = vpop.permute.xlu2 %4417  ;;  %v5154_v37 = vor.u32 %v5152_v62, %v5151_v1  ;;  %v5156_v39 = vrot.slane %v5151_v1, 4  ;;  %v8764_v16 = vrot.slane %v6320_v48, 11  ;;  %v6334_v31 = vshrl.u32 %v6216_v59, 16  ;;  %v11464_v3 = vld [vmem:[#allocation3 + $0x68] sm:$0xf]  ;;  %v9143_v21 = vld [vmem:[%s12288_s3 + $0x78] sm:$0xff]  ;;  %7922 = vmatpush.bf16.msra.mxu1 %v9135_v57 }
 0x4b8   : > { %4486 = vst.msk [vmem:[#allocation4 + $0x150] sm:$0xf] %vm4457_vm7, %v4418_v7  ;;  %v5599_v7 = vld [vmem:[#allocation3 + $0xfc] sm:$0xf]  ;;  %v8763_v33 = vrot.slane %v6298_v10, 11  ;;  %v6330_v4 = vor.u32 %v6328_v60, %v11454_v58  ;;  %v5180_v6 = vshrl.u32 %v5062_v61, 16  ;;  %8011 = vmatpush.bf16.msra.mxu2 %v9143_v21 }
 0x4b9   : > { %5631 = vst.msk [vmem:[#allocation4 + $0xe8] sm:$0xf] %vm3687_vm1, %v5599_v7  ;;  %v5155_v11 = vsel %vm10913_vm5, %v8747_v24, %v5154_v37  ;;  %v5164_v56 = vsel %vm10913_vm5, %v5156_v39, %v5163_v52  ;;  %v5656_v10 = vld [vmem:[#allocation3 + $0x80] sm:$0xf]  ;;  %v5601_v9 = vld [vmem:[#allocation3 + $0x114] sm:$0xf] }
 0x4ba   : > { %v6309_v14 = vsel %vm10913_vm5, %v8763_v33, %v6308_v35  ;;  %v6336_v2 = vrot.slane %v6334_v31, 7  ;;  %5633 = vst.msk [vmem:[#allocation4 + $0x100] sm:$0xf] %vm3687_vm1, %v5601_v9  ;;  %v6739_v18 = vld [vmem:[#allocation3 + $0x80] sm:$0xf]  ;;  %v5182_v23 = vrot.slane %v5180_v6, 7 }
 0x4bb   : > { %v6337_v7 = vshll.u32 %v6216_v59, 16  ;;  %v5792_v62 = vshll.u32 %v5656_v10, 16  ;;  %v6218_v33 = vld [vmem:[#allocation3 + $0x98] sm:$0xf]  ;;  %v9202_v35 = vld [vmem:[%s12287_s2] ss:$0 sm:$0xff] }
 0x4bc   : > { %v6740_v54 = vld [vmem:[#allocation3 + $0x84] sm:$0xf]  ;;  %v9134_v60 = vld [vmem:[%s12288_s3 + $0x30] sm:$0xff] }
 0x4bd   : > { %6084 = vrot.lane.b32.xlu0 %v5753_v8, %s9275_s17  ;;  %v5768_v8 = vshll.u32 %v5653_v30, 16  ;;  %v3650_v26 = vpop.f32.mrf.mxu0  ;;  %7923 = vmatpush.bf16.msra.mxu1 %v9134_v60  ;;  %v11553_v60 = vld [vmem:[#allocation3 + $0xb4] sm:$0xf] }
 0x4be   : > { %5455 = vrot.lane.b32.xlu1 %v5133_v46, %s9278_s25  ;;  %6801 = vrot.lane.b32.xlu2 %v6735_v47, %s9278_s25  ;;  %v5781_v46 = vor.u32 %v5780_v38, %v5776_v17  ;;  %v5784_v47 = vshll.u32 %v5655_v32, 16  ;;  %v3651_v20 = vadd.f32 %v9202_v35, %v3650_v26  ;;  %v5183_v38 = vshll.u32 %v5062_v61, 16  ;;  %v5060_v32 = vld [vmem:[#allocation3 + $0x64] sm:$0x8]  ;;  %v9141_v26 = vld [vmem:[%s12288_s3 + $0x68] sm:$0xff] }
 0x4bf   : > { %v4414_v42 = vpop.permute.xlu0 %4413  ;;  %v5770_v19 = vrot.slane %v5768_v8, 5  ;;  %v5794_v8 = vrot.slane %v5792_v62, 5 }
 0x4c0   : > { %4484 = vst.msk [vmem:[#allocation4 + $0x138] sm:$0xf] %vm4457_vm7, %v4414_v42  ;;  %v5782_v44 = vrot.slane %v5781_v46, 4  ;;  %v5786_v15 = vrot.slane %v5784_v47, 5  ;;  %v5767_v42 = vrot.slane %v5765_v49, 4  ;;  %v3685_v45 = vmax.f32 %v3651_v20, 0.0 }
 0x4c1   : > { %v5185_v46 = vor.u32 %v5183_v38, %v5182_v23  ;;  %v6347_v47 = vshrl.u32 %v6218_v33, 16  ;;  %v9133_v23 = vld [vmem:[%s12288_s3 + $0x28] sm:$0xff] }
 0x4c2   : > { %v5787_v28 = vsel %vm9373_vm2, %v5782_v44, %v5786_v15  ;;  %v5771_v43 = vor.u32 %v5770_v19, %v5767_v42  ;;  %v3796_v52 = vpack.c.bf16 %v3685_v45, %v3685_v45  ;;  %v5166_v42 = vshrl.u32 %v5060_v32, 16  ;;  %7924 = vmatpush.bf16.msra.mxu1 %v9133_v23 }
 0x4c4   : > { %3828 = vst.msk [vmem:[#allocation3 + $0x188] sm:$0xf] %vm3687_vm1, %v3796_v52  ;;  %v8748_v6 = vrot.slane %v5166_v42, 11  ;;  %v9131_v52 = vld [vmem:[%s12288_s3 + $0x18] sm:$0xff] }
 0x4c5   : > { %6615 = vrot.lane.b32.xlu0 %v6318_v13, %s9277_s23  ;;  %v6331_v13 = vsel %vm10913_vm5, %v8764_v16, %v6330_v4  ;;  %v3652_v48 = vpop.f32.mrf.mxu0  ;;  %v6350_v16 = vshll.u32 %v6218_v33, 16 }
 0x4c6   : > { %6086 = vrot.lane.b32.xlu1 %v5763_v5, %s9275_s17  ;;  %5457 = vrot.lane.b32.xlu2 %v5142_v36, %s9278_s25  ;;  %v5772_v5 = vrot.slane %v5771_v43, 4  ;;  %v5171_v36 = vshrl.u32 %v11464_v3, 16  ;;  %v3653_v59 = vadd.f32 %v9202_v35, %v3652_v48  ;;  %v9142_v43 = vld [vmem:[%s12288_s3 + $0x70] sm:$0xff]  ;;  %v5659_v35 = vld [vmem:[#allocation3 + $0x98] sm:$0xf] }
 0x4c7   : > { %8012 = vmatpush.bf16.msra.mxu2 %v9142_v43  ;;  %v5816_v45 = vshll.u32 %v5659_v35, 16  ;;  %v11550_v48 = vld [vmem:[#allocation3 + $0x84] sm:$0xf]  ;;  %v9130_v43 = vld [vmem:[%s12288_s3 + $0x10] sm:$0xff] }
 0x4c8   : > { %v4416_v29 = vpop.permute.xlu1 %4415  ;;  %v5777_v1 = vsel %vm9373_vm2, %v5772_v5, %v5776_v17  ;;  %v5173_v17 = vrot.slane %v5171_v36, 7  ;;  %v3686_v36 = vmax.f32 %v3653_v59, 0.0 }
 0x4c9   : > { %4485 = vst.msk [vmem:[#allocation4 + $0x144] sm:$0xf] %vm4457_vm7, %v4416_v29  ;;  %v5789_v29 = vshrl.u32 %v5656_v10, 16 }
 0x4ca   : > { %v5178_v27 = vrot.slane %v5173_v17, 4 }
 0x4cb   : > { %v5791_v49 = vrot.slane %v5789_v29, 4  ;;  %8013 = vmatpush.bf16.msra.mxu2 %v9141_v26  ;;  %v9129_v26 = vld [vmem:[%s12288_s3 + $0x8] sm:$0xff] }
 0x4cc   : > { %v5186_v19 = vsel %vm10913_vm5, %v5178_v27, %v5185_v46  ;;  %v6967_v27 = vld [vmem:[#allocation3 + $0x188] sm:$0xf] }
 0x4cd   : > { %5459 = vrot.lane.b32.xlu0 %v5155_v11, %s9278_s25  ;;  %v6332_v11 = vrot.slane %v11454_v58, 4  ;;  %v5795_v58 = vor.u32 %v5794_v8, %v5791_v49  ;;  %v5660_v49 = vld [vmem:[#allocation3 + $0x9c] sm:$0xf] }
 0x4ce   : > { %6805 = vrot.lane.b32.xlu1 %v6737_v41, %s9278_s25  ;;  %6613 = vrot.lane.b32.xlu2 %v6309_v14, %s9277_s23  ;;  %v6339_v41 = vor.u32 %v6337_v7, %v6336_v2  ;;  %v5657_v14 = vld [vmem:[#allocation3 + $0x84] sm:$0xf]  ;;  %v3797_v2 = vpack.c.bf16 %v3686_v36, %v3686_v36 }
 0x4cf   : > { %v5798_v44 = vshll.u32 %v5657_v14, 16  ;;  %v5802_v15 = vshrl.u32 %v5657_v14, 16  ;;  %v5813_v14 = vshrl.u32 %v5659_v35, 16  ;;  %v9137_v35 = vld [vmem:[%s12288_s3 + $0x48] sm:$0xff] }
 0x4d0   : > { %v4424_v51 = vpop.permute.xlu2 %4423  ;;  %v6340_v39 = vsel %vm10913_vm5, %v6332_v11, %v6339_v41  ;;  %3829 = vst.msk [vmem:[#allocation3 + $0x18c] sm:$0xf] %vm3687_vm1, %v3797_v2  ;;  %v5063_v41 = vld [vmem:[#allocation3 + $0x7c] sm:$0x8]  ;;  %v9140_v11 = vld [vmem:[%s12288_s3 + $0x60] sm:$0xff] }
 0x4d1   : > { %4489 = vst.msk [vmem:[#allocation4 + $0x174] sm:$0xf] %vm4457_vm7, %v4424_v51  ;;  %v6217_v51 = vld [vmem:[#allocation3 + $0x94] sm:$0x8]  ;;  %v5804_v4 = vrot.slane %v5802_v15, 4  ;;  %v5818_v15 = vrot.slane %v5816_v45, 5  ;;  %8014 = vmatpush.bf16.msra.mxu2 %v9140_v11 }
 0x4d2   : > { %v6342_v55 = vshrl.u32 %v6217_v51, 16  ;;  %v5188_v51 = vshrl.u32 %v5063_v41, 16  ;;  %v5602_v2 = vld [vmem:[#allocation3 + $0x128] sm:$0xf]  ;;  %v5067_v45 = vld [vmem:[#allocation3 + $0x98] sm:$0xf] }
 0x4d3   : > { %5634 = vst.msk [vmem:[#allocation4 + $0x10c] sm:$0xf] %vm3687_vm1, %v5602_v2  ;;  %v9128_v11 = vld [vmem:[%s12288_s3] sm:$0xff] }
 0x4d4   : > { %v8765_v10 = vrot.slane %v6342_v55, 11 }
 0x4d5   : > { %6090 = vrot.lane.b32.xlu0 %v5787_v28, %s9275_s17  ;;  %v5174_v28 = vshll.u32 %v11464_v3, 16 }
 0x4d6   : > { %5461 = vrot.lane.b32.xlu1 %v5164_v56, %s9278_s25  ;;  %6807 = vrot.lane.b32.xlu2 %v6738_v50, %s9278_s25  ;;  %v11496_v56 = vrot.slane %v6347_v47, 7  ;;  %v6219_v50 = vld [vmem:[#allocation3 + $0x9c] sm:$0xf] }
 0x4d7   : > { %v4420_v0 = vpop.permute.xlu0 %4419  ;;  %v5176_v5 = vor.u32 %v5174_v28, %v5173_v17  ;;  %v6356_v3 = vshrl.u32 %v6219_v50, 16  ;;  %v9132_v17 = vld [vmem:[%s12288_s3 + $0x20] sm:$0xff]  ;;  %v7313_v28 = vshll.u32 %v6967_v27, 16 }
 0x4d8   : > { %v4927_v63 = vpop.permute.xlu2 %4926  ;;  %4487 = vst.msk [vmem:[#allocation4 + $0x15c] sm:$0xf] %vm4457_vm7, %v4420_v0  ;;  %v5800_v0 = vrot.slane %v5798_v44, 5  ;;  %v6352_v9 = vor.u32 %v6350_v16, %v11496_v56  ;;  %v6354_v8 = vrot.slane %v11496_v56, 4  ;;  %7925 = vmatpush.bf16.msra.mxu1 %v9132_v17  ;;  %v5815_v44 = vrot.slane %v5813_v14, 4 }
 0x4d9   : > { %5021 = vst.msk [vmem:[#allocation4 + $0x18] sm:$0xf] %vm5018_vm8, %v4927_v63  ;;  %v5177_v29 = vsel %vm10913_vm5, %v8748_v6, %v5176_v5  ;;  %v6358_v62 = vrot.slane %v6356_v3, 7  ;;  %v5826_v56 = vshrl.u32 %v5660_v49, 16  ;;  %v11558_v6 = vld [vmem:[#allocation3 + $0xb0] sm:$0xf] }
 0x4da   : > { %v6353_v20 = vsel %vm10913_vm5, %v8765_v10, %v6352_v9  ;;  %v5819_v16 = vor.u32 %v5818_v15, %v5815_v44  ;;  %v9138_v5 = vld [vmem:[%s12288_s3 + $0x50] sm:$0xff]  ;;  %v6968_v10 = vld [vmem:[#allocation3 + $0x18c] sm:$0xf]  ;;  %v7315_v23 = vrot.slane %v7313_v28, 5  ;;  %v5205_v14 = vshll.u32 %v11550_v48, 16 }
 0x4db   : > { %v5828_v9 = vrot.slane %v5826_v56, 4 }
 0x4dc   : > { %7926 = vmatpush.bf16.msra.mxu1 %v9131_v52 }
 0x4dd   : > { %6809 = vrot.lane.b32.xlu0 %v6739_v18, %s9278_s25  ;;  %v5805_v18 = vor.u32 %v5804_v4, %v5800_v0 }
 0x4de   : > { %6617 = vrot.lane.b32.xlu1 %v6331_v13, %s9277_s23  ;;  %6088 = vrot.lane.b32.xlu2 %v5777_v1, %s9275_s17  ;;  %v5658_v13 = vld [vmem:[#allocation3 + $0x88] sm:$0x1]  ;;  %v5796_v1 = vrot.slane %v5795_v58, 4  ;;  %v7310_v58 = vshrl.u32 %v6967_v27, 16 }
 0x4df   : > { %v4923_v30 = vpop.permute.xlu0 %4922  ;;  %v5808_v33 = vshll.u32 %v5658_v13, 16  ;;  %v5202_v13 = vshrl.u32 %v11550_v48, 16  ;;  %v5663_v48 = vld [vmem:[#allocation3 + $0xb4] sm:$0xf] }
 0x4e0   : > { %v4422_v24 = vpop.permute.xlu1 %4421  ;;  %v4933_v37 = vpop.permute.xlu2 %4932  ;;  %5019 = vst.msk [vmem:[#allocation4] sm:$0xf] %vm5018_vm8, %v4923_v30  ;;  %v5801_v7 = vsel %vm9373_vm2, %v5796_v1, %v5800_v0  ;;  %v5806_v30 = vrot.slane %v5805_v18, 4  ;;  %v8749_v0 = vrot.slane %v5188_v51, 11  ;;  %v6378_v1 = vshrl.u32 %v11553_v60, 16  ;;  %7927 = vmatpush.bf16.msra.mxu1 %v9130_v43  ;;  %v9136_v51 = vld [vmem:[%s12288_s3 + $0x40] sm:$0xff] }
 0x4e1   : > { %4488 = vst.msk [vmem:[#allocation4 + $0x168] sm:$0xf] %vm4457_vm7, %v4422_v24  ;;  %v5064_v24 = vld [vmem:[#allocation3 + $0x80] sm:$0xf]  ;;  %v5810_v57 = vrot.slane %v5808_v33, 5  ;;  %v7312_v18 = vrot.slane %v7310_v58, 4 }
 0x4e2   : > { %5024 = vst.msk [vmem:[#allocation4 + $0x3c] sm:$0xf] %vm5018_vm8, %v4933_v37  ;;  %v6359_v37 = vshll.u32 %v6219_v50, 16  ;;  %v5193_v21 = vshrl.u32 %v5064_v24, 16  ;;  %v6742_v50 = vld [vmem:[#allocation3 + $0x9c] sm:$0xf] }
 0x4e3   : > { %v5196_v59 = vshll.u32 %v5064_v24, 16  ;;  %v6369_v33 = vshrl.u32 %v11558_v6, 16  ;;  %v6741_v24 = vld [vmem:[#allocation3 + $0x98] sm:$0xf]  ;;  %v7316_v41 = vor.u32 %v7315_v23, %v7312_v18 }
 0x4e4   : > { %v6361_v47 = vor.u32 %v6359_v37, %v6358_v62  ;;  %v11546_v55 = vrot.slane %v5193_v21, 7  ;;  %v7323_v62 = vshrl.u32 %v6968_v10, 16  ;;  %7928 = vmatpush.bf16.msra.mxu1 %v9129_v26 }
 0x4e5   : > { %5465 = vrot.lane.b32.xlu0 %v5186_v19, %s9278_s25  ;;  %v5811_v19 = vsel %vm9373_vm2, %v5806_v30, %v5810_v57  ;;  %v6380_v30 = vrot.slane %v6378_v1, 7  ;;  %v7317_v56 = vrot.slane %v7316_v41, 4 }
 0x4e6   : > { %6811 = vrot.lane.b32.xlu1 %v6740_v54, %s9278_s25  ;;  %6619 = vrot.lane.b32.xlu2 %v6340_v39, %s9277_s23  ;;  %v5822_v54 = vshll.u32 %v5660_v49, 16  ;;  %v9139_v39 = vld [vmem:[%s12288_s3 + $0x58] sm:$0xff]  ;;  %v6362_v42 = vsel %vm10913_vm5, %v6354_v8, %v6361_v47  ;;  %v5198_v36 = vor.u32 %v5196_v59, %v11546_v55  ;;  %v7325_v21 = vrot.slane %v7323_v62, 4 }
 0x4e7   : > { %v4929_v31 = vpop.permute.xlu0 %4928  ;;  %8015 = vmatpush.bf16.msra.mxu2 %v9139_v39  ;;  %v6371_v49 = vrot.slane %v6369_v33, 7  ;;  %v6381_v8 = vshll.u32 %v11553_v60, 16 }
 0x4e8   : > { %v4925_v61 = vpop.permute.xlu1 %4924  ;;  %v4939_v63 = vpop.permute.xlu2 %4938  ;;  %5022 = vst.msk [vmem:[#allocation4 + $0x24] sm:$0xf] %vm5018_vm8, %v4929_v31  ;;  %v5824_v4 = vrot.slane %v5822_v54, 5  ;;  %v5661_v31 = vld [vmem:[#allocation3 + $0xa0] sm:$0x1]  ;;  %7929 = vmatpush.bf16.msra.mxu1 %v9128_v11 }
 0x4e9   : > { %5020 = vst.msk [vmem:[#allocation4 + $0xc] sm:$0xf] %vm5018_vm8, %v4925_v61  ;;  %v5832_v17 = vshll.u32 %v5661_v31, 16  ;;  %v5066_v54 = vld [vmem:[#allocation3 + $0x94] sm:$0x8]  ;;  %v6383_v39 = vor.u32 %v6381_v8, %v6380_v30  ;;  %v6376_v28 = vrot.slane %v6371_v49, 4 }
 0x4ea   : > { %5027 = vst.msk [vmem:[#allocation4 + $0x60] sm:$0xf] %vm5018_vm8, %v4939_v63  ;;  %v5829_v37 = vor.u32 %v5828_v9, %v5824_v4  ;;  %v6372_v31 = vshll.u32 %v11558_v6, 16 }
 0x4eb   : > { %8016 = vmatpush.bf16.msra.mxu2 %v9138_v5  ;;  %v5834_v44 = vrot.slane %v5832_v17, 5  ;;  %v6969_v5 = vld [vmem:[#allocation3 + $0x190] sm:$0x1] }
 0x4ec   : > { %v5830_v27 = vrot.slane %v5829_v37, 4  ;;  %v7329_v1 = vshll.u32 %v6969_v5, 16  ;;  %v6374_v23 = vor.u32 %v6372_v31, %v6371_v49  ;;  %v11619_v37 = vpop.f32.mrf.mxu3  ;;  %v6743_v17 = vld [vmem:[#allocation3 + $0xb0] sm:$0xf] }
 0x4ed   : > { %6621 = vrot.lane.b32.xlu0 %v6353_v20, %s9277_s23  ;;  %v5199_v20 = vsel %vm10913_vm5, %v8749_v0, %v5198_v36  ;;  %v5068_v0 = vld [vmem:[#allocation3 + $0x9c] sm:$0xf]  ;;  %v11647_v31 = vld [vmem:[#allocation3 + $0xb0] sm:$0xf] }
 0x4ee   : > { %6092 = vrot.lane.b32.xlu1 %v5801_v7, %s9275_s17  ;;  %5463 = vrot.lane.b32.xlu2 %v5177_v29, %s9278_s25  ;;  %v5820_v7 = vrot.slane %v5819_v16, 4  ;;  %v7319_v29 = vshll.u32 %v6968_v10, 16  ;;  %v5835_v59 = vsel %vm9373_vm2, %v5830_v27, %v5834_v44  ;;  %v5846_v16 = vshll.u32 %v5663_v48, 16 }
 0x4ef   : > { %v4935_v46 = vpop.permute.xlu0 %4934  ;;  %8017 = vmatpush.bf16.msra.mxu2 %v9137_v35  ;;  %v7331_v33 = vrot.slane %v7329_v1, 5  ;;  %v5664_v35 = vld [vmem:[#allocation3 + $0xb8] sm:$0x1]  ;;  %v5227_v11 = vshll.u32 %v5068_v0, 16 }
 0x4f0   : > { %v4931_v38 = vpop.permute.xlu1 %4930  ;;  %v4945_v32 = vpop.permute.xlu2 %4944  ;;  %5025 = vst.msk [vmem:[#allocation4 + $0x48] sm:$0xf] %vm5018_vm8, %v4935_v46  ;;  %v7321_v57 = vrot.slane %v7319_v29, 5  ;;  %v11613_v29 = vrot.slane %v5846_v16, 5 }
 0x4f1   : > { %5023 = vst.msk [vmem:[#allocation4 + $0x30] sm:$0xf] %vm5018_vm8, %v4931_v38  ;;  %v5204_v38 = vrot.slane %v5202_v13, 7  ;;  %v5218_v13 = vshll.u32 %v5067_v45, 16 }
 0x4f2   : > { %5030 = vst.msk [vmem:[#allocation4 + $0x84] sm:$0xf] %vm5018_vm8, %v4945_v32  ;;  %v5825_v32 = vsel %vm9373_vm2, %v5820_v7, %v5824_v4  ;;  %v7326_v58 = vor.u32 %v7325_v21, %v7321_v57  ;;  %v5850_v4 = vshrl.u32 %v5663_v48, 16  ;;  %v5224_v7 = vshrl.u32 %v5068_v0, 16  ;;  %v6744_v48 = vld [vmem:[#allocation3 + $0xb4] sm:$0xf] }
 0x4f3   : > { %v5207_v15 = vor.u32 %v5205_v14, %v5204_v38  ;;  %8018 = vmatpush.bf16.msra.mxu2 %v9136_v51  ;;  %v5856_v14 = vshll.u32 %v5664_v35, 16  ;;  %v5071_v0 = vld [vmem:[#allocation3 + $0xb4] sm:$0xf]  ;;  %v5666_v35 = vld [vmem:[#allocation3 + $0xcc] sm:$0xf] }
 0x4f4   : > { %v7327_v36 = vrot.slane %v7326_v58, 4  ;;  %v5852_v62 = vrot.slane %v5850_v4, 4 }
 0x4f5   : > { %6815 = vrot.lane.b32.xlu0 %v6742_v50, %s9278_s25  ;;  %v5200_v50 = vrot.slane %v11546_v55, 4  ;;  %v6384_v55 = vsel %vm10913_vm5, %v6376_v28, %v6383_v39 }
 0x4f6   : > { %6623 = vrot.lane.b32.xlu1 %v6362_v42, %s9277_s23  ;;  %6094 = vrot.lane.b32.xlu2 %v5811_v19, %s9275_s17  ;;  %v6220_v42 = vld [vmem:[#allocation3 + $0xac] sm:$0x8]  ;;  %v5215_v19 = vshrl.u32 %v5067_v45, 16  ;;  %v5853_v41 = vor.u32 %v5852_v62, %v11613_v29  ;;  %v6224_v45 = vld [vmem:[#allocation3 + $0xc8] sm:$0xf] }
 0x4f7   : > { %v4941_v3 = vpop.permute.xlu0 %4940  ;;  %v5208_v60 = vsel %vm10913_vm5, %v5200_v50, %v5207_v15  ;;  %v6364_v43 = vshrl.u32 %v6220_v42, 16  ;;  %v6391_v27 = vshrl.u32 %v6224_v45, 16  ;;  %v5858_v15 = vrot.slane %v5856_v14, 5  ;;  %v5605_v62 = vld [vmem:[#allocation3 + $0x144] sm:$0xf] }
 0x4f8   : > { %v4937_v61 = vpop.permute.xlu1 %4936  ;;  %v6077_v63 = vpop.permute.xlu2 %6076  ;;  %5028 = vst.msk [vmem:[#allocation4 + $0x6c] sm:$0xf] %vm5018_vm8, %v4941_v3  ;;  %v7322_v3 = vsel %vm9373_vm2, %v7317_v56, %v7321_v57  ;;  %v5854_v44 = vrot.slane %v5853_v41, 4 }
 0x4f9   : > { %5026 = vst.msk [vmem:[#allocation4 + $0x54] sm:$0xf] %vm5018_vm8, %v4937_v61  ;;  %v5210_v61 = vshrl.u32 %v5066_v54, 16  ;;  %v8766_v18 = vrot.slane %v6364_v43, 11  ;;  %v11636_v28 = vrot.slane %v6391_v27, 7 }
 0x4fa   : > { %6172 = vst.msk [vmem:[#allocation4 + $0x4] sm:$0xf] %vm4457_vm7, %v6077_v63  ;;  %v11603_v63 = vrot.slane %v5215_v19, 7  ;;  %v5603_v19 = vld [vmem:[#allocation3 + $0x12c] sm:$0xf] }
 0x4fb   : > { %7417 = vst.msk [vmem:[#allocation4 + $0x158] sm:$0xf] %vm3687_vm1, %v7322_v3  ;;  %v8750_v26 = vrot.slane %v5210_v61, 11  ;;  %v6375_v38 = vsel %vm10913_vm5, %v8766_v18, %v6374_v23  ;;  %v6225_v43 = vld [vmem:[#allocation3 + $0xcc] sm:$0xf]  ;;  %v11643_v61 = vpop.f32.mrf.mxu3  ;;  %v5237_v18 = vshrl.u32 %v11647_v31, 16 }
 0x4fc   : > { %v5220_v6 = vor.u32 %v5218_v13, %v11603_v63  ;;  %v5222_v8 = vrot.slane %v11603_v63, 4  ;;  %5635 = vst.msk [vmem:[#allocation4 + $0x118] sm:$0xf] %vm3687_vm1, %v5603_v19  ;;  %v5246_v13 = vshrl.u32 %v5071_v0, 16 }
 0x4fd   : > { %6096 = vrot.lane.b32.xlu0 %v5825_v32, %s9275_s17  ;;  %v5226_v32 = vrot.slane %v5224_v7, 7  ;;  %v6745_v7 = vld [vmem:[#allocation3 + $0xc8] sm:$0xf]  ;;  %5637 = vst.msk [vmem:[#allocation4 + $0x130] sm:$0xf] %vm3687_vm1, %v5605_v62 }
 0x4fe   : > { %5467 = vrot.lane.b32.xlu1 %v5199_v20, %s9278_s25  ;;  %6813 = vrot.lane.b32.xlu2 %v6741_v24, %s9278_s25  ;;  %v5662_v20 = vld [vmem:[#allocation3 + $0xb0] sm:$0xf]  ;;  %v7332_v24 = vsel %vm9373_vm2, %v7327_v36, %v7331_v33  ;;  %v5221_v30 = vsel %vm10913_vm5, %v8750_v26, %v5220_v6  ;;  %v5248_v33 = vrot.slane %v5246_v13, 7 }
 0x4ff   : > { %v4947_v52 = vpop.permute.xlu0 %4946  ;;  %7418 = vst.msk [vmem:[#allocation4 + $0x164] sm:$0xf] %vm3687_vm1, %v7332_v24  ;;  %v5229_v51 = vor.u32 %v5227_v11, %v5226_v32  ;;  %v6398_v24 = vrot.slane %v11636_v28, 4  ;;  %v6227_v32 = vld [vmem:[#allocation3 + $0xe0] sm:$0xf]  ;;  %v5249_v11 = vshll.u32 %v5071_v0, 16 }
 0x500   : > { %v4943_v46 = vpop.permute.xlu1 %4942  ;;  %v6608_v47 = vpop.permute.xlu2 %6607  ;;  %5031 = vst.msk [vmem:[#allocation4 + $0x90] sm:$0xf] %vm5018_vm8, %v4947_v52  ;;  %v6223_v52 = vld [vmem:[#allocation3 + $0xc4] sm:$0x8] }
 0x501   : > { %5029 = vst.msk [vmem:[#allocation4 + $0x78] sm:$0xf] %vm5018_vm8, %v4943_v46  ;;  %v5837_v46 = vshrl.u32 %v5662_v20, 16  ;;  %v5230_v50 = vsel %vm10913_vm5, %v5222_v8, %v5229_v51  ;;  %v6386_v58 = vshrl.u32 %v6223_v52, 16  ;;  %v5251_v52 = vor.u32 %v5249_v11, %v5248_v33  ;;  %v4511_v33 = vld [vmem:[#allocation3 + $0xb0] sm:$0xf] }
 0x502   : > { %v8955_v54 = vld [vmem:[#allocation4 + $0x158] sm:$0xf] }
 0x503   : > { %v5839_v39 = vrot.slane %v5837_v46, 4  ;;  %v8767_v3 = vrot.slane %v6386_v58, 11  ;;  %v5069_v46 = vld [vmem:[#allocation3 + $0xac] sm:$0x8] }
 0x505   : > { %6627 = vrot.lane.b32.xlu0 %v6384_v55, %s9277_s23  ;;  %v6394_v55 = vshll.u32 %v6224_v45, 16  ;;  %v5239_v45 = vrot.slane %v5237_v18, 7 }
 0x506   : > { %6098 = vrot.lane.b32.xlu1 %v5835_v59, %s9275_s17  ;;  %5469 = vrot.lane.b32.xlu2 %v5208_v60, %s9278_s25  ;;  %v9124_v56 = vld [vmem:[#allocation4 + $0x160] sm:$0xf0]  ;;  %v5859_v60 = vsel %vm9373_vm2, %v5854_v44, %v5858_v15  ;;  %v6413_v44 = vshrl.u32 %v6227_v32, 16  ;;  %v5607_v15 = vld [vmem:[#allocation3 + $0x15c] sm:$0xf] }
 0x507   : > { %v6079_v2 = vpop.permute.xlu0 %6078  ;;  %v8956_v59 = vor.u32 %v9124_v56, %v8955_v54  ;;  %v6396_v36 = vor.u32 %v6394_v55, %v11636_v28  ;;  %v5244_v19 = vrot.slane %v5239_v45, 4  ;;  %v5874_v56 = vshrl.u32 %v5666_v35, 16  ;;  %5639 = vst.msk [vmem:[#allocation4 + $0x148] sm:$0xf] %vm3687_vm1, %v5607_v15  ;;  %v6228_v55 = vld [vmem:[#allocation3 + $0xe4] sm:$0xf] }
 0x508   : > { %v4949_v10 = vpop.permute.xlu1 %4948  ;;  %v5452_v9 = vpop.permute.xlu2 %5451  ;;  %6173 = vst.msk [vmem:[#allocation4 + $0x10] sm:$0xf] %vm4457_vm7, %v6079_v2  ;;  %v5665_v2 = vld [vmem:[#allocation3 + $0xc8] sm:$0xf]  ;;  %v5232_v28 = vshrl.u32 %v5069_v46, 16  ;;  %v6422_v18 = vshrl.u32 %v6228_v55, 16 }
 0x509   : > { %5032 = vst.msk [vmem:[#allocation4 + $0x9c] sm:$0xf] %vm5018_vm8, %v4949_v10  ;;  %9055 = vmatmul.msk.bf16.gmra.mxu3 %vm7873_vm6, %v8956_v59  ;;  %v6400_v10 = vshrl.u32 %v6225_v43, 16  ;;  %v6397_v23 = vsel %vm10913_vm5, %v8767_v3, %v6396_v36  ;;  %v5252_v59 = vsel %vm10913_vm5, %v5244_v19, %v5251_v52  ;;  %v6416_v36 = vshll.u32 %v6227_v32, 16  ;;  %v4512_v46 = vld [vmem:[#allocation3 + $0xb4] sm:$0xf] }
 0x50a   : > { %5548 = vst.msk [vmem:[#allocation4] sm:$0xf] %vm5547_vm9, %v5452_v9  ;;  %v5604_v9 = vld [vmem:[#allocation3 + $0x140] sm:$0xf]  ;;  %v4707_v32 = vshrl.u32 %v4511_v33, 16  ;;  %v4716_v19 = vshll.u32 %v4512_v46, 16 }
 0x50b   : > { %6702 = vst.msk [vmem:[#allocation4 + $0x10] sm:$0xf] %vm5018_vm8, %v6608_v47  ;;  %v5840_v47 = vshll.u32 %v5662_v20, 16  ;;  %v6402_v6 = vrot.slane %v6400_v10, 7  ;;  %v5861_v20 = vshrl.u32 %v5665_v2, 16  ;;  %v5876_v10 = vrot.slane %v5874_v56, 4 }
 0x50c   : > { %5636 = vst.msk [vmem:[#allocation4 + $0x124] sm:$0xf] %vm3687_vm1, %v5604_v9  ;;  %v5609_v9 = vld [vmem:[#allocation3 + $0x174] sm:$0xf]  ;;  %v5072_v52 = vld [vmem:[#allocation3 + $0xc4] sm:$0x8] }
 0x50d   : > { %5471 = vrot.lane.b32.xlu0 %v5221_v30, %s9278_s25  ;;  %v5842_v42 = vrot.slane %v5840_v47, 5  ;;  %v5863_v27 = vrot.slane %v5861_v20, 4  ;;  %5641 = vst.msk [vmem:[#allocation4 + $0x160] sm:$0xf] %vm3687_vm1, %v5609_v9  ;;  %v4720_v56 = vshrl.u32 %v4512_v46, 16 }
 0x50e   : > { %6817 = vrot.lane.b32.xlu1 %v6743_v17, %s9278_s25  ;;  %6625 = vrot.lane.b32.xlu2 %v6375_v38, %s9277_s23  ;;  %v6403_v17 = vshll.u32 %v6225_v43, 16  ;;  %v5864_v38 = vshll.u32 %v5665_v2, 16  ;;  %v6415_v43 = vrot.slane %v6413_v44, 7  ;;  %v4709_v44 = vrot.slane %v4707_v32, 4  ;;  %v6230_v32 = vld [vmem:[#allocation3 + $0xf8] sm:$0xf] }
 0x50f   : > { %v6798_v49 = vpop.permute.xlu0 %6797  ;;  %v5843_v63 = vor.u32 %v5842_v42, %v5839_v39  ;;  %v5870_v39 = vshll.u32 %v5666_v35, 16  ;;  %v6226_v42 = vld [vmem:[#allocation3 + $0xdc] sm:$0x8] }
 0x510   : > { %v6606_v57 = vpop.permute.xlu1 %6605  ;;  %v6083_v21 = vpop.permute.xlu2 %6082  ;;  %v6405_v8 = vor.u32 %v6403_v17, %v6402_v6  ;;  %v5866_v54 = vrot.slane %v5864_v38, 5  ;;  %v6425_v38 = vshll.u32 %v6228_v55, 16 }
 0x511   : > { %6701 = vst.msk [vmem:[#allocation4 + $0x4] sm:$0xf] %vm5018_vm8, %v6606_v57  ;;  %v5844_v1 = vrot.slane %v5843_v63, 4  ;;  %v8779_v57 = vld [vmem:[#allocation4] sm:$0xf]  ;;  %v5872_v0 = vrot.slane %v5870_v39, 5 }
 0x512   : > { %6175 = vst.msk [vmem:[#allocation4 + $0x28] sm:$0xf] %vm4457_vm7, %v6083_v21  ;;  %v6406_v58 = vsel %vm10913_vm5, %v6398_v24, %v6405_v8  ;;  %v5867_v63 = vor.u32 %v5866_v54, %v5863_v27  ;;  %v6424_v24 = vrot.slane %v6422_v18, 7  ;;  %v5669_v54 = vld [vmem:[#allocation3 + $0xe4] sm:$0xf] }
 0x513   : > { %6893 = vst.msk [vmem:[#allocation4 + $0x4] sm:$0xf] %vm5547_vm9, %v6798_v49  ;;  %v5849_v26 = vsel %vm9373_vm2, %v5844_v1, %v11613_v29  ;;  %v8751_v1 = vrot.slane %v5232_v28, 11  ;;  %v5877_v6 = vor.u32 %v5876_v10, %v5872_v0  ;;  %v4718_v10 = vrot.slane %v4716_v19, 5 }
 0x515   : > { %6102 = vrot.lane.b32.xlu0 %v5859_v60, %s9275_s17  ;;  %v6408_v60 = vshrl.u32 %v6226_v42, 16 }
 0x516   : > { %5473 = vrot.lane.b32.xlu1 %v5230_v50, %s9278_s25  ;;  %6819 = vrot.lane.b32.xlu2 %v6744_v48, %s9278_s25  ;;  %v5606_v50 = vld [vmem:[#allocation3 + $0x158] sm:$0xf]  ;;  %v6746_v48 = vld [vmem:[#allocation3 + $0xcc] sm:$0xf] }
 0x517   : > { %v5454_v5 = vpop.permute.xlu0 %5453  ;;  %5638 = vst.msk [vmem:[#allocation4 + $0x13c] sm:$0xf] %vm3687_vm1, %v5606_v50  ;;  %v5074_v50 = vld [vmem:[#allocation3 + $0xcc] sm:$0xf] }
 0x518   : > { %v6800_v16 = vpop.permute.xlu1 %6799  ;;  %v6802_v4 = vpop.permute.xlu2 %6801  ;;  %5549 = vst.msk [vmem:[#allocation4 + $0xc] sm:$0xf] %vm5547_vm9, %v5454_v5  ;;  %v5268_v9 = vshrl.u32 %v5074_v50, 16 }
 0x519   : > { %6894 = vst.msk [vmem:[#allocation4 + $0x10] sm:$0xf] %vm5547_vm9, %v6800_v16  ;;  %v5240_v16 = vshll.u32 %v11647_v31, 16  ;;  %v5868_v31 = vrot.slane %v5867_v63, 4 }
 0x51a   : > { %v9080_v41 = vld [vmem:[#allocation4 + $0x4] sm:$0xf] }
 0x51b   : > { %v5242_v2 = vor.u32 %v5240_v16, %v5239_v45  ;;  %v5873_v35 = vsel %vm9373_vm2, %v5868_v31, %v5872_v0  ;;  %v5878_v45 = vrot.slane %v5877_v6, 4  ;;  %v5668_v31 = vld [vmem:[#allocation3 + $0xe0] sm:$0xf] }
 0x51d   : > { %6821 = vrot.lane.b32.xlu0 %v6745_v7, %s9278_s25  ;;  %v6418_v7 = vor.u32 %v6416_v36, %v6415_v43  ;;  %v5243_v20 = vsel %vm10913_vm5, %v8751_v1, %v5242_v2 }
 0x51e   : > { %6629 = vrot.lane.b32.xlu1 %v6397_v23, %s9277_s23  ;;  %6100 = vrot.lane.b32.xlu2 %v5849_v26, %s9275_s17  ;;  %v5667_v23 = vld [vmem:[#allocation3 + $0xd0] sm:$0x1]  ;;  %v8768_v26 = vrot.slane %v6408_v60, 11  ;;  %v5898_v60 = vshrl.u32 %v5669_v54, 16 }
 0x51f   : > { %v6610_v47 = vpop.permute.xlu0 %6609  ;;  %v9081_v21 = vld [vmem:[#allocation4 + $0x8] sm:$0xf0]  ;;  %v5880_v62 = vshll.u32 %v5667_v23, 16 }
 0x520   : > { %v6081_v29 = vpop.permute.xlu1 %6080  ;;  %v5458_v30 = vpop.permute.xlu2 %5457  ;;  %v8781_v14 = vld [vmem:[#allocation4 + $0xc] sm:$0xf0]  ;;  %v8780_v51 = vor.u32 %v9081_v21, %v8779_v57  ;;  %v6419_v17 = vsel %vm10913_vm5, %v8768_v26, %v6418_v7  ;;  %v5900_v23 = vrot.slane %v5898_v60, 4  ;;  %v5670_v7 = vld [vmem:[#allocation3 + $0xe8] sm:$0x1] }
 0x521   : > { %6174 = vst.msk [vmem:[#allocation4 + $0x1c] sm:$0xf] %vm4457_vm7, %v6081_v29  ;;  %v8784_v49 = vor.u32 %v9080_v41, %v8781_v14  ;;  %v4710_v29 = vshll.u32 %v4511_v33, 16  ;;  %v5882_v11 = vrot.slane %v5880_v62, 5  ;;  %v6747_v62 = vld [vmem:[#allocation3 + $0xe0] sm:$0xf] }
 0x522   : > { %5551 = vst.msk [vmem:[#allocation4 + $0x24] sm:$0xf] %vm5547_vm9, %v5458_v30  ;;  %7930 = vmatmul.bf16.vlgmr.msra.gmra.mxu1 %v8780_v51  ;;  %v5073_v30 = vld [vmem:[#allocation3 + $0xc8] sm:$0xf]  ;;  %v6420_v51 = vrot.slane %v6415_v43, 4  ;;  %v5270_v33 = vrot.slane %v5268_v9, 7 }
 0x523   : > { %6703 = vst.msk [vmem:[#allocation4 + $0x1c] sm:$0xf] %vm5018_vm8, %v6610_v47  ;;  %8019 = vmatmul.bf16.vlgmr.msra.gmra.mxu2 %v8784_v49  ;;  %v6427_v49 = vor.u32 %v6425_v38, %v6424_v24  ;;  %v5259_v27 = vshrl.u32 %v5073_v30, 16  ;;  %v4712_v15 = vrot.slane %v4710_v29, 5  ;;  %v5883_v42 = vsel %vm9373_vm2, %v5878_v45, %v5882_v11  ;;  %v4514_v9 = vld [vmem:[#allocation3 + $0xc8] sm:$0xf] }
 0x524   : > { %6895 = vst.msk [vmem:[#allocation4 + $0x1c] sm:$0xf] %vm5547_vm9, %v6802_v4  ;;  %v5608_v4 = vld [vmem:[#allocation3 + $0x170] sm:$0xf]  ;;  %v5904_v38 = vshll.u32 %v5670_v7, 16  ;;  %v5271_v29 = vshll.u32 %v5074_v50, 16 }
 0x525   : > { %5477 = vrot.lane.b32.xlu0 %v5252_v59, %s9278_s25  ;;  %5640 = vst.msk [vmem:[#allocation4 + $0x154] sm:$0xf] %vm3687_vm1, %v5608_v4  ;;  %v6428_v39 = vsel %vm10913_vm5, %v6420_v51, %v6427_v49  ;;  %v5261_v28 = vrot.slane %v5259_v27, 7  ;;  %v5894_v59 = vshll.u32 %v5669_v54, 16  ;;  %v4713_v43 = vor.u32 %v4712_v15, %v4709_v44  ;;  %v6229_v51 = vld [vmem:[#allocation3 + $0xf4] sm:$0x8] }
 0x526   : > { %6823 = vrot.lane.b32.xlu1 %v6746_v48, %s9278_s25  ;;  %6631 = vrot.lane.b32.xlu2 %v6406_v58, %s9277_s23  ;;  %v6748_v48 = vld [vmem:[#allocation3 + $0xe4] sm:$0xf]  ;;  %v5254_v58 = vshrl.u32 %v5072_v52, 16  ;;  %v5262_v4 = vshll.u32 %v5073_v30, 16  ;;  %v5885_v30 = vshrl.u32 %v5668_v31, 16  ;;  %v5273_v46 = vor.u32 %v5271_v29, %v5270_v33 }
 0x527   : > { %v6804_v13 = vpop.permute.xlu0 %6803  ;;  %v11703_v18 = vrot.slane %v5894_v59, 5  ;;  %v4714_v26 = vrot.slane %v4713_v43, 4  ;;  %v5266_v52 = vrot.slane %v5261_v28, 4  ;;  %v4515_v15 = vld [vmem:[#allocation3 + $0xcc] sm:$0xf] }
 0x528   : > { %v6612_v5 = vpop.permute.xlu1 %6611  ;;  %v6614_v3 = vpop.permute.xlu2 %6613  ;;  %v8752_v1 = vrot.slane %v5254_v58, 11  ;;  %v5264_v2 = vor.u32 %v5262_v4, %v5261_v28  ;;  %v5887_v27 = vrot.slane %v5885_v30, 4  ;;  %v6231_v50 = vld [vmem:[#allocation3 + $0xfc] sm:$0xf]  ;;  %v4744_v58 = vshrl.u32 %v4515_v15, 16 }
 0x529   : > { %6704 = vst.msk [vmem:[#allocation4 + $0x28] sm:$0xf] %vm5018_vm8, %v6612_v5  ;;  %v9084_v16 = vld [vmem:[#allocation4 + $0x20] sm:$0xf0]  ;;  %v4513_v5 = vld [vmem:[#allocation3 + $0xb8] sm:$0x1]  ;;  %v4719_v6 = vsel %vm9373_vm2, %v4714_v26, %v4718_v10  ;;  %v5274_v54 = vsel %vm10913_vm5, %v5266_v52, %v5273_v46 }
 0x52a   : > { %6896 = vst.msk [vmem:[#allocation4 + $0x28] sm:$0xf] %vm5547_vm9, %v6804_v13  ;;  %v4722_v13 = vrot.slane %v4720_v56, 4  ;;  %v5265_v24 = vsel %vm10913_vm5, %v8752_v1, %v5264_v2  ;;  %v6438_v28 = vshll.u32 %v6230_v32, 16  ;;  %v4516_v1 = vld [vmem:[#allocation3 + $0xd0] sm:$0x1] }
 0x52b   : > { %v9083_v57 = vld [vmem:[#allocation4 + $0x1c] sm:$0xf]  ;;  %v5671_v2 = vld [vmem:[#allocation3 + $0xf8] sm:$0xf]  ;;  %v5076_v33 = vld [vmem:[#allocation3 + $0xe0] sm:$0xf] }
 0x52c   : > { %v5075_v46 = vld [vmem:[#allocation3 + $0xdc] sm:$0x8] }
 0x52d   : > { %6633 = vrot.lane.b32.xlu0 %v6419_v17, %s9277_s23  ;;  %v5901_v17 = vor.u32 %v5900_v23, %v11703_v18 }
 0x52e   : > { %6104 = vrot.lane.b32.xlu1 %v5873_v35, %s9275_s17  ;;  %5475 = vrot.lane.b32.xlu2 %v5243_v20, %s9278_s25  ;;  %v4723_v35 = vor.u32 %v4722_v13, %v4718_v10  ;;  %v4726_v20 = vshll.u32 %v4513_v5, 16  ;;  %v4746_v10 = vrot.slane %v4744_v58, 4 }
 0x52f   : > { %v6085_v47 = vpop.permute.xlu0 %6084  ;;  %v5902_v49 = vrot.slane %v5901_v17, 4  ;;  %v5909_v17 = vshrl.u32 %v5671_v2, 16 }
 0x530   : > { %v5456_v41 = vpop.permute.xlu1 %5455  ;;  %v6808_v14 = vpop.permute.xlu2 %6807  ;;  %6176 = vst.msk [vmem:[#allocation4 + $0x34] sm:$0xf] %vm4457_vm7, %v6085_v47  ;;  %v4724_v47 = vrot.slane %v4723_v35, 4  ;;  %v4731_v35 = vshrl.u32 %v4514_v9, 16 }
 0x531   : > { %5550 = vst.msk [vmem:[#allocation4 + $0x18] sm:$0xf] %vm5547_vm9, %v5456_v41  ;;  %v8793_v21 = vld [vmem:[#allocation4 + $0x24] sm:$0xf0]  ;;  %v5888_v41 = vshll.u32 %v5668_v31, 16 }
 0x532   : > { %v8796_v8 = vor.u32 %v9083_v57, %v8793_v21  ;;  %6705 = vst.msk [vmem:[#allocation4 + $0x34] sm:$0xf] %vm5018_vm8, %v6614_v3  ;;  %v4728_v57 = vrot.slane %v4726_v20, 5  ;;  %v6435_v21 = vshrl.u32 %v6230_v32, 16  ;;  %v6749_v31 = vld [vmem:[#allocation3 + $0xf8] sm:$0xf] }
 0x533   : > { %v5890_v44 = vrot.slane %v5888_v41, 5  ;;  %v6447_v20 = vshll.u32 %v6231_v50, 16  ;;  %v5672_v41 = vld [vmem:[#allocation3 + $0xfc] sm:$0xf] }
 0x534   : > { %8024 = vmatmul.bf16.gmra.mxu2 %v8796_v8  ;;  %v5906_v8 = vrot.slane %v5904_v38, 5  ;;  %v11721_v19 = vrot.slane %v6435_v21, 7  ;;  %v5912_v38 = vshll.u32 %v5671_v2, 16  ;;  %v5918_v52 = vshll.u32 %v5672_v41, 16 }
 0x535   : > { %6827 = vrot.lane.b32.xlu0 %v6748_v48, %s9278_s25  ;;  %v4740_v48 = vshll.u32 %v4515_v15, 16  ;;  %v5891_v59 = vor.u32 %v5890_v44, %v5887_v27  ;;  %v5922_v27 = vshrl.u32 %v5672_v41, 16  ;;  %v5911_v44 = vrot.slane %v5909_v17, 4 }
 0x536   : > { %6635 = vrot.lane.b32.xlu1 %v6428_v39, %s9277_s23  ;;  %6106 = vrot.lane.b32.xlu2 %v5883_v42, %s9275_s17  ;;  %v4729_v39 = vsel %vm9373_vm2, %v4724_v47, %v4728_v57  ;;  %v6430_v42 = vshrl.u32 %v6229_v51, 16  ;;  %v5907_v56 = vsel %vm9373_vm2, %v5902_v49, %v5906_v8  ;;  %v6440_v5 = vor.u32 %v6438_v28, %v11721_v19 }
 0x537   : > { %v6616_v3 = vpop.permute.xlu0 %6615  ;;  %v5892_v13 = vrot.slane %v5891_v59, 4  ;;  %v5281_v47 = vshrl.u32 %v5076_v33, 16  ;;  %v4733_v49 = vrot.slane %v4731_v35, 4  ;;  %v6442_v8 = vrot.slane %v11721_v19, 4  ;;  %v5077_v19 = vld [vmem:[#allocation3 + $0xe4] sm:$0xf] }
 0x538   : > { %v6087_v55 = vpop.permute.xlu1 %6086  ;;  %v6089_v63 = vpop.permute.xlu2 %6088  ;;  %v8791_v0 = vld [vmem:[#allocation4 + $0x18] sm:$0xf]  ;;  %v8769_v4 = vrot.slane %v6430_v42, 11  ;;  %v5914_v15 = vrot.slane %v5912_v38, 5  ;;  %v5276_v42 = vshrl.u32 %v5075_v46, 16  ;;  %v5920_v28 = vrot.slane %v5918_v52, 5 }
 0x539   : > { %6177 = vst.msk [vmem:[#allocation4 + $0x40] sm:$0xf] %vm4457_vm7, %v6087_v55  ;;  %v8792_v36 = vor.u32 %v9084_v16, %v8791_v0  ;;  %v5897_v26 = vsel %vm9373_vm2, %v5892_v13, %v11703_v18  ;;  %v5924_v59 = vrot.slane %v5922_v27, 4  ;;  %v5293_v38 = vshll.u32 %v5077_v19, 16 }
 0x53a   : > { %6178 = vst.msk [vmem:[#allocation4 + $0x4c] sm:$0xf] %vm4457_vm7, %v6089_v63  ;;  %v6441_v23 = vsel %vm10913_vm5, %v8769_v4, %v6440_v5  ;;  %v8753_v4 = vrot.slane %v5276_v42, 11 }
 0x53b   : > { %6706 = vst.msk [vmem:[#allocation4 + $0x40] sm:$0xf] %vm5018_vm8, %v6616_v3  ;;  %7935 = vmatmul.bf16.gmra.mxu1 %v8792_v36  ;;  %v6444_v3 = vshrl.u32 %v6231_v50, 16  ;;  %v11731_v36 = vrot.slane %v4740_v48, 5  ;;  %v5284_v48 = vshll.u32 %v5076_v33, 16 }
 0x53c   : > { %6898 = vst.msk [vmem:[#allocation4 + $0x40] sm:$0xf] %vm5547_vm9, %v6808_v14 }
 0x53d   : > { %5479 = vrot.lane.b32.xlu0 %v5265_v24, %s9278_s25  ;;  %v6446_v7 = vrot.slane %v6444_v3, 7  ;;  %v4734_v24 = vshll.u32 %v4514_v9, 16  ;;  %v5290_v3 = vshrl.u32 %v5077_v19, 16 }
 0x53e   : > { %4950 = vrot.lane.b32.xlu1 %v4719_v6, %s9277_s23  ;;  %6825 = vrot.lane.b32.xlu2 %v6747_v62, %s9278_s25  ;;  %v4747_v6 = vor.u32 %v4746_v10, %v11731_v36  ;;  %v4750_v62 = vshll.u32 %v4516_v1, 16  ;;  %v11759_v10 = vld [vmem:[#allocation3 + $0x110] sm:$0xf]  ;;  %v5925_v1 = vor.u32 %v5924_v59, %v5920_v28 }
 0x53f   : > { %v5460_v11 = vpop.permute.xlu0 %5459  ;;  %v4736_v51 = vrot.slane %v4734_v24, 5 }
 0x540   : > { %v6806_v14 = vpop.permute.xlu1 %6805  ;;  %v6620_v45 = vpop.permute.xlu2 %6619  ;;  %5552 = vst.msk [vmem:[#allocation4 + $0x30] sm:$0xf] %vm5547_vm9, %v5460_v11  ;;  %v6449_v11 = vor.u32 %v6447_v20, %v6446_v7  ;;  %v4748_v57 = vrot.slane %v4747_v6, 4  ;;  %v4752_v21 = vrot.slane %v4750_v62, 5  ;;  %v6457_v7 = vshrl.u32 %v11759_v10, 16 }
 0x541   : > { %6897 = vst.msk [vmem:[#allocation4 + $0x34] sm:$0xf] %vm5547_vm9, %v6806_v14  ;;  %v4737_v58 = vor.u32 %v4736_v51, %v4733_v49  ;;  %v5292_v62 = vrot.slane %v5290_v3, 7  ;;  %v5926_v24 = vrot.slane %v5925_v1, 4  ;;  %v6232_v51 = vld [vmem:[#allocation3 + $0x10c] sm:$0x8] }
 0x542   : > { %v4753_v50 = vsel %vm9373_vm2, %v4748_v57, %v4752_v21  ;;  %v6452_v19 = vshrl.u32 %v6232_v51, 16  ;;  %v6752_v51 = vld [vmem:[#allocation3 + $0x114] sm:$0xf] }
 0x543   : > { %v8805_v63 = vld [vmem:[#allocation4 + $0x3c] sm:$0xf0]  ;;  %v4738_v13 = vrot.slane %v4737_v58, 4  ;;  %v5295_v21 = vor.u32 %v5293_v38, %v5292_v62  ;;  %v5080_v58 = vld [vmem:[#allocation3 + $0xfc] sm:$0xf] }
 0x544   : > { %v5312_v3 = vshrl.u32 %v5080_v58, 16 }
 0x545   : > { %6110 = vrot.lane.b32.xlu0 %v5907_v56, %s9275_s17  ;;  %v11750_v56 = vrot.slane %v5281_v47, 7  ;;  %v4743_v6 = vsel %vm9373_vm2, %v4738_v13, %v11731_v36 }
 0x546   : > { %5481 = vrot.lane.b32.xlu1 %v5274_v54, %s9278_s25  ;;  %4952 = vrot.lane.b32.xlu2 %v4729_v39, %s9277_s23  ;;  %v6750_v54 = vld [vmem:[#allocation3 + $0xfc] sm:$0xf]  ;;  %v6450_v39 = vsel %vm10913_vm5, %v6442_v8, %v6449_v11 }
 0x547   : > { %v6091_v0 = vpop.permute.xlu0 %6090  ;;  %v8803_v18 = vld [vmem:[#allocation4 + $0x30] sm:$0xf]  ;;  %v5286_v5 = vor.u32 %v5284_v48, %v11750_v56  ;;  %v5288_v52 = vrot.slane %v11750_v56, 4  ;;  %v6460_v48 = vshll.u32 %v11759_v10, 16 }
 0x548   : > { %v5462_v60 = vpop.permute.xlu1 %5461  ;;  %v5464_v43 = vpop.permute.xlu2 %5463  ;;  %v9086_v55 = vld [vmem:[#allocation4 + $0x34] sm:$0xf]  ;;  %6179 = vst.msk [vmem:[#allocation4 + $0x58] sm:$0xf] %vm4457_vm7, %v6091_v0  ;;  %v5673_v0 = vld [vmem:[#allocation3 + $0x100] sm:$0x1] }
 0x549   : > { %5553 = vst.msk [vmem:[#allocation4 + $0x3c] sm:$0xf] %vm5547_vm9, %v5462_v60  ;;  %v8808_v16 = vor.u32 %v9086_v55, %v8805_v63  ;;  %v6234_v60 = vld [vmem:[#allocation3 + $0x114] sm:$0xf]  ;;  %v5915_v63 = vor.u32 %v5914_v15, %v5911_v44  ;;  %v5928_v2 = vshll.u32 %v5673_v0, 16 }
 0x54a   : > { %5554 = vst.msk [vmem:[#allocation4 + $0x48] sm:$0xf] %vm5547_vm9, %v5464_v43  ;;  %v6466_v9 = vshrl.u32 %v6234_v60, 16 }
 0x54b   : > { %8029 = vmatmul.bf16.gmra.mxu2 %v8808_v16  ;;  %6708 = vst.msk [vmem:[#allocation4 + $0x58] sm:$0xf] %vm5018_vm8, %v6620_v45  ;;  %v5930_v17 = vrot.slane %v5928_v2, 5  ;;  %v5674_v2 = vld [vmem:[#allocation3 + $0x110] sm:$0xf] }
 0x54c   : > { %v6468_v35 = vrot.slane %v6466_v9, 7  ;;  %v5936_v62 = vshll.u32 %v5674_v2, 16 }
 0x54d   : > { %6829 = vrot.lane.b32.xlu0 %v6749_v31, %s9278_s25  ;;  %v5287_v31 = vsel %vm10913_vm5, %v8753_v4, %v5286_v5  ;;  %v5931_v42 = vsel %vm9373_vm2, %v5926_v24, %v5930_v17  ;;  %v5079_v5 = vld [vmem:[#allocation3 + $0xf8] sm:$0xf] }
 0x54e   : > { %6637 = vrot.lane.b32.xlu1 %v6441_v23, %s9277_s23  ;;  %6108 = vrot.lane.b32.xlu2 %v5897_v26, %s9275_s17  ;;  %v4517_v23 = vld [vmem:[#allocation3 + $0xe0] sm:$0xf]  ;;  %v5916_v26 = vrot.slane %v5915_v63, 4  ;;  %v5303_v10 = vshrl.u32 %v5079_v5, 16 }
 0x54f   : > { %v6810_v14 = vpop.permute.xlu0 %6809  ;;  %v4755_v20 = vshrl.u32 %v4517_v23, 16 }
 0x550   : > { %v6618_v32 = vpop.permute.xlu1 %6617  ;;  %v6095_v29 = vpop.permute.xlu2 %6094  ;;  %v9087_v30 = vld [vmem:[#allocation4 + $0x38] sm:$0xf0]  ;;  %v5921_v33 = vsel %vm9373_vm2, %v5916_v26, %v5920_v28  ;;  %v5305_v38 = vrot.slane %v5303_v10, 7 }
 0x551   : > { %6707 = vst.msk [vmem:[#allocation4 + $0x4c] sm:$0xf] %vm5018_vm8, %v6618_v32  ;;  %v8804_v45 = vor.u32 %v9087_v30, %v8803_v18  ;;  %v4518_v32 = vld [vmem:[#allocation3 + $0xe4] sm:$0xf]  ;;  %v8815_v46 = vld [vmem:[#allocation4 + $0x48] sm:$0xf] }
 0x552   : > { %6181 = vst.msk [vmem:[#allocation4 + $0x70] sm:$0xf] %vm4457_vm7, %v6095_v29  ;;  %v4758_v29 = vshll.u32 %v4517_v23, 16  ;;  %v4757_v27 = vrot.slane %v4755_v20, 4  ;;  %v6751_v23 = vld [vmem:[#allocation3 + $0x110] sm:$0xf] }
 0x553   : > { %6899 = vst.msk [vmem:[#allocation4 + $0x4c] sm:$0xf] %vm5547_vm9, %v6810_v14  ;;  %7940 = vmatmul.bf16.gmra.mxu1 %v8804_v45  ;;  %v6459_v14 = vrot.slane %v6457_v7, 7  ;;  %v6469_v45 = vshll.u32 %v6234_v60, 16 }
 0x554   : > { %v4760_v15 = vrot.slane %v4758_v29, 5  ;;  %v5078_v29 = vld [vmem:[#allocation3 + $0xf4] sm:$0x8] }
 0x555   : > { %4956 = vrot.lane.b32.xlu0 %v4753_v50, %s9277_s23  ;;  %v6471_v8 = vor.u32 %v6469_v45, %v6468_v35  ;;  %v6464_v44 = vrot.slane %v6459_v14, 4  ;;  %v5296_v50 = vsel %vm10913_vm5, %v5288_v52, %v5295_v21  ;;  %v6462_v4 = vor.u32 %v6460_v48, %v6459_v14  ;;  %v5675_v45 = vld [vmem:[#allocation3 + $0x114] sm:$0xf] }
 0x556   : > { %6831 = vrot.lane.b32.xlu1 %v6750_v54, %s9278_s25  ;;  %6639 = vrot.lane.b32.xlu2 %v6450_v39, %s9277_s23  ;;  %v4764_v54 = vshll.u32 %v4518_v32, 16  ;;  %v4768_v39 = vshrl.u32 %v4518_v32, 16  ;;  %v4761_v60 = vor.u32 %v4760_v15, %v4757_v27  ;;  %v5315_v32 = vshll.u32 %v5080_v58, 16 }
 0x557   : > { %v5466_v16 = vpop.permute.xlu0 %5465  ;;  %v6472_v56 = vsel %vm10913_vm5, %v6464_v44, %v6471_v8  ;;  %v5310_v21 = vrot.slane %v5305_v38, 4  ;;  %v5942_v52 = vshll.u32 %v5675_v45, 16  ;;  %v5946_v27 = vshrl.u32 %v5675_v45, 16 }
 0x558   : > { %v6812_v43 = vpop.permute.xlu1 %6811  ;;  %v6814_v55 = vpop.permute.xlu2 %6813  ;;  %5555 = vst.msk [vmem:[#allocation4 + $0x54] sm:$0xf] %vm5547_vm9, %v5466_v16  ;;  %v4770_v63 = vrot.slane %v4768_v39, 4  ;;  %v8770_v16 = vrot.slane %v6452_v19, 11  ;;  %v4762_v9 = vrot.slane %v4761_v60, 4  ;;  %v5306_v15 = vshll.u32 %v5079_v5, 16 }
 0x559   : > { %6900 = vst.msk [vmem:[#allocation4 + $0x58] sm:$0xf] %vm5547_vm9, %v6812_v43  ;;  %v4766_v43 = vrot.slane %v4764_v54, 5 }
 0x55a   : > { %v9089_v36 = vld [vmem:[#allocation4 + $0x4c] sm:$0xf]  ;;  %v6463_v26 = vsel %vm10913_vm5, %v8770_v16, %v6462_v4  ;;  %v5948_v16 = vrot.slane %v5946_v27, 4 }
 0x55b   : > { %v4771_v13 = vor.u32 %v4770_v63, %v4766_v43  ;;  %v4767_v7 = vsel %vm9373_vm2, %v4762_v9, %v4766_v43  ;;  %v5944_v63 = vrot.slane %v5942_v52, 5 }
 0x55d   : > { %6112 = vrot.lane.b32.xlu0 %v5921_v33, %s9275_s17  ;;  %v6236_v33 = vld [vmem:[#allocation3 + $0x128] sm:$0xf]  ;;  %v4772_v24 = vrot.slane %v4771_v13, 4 }
 0x55e   : > { %5483 = vrot.lane.b32.xlu1 %v5287_v31, %s9278_s25  ;;  %4954 = vrot.lane.b32.xlu2 %v4743_v6, %s9277_s23  ;;  %v5314_v31 = vrot.slane %v5312_v3, 7  ;;  %v5933_v6 = vshrl.u32 %v5674_v2, 16  ;;  %v6482_v60 = vshll.u32 %v6236_v33, 16  ;;  %v5676_v3 = vld [vmem:[#allocation3 + $0x118] sm:$0x1] }
 0x55f   : > { %v6622_v11 = vpop.permute.xlu0 %6621  ;;  %v9090_v47 = vld [vmem:[#allocation4 + $0x50] sm:$0xf0] }
 0x560   : > { %v6093_v18 = vpop.permute.xlu1 %6092  ;;  %v5470_v30 = vpop.permute.xlu2 %5469  ;;  %v8817_v41 = vld [vmem:[#allocation4 + $0x54] sm:$0xf0]  ;;  %v8816_v49 = vor.u32 %v9090_v47, %v8815_v46  ;;  %v5317_v14 = vor.u32 %v5315_v32, %v5314_v31  ;;  %v5935_v46 = vrot.slane %v5933_v6, 4  ;;  %v5938_v47 = vrot.slane %v5936_v62, 5  ;;  %v5082_v31 = vld [vmem:[#allocation3 + $0x110] sm:$0xf] }
 0x561   : > { %6180 = vst.msk [vmem:[#allocation4 + $0x64] sm:$0xf] %vm4457_vm7, %v6093_v18  ;;  %v8820_v57 = vor.u32 %v9089_v36, %v8817_v41 }
 0x562   : > { %5557 = vst.msk [vmem:[#allocation4 + $0x6c] sm:$0xf] %vm5547_vm9, %v5470_v30  ;;  %v5318_v44 = vsel %vm10913_vm5, %v5310_v21, %v5317_v14 }
 0x563   : > { %6709 = vst.msk [vmem:[#allocation4 + $0x64] sm:$0xf] %vm5018_vm8, %v6622_v11  ;;  %8034 = vmatmul.bf16.gmra.mxu2 %v8820_v57  ;;  %7945 = vmatmul.bf16.gmra.mxu1 %v8816_v49  ;;  %v6479_v11 = vshrl.u32 %v6236_v33, 16  ;;  %v6235_v57 = vld [vmem:[#allocation3 + $0x124] sm:$0x8]  ;;  %v5298_v49 = vshrl.u32 %v5078_v29, 16 }
 0x564   : > { %6901 = vst.msk [vmem:[#allocation4 + $0x64] sm:$0xf] %vm5547_vm9, %v6814_v55  ;;  %v4519_v55 = vld [vmem:[#allocation3 + $0xe8] sm:$0x1]  ;;  %v6474_v54 = vshrl.u32 %v6235_v57, 16 }
 0x565   : > { %6643 = vrot.lane.b32.xlu0 %v6472_v56, %s9277_s23  ;;  %v4774_v1 = vshll.u32 %v4519_v55, 16  ;;  %v6481_v39 = vrot.slane %v6479_v11, 7  ;;  %v5678_v11 = vld [vmem:[#allocation3 + $0x12c] sm:$0xf] }
 0x566   : > { %6114 = vrot.lane.b32.xlu1 %v5931_v42, %s9275_s17  ;;  %5485 = vrot.lane.b32.xlu2 %v5296_v50, %s9278_s25  ;;  %v6237_v42 = vld [vmem:[#allocation3 + $0x12c] sm:$0xf]  ;;  %v5939_v50 = vor.u32 %v5938_v47, %v5935_v46  ;;  %v8771_v4 = vrot.slane %v6474_v54, 11  ;;  %v5966_v52 = vshll.u32 %v5678_v11, 16  ;;  %v5970_v27 = vshrl.u32 %v5678_v11, 16 }
 0x567   : > { %v6816_v0 = vpop.permute.xlu0 %6815  ;;  %v4776_v17 = vrot.slane %v4774_v1, 5  ;;  %v6484_v5 = vor.u32 %v6482_v60, %v6481_v39  ;;  %v4520_v1 = vld [vmem:[#allocation3 + $0xf8] sm:$0xf]  ;;  %v6491_v6 = vshll.u32 %v6237_v42, 16 }
 0x568   : > { %v6624_v28 = vpop.permute.xlu1 %6623  ;;  %v6626_v59 = vpop.permute.xlu2 %6625  ;;  %v5940_v9 = vrot.slane %v5939_v50, 4  ;;  %v4779_v62 = vshrl.u32 %v4520_v1, 16  ;;  %v4782_v33 = vshll.u32 %v4520_v1, 16 }
 0x569   : > { %6710 = vst.msk [vmem:[#allocation4 + $0x70] sm:$0xf] %vm5018_vm8, %v6624_v28  ;;  %v4777_v8 = vsel %vm9373_vm2, %v4772_v24, %v4776_v17  ;;  %v9093_v58 = vld [vmem:[#allocation4 + $0x68] sm:$0xf0]  ;;  %v8754_v28 = vrot.slane %v5298_v49, 11 }
 0x56a   : > { %6902 = vst.msk [vmem:[#allocation4 + $0x70] sm:$0xf] %vm5547_vm9, %v6816_v0  ;;  %v6488_v0 = vshrl.u32 %v6237_v42, 16  ;;  %v5945_v10 = vsel %vm9373_vm2, %v5940_v9, %v5944_v63  ;;  %v4521_v24 = vld [vmem:[#allocation3 + $0xfc] sm:$0xf]  ;;  %v4784_v14 = vrot.slane %v4782_v33, 5 }
 0x56b   : > { %v9092_v30 = vld [vmem:[#allocation4 + $0x64] sm:$0xf]  ;;  %v4788_v45 = vshll.u32 %v4521_v24, 16  ;;  %v4792_v46 = vshrl.u32 %v4521_v24, 16 }
 0x56c   : > { %v6490_v2 = vrot.slane %v6488_v0, 7 }
 0x56d   : > { %4958 = vrot.lane.b32.xlu0 %v4767_v7, %s9277_s23  ;;  %v6485_v7 = vsel %vm10913_vm5, %v8771_v4, %v6484_v5 }
 0x56e   : > { %6833 = vrot.lane.b32.xlu1 %v6751_v23, %s9278_s25  ;;  %6641 = vrot.lane.b32.xlu2 %v6463_v26, %s9277_s23  ;;  %v5949_v23 = vor.u32 %v5948_v16, %v5944_v63  ;;  %v5952_v26 = vshll.u32 %v5676_v3, 16  ;;  %v5972_v63 = vrot.slane %v5970_v27, 4  ;;  %v5679_v16 = vld [vmem:[#allocation3 + $0x130] sm:$0x1]  ;;  %v5677_v3 = vld [vmem:[#allocation3 + $0x128] sm:$0xf] }
 0x56f   : > { %v6097_v18 = vpop.permute.xlu0 %6096 }
 0x570   : > { %v5468_v35 = vpop.permute.xlu1 %5467  ;;  %v6820_v20 = vpop.permute.xlu2 %6819  ;;  %6182 = vst.msk [vmem:[#allocation4 + $0x7c] sm:$0xf] %vm4457_vm7, %v6097_v18  ;;  %v5950_v32 = vrot.slane %v5949_v23, 4  ;;  %v5954_v29 = vrot.slane %v5952_v26, 5  ;;  %v5325_v18 = vshrl.u32 %v5082_v31, 16  ;;  %v5976_v23 = vshll.u32 %v5679_v16, 16 }
 0x571   : > { %5556 = vst.msk [vmem:[#allocation4 + $0x60] sm:$0xf] %vm5547_vm9, %v5468_v35  ;;  %v8829_v36 = vld [vmem:[#allocation4 + $0x6c] sm:$0xf0] }
 0x572   : > { %v8832_v41 = vor.u32 %v9092_v30, %v8829_v36  ;;  %6711 = vst.msk [vmem:[#allocation4 + $0x7c] sm:$0xf] %vm5018_vm8, %v6626_v59  ;;  %v5308_v59 = vor.u32 %v5306_v15, %v5305_v38  ;;  %v6493_v38 = vor.u32 %v6491_v6, %v6490_v2  ;;  %v5081_v30 = vld [vmem:[#allocation3 + $0x10c] sm:$0x8]  ;;  %v6486_v36 = vrot.slane %v6481_v39, 4 }
 0x573   : > { %v5955_v57 = vsel %vm9373_vm2, %v5950_v32, %v5954_v29  ;;  %v5320_v21 = vshrl.u32 %v5081_v30, 16  ;;  %v11826_v49 = vrot.slane %v5325_v18, 7  ;;  %v4790_v15 = vrot.slane %v4788_v45, 5  ;;  %v6239_v26 = vld [vmem:[#allocation3 + $0x140] sm:$0xf] }
 0x574   : > { %8039 = vmatmul.bf16.gmra.mxu2 %v8832_v41  ;;  %v5309_v13 = vsel %vm10913_vm5, %v8754_v28, %v5308_v59  ;;  %v4781_v41 = vrot.slane %v4779_v62, 4  ;;  %v6494_v47 = vsel %vm10913_vm5, %v6486_v36, %v6493_v38  ;;  %v4522_v59 = vld [vmem:[#allocation3 + $0x100] sm:$0x1]  ;;  %v5960_v6 = vshll.u32 %v5677_v3, 16 }
 0x575   : > { %5489 = vrot.lane.b32.xlu0 %v5318_v44, %s9278_s25  ;;  %v8755_v60 = vrot.slane %v5320_v21, 11  ;;  %v4798_v5 = vshll.u32 %v4522_v59, 16  ;;  %v5332_v29 = vrot.slane %v11826_v49, 4  ;;  %v6501_v30 = vshrl.u32 %v6239_v26, 16  ;;  %v5680_v16 = vld [vmem:[#allocation3 + $0x140] sm:$0xf] }
 0x576   : > { %4960 = vrot.lane.b32.xlu1 %v4777_v8, %s9277_s23  ;;  %6835 = vrot.lane.b32.xlu2 %v6752_v51, %s9278_s25  ;;  %v6754_v8 = vld [vmem:[#allocation3 + $0x12c] sm:$0xf]  ;;  %v5083_v51 = vld [vmem:[#allocation3 + $0x114] sm:$0xf]  ;;  %v4785_v44 = vor.u32 %v4784_v14, %v4781_v41  ;;  %v5978_v41 = vrot.slane %v5976_v23, 5  ;;  %v5962_v11 = vrot.slane %v5960_v6, 5 }
 0x577   : > { %v6628_v43 = vpop.permute.xlu0 %6627  ;;  %v5334_v28 = vshrl.u32 %v5083_v51, 16  ;;  %v6238_v14 = vld [vmem:[#allocation3 + $0x13c] sm:$0x8]  ;;  %v5984_v6 = vshll.u32 %v5680_v16, 16 }
 0x578   : > { %v6099_v19 = vpop.permute.xlu1 %6098  ;;  %v6101_v56 = vpop.permute.xlu2 %6100  ;;  %v8827_v48 = vld [vmem:[#allocation4 + $0x60] sm:$0xf]  ;;  %v4786_v0 = vrot.slane %v4785_v44, 4  ;;  %v6496_v21 = vshrl.u32 %v6238_v14, 16  ;;  %v6504_v44 = vshll.u32 %v6239_v26, 16 }
 0x579   : > { %6183 = vst.msk [vmem:[#allocation4 + $0x88] sm:$0xf] %vm4457_vm7, %v6099_v19  ;;  %v8828_v55 = vor.u32 %v9093_v58, %v8827_v48  ;;  %v5328_v19 = vshll.u32 %v5082_v31, 16  ;;  %v5336_v1 = vrot.slane %v5334_v28, 7  ;;  %v5957_v31 = vshrl.u32 %v5677_v3, 16 }
 0x57a   : > { %6184 = vst.msk [vmem:[#allocation4 + $0x94] sm:$0xf] %vm4457_vm7, %v6101_v56  ;;  %v4794_v56 = vrot.slane %v4792_v46, 4  ;;  %v4791_v9 = vsel %vm9373_vm2, %v4786_v0, %v4790_v15  ;;  %v4524_v46 = vld [vmem:[#allocation3 + $0x114] sm:$0xf] }
 0x57b   : > { %6712 = vst.msk [vmem:[#allocation4 + $0x88] sm:$0xf] %vm5018_vm8, %v6628_v43  ;;  %7950 = vmatmul.bf16.gmra.mxu1 %v8828_v55  ;;  %v5330_v43 = vor.u32 %v5328_v19, %v11826_v49  ;;  %v11834_v55 = vrot.slane %v5966_v52, 5  ;;  %v5959_v45 = vrot.slane %v5957_v31, 4  ;;  %v11854_v49 = vrot.slane %v6501_v30, 7 }
 0x57c   : > { %6904 = vst.msk [vmem:[#allocation4 + $0x88] sm:$0xf] %vm5547_vm9, %v6820_v20  ;;  %v4795_v4 = vor.u32 %v4794_v56, %v4790_v15  ;;  %v4812_v52 = vshll.u32 %v4524_v46, 16  ;;  %v4816_v27 = vshrl.u32 %v4524_v46, 16  ;;  %v8772_v19 = vrot.slane %v6496_v21, 11 }
 0x57d   : > { %6645 = vrot.lane.b32.xlu0 %v6485_v7, %s9277_s23  ;;  %v5973_v2 = vor.u32 %v5972_v63, %v11834_v55  ;;  %v5337_v7 = vshll.u32 %v5083_v51, 16  ;;  %v6240_v51 = vld [vmem:[#allocation3 + $0x144] sm:$0xf]  ;;  %v5963_v15 = vor.u32 %v5962_v11, %v5959_v45  ;;  %v6506_v56 = vor.u32 %v6504_v44, %v11854_v49  ;;  %v4525_v63 = vld [vmem:[#allocation3 + $0x118] sm:$0x1] }
 0x57e   : > { %6116 = vrot.lane.b32.xlu1 %v5945_v10, %s9275_s17  ;;  %5487 = vrot.lane.b32.xlu2 %v5309_v13, %s9278_s25  ;;  %v6753_v13 = vld [vmem:[#allocation3 + $0x128] sm:$0xf]  ;;  %v5331_v10 = vsel %vm10913_vm5, %v8755_v60, %v5330_v43  ;;  %v4796_v24 = vrot.slane %v4795_v4, 4  ;;  %v4818_v28 = vrot.slane %v4816_v27, 4  ;;  %v6513_v23 = vshll.u32 %v6240_v51, 16 }
 0x57f   : > { %v5472_v17 = vpop.permute.xlu0 %5471  ;;  %v5339_v18 = vor.u32 %v5337_v7, %v5336_v1  ;;  %v5974_v36 = vrot.slane %v5973_v2, 4  ;;  %v5964_v43 = vrot.slane %v5963_v15, 4  ;;  %v11866_v0 = vld [vmem:[#allocation3 + $0x128] sm:$0xf]  ;;  %v6507_v4 = vsel %vm10913_vm5, %v8772_v19, %v6506_v56  ;;  %v5084_v26 = vld [vmem:[#allocation3 + $0x124] sm:$0x8] }
 0x580   : > { %v6818_v35 = vpop.permute.xlu1 %6817  ;;  %v6632_v20 = vpop.permute.xlu2 %6631  ;;  %5558 = vst.msk [vmem:[#allocation4 + $0x78] sm:$0xf] %vm5547_vm9, %v5472_v17  ;;  %v4800_v17 = vrot.slane %v4798_v5, 5  ;;  %v4822_v1 = vshll.u32 %v4525_v63, 16  ;;  %v5347_v7 = vshrl.u32 %v11866_v0, 16  ;;  %v5981_v31 = vshrl.u32 %v5680_v16, 16 }
 0x581   : > { %6903 = vst.msk [vmem:[#allocation4 + $0x7c] sm:$0xf] %vm5547_vm9, %v6818_v35  ;;  %v5969_v5 = vsel %vm9373_vm2, %v5964_v43, %v11834_v55  ;;  %v5681_v14 = vld [vmem:[#allocation3 + $0x144] sm:$0xf]  ;;  %v6508_v45 = vrot.slane %v11854_v49, 4  ;;  %v5342_v11 = vshrl.u32 %v5084_v26, 16 }
 0x582   : > { %v11889_v46 = vrot.slane %v5347_v7, 7  ;;  %v5986_v21 = vrot.slane %v5984_v6, 5  ;;  %v5990_v27 = vshll.u32 %v5681_v14, 16  ;;  %v5994_v44 = vshrl.u32 %v5681_v14, 16  ;;  %v5086_v49 = vld [vmem:[#allocation3 + $0x12c] sm:$0xf] }
 0x583   : > { %v8841_v50 = vld [vmem:[#allocation4 + $0x84] sm:$0xf0]  ;;  %v4526_v26 = vld [vmem:[#allocation3 + $0x128] sm:$0xf] }
 0x584   : > { %v4830_v14 = vshll.u32 %v4526_v26, 16 }
 0x585   : > { %6839 = vrot.lane.b32.xlu0 %v6754_v8, %s9278_s25  ;;  %v5979_v8 = vsel %vm9373_vm2, %v5974_v36, %v5978_v41  ;;  %v4824_v41 = vrot.slane %v4822_v1, 5 }
 0x586   : > { %6647 = vrot.lane.b32.xlu1 %v6494_v47, %s9277_s23  ;;  %6118 = vrot.lane.b32.xlu2 %v5955_v57, %s9275_s17  ;;  %v5340_v47 = vsel %vm10913_vm5, %v5332_v29, %v5339_v18  ;;  %v4801_v57 = vsel %vm9373_vm2, %v4796_v24, %v4800_v17 }
 0x587   : > { %v6103_v48 = vpop.permute.xlu0 %6102  ;;  %v8839_v35 = vld [vmem:[#allocation4 + $0x78] sm:$0xf] }
 0x588   : > { %v5474_v54 = vpop.permute.xlu1 %5473  ;;  %v5476_v39 = vpop.permute.xlu2 %5475  ;;  %v9095_v42 = vld [vmem:[#allocation4 + $0x7c] sm:$0xf]  ;;  %6185 = vst.msk [vmem:[#allocation4 + $0xa0] sm:$0xf] %vm4457_vm7, %v6103_v48  ;;  %v6510_v48 = vshrl.u32 %v6240_v51, 16 }
 0x589   : > { %5559 = vst.msk [vmem:[#allocation4 + $0x84] sm:$0xf] %vm5547_vm9, %v5474_v54  ;;  %v8844_v58 = vor.u32 %v9095_v42, %v8841_v50  ;;  %v4523_v54 = vld [vmem:[#allocation3 + $0x110] sm:$0xf]  ;;  %v6756_v51 = vld [vmem:[#allocation3 + $0x144] sm:$0xf] }
 0x58a   : > { %5560 = vst.msk [vmem:[#allocation4 + $0x90] sm:$0xf] %vm5547_vm9, %v5476_v39  ;;  %v4803_v59 = vshrl.u32 %v4523_v54, 16  ;;  %v4806_v60 = vshll.u32 %v4523_v54, 16  ;;  %v6512_v3 = vrot.slane %v6510_v48, 7  ;;  %v8756_v48 = vrot.slane %v5342_v11, 11 }
 0x58b   : > { %8044 = vmatmul.bf16.gmra.mxu2 %v8844_v58  ;;  %6714 = vst.msk [vmem:[#allocation4 + $0xa0] sm:$0xf] %vm5018_vm8, %v6632_v20  ;;  %v11864_v58 = vrot.slane %v4812_v52, 5 }
 0x58c   : > { %v4808_v2 = vrot.slane %v4806_v60, 5  ;;  %v6515_v18 = vor.u32 %v6513_v23, %v6512_v3  ;;  %v5356_v60 = vshrl.u32 %v5086_v49, 16  ;;  %v11905_v3 = vld [vmem:[#allocation3 + $0x158] sm:$0xf] }
 0x58d   : > { %5491 = vrot.lane.b32.xlu0 %v5331_v10, %s9278_s25  ;;  %v4805_v10 = vrot.slane %v4803_v59, 4  ;;  %v6523_v23 = vshrl.u32 %v11905_v3, 16 }
 0x58e   : > { %4962 = vrot.lane.b32.xlu1 %v4791_v9, %s9277_s23  ;;  %6837 = vrot.lane.b32.xlu2 %v6753_v13, %s9278_s25  ;;  %v6755_v9 = vld [vmem:[#allocation3 + $0x140] sm:$0xf]  ;;  %v4819_v13 = vor.u32 %v4818_v28, %v11864_v58  ;;  %v6516_v52 = vsel %vm10913_vm5, %v6508_v45, %v6515_v18 }
 0x58f   : > { %v6822_v38 = vpop.permute.xlu0 %6821 }
 0x590   : > { %v6630_v62 = vpop.permute.xlu1 %6629  ;;  %v6107_v33 = vpop.permute.xlu2 %6106  ;;  %v9096_v20 = vld [vmem:[#allocation4 + $0x80] sm:$0xf0]  ;;  %v4820_v36 = vrot.slane %v4819_v13, 4 }
 0x591   : > { %6713 = vst.msk [vmem:[#allocation4 + $0x94] sm:$0xf] %vm5018_vm8, %v6630_v62  ;;  %v8840_v32 = vor.u32 %v9096_v20, %v8839_v35 }
 0x592   : > { %6187 = vst.msk [vmem:[#allocation4 + $0xb8] sm:$0xf] %vm4457_vm7, %v6107_v33  ;;  %v11881_v33 = vld [vmem:[%s12289_s4] ss:$0 sm:$0xff]  ;;  %v4825_v15 = vsel %vm9373_vm2, %v4820_v36, %v4824_v41  ;;  %v4527_v41 = vld [vmem:[#allocation3 + $0x12c] sm:$0xf] }
 0x593   : > { %6905 = vst.msk [vmem:[#allocation4 + $0x94] sm:$0xf] %vm5547_vm9, %v6822_v38  ;;  %7955 = vmatmul.bf16.gmra.mxu1 %v8840_v32  ;;  %v8851_v38 = vld [vmem:[#allocation4 + $0x90] sm:$0xf] }
 0x595   : > { %6122 = vrot.lane.b32.xlu0 %v5979_v8, %s9275_s17 }
 0x596   : > { %5493 = vrot.lane.b32.xlu1 %v5340_v47, %s9278_s25  ;;  %4964 = vrot.lane.b32.xlu2 %v4801_v57, %s9277_s23  ;;  %v4809_v47 = vor.u32 %v4808_v2, %v4805_v10  ;;  %v5983_v57 = vrot.slane %v5981_v31, 4  ;;  %v5358_v2 = vrot.slane %v5356_v60, 7 }
 0x597   : > { %v5478_v50 = vpop.permute.xlu0 %5477 }
 0x598   : > { %v6824_v39 = vpop.permute.xlu1 %6823  ;;  %v6826_v42 = vpop.permute.xlu2 %6825  ;;  %5561 = vst.msk [vmem:[#allocation4 + $0x9c] sm:$0xf] %vm5547_vm9, %v5478_v50  ;;  %v6243_v50 = vld [vmem:[#allocation3 + $0x15c] sm:$0xf]  ;;  %v4810_v28 = vrot.slane %v4809_v47, 4  ;;  %v5987_v59 = vor.u32 %v5986_v21, %v5983_v57 }
 0x599   : > { %6906 = vst.msk [vmem:[#allocation4 + $0xa0] sm:$0xf] %vm5547_vm9, %v6824_v39  ;;  %v6532_v13 = vshrl.u32 %v6243_v50, 16  ;;  %v6535_v36 = vshll.u32 %v6243_v50, 16  ;;  %v6241_v21 = vld [vmem:[#allocation3 + $0x154] sm:$0x8] }
 0x59a   : > { %v9098_v35 = vld [vmem:[#allocation4 + $0x94] sm:$0xf]  ;;  %v5988_v10 = vrot.slane %v5987_v59, 4  ;;  %v4840_v50 = vshrl.u32 %v4527_v41, 16 }
 0x59d   : > { %6841 = vrot.lane.b32.xlu0 %v6755_v9, %s9278_s25  ;;  %v5682_v9 = vld [vmem:[#allocation3 + $0x148] sm:$0x1] }
 0x59e   : > { %6649 = vrot.lane.b32.xlu1 %v6507_v4, %s9277_s23  ;;  %6120 = vrot.lane.b32.xlu2 %v5969_v5, %s9275_s17  ;;  %v5992_v4 = vrot.slane %v5990_v27, 5  ;;  %v5996_v5 = vrot.slane %v5994_v44, 4 }
 0x59f   : > { %v7931_v24 = vpop.f32.mrf.mxu1  ;;  %v6634_v17 = vpop.permute.xlu0 %6633  ;;  %v9099_v32 = vld [vmem:[#allocation4 + $0x98] sm:$0xf0] }
 0x5a0   : > { %v6105_v55 = vpop.permute.xlu1 %6104  ;;  %v4953_v62 = vpop.permute.xlu2 %4952  ;;  %v8853_v20 = vld [vmem:[#allocation4 + $0x9c] sm:$0xf0]  ;;  %v8852_v30 = vor.u32 %v9099_v32, %v8851_v38  ;;  %v7932_v8 = vadd.f32 %v11881_v33, %v7931_v24  ;;  %v5997_v6 = vor.u32 %v5996_v5, %v5992_v4  ;;  %v4827_v38 = vshrl.u32 %v4526_v26, 16  ;;  %v5683_v26 = vld [vmem:[#allocation3 + $0x158] sm:$0xf] }
 0x5a1   : > { %6186 = vst.msk [vmem:[#allocation4 + $0xac] sm:$0xf] %vm4457_vm7, %v6105_v55  ;;  %v8856_v29 = vor.u32 %v9098_v35, %v8853_v20  ;;  %v6000_v55 = vshll.u32 %v5682_v9, 16  ;;  %v5359_v35 = vshll.u32 %v5086_v49, 16  ;;  %v6534_v20 = vrot.slane %v6532_v13, 7 }
 0x5a2   : > { %5034 = vst.msk [vmem:[#allocation4 + $0xb4] sm:$0xf] %vm5018_vm8, %v4953_v62  ;;  %v5998_v47 = vrot.slane %v5997_v6, 4  ;;  %v4842_v13 = vrot.slane %v4840_v50, 4 }
 0x5a3   : > { %6715 = vst.msk [vmem:[#allocation4 + $0xac] sm:$0xf] %vm5018_vm8, %v6634_v17  ;;  %8049 = vmatmul.bf16.gmra.mxu2 %v8856_v29  ;;  %7960 = vmatmul.bf16.gmra.mxu1 %v8852_v30  ;;  %v5354_v17 = vrot.slane %v11889_v46, 4  ;;  %v5361_v18 = vor.u32 %v5359_v35, %v5358_v2  ;;  %v6525_v30 = vrot.slane %v6523_v23, 7  ;;  %v6002_v57 = vrot.slane %v6000_v55, 5 }
 0x5a4   : > { %6907 = vst.msk [vmem:[#allocation4 + $0xac] sm:$0xf] %vm5547_vm9, %v6826_v42  ;;  %v5350_v42 = vshll.u32 %v11866_v0, 16 }
 0x5a5   : > { %4968 = vrot.lane.b32.xlu0 %v4825_v15, %s9277_s23  ;;  %v5362_v44 = vsel %vm10913_vm5, %v5354_v17, %v5361_v18  ;;  %v6530_v49 = vrot.slane %v6525_v30, 4  ;;  %v4829_v15 = vrot.slane %v4827_v38, 4  ;;  %v6008_v17 = vshll.u32 %v5683_v26, 16  ;;  %v6245_v38 = vld [vmem:[#allocation3 + $0x170] sm:$0xf] }
 0x5a6   : > { %6843 = vrot.lane.b32.xlu1 %v6756_v51, %s9278_s25  ;;  %6651 = vrot.lane.b32.xlu2 %v6516_v52, %s9277_s23  ;;  %v8020_v54 = vpop.f32.mrf.mxu2  ;;  %v5352_v16 = vor.u32 %v5350_v42, %v11889_v46  ;;  %v6537_v51 = vor.u32 %v6535_v36, %v6534_v20  ;;  %v4836_v42 = vshll.u32 %v4527_v41, 16 }
 0x5a7   : > { %v8021_v39 = vadd.f32 %v8020_v54, %v7932_v8  ;;  %v6828_v63 = vpop.permute.xlu0 %6827  ;;  %v7933_v0 = vpop.f32.mrf.mxu1  ;;  %v6003_v54 = vsel %vm9373_vm2, %v5998_v47, %v6002_v57  ;;  %v5087_v57 = vld [vmem:[#allocation3 + $0x13c] sm:$0x8] }
 0x5a8   : > { %v6636_v19 = vpop.permute.xlu1 %6635  ;;  %v6109_v56 = vpop.permute.xlu2 %6108  ;;  %v7934_v7 = vadd.f32 %v11881_v33, %v7933_v0  ;;  %v5353_v31 = vsel %vm10913_vm5, %v8756_v48, %v5352_v16  ;;  %v6526_v48 = vshll.u32 %v11905_v3, 16  ;;  %v4838_v9 = vrot.slane %v4836_v42, 5  ;;  %v6758_v42 = vld [vmem:[#allocation3 + $0x15c] sm:$0xf] }
 0x5a9   : > { %v8110_v43 = vadd.f32 %v11210_v40, %v8021_v39  ;;  %6716 = vst.msk [vmem:[#allocation4 + $0xb8] sm:$0xf] %vm5018_vm8, %v6636_v19  ;;  %v4815_v40 = vsel %vm9373_vm2, %v4810_v28, %v11864_v58  ;;  %v5993_v58 = vsel %vm9373_vm2, %v5988_v10, %v5992_v4  ;;  %v6518_v39 = vshrl.u32 %v6241_v21, 16  ;;  %v5089_v28 = vld [vmem:[#allocation3 + $0x144] sm:$0xf] }
 0x5aa   : > { %6188 = vst.msk [vmem:[#allocation4 + $0xc4] sm:$0xf] %vm4457_vm7, %v6109_v56  ;;  %v6538_v19 = vsel %vm10913_vm5, %v6530_v49, %v6537_v51  ;;  %v6528_v0 = vor.u32 %v6526_v48, %v6525_v30  ;;  %v5378_v3 = vshrl.u32 %v5089_v28, 16  ;;  %v4843_v6 = vor.u32 %v4842_v13, %v4838_v9  ;;  %v6244_v49 = vld [vmem:[#allocation3 + $0x16c] sm:$0x8] }
 0x5ab   : > { %v8189_v1 = vmax.f32 %v8110_v43, 0.0  ;;  %6908 = vst.msk [vmem:[#allocation4 + $0xb8] sm:$0xf] %vm5547_vm9, %v6828_v63  ;;  %v9101_v46 = vld [vmem:[#allocation4 + $0xac] sm:$0xf]  ;;  %v8773_v5 = vrot.slane %v6518_v39, 11 }
 0x5ac   : > { %v11939_v63 = vld [vmem:[#allocation3 + $0x140] sm:$0xf]  ;;  %v5380_v35 = vrot.slane %v5378_v3, 7  ;;  %v5381_v36 = vshll.u32 %v5089_v28, 16  ;;  %v6545_v51 = vshrl.u32 %v6245_v38, 16  ;;  %v6540_v28 = vshrl.u32 %v6244_v49, 16 }
 0x5ad   : > { %8221 = vst [vmem:[%s11913_s6] sm:$0xff] %v8189_v1  ;;  %6124 = vrot.lane.b32.xlu0 %v5993_v58, %s9275_s17  ;;  %v5369_v10 = vshrl.u32 %v11939_v63, 16  ;;  %v5685_v13 = vld [vmem:[#allocation3 + $0x160] sm:$0x1] }
 0x5ae   : > { %5495 = vrot.lane.b32.xlu1 %v5353_v31, %s9278_s25  ;;  %4966 = vrot.lane.b32.xlu2 %v4815_v40, %s9277_s23  ;;  %v8022_v62 = vpop.f32.mrf.mxu2  ;;  %v4528_v40 = vld [vmem:[#allocation3 + $0x130] sm:$0x1]  ;;  %v6529_v31 = vsel %vm10913_vm5, %v8773_v5, %v6528_v0 }
 0x5af   : > { %v8023_v24 = vadd.f32 %v8022_v62, %v7934_v7  ;;  %v5480_v11 = vpop.permute.xlu0 %5479  ;;  %v6757_v7 = vld [vmem:[#allocation3 + $0x158] sm:$0xf]  ;;  %v4846_v55 = vshll.u32 %v4528_v40, 16  ;;  %v5371_v20 = vrot.slane %v5369_v10, 7 }
 0x5b0   : > { %v4951_v32 = vpop.permute.xlu1 %4950  ;;  %v6640_v29 = vpop.permute.xlu2 %6639 }
 0x5b1   : > { %v8112_v45 = vadd.f32 %v11238_v34, %v8023_v24  ;;  %5033 = vst.msk [vmem:[#allocation4 + $0xa8] sm:$0xf] %vm5018_vm8, %v4951_v32  ;;  %v4832_v34 = vrot.slane %v4830_v14, 5  ;;  %v6005_v24 = vshrl.u32 %v5683_v26, 16  ;;  %v4848_v47 = vrot.slane %v4846_v55, 5 }
 0x5b2   : > { %5562 = vst.msk [vmem:[#allocation4 + $0xa8] sm:$0xf] %vm5547_vm9, %v5480_v11  ;;  %v8865_v8 = vld [vmem:[#allocation4 + $0xb4] sm:$0xf0]  ;;  %v4844_v11 = vrot.slane %v4843_v6, 4 }
 0x5b3   : > { %v8190_v52 = vmax.f32 %v8112_v45, 0.0  ;;  %v8868_v27 = vor.u32 %v9101_v46, %v8865_v8  ;;  %v4833_v43 = vor.u32 %v4832_v34, %v4829_v15  ;;  %v5383_v46 = vor.u32 %v5381_v36, %v5380_v35  ;;  %v5684_v8 = vld [vmem:[#allocation3 + $0x15c] sm:$0xf]  ;;  %v11979_v35 = vld [vmem:[#allocation3 + $0x158] sm:$0xf] }
 0x5b4   : > { %v5376_v34 = vrot.slane %v5371_v20, 4  ;;  %v4849_v39 = vsel %vm9373_vm2, %v4844_v11, %v4848_v47  ;;  %v6014_v50 = vshll.u32 %v5684_v8, 16 }
 0x5b5   : > { %8222 = vst [vmem:[%s11913_s6 + $0x8] sm:$0xff] %v8190_v52  ;;  %8054 = vmatmul.bf16.gmra.mxu2 %v8868_v27  ;;  %6655 = vrot.lane.b32.xlu0 %v6538_v19, %s9277_s23  ;;  %v4834_v23 = vrot.slane %v4833_v43, 4  ;;  %v6007_v27 = vrot.slane %v6005_v24, 4  ;;  %v6018_v19 = vshrl.u32 %v5684_v8, 16  ;;  %v5391_v8 = vshrl.u32 %v11979_v35, 16 }
 0x5b6   : > { %6126 = vrot.lane.b32.xlu1 %v6003_v54, %s9275_s17  ;;  %5497 = vrot.lane.b32.xlu2 %v5362_v44, %s9278_s25  ;;  %v6010_v44 = vrot.slane %v6008_v17, 5  ;;  %v5364_v54 = vshrl.u32 %v5087_v57, 16  ;;  %v5384_v48 = vsel %vm10913_vm5, %v5376_v34, %v5383_v46  ;;  %v6016_v40 = vrot.slane %v6014_v50, 5  ;;  %v5687_v34 = vld [vmem:[#allocation3 + $0x174] sm:$0xf] }
 0x5b7   : > { %v8025_v56 = vpop.f32.mrf.mxu2  ;;  %v6111_v16 = vpop.permute.xlu0 %6110  ;;  %v4839_v62 = vsel %vm9373_vm2, %v4834_v23, %v4838_v9  ;;  %v6548_v9 = vshll.u32 %v6245_v38, 16  ;;  %v8774_v23 = vrot.slane %v6540_v28, 11  ;;  %v5610_v38 = vld [vmem:[#allocation3 + $0x188] sm:$0xf] }
 0x5b8   : > { %v5482_v59 = vpop.permute.xlu1 %5481  ;;  %v4955_v60 = vpop.permute.xlu2 %4954  ;;  %6189 = vst.msk [vmem:[#allocation4 + $0xd0] sm:$0xf] %vm4457_vm7, %v6111_v16  ;;  %v6011_v43 = vor.u32 %v6010_v44, %v6007_v27  ;;  %v5372_v16 = vshll.u32 %v11939_v63, 16  ;;  %v8757_v0 = vrot.slane %v5364_v54, 11  ;;  %v5090_v44 = vld [vmem:[#allocation3 + $0x154] sm:$0x8] }
 0x5b9   : > { %5563 = vst.msk [vmem:[#allocation4 + $0xb4] sm:$0xf] %vm5547_vm9, %v5482_v59  ;;  %v7936_v4 = vpop.f32.mrf.mxu1  ;;  %v8863_v30 = vld [vmem:[#allocation4 + $0xa8] sm:$0xf]  ;;  %v11966_v59 = vrot.slane %v6545_v51, 7 }
 0x5ba   : > { %5035 = vst.msk [vmem:[#allocation4 + $0xc0] sm:$0xf] %vm5018_vm8, %v4955_v60  ;;  %v7937_v1 = vadd.f32 %v11881_v33, %v7936_v4  ;;  %v6246_v60 = vld [vmem:[#allocation3 + $0x174] sm:$0xf]  ;;  %v5374_v3 = vor.u32 %v5372_v16, %v5371_v20  ;;  %v6012_v63 = vrot.slane %v6011_v43, 4  ;;  %v6042_v43 = vshrl.u32 %v5687_v34, 16 }
 0x5bb   : > { %6718 = vst.msk [vmem:[#allocation4 + $0xd0] sm:$0xf] %vm5018_vm8, %v6640_v29  ;;  %v6554_v10 = vshrl.u32 %v6246_v60, 16  ;;  %v6550_v26 = vor.u32 %v6548_v9, %v11966_v59  ;;  %v6552_v49 = vrot.slane %v11966_v59, 4  ;;  %v6760_v59 = vld [vmem:[#allocation3 + $0x174] sm:$0xf] }
 0x5bc   : > { %v8026_v2 = vadd.f32 %v8025_v56, %v7937_v1  ;;  %v6017_v6 = vsel %vm9373_vm2, %v6012_v63, %v6016_v40  ;;  %v5375_v55 = vsel %vm10913_vm5, %v8757_v0, %v5374_v3  ;;  %5642 = vst.msk [vmem:[#allocation4 + $0x16c] sm:$0xf] %vm3687_vm1, %v5610_v38  ;;  %v4531_v63 = vld [vmem:[#allocation3 + $0x148] sm:$0x1] }
 0x5bd   : > { %4970 = vrot.lane.b32.xlu0 %v4839_v62, %s9277_s23  ;;  %v6551_v20 = vsel %vm10913_vm5, %v8774_v23, %v6550_v26  ;;  %v4870_v38 = vshll.u32 %v4531_v63, 16 }
 0x5be   : > { %v8115_v58 = vadd.f32 %v11271_v53, %v8026_v2  ;;  %6845 = vrot.lane.b32.xlu1 %v6757_v7, %s9278_s25  ;;  %6653 = vrot.lane.b32.xlu2 %v6529_v31, %s9277_s23  ;;  %v6020_v2 = vrot.slane %v6018_v19, 4  ;;  %v6024_v7 = vshll.u32 %v5685_v13, 16  ;;  %v4529_v31 = vld [vmem:[#allocation3 + $0x140] sm:$0xf] }
 0x5bf   : > { %v6830_v41 = vpop.permute.xlu0 %6829  ;;  %v8027_v52 = vpop.f32.mrf.mxu2  ;;  %v4851_v24 = vshrl.u32 %v4529_v31, 16  ;;  %v4854_v17 = vshll.u32 %v4529_v31, 16 }
 0x5c0   : > { %v8191_v32 = vmax.f32 %v8115_v58, 0.0  ;;  %v6638_v29 = vpop.permute.xlu1 %6637  ;;  %v5486_v18 = vpop.permute.xlu2 %5485  ;;  %v9102_v53 = vld [vmem:[#allocation4 + $0xb0] sm:$0xf0]  ;;  %v6556_v58 = vrot.slane %v6554_v10, 7  ;;  %v6021_v62 = vor.u32 %v6020_v2, %v6016_v40 }
 0x5c1   : > { %6717 = vst.msk [vmem:[#allocation4 + $0xc4] sm:$0xf] %vm5018_vm8, %v6638_v29  ;;  %v7938_v14 = vpop.f32.mrf.mxu1  ;;  %v8864_v45 = vor.u32 %v9102_v53, %v8863_v30  ;;  %v6026_v30 = vrot.slane %v6024_v7, 5  ;;  %v4530_v53 = vld [vmem:[#allocation3 + $0x144] sm:$0xf]  ;;  %v4856_v27 = vrot.slane %v4854_v17, 5 }
 0x5c2   : > { %8223 = vst [vmem:[%s11913_s6 + $0x10] sm:$0xff] %v8191_v32  ;;  %v7939_v21 = vadd.f32 %v11881_v33, %v7938_v14  ;;  %v5611_v32 = vld [vmem:[#allocation3 + $0x18c] sm:$0xf]  ;;  %v6022_v46 = vrot.slane %v6021_v62, 4 }
 0x5c3   : > { %6909 = vst.msk [vmem:[#allocation4 + $0xc4] sm:$0xf] %vm5547_vm9, %v6830_v41  ;;  %7965 = vmatmul.bf16.gmra.mxu1 %v8864_v45 }
 0x5c4   : > { %v8028_v15 = vadd.f32 %v8027_v52, %v7939_v21  ;;  %5643 = vst.msk [vmem:[#allocation4 + $0x178] sm:$0xf] %vm3687_vm1, %v5611_v32  ;;  %v4853_v52 = vrot.slane %v4851_v24, 4  ;;  %v6027_v19 = vsel %vm9373_vm2, %v6022_v46, %v6026_v30 }
 0x5c5   : > { %5501 = vrot.lane.b32.xlu0 %v5384_v48, %s9278_s25  ;;  %v11998_v48 = vrot.slane %v5391_v8, 7 }
 0x5c6   : > { %v8117_v56 = vadd.f32 %v11294_v12, %v8028_v15  ;;  %4972 = vrot.lane.b32.xlu1 %v4849_v39, %s9277_s23  ;;  %6847 = vrot.lane.b32.xlu2 %v6758_v42, %s9278_s25  ;;  %v4860_v15 = vshll.u32 %v4530_v53, 16  ;;  %v4864_v39 = vshrl.u32 %v4530_v53, 16  ;;  %v5092_v42 = vld [vmem:[#allocation3 + $0x15c] sm:$0xf]  ;;  %v4857_v16 = vor.u32 %v4856_v27, %v4853_v52 }
 0x5c7   : > { %v4957_v1 = vpop.permute.xlu0 %4956  ;;  %v5403_v30 = vshll.u32 %v5092_v42, 16  ;;  %v5398_v27 = vrot.slane %v11998_v48, 4 }
 0x5c8   : > { %v8192_v4 = vmax.f32 %v8117_v56, 0.0  ;;  %v6832_v5 = vpop.permute.xlu1 %6831  ;;  %v6642_v12 = vpop.permute.xlu2 %6641  ;;  %5036 = vst.msk [vmem:[#allocation4 + $0xcc] sm:$0xf] %vm5018_vm8, %v4957_v1  ;;  %v5386_v56 = vshrl.u32 %v5090_v44, 16  ;;  %v4866_v40 = vrot.slane %v4864_v39, 4  ;;  %v4858_v62 = vrot.slane %v4857_v16, 4 }
 0x5c9   : > { %6910 = vst.msk [vmem:[#allocation4 + $0xd0] sm:$0xf] %vm5547_vm9, %v6832_v5  ;;  %v5394_v5 = vshll.u32 %v11979_v35, 16  ;;  %v5688_v35 = vld [vmem:[#allocation3 + $0x178] sm:$0x1] }
 0x5ca   : > { %8224 = vst [vmem:[%s11913_s6 + $0x18] sm:$0xff] %v8192_v4  ;;  %v9104_v14 = vld [vmem:[#allocation4 + $0xc4] sm:$0xf]  ;;  %v4862_v4 = vrot.slane %v4860_v15, 5  ;;  %v8758_v23 = vrot.slane %v5386_v56, 11 }
 0x5cb   : > { %5565 = vst.msk [vmem:[#allocation4 + $0xcc] sm:$0xf] %vm5547_vm9, %v5486_v18  ;;  %v6557_v18 = vshll.u32 %v6246_v60, 16  ;;  %v6038_v60 = vshll.u32 %v5687_v34, 16  ;;  %v5396_v26 = vor.u32 %v5394_v5, %v11998_v48  ;;  %v12033_v56 = vld [vmem:[#allocation3 + $0x18c] sm:$0xf]  ;;  %v8124_v48 = vpop.f32.mrf.mxu3 }
 0x5cc   : > { %v4867_v17 = vor.u32 %v4866_v40, %v4862_v4  ;;  %v4863_v32 = vsel %vm9373_vm2, %v4858_v62, %v4862_v4 }
 0x5cd   : > { %6657 = vrot.lane.b32.xlu0 %v6551_v20, %s9277_s23  ;;  %v6559_v21 = vor.u32 %v6557_v18, %v6556_v58  ;;  %v12011_v31 = vrot.slane %v6038_v60, 5  ;;  %v5397_v18 = vsel %vm10913_vm5, %v8758_v23, %v5396_v26 }
 0x5ce   : > { %6128 = vrot.lane.b32.xlu1 %v6017_v6, %s9275_s17  ;;  %5499 = vrot.lane.b32.xlu2 %v5375_v55, %s9278_s25  ;;  %v8030_v29 = vpop.f32.mrf.mxu2  ;;  %v6044_v6 = vrot.slane %v6042_v43, 4  ;;  %v5686_v55 = vld [vmem:[#allocation3 + $0x170] sm:$0xf]  ;;  %v4868_v8 = vrot.slane %v4867_v17, 4 }
 0x5cf   : > { %v6113_v11 = vpop.permute.xlu0 %6112  ;;  %v6560_v50 = vsel %vm10913_vm5, %v6552_v49, %v6559_v21  ;;  %v6029_v53 = vshrl.u32 %v5686_v55, 16 }
 0x5d0   : > { %v5484_v36 = vpop.permute.xlu1 %5483  ;;  %v6836_v41 = vpop.permute.xlu2 %6835  ;;  %v8877_v45 = vld [vmem:[#allocation4 + $0xcc] sm:$0xf0]  ;;  %6190 = vst.msk [vmem:[#allocation4 + $0xdc] sm:$0xf] %vm4457_vm7, %v6113_v11  ;;  %v6032_v11 = vshll.u32 %v5686_v55, 16 }
 0x5d1   : > { %5564 = vst.msk [vmem:[#allocation4 + $0xc0] sm:$0xf] %vm5547_vm9, %v5484_v36  ;;  %v7941_v47 = vpop.f32.mrf.mxu1  ;;  %v8880_v57 = vor.u32 %v9104_v14, %v8877_v45  ;;  %v6048_v14 = vshll.u32 %v5688_v35, 16  ;;  %v6248_v45 = vld [vmem:[#allocation3 + $0x188] sm:$0xf]  ;;  %v6031_v49 = vrot.slane %v6029_v53, 4 }
 0x5d2   : > { %v7942_v51 = vadd.f32 %v11881_v33, %v7941_v47  ;;  %6719 = vst.msk [vmem:[#allocation4 + $0xdc] sm:$0xf] %vm5018_vm8, %v6642_v12  ;;  %v5400_v12 = vshrl.u32 %v5092_v42, 16  ;;  %v9105_v1 = vld [vmem:[#allocation4 + $0xc8] sm:$0xf0]  ;;  %v6567_v44 = vshrl.u32 %v6248_v45, 16 }
 0x5d3   : > { %8059 = vmatmul.bf16.gmra.mxu2 %v8880_v57  ;;  %v6050_v34 = vrot.slane %v6048_v14, 5  ;;  %v6034_v39 = vrot.slane %v6032_v11, 5  ;;  %v4533_v42 = vld [vmem:[#allocation3 + $0x15c] sm:$0xf]  ;;  %v6570_v43 = vshll.u32 %v6248_v45, 16  ;;  %v8126_v11 = vpop.f32.mrf.mxu3 }
 0x5d4   : > { %v8031_v54 = vadd.f32 %v8030_v29, %v7942_v51  ;;  %v5402_v24 = vrot.slane %v5400_v12, 7  ;;  %v6759_v29 = vld [vmem:[#allocation3 + $0x170] sm:$0xf]  ;;  %v4872_v51 = vrot.slane %v4870_v38, 5  ;;  %v12038_v60 = vrot.slane %v6567_v44, 7 }
 0x5d5   : > { %6851 = vrot.lane.b32.xlu0 %v6760_v59, %s9278_s25  ;;  %v6035_v5 = vor.u32 %v6034_v39, %v6031_v49  ;;  %v4884_v12 = vshll.u32 %v4533_v42, 16  ;;  %v4532_v38 = vld [vmem:[#allocation3 + $0x158] sm:$0xf]  ;;  %v12061_v53 = vld [vmem:[#allocation3 + $0x170] sm:$0xf] }
 0x5d6   : > { %v8120_v28 = vadd.f32 %v11619_v37, %v8031_v54  ;;  %6659 = vrot.lane.b32.xlu1 %v6560_v50, %s9277_s23  ;;  %6130 = vrot.lane.b32.xlu2 %v6027_v19, %s9275_s17  ;;  %v8032_v58 = vpop.f32.mrf.mxu2  ;;  %v5405_v46 = vor.u32 %v5403_v30, %v5402_v24  ;;  %v6247_v54 = vld [vmem:[#allocation3 + $0x184] sm:$0x8]  ;;  %v4873_v19 = vsel %vm9373_vm2, %v4868_v8, %v4872_v51  ;;  %v6579_v30 = vshll.u32 %v12033_v56, 16  ;;  %v5690_v44 = vld [vmem:[#allocation3 + $0x18c] sm:$0xf] }
 0x5d7   : > { %v6644_v3 = vpop.permute.xlu0 %6643  ;;  %v6562_v59 = vshrl.u32 %v6247_v54, 16  ;;  %v6572_v63 = vor.u32 %v6570_v43, %v12038_v60  ;;  %v6036_v55 = vrot.slane %v6035_v5, 4  ;;  %v6062_v5 = vshll.u32 %v5690_v44, 16 }
 0x5d8   : > { %v8193_v0 = vmax.f32 %v8120_v28, 0.0  ;;  %v6115_v9 = vpop.permute.xlu1 %6114  ;;  %v12005_v13 = vpop.permute.xlu2 %5487  ;;  %v8875_v37 = vld [vmem:[#allocation4 + $0xc0] sm:$0xf]  ;;  %v5406_v50 = vsel %vm10913_vm5, %v5398_v27, %v5405_v46  ;;  %v4878_v46 = vshll.u32 %v4532_v38, 16  ;;  %v5413_v27 = vshrl.u32 %v12061_v53, 16 }
 0x5d9   : > { %6191 = vst.msk [vmem:[#allocation4 + $0xe8] sm:$0xf] %vm4457_vm7, %v6115_v9  ;;  %v7943_v10 = vpop.f32.mrf.mxu1  ;;  %v8876_v2 = vor.u32 %v9105_v1, %v8875_v37  ;;  %v8775_v26 = vrot.slane %v6562_v59, 11  ;;  %v6041_v24 = vsel %vm9373_vm2, %v6036_v55, %v12011_v31 }
 0x5da   : > { %8225 = vst [vmem:[%s11913_s6 + $0x20] sm:$0xff] %v8193_v0  ;;  %v7944_v7 = vadd.f32 %v11881_v33, %v7943_v10  ;;  %v4888_v0 = vshrl.u32 %v4533_v42, 16  ;;  %v4880_v43 = vrot.slane %v4878_v46, 5 }
 0x5db   : > { %6720 = vst.msk [vmem:[#allocation4 + $0xe8] sm:$0xf] %vm5018_vm8, %v6644_v3  ;;  %7970 = vmatmul.bf16.gmra.mxu1 %v8876_v2  ;;  %v6576_v3 = vshrl.u32 %v12033_v56, 16 }
 0x5dc   : > { %6912 = vst.msk [vmem:[#allocation4 + $0xe8] sm:$0xf] %vm5547_vm9, %v6836_v41  ;;  %v8033_v20 = vadd.f32 %v8032_v58, %v7944_v7  ;;  %v6045_v41 = vor.u32 %v6044_v6, %v12011_v31  ;;  %v4534_v7 = vld [vmem:[#allocation3 + $0x160] sm:$0x1]  ;;  %v12051_v58 = vrot.slane %v4884_v12, 5  ;;  %v4890_v62 = vrot.slane %v4888_v0, 4 }
 0x5dd   : > { %5503 = vrot.lane.b32.xlu0 %v5397_v18, %s9278_s25  ;;  %v4894_v17 = vshll.u32 %v4534_v7, 16  ;;  %v6578_v18 = vrot.slane %v6576_v3, 7  ;;  %v6066_v0 = vshrl.u32 %v5690_v44, 16  ;;  %v5416_v3 = vshll.u32 %v12061_v53, 16 }
 0x5de   : > { %v8122_v36 = vadd.f32 %v11643_v61, %v8033_v20  ;;  %4974 = vrot.lane.b32.xlu1 %v4863_v32, %s9277_s23  ;;  %6849 = vrot.lane.b32.xlu2 %v6759_v29, %s9278_s25  ;;  %v6046_v15 = vrot.slane %v6045_v41, 4  ;;  %v5689_v20 = vld [vmem:[#allocation3 + $0x188] sm:$0xf]  ;;  %v6573_v29 = vsel %vm10913_vm5, %v8775_v26, %v6572_v63  ;;  %v4891_v31 = vor.u32 %v4890_v62, %v12051_v58 }
 0x5df   : > { %v4959_v61 = vpop.permute.xlu0 %4958  ;;  %v6053_v14 = vshrl.u32 %v5689_v20, 16  ;;  %v6056_v45 = vshll.u32 %v5689_v20, 16  ;;  %v6581_v39 = vor.u32 %v6579_v30, %v6578_v18  ;;  %v6064_v20 = vrot.slane %v6062_v5, 5 }
 0x5e0   : > { %v8194_v47 = vmax.f32 %v8122_v36, 0.0  ;;  %v6834_v57 = vpop.permute.xlu1 %6833  ;;  %v6119_v21 = vpop.permute.xlu2 %6118  ;;  %5037 = vst.msk [vmem:[#allocation4 + $0xd8] sm:$0xf] %vm5018_vm8, %v4959_v61  ;;  %v6051_v16 = vsel %vm9373_vm2, %v6046_v15, %v6050_v34  ;;  %v6761_v36 = vld [vmem:[#allocation3 + $0x188] sm:$0xf]  ;;  %v6574_v61 = vrot.slane %v12038_v60, 4 }
 0x5e1   : > { %6911 = vst.msk [vmem:[#allocation4 + $0xdc] sm:$0xf] %vm5547_vm9, %v6834_v57  ;;  %v7946_v52 = vpop.f32.mrf.mxu1  ;;  %v5093_v57 = vld [vmem:[#allocation3 + $0x16c] sm:$0x8]  ;;  %v6058_v56 = vrot.slane %v6056_v45, 5 }
 0x5e2   : > { %8226 = vst [vmem:[%s11913_s6 + $0x28] sm:$0xff] %v8194_v47  ;;  %v7947_v28 = vadd.f32 %v11881_v33, %v7946_v52  ;;  %v4896_v52 = vrot.slane %v4894_v17, 5  ;;  %v5408_v59 = vshrl.u32 %v5093_v57, 16  ;;  %v6582_v12 = vsel %vm10913_vm5, %v6574_v61, %v6581_v39 }
 0x5e3   : > { %6193 = vst.msk [vmem:[#allocation4 + $0x100] sm:$0xf] %vm4457_vm7, %v6119_v21  ;;  %v8889_v40 = vld [vmem:[#allocation4 + $0xe4] sm:$0xf0]  ;;  %v4875_v21 = vshrl.u32 %v4532_v38, 16 }
 0x5e4   : > { %5566 = vst.msk [vmem:[#allocation4 + $0xd8] sm:$0xf] %vm5547_vm9, %v12005_v13  ;;  %v8759_v62 = vrot.slane %v5408_v59, 11 }
 0x5e5   : > { %6134 = vrot.lane.b32.xlu0 %v6051_v16, %s9275_s17  ;;  %v4877_v60 = vrot.slane %v4875_v21, 4  ;;  %v6762_v16 = vld [vmem:[#allocation3 + $0x18c] sm:$0xf] }
 0x5e6   : > { %5505 = vrot.lane.b32.xlu1 %v5406_v50, %s9278_s25  ;;  %4976 = vrot.lane.b32.xlu2 %v4873_v19, %s9277_s23  ;;  %v8035_v4 = vpop.f32.mrf.mxu2  ;;  %v4892_v50 = vrot.slane %v4891_v31, 4  ;;  %v6055_v19 = vrot.slane %v6053_v14, 4  ;;  %v4535_v14 = vld [vmem:[#allocation3 + $0x170] sm:$0xf] }
 0x5e7   : > { %v8036_v9 = vadd.f32 %v8035_v4, %v7947_v28  ;;  %v5490_v2 = vpop.permute.xlu0 %5489  ;;  %v12076_v4 = vrot.slane %v5413_v27, 7 }
 0x5e8   : > { %v4961_v13 = vpop.permute.xlu1 %4960  ;;  %v12045_v37 = vpop.permute.xlu2 %6837  ;;  %v9107_v1 = vld [vmem:[#allocation4 + $0xdc] sm:$0xf] }
 0x5e9   : > { %v8125_v10 = vadd.f32 %v8124_v48, %v8036_v9  ;;  %5038 = vst.msk [vmem:[#allocation4 + $0xe4] sm:$0xf] %vm5018_vm8, %v4961_v13  ;;  %v8892_v23 = vor.u32 %v9107_v1, %v8889_v40  ;;  %v7948_v6 = vpop.f32.mrf.mxu1  ;;  %v12071_v48 = vld [vmem:[#allocation3 + $0x174] sm:$0xf]  ;;  %v12081_v9 = vld [vmem:[#allocation3 + $0x1a0] sm:$0xf]  ;;  %v6059_v1 = vor.u32 %v6058_v56, %v6055_v19 }
 0x5ea   : > { %5567 = vst.msk [vmem:[#allocation4 + $0xe4] sm:$0xf] %vm5547_vm9, %v5490_v2  ;;  %v7949_v32 = vadd.f32 %v11881_v33, %v7948_v6  ;;  %v6252_v13 = vld [vmem:[#allocation3 + $0x1a4] sm:$0xf]  ;;  %v5422_v2 = vshrl.u32 %v12071_v48, 16  ;;  %v6589_v63 = vshrl.u32 %v12081_v9, 16 }
 0x5eb   : > { %v8195_v35 = vmax.f32 %v8125_v10, 0.0  ;;  %8064 = vmatmul.bf16.gmra.mxu2 %v8892_v23  ;;  %v8887_v34 = vld [vmem:[#allocation4 + $0xd8] sm:$0xf]  ;;  %v4881_v10 = vor.u32 %v4880_v43, %v4877_v60  ;;  %v6598_v7 = vshrl.u32 %v6252_v13, 16  ;;  %v6060_v38 = vrot.slane %v6059_v1, 4 }
 0x5ec   : > { %v5424_v30 = vrot.slane %v5422_v2, 7  ;;  %v6601_v31 = vshll.u32 %v6252_v13, 16  ;;  %v4536_v19 = vld [vmem:[#allocation3 + $0x174] sm:$0xf]  ;;  %v5420_v43 = vrot.slane %v12076_v4, 4  ;;  %v6592_v5 = vshll.u32 %v12081_v9, 16 }
 0x5ed   : > { %8227 = vst [vmem:[%s11913_s6 + $0x30] sm:$0xff] %v8195_v35  ;;  %6853 = vrot.lane.b32.xlu0 %v6761_v36, %s9278_s25  ;;  %v5418_v35 = vor.u32 %v5416_v3, %v12076_v4  ;;  %v4882_v18 = vrot.slane %v4881_v10, 4  ;;  %v6591_v36 = vrot.slane %v6589_v63, 7  ;;  %v6065_v46 = vsel %vm9373_vm2, %v6060_v38, %v6064_v20 }
 0x5ee   : > { %6661 = vrot.lane.b32.xlu1 %v6573_v29, %s9277_s23  ;;  %6132 = vrot.lane.b32.xlu2 %v6041_v24, %s9275_s17  ;;  %v8037_v41 = vpop.f32.mrf.mxu2  ;;  %v6068_v24 = vrot.slane %v6066_v0, 4  ;;  %v8129_v29 = vpop.f32.mrf.mxu3  ;;  %v4908_v3 = vshll.u32 %v4536_v19, 16  ;;  %v4912_v10 = vshrl.u32 %v4536_v19, 16 }
 0x5ef   : > { %v8038_v47 = vadd.f32 %v8037_v41, %v7949_v32  ;;  %v6646_v15 = vpop.permute.xlu0 %6645  ;;  %v5691_v32 = vld [vmem:[#allocation3 + $0x190] sm:$0x1]  ;;  %v6600_v41 = vrot.slane %v6598_v7, 7  ;;  %v5419_v45 = vsel %vm10913_vm5, %v8759_v62, %v5418_v35  ;;  %v6594_v2 = vor.u32 %v6592_v5, %v6591_v36 }
 0x5f0   : > { %v6117_v8 = vpop.permute.xlu1 %6116  ;;  %v4965_v51 = vpop.permute.xlu2 %4964  ;;  %v6072_v57 = vshll.u32 %v5691_v32, 16  ;;  %v4910_v35 = vrot.slane %v4908_v3, 5  ;;  %v6763_v32 = vld [vmem:[#allocation3 + $0x1a0] sm:$0xf] }
 0x5f1   : > { %v8127_v49 = vadd.f32 %v8126_v11, %v8038_v47  ;;  %6192 = vst.msk [vmem:[#allocation4 + $0xf4] sm:$0xf] %vm4457_vm7, %v6117_v8  ;;  %v9108_v54 = vld [vmem:[#allocation4 + $0xe0] sm:$0xf0]  ;;  %v4887_v11 = vsel %vm9373_vm2, %v4882_v18, %v12051_v58  ;;  %v6069_v47 = vor.u32 %v6068_v24, %v6064_v20  ;;  %v5425_v8 = vshll.u32 %v12071_v48, 16 }
 0x5f2   : > { %5040 = vst.msk [vmem:[#allocation4 + $0xfc] sm:$0xf] %vm5018_vm8, %v4965_v51  ;;  %v8888_v42 = vor.u32 %v9108_v54, %v8887_v34  ;;  %v4899_v51 = vshrl.u32 %v4535_v14, 16  ;;  %v6596_v58 = vrot.slane %v6591_v36, 4  ;;  %v6603_v44 = vor.u32 %v6601_v31, %v6600_v41  ;;  %v4537_v24 = vld [vmem:[#allocation3 + $0x178] sm:$0x1] }
 0x5f3   : > { %v8196_v28 = vmax.f32 %v8127_v49, 0.0  ;;  %6721 = vst.msk [vmem:[#allocation4 + $0xf4] sm:$0xf] %vm5018_vm8, %v6646_v15  ;;  %v6250_v49 = vld [vmem:[#allocation3 + $0x19c] sm:$0x8]  ;;  %v4902_v15 = vshll.u32 %v4535_v14, 16 }
 0x5f4   : > { %6913 = vst.msk [vmem:[#allocation4 + $0xf4] sm:$0xf] %vm5547_vm9, %v12045_v37  ;;  %7975 = vmatmul.bf16.gmra.mxu1 %v8888_v42  ;;  %v4897_v37 = vsel %vm9373_vm2, %v4892_v50, %v4896_v52  ;;  %v6070_v39 = vrot.slane %v6069_v47, 4  ;;  %v6074_v42 = vrot.slane %v6072_v57, 5  ;;  %v5427_v50 = vor.u32 %v5425_v8, %v5424_v30 }
 0x5f5   : > { %8228 = vst [vmem:[%s11913_s6 + $0x38] sm:$0xff] %v8196_v28  ;;  %4980 = vrot.lane.b32.xlu0 %v4897_v37, %s9277_s23  ;;  %v6604_v0 = vsel %vm10913_vm5, %v6596_v58, %v6603_v44  ;;  %v4901_v13 = vrot.slane %v4899_v51, 4  ;;  %v4904_v37 = vrot.slane %v4902_v15, 5  ;;  %v4914_v20 = vrot.slane %v4912_v10, 4  ;;  %v12142_v58 = vld [vmem:[%s12289_s4] ss:$0 sm:$0xff] }
 0x5f6   : > { %6855 = vrot.lane.b32.xlu1 %v6762_v16, %s9278_s25  ;;  %6663 = vrot.lane.b32.xlu2 %v6582_v12, %s9277_s23  ;;  %v6584_v16 = vshrl.u32 %v6250_v49, 16  ;;  %v8131_v1 = vpop.f32.mrf.mxu3 }
 0x5f7   : > { %v8040_v40 = vpop.f32.mrf.mxu2  ;;  %v6840_v6 = vpop.permute.xlu0 %6839  ;;  %v4915_v30 = vor.u32 %v4914_v20, %v4910_v35 }
 0x5f8   : > { %v6648_v23 = vpop.permute.xlu1 %6647  ;;  %v6121_v26 = vpop.permute.xlu2 %6120  ;;  %v8776_v9 = vrot.slane %v6584_v16, 11 }
 0x5f9   : > { %6722 = vst.msk [vmem:[#allocation4 + $0x100] sm:$0xf] %vm5018_vm8, %v6648_v23  ;;  %v7951_v55 = vpop.f32.mrf.mxu1  ;;  %v12122_v23 = vld [vmem:[#allocation3 + $0x188] sm:$0xf] }
 0x5fa   : > { %6194 = vst.msk [vmem:[#allocation4 + $0x10c] sm:$0xf] %vm4457_vm7, %v6121_v26  ;;  %v7952_v17 = vadd.f32 %v11881_v33, %v7951_v55  ;;  %v5098_v26 = vld [vmem:[#allocation3 + $0x18c] sm:$0xf]  ;;  %v4905_v55 = vor.u32 %v4904_v37, %v4901_v13  ;;  %v5438_v19 = vshll.u32 %v12122_v23, 16 }
 0x5fb   : > { %6914 = vst.msk [vmem:[#allocation4 + $0x100] sm:$0xf] %vm5547_vm9, %v6840_v6  ;;  %v9110_v48 = vld [vmem:[#allocation4 + $0xf4] sm:$0xf]  ;;  %v5444_v38 = vshrl.u32 %v5098_v26, 16  ;;  %v5447_v14 = vshll.u32 %v5098_v26, 16 }
 0x5fc   : > { %v8041_v53 = vadd.f32 %v8040_v40, %v7952_v17  ;;  %v5428_v40 = vsel %vm10913_vm5, %v5420_v43, %v5427_v50  ;;  %v5435_v17 = vshrl.u32 %v12122_v23, 16  ;;  %v4906_v18 = vrot.slane %v4905_v55, 4 }
 0x5fd   : > { %6136 = vrot.lane.b32.xlu0 %v6065_v46, %s9275_s17  ;;  %v5446_v31 = vrot.slane %v5444_v38, 7 }
 0x5fe   : > { %v8130_v21 = vadd.f32 %v8129_v29, %v8041_v53  ;;  %5507 = vrot.lane.b32.xlu1 %v5419_v45, %s9278_s25  ;;  %4978 = vrot.lane.b32.xlu2 %v4887_v11, %s9277_s23  ;;  %v6595_v29 = vsel %vm10913_vm5, %v8776_v9, %v6594_v2  ;;  %v4918_v53 = vshll.u32 %v4537_v24, 16  ;;  %v4911_v36 = vsel %vm9373_vm2, %v4906_v18, %v4910_v35  ;;  %v8134_v45 = vpop.f32.mrf.mxu3 }
 0x5ff   : > { %v5492_v34 = vpop.permute.xlu0 %5491  ;;  %v8042_v59 = vpop.f32.mrf.mxu2  ;;  %v5437_v41 = vrot.slane %v5435_v17, 7  ;;  %v5449_v15 = vor.u32 %v5447_v14, %v5446_v31 }
 0x600   : > { %v8197_v61 = vmax.f32 %v8130_v21, 0.0  ;;  %v4963_v52 = vpop.permute.xlu1 %4962  ;;  %v6652_v27 = vpop.permute.xlu2 %6651 }
 0x601   : > { %5039 = vst.msk [vmem:[#allocation4 + $0xf0] sm:$0xf] %vm5018_vm8, %v4963_v52  ;;  %v7953_v54 = vpop.f32.mrf.mxu1  ;;  %v4916_v52 = vrot.slane %v4915_v30, 4  ;;  %v5442_v49 = vrot.slane %v5437_v41, 4 }
 0x602   : > { %8229 = vst [vmem:[%s11913_s6 + $0x40] sm:$0xff] %v8197_v61  ;;  %v7954_v56 = vadd.f32 %v11881_v33, %v7953_v54  ;;  %v8901_v28 = vld [vmem:[#allocation4 + $0xfc] sm:$0xf0]  ;;  %v6075_v33 = vsel %vm9373_vm2, %v6070_v39, %v6074_v42  ;;  %v6764_v54 = vld [vmem:[#allocation3 + $0x1a4] sm:$0xf] }
 0x603   : > { %5568 = vst.msk [vmem:[#allocation4 + $0xf0] sm:$0xf] %vm5547_vm9, %v5492_v34  ;;  %v8904_v60 = vor.u32 %v9110_v48, %v8901_v28  ;;  %v5096_v34 = vld [vmem:[#allocation3 + $0x184] sm:$0x8]  ;;  %v5450_v48 = vsel %vm10913_vm5, %v5442_v49, %v5449_v15 }
 0x604   : > { %v8043_v12 = vadd.f32 %v8042_v59, %v7954_v56  ;;  %v5430_v50 = vshrl.u32 %v5096_v34, 16 }
 0x605   : > { %8069 = vmatmul.bf16.gmra.mxu2 %v8904_v60  ;;  %6667 = vrot.lane.b32.xlu0 %v6604_v0, %s9277_s23 }
 0x606   : > { %v8132_v4 = vadd.f32 %v8131_v1, %v8043_v12  ;;  %6138 = vrot.lane.b32.xlu1 %v6075_v33, %s9275_s17  ;;  %5509 = vrot.lane.b32.xlu2 %v5428_v40, %s9278_s25  ;;  %v8760_v5 = vrot.slane %v5430_v50, 11  ;;  %v5440_v12 = vor.u32 %v5438_v19, %v5437_v41  ;;  %v8136_v13 = vpop.f32.mrf.mxu3 }
 0x607   : > { %v6123_v62 = vpop.permute.xlu0 %6122 }
 0x608   : > { %v8198_v63 = vmax.f32 %v8132_v4, 0.0  ;;  %v5494_v7 = vpop.permute.xlu1 %5493  ;;  %v4967_v6 = vpop.permute.xlu2 %4966  ;;  %6195 = vst.msk [vmem:[#allocation4 + $0x118] sm:$0xf] %vm4457_vm7, %v6123_v62  ;;  %v5441_v33 = vsel %vm10913_vm5, %v8760_v5, %v5440_v12 }
 0x609   : > { %5569 = vst.msk [vmem:[#allocation4 + $0xfc] sm:$0xf] %vm5547_vm9, %v5494_v7 }
 0x60a   : > { %8230 = vst [vmem:[%s11913_s6 + $0x48] sm:$0xff] %v8198_v63  ;;  %v8899_v21 = vld [vmem:[#allocation4 + $0xf0] sm:$0xf] }
 0x60b   : > { %5041 = vst.msk [vmem:[#allocation4 + $0x108] sm:$0xf] %vm5018_vm8, %v4967_v6 }
 0x60c   : > { %6724 = vst.msk [vmem:[#allocation4 + $0x118] sm:$0xf] %vm5018_vm8, %v6652_v27  ;;  %v4920_v27 = vrot.slane %v4918_v53, 5 }
 0x60d   : > { %4982 = vrot.lane.b32.xlu0 %v4911_v36, %s9277_s23 }
 0x60e   : > { %6857 = vrot.lane.b32.xlu1 %v6763_v32, %s9278_s25  ;;  %6665 = vrot.lane.b32.xlu2 %v6595_v29, %s9277_s23  ;;  %v8045_v11 = vpop.f32.mrf.mxu2  ;;  %v4921_v42 = vsel %vm9373_vm2, %v4916_v52, %v4920_v27  ;;  %v8139_v25 = vpop.f32.mrf.mxu3 }
 0x60f   : > { %v6842_v8 = vpop.permute.xlu0 %6841 }
 0x610   : > { %v6650_v47 = vpop.permute.xlu1 %6649  ;;  %v5498_v57 = vpop.permute.xlu2 %5497  ;;  %v9111_v46 = vld [vmem:[#allocation4 + $0xf8] sm:$0xf0] }
 0x611   : > { %6723 = vst.msk [vmem:[#allocation4 + $0x10c] sm:$0xf] %vm5018_vm8, %v6650_v47  ;;  %v7956_v51 = vpop.f32.mrf.mxu1  ;;  %v8900_v61 = vor.u32 %v9111_v46, %v8899_v21 }
 0x612   : > { %6915 = vst.msk [vmem:[#allocation4 + $0x10c] sm:$0xf] %vm5547_vm9, %v6842_v8  ;;  %v7957_v44 = vadd.f32 %v12142_v58, %v7956_v51 }
 0x613   : > { %7980 = vmatmul.bf16.gmra.mxu1 %v8900_v61 }
 0x614   : > { %v8046_v39 = vadd.f32 %v8045_v11, %v7957_v44 }
 0x615   : > { %5513 = vrot.lane.b32.xlu0 %v5450_v48, %s9278_s25 }
 0x616   : > { %v8135_v56 = vadd.f32 %v8134_v45, %v8046_v39  ;;  %4984 = vrot.lane.b32.xlu1 %v4921_v42, %s9277_s23  ;;  %6859 = vrot.lane.b32.xlu2 %v6764_v54, %s9278_s25  ;;  %v8047_v37 = vpop.f32.mrf.mxu2  ;;  %v8141_v36 = vpop.f32.mrf.mxu3  ;;  %s9146_s23 = sshll.u32 %s9331_s22, 8  ;;  %s8254_s22 = scalar_lea.sflag [#allocation6], %s215_s26 }
 0x617   : > { %v4969_v43 = vpop.permute.xlu0 %4968  ;;  %s8265_s9 = scalar_lea.hbm %s12290_s5, %s9146_s23 }
 0x618   : > { %v8199_v28 = vmax.f32 %v8135_v56, 0.0  ;;  %v6844_v59 = vpop.permute.xlu1 %6843  ;;  %v6654_v60 = vpop.permute.xlu2 %6653  ;;  %5042 = vst.msk [vmem:[#allocation4 + $0x114] sm:$0xf] %vm5018_vm8, %v4969_v43  ;;  %s8268_s12 = sshll.u32 %s8265_s9, 4  ;;  %s8269_s12 = int_to_ptr.hbm [resolvable:$true] %s8268_s12 }
 0x619   : > { %6916 = vst.msk [vmem:[#allocation4 + $0x118] sm:$0xf] %vm5547_vm9, %v6844_v59  ;;  %v7958_v16 = vpop.f32.mrf.mxu1  ;;  %v9113_v9 = vld [vmem:[#allocation4 + $0x10c] sm:$0xf]  ;;  %s9218_s13 = sshra.s32 %s8269_s12, 4  ;;  %s9219_s13 = int_to_ptr.hbm [resolvable:$true] %s9218_s13 }
 0x61a   : > { %8231 = vst [vmem:[%s11913_s6 + $0x50] sm:$0xff] %v8199_v28  ;;  %v7959_v0 = vadd.f32 %v12142_v58, %v7958_v16  ;;  %s9220_s14 = scalar_lea.hbm %s9219_s13, 256  ;;  %p9225_p0 = scmp.lt.s32.totalorder %s9219_s13, %s12290_s5 }
 0x61b   : > { %5571 = vst.msk [vmem:[#allocation4 + $0x114] sm:$0xf] %vm5547_vm9, %v5498_v57  ;;  %p9221_p11 = scmp.ne.s32.totalorder %s9219_s13, %s9220_s14  ;;  %p9226_p1 = scmp.lt.s32.totalorder %s9224_s30, %s9220_s14 }
 0x61c   : > { %v8048_v1 = vadd.f32 %v8047_v37, %v7959_v0 }
 0x61d   : > { %p9222_p12 = pnand %p9221_p11, %p9348_p5  ;;  %p9227_p2 = por %p9226_p1, %p9225_p0 }
 0x61e   : > { %v8137_v40 = vadd.f32 %v8136_v13, %v8048_v1  ;;  %5511 = vrot.lane.b32.xlu2 %v5441_v33, %s9278_s25  ;;  %v8144_v50 = vpop.f32.mrf.mxu3 }
 0x61f   : > { %v6125_v23 = vpop.permute.xlu0 %6124  ;;  %p9223_p13 = pneg %p9222_p12 }
 0x620   : > { %v8200_v3 = vmax.f32 %v8137_v40, 0.0  ;;  %v5496_v10 = vpop.permute.xlu1 %5495  ;;  %v6848_v4 = vpop.permute.xlu2 %6847  ;;  %v8913_v2 = vld [vmem:[#allocation4 + $0x114] sm:$0xf0]  ;;  %6196 = vst.msk [vmem:[#allocation4 + $0x124] sm:$0xf] %vm4457_vm7, %v6125_v23 }
 0x621   : > { %5570 = vst.msk [vmem:[#allocation4 + $0x108] sm:$0xf] %vm5547_vm9, %v5496_v10  ;;  %v7961_v26 = vpop.f32.mrf.mxu1  ;;  %v8916_v63 = vor.u32 %v9113_v9, %v8913_v2  ;;  %p9228_p3 = pnand %p9227_p2, %p9223_p13 }
 0x622   : > { %8232 = vst [vmem:[%s11913_s6 + $0x58] sm:$0xff] %v8200_v3  ;;  %v7962_v7 = vadd.f32 %v12142_v58, %v7961_v26  ;;  %v9114_v24 = vld [vmem:[#allocation4 + $0x110] sm:$0xf0] }
 0x623   : > { %8074 = vmatmul.bf16.gmra.mxu2 %v8916_v63  ;;  %6725 = vst.msk [vmem:[#allocation4 + $0x124] sm:$0xf] %vm5018_vm8, %v6654_v60 }
 0x626   : > { %v8050_v6 = vpop.f32.mrf.mxu2  ;;  %v8146_v0 = vpop.f32.mrf.mxu3 }
 0x627   : > { %v8051_v55 = vadd.f32 %v8050_v6, %v7962_v7  ;;  %v6656_v38 = vpop.permute.xlu0 %6655 }
 0x628   : > { %v6127_v62 = vpop.permute.xlu1 %6126  ;;  %v5500_v35 = vpop.permute.xlu2 %5499  ;;  %v8911_v20 = vld [vmem:[#allocation4 + $0x108] sm:$0xf] }
 0x629   : > { %v8140_v17 = vadd.f32 %v8139_v25, %v8051_v55  ;;  %6197 = vst.msk [vmem:[#allocation4 + $0x130] sm:$0xf] %vm4457_vm7, %v6127_v62  ;;  %v8912_v32 = vor.u32 %v9114_v24, %v8911_v20  ;;  %v7963_v29 = vpop.f32.mrf.mxu1 }
 0x62a   : > { %6726 = vst.msk [vmem:[#allocation4 + $0x130] sm:$0xf] %vm5018_vm8, %v6656_v38  ;;  %v7964_v30 = vadd.f32 %v12142_v58, %v7963_v29 }
 0x62b   : > { %v8201_v18 = vmax.f32 %v8140_v17, 0.0  ;;  %6918 = vst.msk [vmem:[#allocation4 + $0x130] sm:$0xf] %vm5547_vm9, %v6848_v4  ;;  %7985 = vmatmul.bf16.gmra.mxu1 %v8912_v32 }
 0x62d   : > { %8233 = vst [vmem:[%s11913_s6 + $0x60] sm:$0xff] %v8201_v18 }
 0x62e   : > { %v8052_v53 = vpop.f32.mrf.mxu2  ;;  %v8149_v7 = vpop.f32.mrf.mxu3 }
 0x62f   : > { %v8053_v41 = vadd.f32 %v8052_v53, %v7964_v30  ;;  %v4971_v11 = vpop.permute.xlu0 %4970 }
 0x630   : > { %v6846_v31 = vpop.permute.xlu1 %6845  ;;  %v6131_v14 = vpop.permute.xlu2 %6130  ;;  %5043 = vst.msk [vmem:[#allocation4 + $0x120] sm:$0xf] %vm5018_vm8, %v4971_v11  ;;  %v6970_v11 = vld [vmem:[#allocation3 + $0x1a0] sm:$0xf] }
 0x631   : > { %v8142_v45 = vadd.f32 %v8141_v36, %v8053_v41  ;;  %6917 = vst.msk [vmem:[#allocation4 + $0x124] sm:$0xf] %vm5547_vm9, %v6846_v31 }
 0x632   : > { %6199 = vst.msk [vmem:[#allocation4 + $0x148] sm:$0xf] %vm4457_vm7, %v6131_v14  ;;  %v8925_v46 = vld [vmem:[#allocation4 + $0x12c] sm:$0xf0] }
 0x633   : > { %v8202_v47 = vmax.f32 %v8142_v45, 0.0  ;;  %5572 = vst.msk [vmem:[#allocation4 + $0x120] sm:$0xf] %vm5547_vm9, %v5500_v35 }
 0x635   : > { %8234 = vst [vmem:[%s11913_s6 + $0x68] sm:$0xff] %v8202_v47  ;;  %v6971_v47 = vld [vmem:[#allocation3 + $0x1a4] sm:$0xf] }
 0x636   : > { %v8151_v53 = vpop.f32.mrf.mxu3 }
 0x637   : > { %v5502_v51 = vpop.permute.xlu0 %5501 }
 0x638   : > { %v4973_v57 = vpop.permute.xlu1 %4972  ;;  %v9116_v21 = vld [vmem:[#allocation4 + $0x124] sm:$0xf]  ;;  %v6850_v8 = vpop.permute.xlu2 %6849 }
 0x639   : > { %5044 = vst.msk [vmem:[#allocation4 + $0x12c] sm:$0xf] %vm5018_vm8, %v4973_v57  ;;  %v8928_v61 = vor.u32 %v9116_v21, %v8925_v46  ;;  %v8055_v34 = vpop.f32.mrf.mxu2  ;;  %v6972_v57 = vld [vmem:[#allocation3 + $0x1a8] sm:$0x1]  ;;  %v7334_v21 = vshrl.u32 %v6970_v11, 16  ;;  %v7337_v46 = vshll.u32 %v6970_v11, 16 }
 0x63a   : > { %5573 = vst.msk [vmem:[#allocation4 + $0x12c] sm:$0xf] %vm5547_vm9, %v5502_v51  ;;  %v8923_v49 = vld [vmem:[#allocation4 + $0x120] sm:$0xf]  ;;  %v7347_v51 = vshrl.u32 %v6971_v47, 16 }
 0x63b   : > { %8079 = vmatmul.bf16.gmra.mxu2 %v8928_v61  ;;  %v7353_v61 = vshll.u32 %v6972_v57, 16 }
 0x63f   : > { %v6658_v44 = vpop.permute.xlu0 %6657 }
 0x640   : > { %v6129_v52 = vpop.permute.xlu1 %6128  ;;  %v4977_v27 = vpop.permute.xlu2 %4976 }
 0x641   : > { %6198 = vst.msk [vmem:[#allocation4 + $0x13c] sm:$0xf] %vm4457_vm7, %v6129_v52  ;;  %v9117_v15 = vld [vmem:[#allocation4 + $0x128] sm:$0xf0]  ;;  %v7966_v54 = vpop.f32.mrf.mxu1  ;;  %v8057_v5 = vpop.f32.mrf.mxu2  ;;  %v7336_v52 = vrot.slane %v7334_v21, 4 }
 0x642   : > { %5046 = vst.msk [vmem:[#allocation4 + $0x144] sm:$0xf] %vm5018_vm8, %v4977_v27  ;;  %v8924_v39 = vor.u32 %v9117_v15, %v8923_v49  ;;  %v7967_v42 = vadd.f32 %v12142_v58, %v7966_v54  ;;  %v7339_v27 = vrot.slane %v7337_v46, 5  ;;  %v7349_v49 = vrot.slane %v7347_v51, 4 }
 0x643   : > { %6727 = vst.msk [vmem:[#allocation4 + $0x13c] sm:$0xf] %vm5018_vm8, %v6658_v44 }
 0x644   : > { %6919 = vst.msk [vmem:[#allocation4 + $0x13c] sm:$0xf] %vm5547_vm9, %v6850_v8  ;;  %7990 = vmatmul.bf16.gmra.mxu1 %v8924_v39  ;;  %v8056_v19 = vadd.f32 %v8055_v34, %v7967_v42  ;;  %v7343_v8 = vshll.u32 %v6971_v47, 16  ;;  %v7340_v54 = vor.u32 %v7339_v27, %v7336_v52  ;;  %v7355_v42 = vrot.slane %v7353_v61, 5 }
 0x646   : > { %v8145_v56 = vadd.f32 %v8144_v50, %v8056_v19  ;;  %v7345_v44 = vrot.slane %v7343_v8, 5 }
 0x647   : > { %v6852_v60 = vpop.permute.xlu0 %6851 }
 0x648   : > { %v6660_v48 = vpop.permute.xlu1 %6659  ;;  %v8203_v28 = vmax.f32 %v8145_v56, 0.0  ;;  %v6133_v59 = vpop.permute.xlu2 %6132  ;;  %v7350_v39 = vor.u32 %v7349_v49, %v7345_v44 }
 0x649   : > { %6728 = vst.msk [vmem:[#allocation4 + $0x148] sm:$0xf] %vm5018_vm8, %v6660_v48  ;;  %v7968_v43 = vpop.f32.mrf.mxu1 }
 0x64a   : > { %6200 = vst.msk [vmem:[#allocation4 + $0x154] sm:$0xf] %vm4457_vm7, %v6133_v59  ;;  %v7969_v16 = vadd.f32 %v12142_v58, %v7968_v43  ;;  %v7351_v43 = vrot.slane %v7350_v39, 4 }
 0x64b   : > { %8235 = vst [vmem:[%s11913_s6 + $0x70] sm:$0xff] %v8203_v28  ;;  %v9119_v3 = vld [vmem:[#allocation4 + $0x13c] sm:$0xf] }
 0x64c   : > { %6920 = vst.msk [vmem:[#allocation4 + $0x148] sm:$0xf] %vm5547_vm9, %v6852_v60  ;;  %v8058_v12 = vadd.f32 %v8057_v5, %v7969_v16  ;;  %v7341_v60 = vrot.slane %v7340_v54, 4  ;;  %v8154_v5 = vpop.f32.mrf.mxu3 }
 0x64e   : > { %v8147_v13 = vadd.f32 %v8146_v0, %v8058_v12  ;;  %v7346_v12 = vsel %vm9373_vm2, %v7341_v60, %v7345_v44  ;;  %v7356_v0 = vsel %vm9373_vm2, %v7351_v43, %v7355_v42 }
 0x64f   : > { %v5504_v40 = vpop.permute.xlu0 %5503  ;;  %7419 = vst.msk [vmem:[#allocation4 + $0x170] sm:$0xf] %vm3687_vm1, %v7346_v12 }
 0x650   : > { %v4975_v37 = vpop.permute.xlu1 %4974  ;;  %v8204_v1 = vmax.f32 %v8147_v13, 0.0  ;;  %v6664_v33 = vpop.permute.xlu2 %6663  ;;  %7420 = vst.msk [vmem:[#allocation4 + $0x17c] sm:$0xf] %vm3687_vm1, %v7356_v0 }
 0x651   : > { %5045 = vst.msk [vmem:[#allocation4 + $0x138] sm:$0xf] %vm5018_vm8, %v4975_v37 }
 0x652   : > { %5574 = vst.msk [vmem:[#allocation4 + $0x138] sm:$0xf] %vm5547_vm9, %v5504_v40 }
 0x653   : > { %8236 = vst [vmem:[%s11913_s6 + $0x78] sm:$0xff] %v8204_v1  ;;  %v8937_v10 = vld [vmem:[#allocation4 + $0x144] sm:$0xf0] }
 0x654   : > { %v8940_v4 = vor.u32 %v9119_v3, %v8937_v10 }
 0x656   : > { %8084 = vmatmul.bf16.gmra.mxu2 %v8940_v4  ;;  %v8060_v9 = vpop.f32.mrf.mxu2 }
 0x657   : > { %v6135_v63 = vpop.permute.xlu0 %6134 }
 0x658   : > { %v5506_v2 = vpop.permute.xlu1 %5505  ;;  %v7971_v23 = vpop.f32.mrf.mxu1  ;;  %6201 = vst.msk [vmem:[#allocation4 + $0x160] sm:$0xf] %vm4457_vm7, %v6135_v63 }
 0x659   : > { %5575 = vst.msk [vmem:[#allocation4 + $0x144] sm:$0xf] %vm5547_vm9, %v5506_v2  ;;  %v4979_v26 = vpop.permute.xlu2 %4978  ;;  %v7972_v25 = vadd.f32 %v12142_v58, %v7971_v23  ;;  %v8935_v24 = vld [vmem:[#allocation4 + $0x138] sm:$0xf] }
 0x65a   : > { %5047 = vst.msk [vmem:[#allocation4 + $0x150] sm:$0xf] %vm5018_vm8, %v4979_v26  ;;  %v8967_v26 = vld [vmem:[#allocation4 + $0x170] sm:$0xf] }
 0x65b   : > { %v8061_v6 = vadd.f32 %v8060_v9, %v7972_v25  ;;  %6730 = vst.msk [vmem:[#allocation4 + $0x160] sm:$0xf] %vm5018_vm8, %v6664_v33  ;;  %v9127_v25 = vld [vmem:[#allocation4 + $0x178] sm:$0xf0] }
 0x65d   : > { %v8150_v55 = vadd.f32 %v8149_v7, %v8061_v6  ;;  %v8156_v7 = vpop.f32.mrf.mxu3  ;;  %v8968_v6 = vor.u32 %v9127_v25, %v8967_v26 }
 0x65e   : > { %v8062_v18 = vpop.f32.mrf.mxu2 }
 0x65f   : > { %v8205_v62 = vmax.f32 %v8150_v55, 0.0  ;;  %v6854_v38 = vpop.permute.xlu0 %6853  ;;  %9056 = vmatmul.msk.bf16.gmra.mxu3 %vm7873_vm6, %v8968_v6 }
 0x660   : > { %v6662_v35 = vpop.permute.xlu1 %6661  ;;  %v7973_v20 = vpop.f32.mrf.mxu1  ;;  %v9120_v17 = vld [vmem:[#allocation4 + $0x140] sm:$0xf0] }
 0x661   : > { %8237 = vst [vmem:[%s11913_s6 + $0x80] sm:$0xff] %v8205_v62  ;;  %v7974_v32 = vadd.f32 %v12142_v58, %v7973_v20  ;;  %v8936_v29 = vor.u32 %v9120_v17, %v8935_v24  ;;  %v5510_v36 = vpop.permute.xlu2 %5509 }
 0x662   : > { %6729 = vst.msk [vmem:[#allocation4 + $0x154] sm:$0xf] %vm5018_vm8, %v6662_v35 }
 0x663   : > { %6921 = vst.msk [vmem:[#allocation4 + $0x154] sm:$0xf] %vm5547_vm9, %v6854_v38  ;;  %v8063_v30 = vadd.f32 %v8062_v18, %v7974_v32  ;;  %7995 = vmatmul.bf16.gmra.mxu1 %v8936_v29 }
 0x665   : > { %v8152_v41 = vadd.f32 %v8151_v53, %v8063_v30 }
 0x667   : > { %v8206_v31 = vmax.f32 %v8152_v41, 0.0  ;;  %v4981_v45 = vpop.permute.xlu0 %4980 }
 0x668   : > { %v6856_v14 = vpop.permute.xlu1 %6855  ;;  %5048 = vst.msk [vmem:[#allocation4 + $0x15c] sm:$0xf] %vm5018_vm8, %v4981_v45 }
 0x669   : > { %8238 = vst [vmem:[%s11913_s6 + $0x88] sm:$0xff] %v8206_v31  ;;  %v6666_v15 = vpop.permute.xlu2 %6665 }
 0x66a   : > { %6922 = vst.msk [vmem:[#allocation4 + $0x160] sm:$0xf] %vm5547_vm9, %v6856_v14  ;;  %v9122_v19 = vld [vmem:[#allocation4 + $0x154] sm:$0xf]  ;;  %v8159_v14 = vpop.f32.mrf.mxu3 }
 0x66b   : > { %5577 = vst.msk [vmem:[#allocation4 + $0x15c] sm:$0xf] %vm5547_vm9, %v5510_v36 }
 0x66e   : > { %v8065_v48 = vpop.f32.mrf.mxu2 }
 0x66f   : > { %v6137_v50 = vpop.permute.xlu0 %6136 }
 0x670   : > { %v5508_v34 = vpop.permute.xlu1 %5507  ;;  %6202 = vst.msk [vmem:[#allocation4 + $0x16c] sm:$0xf] %vm4457_vm7, %v6137_v50 }
 0x671   : > { %5576 = vst.msk [vmem:[#allocation4 + $0x150] sm:$0xf] %vm5547_vm9, %v5508_v34  ;;  %v8949_v56 = vld [vmem:[#allocation4 + $0x15c] sm:$0xf0]  ;;  %v7976_v28 = vpop.f32.mrf.mxu1  ;;  %v6860_v3 = vpop.permute.xlu2 %6859 }
 0x672   : > { %v8952_v59 = vor.u32 %v9122_v19, %v8949_v56  ;;  %6731 = vst.msk [vmem:[#allocation4 + $0x16c] sm:$0xf] %vm5018_vm8, %v6666_v15  ;;  %v7977_v16 = vadd.f32 %v12142_v58, %v7976_v28  ;;  %v9123_v40 = vld [vmem:[#allocation4 + $0x158] sm:$0xf0]  ;;  %v8161_v61 = vpop.f32.mrf.mxu3 }
 0x674   : > { %8089 = vmatmul.bf16.gmra.mxu2 %v8952_v59  ;;  %v8066_v13 = vadd.f32 %v8065_v48, %v7977_v16 }
 0x676   : > { %v8155_v37 = vadd.f32 %v8154_v5, %v8066_v13  ;;  %v8067_v23 = vpop.f32.mrf.mxu2 }
 0x677   : > { %v6668_v4 = vpop.permute.xlu0 %6667 }
 0x678   : > { %v6139_v1 = vpop.permute.xlu1 %6138  ;;  %v8947_v33 = vld [vmem:[#allocation4 + $0x150] sm:$0xf]  ;;  %v8207_v10 = vmax.f32 %v8155_v37, 0.0 }
 0x679   : > { %6203 = vst.msk [vmem:[#allocation4 + $0x178] sm:$0xf] %vm4457_vm7, %v6139_v1  ;;  %v8948_v9 = vor.u32 %v9123_v40, %v8947_v33  ;;  %v7978_v22 = vpop.f32.mrf.mxu1  ;;  %v5512_v24 = vpop.permute.xlu2 %5511 }
 0x67a   : > { %6732 = vst.msk [vmem:[#allocation4 + $0x178] sm:$0xf] %vm5018_vm8, %v6668_v4  ;;  %v7979_v2 = vadd.f32 %v12142_v58, %v7978_v22  ;;  %v8164_v34 = vpop.f32.mrf.mxu3 }
 0x67b   : > { %8239 = vst [vmem:[%s11913_s6 + $0x90] sm:$0xff] %v8207_v10  ;;  %8000 = vmatmul.bf16.gmra.mxu1 %v8948_v9 }
 0x67c   : > { %6924 = vst.msk [vmem:[#allocation4 + $0x178] sm:$0xf] %vm5547_vm9, %v6860_v3  ;;  %v8068_v63 = vadd.f32 %v8067_v23, %v7979_v2 }
 0x67e   : > { %v8157_v55 = vadd.f32 %v8156_v7, %v8068_v63 }
 0x67f   : > { %v4983_v20 = vpop.permute.xlu0 %4982 }
 0x680   : > { %v6858_v62 = vpop.permute.xlu1 %6857  ;;  %v8208_v35 = vmax.f32 %v8157_v55, 0.0  ;;  %5049 = vst.msk [vmem:[#allocation4 + $0x168] sm:$0xf] %vm5018_vm8, %v4983_v20 }
 0x681   : > { %6923 = vst.msk [vmem:[#allocation4 + $0x16c] sm:$0xf] %vm5547_vm9, %v6858_v62 }
 0x682   : > { %8240 = vst [vmem:[%s11913_s6 + $0x98] sm:$0xff] %v8208_v35  ;;  %v8166_v28 = vpop.f32.mrf.mxu3 }
 0x683   : > { %5578 = vst.msk [vmem:[#allocation4 + $0x168] sm:$0xf] %vm5547_vm9, %v5512_v24  ;;  %v8961_v17 = vld [vmem:[#allocation4 + $0x174] sm:$0xf0] }
 0x687   : > { %v5514_v29 = vpop.permute.xlu0 %5513 }
 0x688   : > { %v4985_v38 = vpop.permute.xlu1 %4984  ;;  %v9125_v32 = vld [vmem:[#allocation4 + $0x16c] sm:$0xf]  ;;  %v8070_v30 = vpop.f32.mrf.mxu2 }
 0x689   : > { %5050 = vst.msk [vmem:[#allocation4 + $0x174] sm:$0xf] %vm5018_vm8, %v4985_v38  ;;  %v8964_v18 = vor.u32 %v9125_v32, %v8961_v17 }
 0x68a   : > { %5579 = vst.msk [vmem:[#allocation4 + $0x174] sm:$0xf] %vm5547_vm9, %v5514_v29  ;;  %v8959_v41 = vld [vmem:[#allocation4 + $0x168] sm:$0xf]  ;;  %v8169_v12 = vpop.f32.mrf.mxu3 }
 0x68b   : > { %8094 = vmatmul.bf16.gmra.mxu2 %v8964_v18 }
 0x690   : > { %v7981_v53 = vpop.f32.mrf.mxu1  ;;  %v8072_v8 = vpop.f32.mrf.mxu2 }
 0x691   : > { %v7982_v36 = vadd.f32 %v12142_v58, %v7981_v53  ;;  %v9126_v31 = vld [vmem:[#allocation4 + $0x170] sm:$0xf0] }
 0x692   : > { %v8960_v45 = vor.u32 %v9126_v31, %v8959_v41  ;;  %v8171_v10 = vpop.f32.mrf.mxu3 }
 0x693   : > { %v8071_v11 = vadd.f32 %v8070_v30, %v7982_v36 }
 0x694   : > { %8005 = vmatmul.bf16.gmra.mxu1 %v8960_v45 }
 0x695   : > { %v8160_v47 = vadd.f32 %v8159_v14, %v8071_v11 }
 0x697   : > { %v8209_v57 = vmax.f32 %v8160_v47, 0.0 }
 0x698   : > { %v7983_v21 = vpop.f32.mrf.mxu1 }
 0x699   : > { %8241 = vst [vmem:[%s11913_s6 + $0xa0] sm:$0xff] %v8209_v57  ;;  %v7984_v46 = vadd.f32 %v12142_v58, %v7983_v21 }
 0x69a   : > { %v8174_v26 = vpop.f32.mrf.mxu3 }
 0x69b   : > { %v8073_v51 = vadd.f32 %v8072_v8, %v7984_v46 }
 0x69d   : > { %v8162_v52 = vadd.f32 %v8161_v61, %v8073_v51 }
 0x69f   : > { %v8210_v27 = vmax.f32 %v8162_v52, 0.0 }
 0x6a1   : > { %8242 = vst [vmem:[%s11913_s6 + $0xa8] sm:$0xff] %v8210_v27 }
 0x6a2   : > { %v8176_v20 = vpop.f32.mrf.mxu3 }
 0x6a6   : > { %v8075_v44 = vpop.f32.mrf.mxu2 }
 0x6a8   : > { %v7986_v49 = vpop.f32.mrf.mxu1 }
 0x6a9   : > { %v7987_v15 = vadd.f32 %v12142_v58, %v7986_v49 }
 0x6aa   : > { %v8179_v18 = vpop.f32.mrf.mxu3 }
 0x6ab   : > { %v8076_v54 = vadd.f32 %v8075_v44, %v7987_v15 }
 0x6ad   : > { %v8165_v39 = vadd.f32 %v8164_v34, %v8076_v54 }
 0x6ae   : > { %v8077_v56 = vpop.f32.mrf.mxu2 }
 0x6af   : > { %v8211_v42 = vmax.f32 %v8165_v39, 0.0 }
 0x6b0   : > { %v7988_v50 = vpop.f32.mrf.mxu1 }
 0x6b1   : > { %8243 = vst [vmem:[%s11913_s6 + $0xb0] sm:$0xff] %v8211_v42  ;;  %v7989_v19 = vadd.f32 %v12142_v58, %v7988_v50 }
 0x6b2   : > { %v8181_v11 = vpop.f32.mrf.mxu3 }
 0x6b3   : > { %v8078_v48 = vadd.f32 %v8077_v56, %v7989_v19 }
 0x6b5   : > { %v8167_v59 = vadd.f32 %v8166_v28, %v8078_v48 }
 0x6b7   : > { %v8212_v60 = vmax.f32 %v8167_v59, 0.0 }
 0x6b9   : > { %8244 = vst [vmem:[%s11913_s6 + $0xb8] sm:$0xff] %v8212_v60 }
 0x6be   : > { %v8080_v43 = vpop.f32.mrf.mxu2 }
 0x6c1   : > { %v7991_v16 = vpop.f32.mrf.mxu1 }
 0x6c2   : > { %v7992_v5 = vadd.f32 %v12142_v58, %v7991_v16 }
 0x6c4   : > { %v8081_v0 = vadd.f32 %v8080_v43, %v7992_v5 }
 0x6c6   : > { %v8170_v13 = vadd.f32 %v8169_v12, %v8081_v0  ;;  %v8082_v40 = vpop.f32.mrf.mxu2 }
 0x6c8   : > { %v8213_v37 = vmax.f32 %v8170_v13, 0.0 }
 0x6c9   : > { %v7993_v1 = vpop.f32.mrf.mxu1 }
 0x6ca   : > { %8245 = vst [vmem:[%s11913_s6 + $0xc0] sm:$0xff] %v8213_v37  ;;  %v7994_v33 = vadd.f32 %v12142_v58, %v7993_v1 }
 0x6cc   : > { %v8083_v3 = vadd.f32 %v8082_v40, %v7994_v33 }
 0x6ce   : > { %v8172_v4 = vadd.f32 %v8171_v10, %v8083_v3 }
 0x6d0   : > { %v8214_v9 = vmax.f32 %v8172_v4, 0.0 }
 0x6d2   : > { %8246 = vst [vmem:[%s11913_s6 + $0xc8] sm:$0xff] %v8214_v9 }
 0x6d9   : > { %v8085_v22 = vpop.f32.mrf.mxu2 }
 0x6e0   : > { %v7996_v2 = vpop.f32.mrf.mxu1 }
 0x6e1   : > { %v7997_v23 = vadd.f32 %v12142_v58, %v7996_v2  ;;  %v8087_v62 = vpop.f32.mrf.mxu2 }
 0x6e2   : > { %v8184_v51 = vpop.f32.mrf.mxu3 }
 0x6e3   : > { %v8086_v63 = vadd.f32 %v8085_v22, %v7997_v23 }
 0x6e5   : > { %v8175_v25 = vadd.f32 %v8174_v26, %v8086_v63 }
 0x6e7   : > { %v8215_v7 = vmax.f32 %v8175_v25, 0.0 }
 0x6e8   : > { %v7998_v6 = vpop.f32.mrf.mxu1 }
 0x6e9   : > { %8247 = vst [vmem:[%s11913_s6 + $0xd0] sm:$0xff] %v8215_v7  ;;  %v7999_v55 = vadd.f32 %v12142_v58, %v7998_v6 }
 0x6ea   : > { %v8186_v54 = vpop.f32.mrf.mxu3 }
 0x6eb   : > { %v8088_v35 = vadd.f32 %v8087_v62, %v7999_v55 }
 0x6ed   : > { %v8177_v24 = vadd.f32 %v8176_v20, %v8088_v35 }
 0x6ef   : > { %v8216_v17 = vmax.f32 %v8177_v24, 0.0 }
 0x6f1   : > { %8248 = vst [vmem:[%s11913_s6 + $0xd8] sm:$0xff] %v8216_v17 }
 0x6f7   : > { %v8090_v38 = vpop.f32.mrf.mxu2 }
 0x6f8   : > { %v8001_v32 = vpop.f32.mrf.mxu1 }
 0x6f9   : > { %v8002_v29 = vadd.f32 %v12142_v58, %v8001_v32 }
 0x6fb   : > { %v8091_v30 = vadd.f32 %v8090_v38, %v8002_v29 }
 0x6fd   : > { %v8180_v53 = vadd.f32 %v8179_v18, %v8091_v30 }
 0x6ff   : > { %v8217_v36 = vmax.f32 %v8180_v53, 0.0  ;;  %v8092_v14 = vpop.f32.mrf.mxu2 }
 0x700   : > { %v8003_v41 = vpop.f32.mrf.mxu1 }
 0x701   : > { %8249 = vst [vmem:[%s11913_s6 + $0xe0] sm:$0xff] %v8217_v36  ;;  %v8004_v31 = vadd.f32 %v12142_v58, %v8003_v41 }
 0x703   : > { %v8093_v45 = vadd.f32 %v8092_v14, %v8004_v31 }
 0x705   : > { %v8182_v47 = vadd.f32 %v8181_v11, %v8093_v45 }
 0x707   : > { %v8218_v57 = vmax.f32 %v8182_v47, 0.0 }
 0x709   : > { %8250 = vst [vmem:[%s11913_s6 + $0xe8] sm:$0xff] %v8218_v57 }
 0x70e   : > { %v8095_v21 = vpop.f32.mrf.mxu2 }
 0x711   : > { %v8006_v46 = vpop.f32.mrf.mxu1 }
 0x712   : > { %v8007_v8 = vadd.f32 %v12142_v58, %v8006_v46 }
 0x714   : > { %v8096_v61 = vadd.f32 %v8095_v21, %v8007_v8 }
 0x716   : > { %v8185_v52 = vadd.f32 %v8184_v51, %v8096_v61  ;;  %v8097_v15 = vpop.f32.mrf.mxu2 }
 0x718   : > { %v8219_v27 = vmax.f32 %v8185_v52, 0.0 }
 0x719   : > { %v8008_v44 = vpop.f32.mrf.mxu1 }
 0x71a   : > { %8251 = vst [vmem:[%s11913_s6 + $0xf0] sm:$0xff] %v8219_v27  ;;  %v8009_v49 = vadd.f32 %v12142_v58, %v8008_v44 }
 0x71c   : > { %v8098_v34 = vadd.f32 %v8097_v15, %v8009_v49 }
 0x71e   : > { %v8187_v39 = vadd.f32 %v8186_v54, %v8098_v34 }
 0x720   : > { %v8220_v42 = vmax.f32 %v8187_v39, 0.0 }
 0x722   : > { %8252 = vst [vmem:[%s11913_s6 + $0xf8] sm:$0xff] %v8220_v42 }
 0x723   : > { %9231 = shalt.err (!%p9228_p3)
}
 0x724   : > { %s9279_s26 = smov 128  }
 0x725   : > { %9148 = dma.vmem_to_hbm [thread:$0]  (%p9348_p5), %s8267_s10, 4096, %s8269_s12, %s8254_s22, %s9279_s26, %s9279_s26, %s9269_s11  }
 0x726 PF: > { %p9154_p4 = scmp.ge.s32.totalorder %s9266_s21, 2  ;;  %s8283_s6 = sand.u32 1, %s9254_s18  }
 0x727   : > { %s8284_s23 = scalar_lea.sflag [#allocation6], %s8283_s6 }
 0x728   : > { %p9151_p7 = pnand %p9154_p4, %p9352_p6 }
 0x72a   : > { %p9152_p8 = pneg %p9151_p7 }
 0x72c   : > { %9249 = dma.done.wait (%p9152_p8), %s8284_s23, 4096  }
 0x72d   : > { %9251 = vsyncadd (%p9152_p8), %s8284_s23, 4294963200  ;;  %p15_p9 = scmp.ge.s32.totalorder %s9335_s24, 4   ;;  %s12299_s18 = smov %s9258_s19 }
 0x72e   : > { %s12300_s19 = smov %s9262_s20  ;;  %s12301_s20 = smov %s9346_s27 }
 0x72f   : > { %s12302_s21 = smov %s9335_s24  ;;  %17 = sbr.rel (!%p15_p9) target bundleno = 3 (0x3), region = 80 }
 0x734   :  { %8290 = vsyncpa [#allocation6], 1 }
 0x735   :  { %8292 = vsyncpa [#allocation6 + $0x1], 1 }

</bundles_post_ra>
